<compile_context>
chip_gen: v7x
topology: tpu7x:2x2x1
jax: 0.10.0
libtpu: 0.0.40
codegen_flags: <defaults>
</compile_context>

<pallas_src>
import functools

import jax
import jax.numpy as jnp
from jax.experimental import pallas as pl
from jax.experimental.pallas import tpu as pltpu

HPAD = 128                        # lane-dense padded width for hidden / output columns
_PAD_MULT = 512                   # N padded to a multiple of 512; tiles are divisors of it
_B_RESIDENT_MAX_BYTES = 16 << 20  # keep B fully VMEM-resident if its buffers fit this


def _pad_to(n, m):
    return (n + m - 1) // m * m


def _choose_row_tile(n_pad):
    """Row tile TM: large (amortize step overhead) but always >= 2 row tiles
    so the 'parallel' axis can shard across v7x's two TensorCores."""
    if n_pad >= 4096 and n_pad % 1024 == 0:
        return 1024
    if n_pad >= 1024:
        return 512
    return n_pad // 2            # n_pad == 512 -> 256 (still 2 row tiles)


def _choose_k_tile(n_pad):
    """Contraction tile TK: the largest of {2048,1024,512} dividing n_pad."""
    return next(t for t in (2048, 1024, 512) if n_pad % t == 0)


# ---------------------------------------------------------------------------
# Kernel: one row-tile of  out = maybe_relu(Â @ B + bias)
# ---------------------------------------------------------------------------
def _agg_kernel(a_ref, b_ref, bias_ref, o_ref, acc_ref, *,
                apply_relu, b_resident, tk):
    k = pl.program_id(1)

    @pl.when(k == 0)
    def _():
        acc_ref[...] = jnp.zeros_like(acc_ref)

    if b_resident:
        # B lives whole in VMEM; slice the current contraction chunk in-place.
        start = pl.multiple_of(k * tk, tk)
        b = b_ref[pl.ds(start, tk), :]
    else:
        b = b_ref[...]

    # bf16 x bf16 on the MXU, f32 accumulation.
    acc_ref[...] += jnp.dot(a_ref[...], b, preferred_element_type=jnp.float32)

    @pl.when(k == pl.num_programs(1) - 1)
    def _():
        r = acc_ref[...] + bias_ref[...]
        if apply_relu:
            r = jnp.maximum(r, 0.0)
        o_ref[...] = r.astype(o_ref.dtype)


def _agg_matmul(a_bf16, b_bf16, bias_f32, *, apply_relu, out_dtype):
    """out = maybe_relu(Â @ B + bias), tiled & pipelined.  Shapes pre-padded."""
    n_rows, n_cols = a_bf16.shape
    hpad = b_bf16.shape[1]
    tm = _choose_row_tile(n_rows)
    tk = _choose_k_tile(n_cols)
    grid = (n_rows // tm, n_cols // tk)

    # Keep B fully VMEM-resident (one DMA total) when it fits; otherwise fall
    # back to streaming a (TK, hpad) slice per k step.
    b_resident = (2 * n_cols * hpad * 2) <= _B_RESIDENT_MAX_BYTES
    if b_resident:
        b_spec = pl.BlockSpec((n_cols, hpad), lambda i, k: (0, 0))
        b_buf_bytes = 2 * n_cols * hpad * 2
        b_hbm_bytes = n_cols * hpad * 2                    # read exactly once
    else:
        b_spec = pl.BlockSpec((tk, hpad), lambda i, k: (k, 0))
        b_buf_bytes = 2 * tk * hpad * 2
        b_hbm_bytes = grid[0] * n_cols * hpad * 2          # re-read per row tile

    out_isz = jnp.dtype(out_dtype).itemsize

    # Explicit VMEM budget (double-buffered Â + B + out, f32 accumulator, bias);
    # v5e's scoped default is only 16 MiB, v7x physical is 64 MiB.
    vmem_need = (2 * tm * tk * 2
                 + b_buf_bytes
                 + 2 * tm * hpad * out_isz
                 + tm * hpad * 4
                 + 2 * hpad * 4)
    vmem_limit = max(32 << 20, min(vmem_need + (8 << 20), 60 << 20))

    flops = 2 * n_rows * n_cols * hpad
    bytes_accessed = (a_bf16.size * 2          # Â streamed once (bf16)
                      + b_hbm_bytes
                      + n_rows * hpad * out_isz
                      + hpad * 4)              # bias

    kernel = functools.partial(_agg_kernel, apply_relu=apply_relu,
                               b_resident=b_resident, tk=tk)

    return pl.pallas_call(
        kernel,
        out_shape=jax.ShapeDtypeStruct((n_rows, hpad), out_dtype),
        grid_spec=pltpu.PrefetchScalarGridSpec(
            num_scalar_prefetch=0,
            grid=grid,
            in_specs=[
                pl.BlockSpec((tm, tk), lambda i, k: (i, k)),   # Â tile (streamed)
                b_spec,                                        # B (resident or per-k)
                pl.BlockSpec((1, hpad), lambda i, k: (0, 0)),  # bias (resident)
            ],
            out_specs=pl.BlockSpec((tm, hpad), lambda i, k: (i, 0)),
            scratch_shapes=[pltpu.VMEM((tm, hpad), jnp.float32)],  # f32 accumulator
        ),
        compiler_params=pltpu.CompilerParams(
            dimension_semantics=("parallel", "arbitrary"),
            vmem_limit_bytes=vmem_limit,
        ),
        cost_estimate=pl.CostEstimate(flops=flops, transcendentals=0,
                                      bytes_accessed=bytes_accessed),
    )(a_bf16, b_bf16, bias_f32)


# ---------------------------------------------------------------------------
# Plain-JAX glue
# ---------------------------------------------------------------------------
def gcn_norm_dense(edge_index, num_nodes):
    """Dense Â = D^-1/2 (A + I) D^-1/2 from edge_index (PyG gcn_norm), f32."""
    src, dst = edge_index[0], edge_index[1]
    loop = jnp.arange(num_nodes, dtype=src.dtype)
    src = jnp.concatenate([src, loop])       # add self-loops
    dst = jnp.concatenate([dst, loop])
    w = jnp.ones(src.shape[0], dtype=jnp.float32)
    deg = jnp.zeros((num_nodes,), jnp.float32).at[dst].add(w)
    dinv = jnp.where(deg > 0, jax.lax.rsqrt(deg), 0.0)
    norm = dinv[src] * w * dinv[dst]
    return jnp.zeros((num_nodes, num_nodes), jnp.float32).at[dst, src].add(norm)


def gcn_norm_padded_bf16(edge_index, num_nodes, n_pad):
    """Â scattered directly into a zero-padded (n_pad, n_pad) bf16 buffer —
    a single N^2-sized materialization (no f32 (N,N) intermediate / pad copy)."""
    src, dst = edge_index[0], edge_index[1]
    loop = jnp.arange(num_nodes, dtype=src.dtype)
    src = jnp.concatenate([src, loop])
    dst = jnp.concatenate([dst, loop])
    w = jnp.ones(src.shape[0], dtype=jnp.float32)
    deg = jnp.zeros((num_nodes,), jnp.float32).at[dst].add(w)
    dinv = jnp.where(deg > 0, jax.lax.rsqrt(deg), 0.0)
    norm = (dinv[src] * w * dinv[dst]).astype(jnp.bfloat16)
    return jnp.zeros((n_pad, n_pad), jnp.bfloat16).at[dst, src].add(norm)


def gnn_forward(x, edge_index, params):
    """Fused GCNConv -> ReLU -> GCNConv forward (matches the torch module)."""
    w1, b1, w2, b2 = params
    n = x.shape[0]
    hidden = w1.shape[1]
    n_pad = _pad_to(n, _PAD_MULT)

    # Normalized adjacency, built directly as the padded bf16 stream operand.
    a_pad = gcn_norm_padded_bf16(edge_index, n, n_pad)

    # Layer-1 linear: K = in_channels = 1, keep it off the MXU (tiny plain-JAX
    # broadcast mul), padded lane-dense to HPAD columns.
    xw1 = x @ w1                                              # (n, hidden) f32
    xw1_pad = jnp.zeros((n_pad, HPAD), jnp.bfloat16).at[:n, :hidden].set(
        xw1.astype(jnp.bfloat16))
    b1_pad = jnp.zeros((1, HPAD), jnp.float32).at[:, :hidden].set(b1)

    # Pass 1: H = relu(Â @ (X W1) + b1), emitted bf16 (pass 2 consumes bf16).
    # NOTE: padded rows of H equal relu(b1) (nonzero iff b1 != 0).  This is
    # harmless only because Â's padded *columns* are exactly zero, so pad
    # garbage can never leak back into real rows in pass 2.
    h_pad = _agg_matmul(a_pad, xw1_pad, b1_pad, apply_relu=True,
                        out_dtype=jnp.bfloat16)               # (n_pad, HPAD) bf16

    # Layer-2 linear hoisted out of the tiled loop: hw = H @ W2 (N,1), tiny.
    w2_pad = jnp.zeros((HPAD, 1), jnp.float32).at[:hidden, :].set(w2)
    hw = h_pad.astype(jnp.float32) @ w2_pad                   # (n_pad, 1) f32
    hw_pad = jnp.zeros((n_pad, HPAD), jnp.bfloat16).at[:, :1].set(
        hw.astype(jnp.bfloat16))
    b2_pad = jnp.zeros((1, HPAD), jnp.float32).at[:, :1].set(b2)

    # Pass 2: out = Â @ (H W2) + b2 (final result kept f32; real data = col 0).
    out_pad = _agg_matmul(a_pad, hw_pad, b2_pad, apply_relu=False,
                          out_dtype=jnp.float32)
    return out_pad[:n, :1]


# ---------------------------------------------------------------------------
# References for correctness checks
# ---------------------------------------------------------------------------
def _reference_f32(x, edge_index, params):
    a = gcn_norm_dense(edge_index, x.shape[0])
    w1, b1, w2, b2 = params
    h = jnp.maximum(a @ (x @ w1) + b1, 0.0)
    return a @ (h @ w2) + b2


def _reference_bf16(x, edge_index, params):
    """Same math with the kernel's bf16-input / f32-accumulate rounding model."""
    w1, b1, w2, b2 = params
    n = x.shape[0]
    f32 = jnp.float32
    a = gcn_norm_padded_bf16(edge_index, n, n).astype(f32)
    xw1 = (x @ w1).astype(jnp.bfloat16).astype(f32)
    h = jnp.maximum(a @ xw1 + b1, 0.0).astype(jnp.bfloat16)      # stored bf16
    hw = (h.astype(f32) @ w2).astype(jnp.bfloat16).astype(f32)
    return a @ hw + b2


if __name__ == "__main__":
    # Shapes from the module spec: 1000 users + 1000 items, in_channels = 1,
    # x = ones.  N = 2000 pads to 2048 (tiles: TM=512 -> 4 row tiles, TK=2048).
    num_users, num_items = 1000, 1000
    num_nodes = num_users + num_items
    in_channels, hidden_channels = 1, 32

    edge_index = jnp.array([[0, 1, 2, 0], [1, 2, 0, 3]], dtype=jnp.int32)
    x = jnp.ones((num_nodes, in_channels), jnp.float32)

    # Deterministic params (glorot-uniform weights, zero bias, like PyG GCNConv).
    key = jax.random.PRNGKey(0)
    k1, k2 = jax.random.split(key)

    def glorot(k, fan_in, fan_out):
        lim = (6.0 / (fan_in + fan_out)) ** 0.5
        return jax.random.uniform(k, (fan_in, fan_out), jnp.float32, -lim, lim)

    w1 = glorot(k1, in_channels, hidden_channels)   # (in, out) so kernel does X @ W
    b1 = jnp.zeros((1, hidden_channels), jnp.float32)
    w2 = glorot(k2, hidden_channels, 1)
    b2 = jnp.zeros((1, 1), jnp.float32)
    params = (w1, b1, w2, b2)

    fwd = jax.jit(gnn_forward)
    out = fwd(x, edge_index, params)
    jax.block_until_ready(out)
    assert out.shape == (num_nodes, 1)

    ref_bf16 = _reference_bf16(x, edge_index, params)   # same precision model
    ref_f32 = _reference_f32(x, edge_index, params)     # full-f32 semantics
    # NOTE: bf16 Â / operands lose ~3 significant digits vs f32 — flagged for
    # downstream accuracy review; f32 check uses a correspondingly loose tol.
    assert jnp.allclose(out, ref_bf16, atol=5e-3, rtol=5e-3), \
        "Pallas kernel mismatch vs bf16-emulated reference"
    assert jnp.allclose(out, ref_f32, atol=2e-2, rtol=2e-2), \
        "Pallas kernel mismatch vs f32 reference"

    print("KERNEL_OK")
</pallas_src>

<mosaic_0001>
module attributes {stable_mosaic.version = 11 : i64} {
  func.func @_agg_kernel(%arg0: i32, %arg1: i32, %arg2: memref<512x2048xbf16, #tpu.memory_space<vmem>>, %arg3: memref<2048x128xbf16, #tpu.memory_space<vmem>>, %arg4: memref<1x128xf32, #tpu.memory_space<vmem>>, %arg5: memref<512x128xbf16, #tpu.memory_space<vmem>>, %arg6: memref<512x128xf32, #tpu.memory_space<vmem>>) attributes {dimension_semantics = [#tpu.dimension_semantics<parallel>, #tpu.dimension_semantics<arbitrary>], iteration_bounds = array<i64: 4, 1>, scalar_prefetch = 0 : i64, scratch_operands = 1 : i64, tpu.core_type = #tpu.core_type<tc>, window_params = [{transform_indices = @transform_0, window_bounds = array<i64: 512, 2048>}, {pipeline_mode = #tpu.pipeline_mode<synchronous>, transform_indices = @transform_1, window_bounds = array<i64: 2048, 128>}, {pipeline_mode = #tpu.pipeline_mode<synchronous>, transform_indices = @transform_2, window_bounds = array<i64: 1, 128>}, {transform_indices = @transform_3, window_bounds = array<i64: 512, 128>}]} {
    %c0_i32 = arith.constant 0 : i32
    %0 = arith.cmpi eq, %arg1, %c0_i32 : i32
    %1 = arith.extui %0 : i1 to i32
    %c0_i32_0 = arith.constant 0 : i32
    %2 = arith.cmpi ne, %1, %c0_i32_0 : i32
    scf.if %2 {
      %cst_9 = arith.constant 0.000000e+00 : f32
      %15 = vector.broadcast %cst_9 : f32 to vector<512x128xf32>
      %c0_10 = arith.constant 0 : index
      %c0_11 = arith.constant 0 : index
      %16 = vector.load %arg6[%c0_10, %c0_11] : memref<512x128xf32, #tpu.memory_space<vmem>>, vector<512x128xf32>
      tpu.vector_store %arg6[%c0_10, %c0_11], %15 {strides = array<i32>} : memref<512x128xf32, #tpu.memory_space<vmem>>, vector<512x128xf32>,
    } else {
    }
    %c2048_i32 = arith.constant 2048 : i32
    %3 = arith.muli %arg1, %c2048_i32 : i32
    %4 = tpu.assume_multiple %3, 2048 : i32
    %5 = arith.index_cast %4 : i32 to index
    %c0 = arith.constant 0 : index
    %6 = vector.load %arg3[%5, %c0] : memref<2048x128xbf16, #tpu.memory_space<vmem>>, vector<2048x128xbf16>
    %c0_1 = arith.constant 0 : index
    %c0_2 = arith.constant 0 : index
    %7 = vector.load %arg6[%c0_1, %c0_2] : memref<512x128xf32, #tpu.memory_space<vmem>>, vector<512x128xf32>
    %c0_3 = arith.constant 0 : index
    %c0_4 = arith.constant 0 : index
    %8 = vector.load %arg2[%c0_3, %c0_4] : memref<512x2048xbf16, #tpu.memory_space<vmem>>, vector<512x2048xbf16>
    %cst = arith.constant dense<0.000000e+00> : vector<512x128xf32>
    %9 = tpu.matmul %8, %6, %cst {dimension_numbers = #tpu.dot_dimension_numbers<[1], [0], [0], [1], [0, 0, 1, 1], [], []>} : vector<512x2048xbf16>, vector<2048x128xbf16>, vector<512x128xf32> -> vector<512x128xf32>
    %10 = arith.addf %7, %9 : vector<512x128xf32>
    %c0_5 = arith.constant 0 : index
    %c0_6 = arith.constant 0 : index
    %11 = vector.load %arg6[%c0_5, %c0_6] : memref<512x128xf32, #tpu.memory_space<vmem>>, vector<512x128xf32>
    tpu.vector_store %arg6[%c0_5, %c0_6], %10 {strides = array<i32>} : memref<512x128xf32, #tpu.memory_space<vmem>>, vector<512x128xf32>,
    %c0_i32_7 = arith.constant 0 : i32
    %12 = arith.cmpi eq, %arg1, %c0_i32_7 : i32
    %13 = arith.extui %12 : i1 to i32
    %c0_i32_8 = arith.constant 0 : i32
    %14 = arith.cmpi ne, %13, %c0_i32_8 : i32
    scf.if %14 {
      %c0_9 = arith.constant 0 : index
      %c0_10 = arith.constant 0 : index
      %15 = vector.load %arg6[%c0_9, %c0_10] : memref<512x128xf32, #tpu.memory_space<vmem>>, vector<512x128xf32>
      %c0_11 = arith.constant 0 : index
      %c0_12 = arith.constant 0 : index
      %16 = vector.load %arg4[%c0_11, %c0_12] : memref<1x128xf32, #tpu.memory_space<vmem>>, vector<1x128xf32>
      %17 = vector.broadcast %16 : vector<1x128xf32> to vector<512x128xf32>
      %18 = arith.addf %15, %17 : vector<512x128xf32>
      %cst_13 = arith.constant 0.000000e+00 : f32
      %19 = vector.broadcast %cst_13 : f32 to vector<512x128xf32>
      %20 = arith.maximumf %18, %19 : vector<512x128xf32>
      %21 = arith.truncf %20 : vector<512x128xf32> to vector<512x128xbf16>
      %c0_14 = arith.constant 0 : index
      %c0_15 = arith.constant 0 : index
      %22 = vector.load %arg5[%c0_14, %c0_15] : memref<512x128xbf16, #tpu.memory_space<vmem>>, vector<512x128xbf16>
      tpu.vector_store %arg5[%c0_14, %c0_15], %21 {strides = array<i32>} : memref<512x128xbf16, #tpu.memory_space<vmem>>, vector<512x128xbf16>,
    } else {
    }
    return
  }
  func.func @transform_0(%arg0: i32, %arg1: i32) -> (i32, i32) {
    %c0_i32 = arith.constant 0 : i32
    return %arg0, %arg1 : i32, i32
  }
  func.func @transform_1(%arg0: i32, %arg1: i32) -> (i32, i32) {
    %c0_i32 = arith.constant 0 : i32
    %c0_i32_0 = arith.constant 0 : i32
    %c0_i32_1 = arith.constant 0 : i32
    return %c0_i32, %c0_i32_0 : i32, i32
  }
  func.func @transform_2(%arg0: i32, %arg1: i32) -> (i32, i32) {
    %c0_i32 = arith.constant 0 : i32
    %c0_i32_0 = arith.constant 0 : i32
    %c0_i32_1 = arith.constant 0 : i32
    return %c0_i32, %c0_i32_0 : i32, i32
  }
  func.func @transform_3(%arg0: i32, %arg1: i32) -> (i32, i32) {
    %c0_i32 = arith.constant 0 : i32
    %c0_i32_0 = arith.constant 0 : i32
    return %arg0, %c0_i32 : i32, i32
  }
}

module attributes {stable_mosaic.version = 11 : i64} {
  func.func @_agg_kernel(%arg0: i32, %arg1: i32, %arg2: memref<512x2048xbf16, #tpu.memory_space<vmem>>, %arg3: memref<2048x128xbf16, #tpu.memory_space<vmem>>, %arg4: memref<1x128xf32, #tpu.memory_space<vmem>>, %arg5: memref<512x128xf32, #tpu.memory_space<vmem>>, %arg6: memref<512x128xf32, #tpu.memory_space<vmem>>) attributes {dimension_semantics = [#tpu.dimension_semantics<parallel>, #tpu.dimension_semantics<arbitrary>], iteration_bounds = array<i64: 4, 1>, scalar_prefetch = 0 : i64, scratch_operands = 1 : i64, tpu.core_type = #tpu.core_type<tc>, window_params = [{transform_indices = @transform_0, window_bounds = array<i64: 512, 2048>}, {pipeline_mode = #tpu.pipeline_mode<synchronous>, transform_indices = @transform_1, window_bounds = array<i64: 2048, 128>}, {pipeline_mode = #tpu.pipeline_mode<synchronous>, transform_indices = @transform_2, window_bounds = array<i64: 1, 128>}, {transform_indices = @transform_3, window_bounds = array<i64: 512, 128>}]} {
    %c0_i32 = arith.constant 0 : i32
    %0 = arith.cmpi eq, %arg1, %c0_i32 : i32
    %1 = arith.extui %0 : i1 to i32
    %c0_i32_0 = arith.constant 0 : i32
    %2 = arith.cmpi ne, %1, %c0_i32_0 : i32
    scf.if %2 {
      %cst_9 = arith.constant 0.000000e+00 : f32
      %15 = vector.broadcast %cst_9 : f32 to vector<512x128xf32>
      %c0_10 = arith.constant 0 : index
      %c0_11 = arith.constant 0 : index
      %16 = vector.load %arg6[%c0_10, %c0_11] : memref<512x128xf32, #tpu.memory_space<vmem>>, vector<512x128xf32>
      tpu.vector_store %arg6[%c0_10, %c0_11], %15 {strides = array<i32>} : memref<512x128xf32, #tpu.memory_space<vmem>>, vector<512x128xf32>,
    } else {
    }
    %c2048_i32 = arith.constant 2048 : i32
    %3 = arith.muli %arg1, %c2048_i32 : i32
    %4 = tpu.assume_multiple %3, 2048 : i32
    %5 = arith.index_cast %4 : i32 to index
    %c0 = arith.constant 0 : index
    %6 = vector.load %arg3[%5, %c0] : memref<2048x128xbf16, #tpu.memory_space<vmem>>, vector<2048x128xbf16>
    %c0_1 = arith.constant 0 : index
    %c0_2 = arith.constant 0 : index
    %7 = vector.load %arg6[%c0_1, %c0_2] : memref<512x128xf32, #tpu.memory_space<vmem>>, vector<512x128xf32>
    %c0_3 = arith.constant 0 : index
    %c0_4 = arith.constant 0 : index
    %8 = vector.load %arg2[%c0_3, %c0_4] : memref<512x2048xbf16, #tpu.memory_space<vmem>>, vector<512x2048xbf16>
    %cst = arith.constant dense<0.000000e+00> : vector<512x128xf32>
    %9 = tpu.matmul %8, %6, %cst {dimension_numbers = #tpu.dot_dimension_numbers<[1], [0], [0], [1], [0, 0, 1, 1], [], []>} : vector<512x2048xbf16>, vector<2048x128xbf16>, vector<512x128xf32> -> vector<512x128xf32>
    %10 = arith.addf %7, %9 : vector<512x128xf32>
    %c0_5 = arith.constant 0 : index
    %c0_6 = arith.constant 0 : index
    %11 = vector.load %arg6[%c0_5, %c0_6] : memref<512x128xf32, #tpu.memory_space<vmem>>, vector<512x128xf32>
    tpu.vector_store %arg6[%c0_5, %c0_6], %10 {strides = array<i32>} : memref<512x128xf32, #tpu.memory_space<vmem>>, vector<512x128xf32>,
    %c0_i32_7 = arith.constant 0 : i32
    %12 = arith.cmpi eq, %arg1, %c0_i32_7 : i32
    %13 = arith.extui %12 : i1 to i32
    %c0_i32_8 = arith.constant 0 : i32
    %14 = arith.cmpi ne, %13, %c0_i32_8 : i32
    scf.if %14 {
      %c0_9 = arith.constant 0 : index
      %c0_10 = arith.constant 0 : index
      %15 = vector.load %arg6[%c0_9, %c0_10] : memref<512x128xf32, #tpu.memory_space<vmem>>, vector<512x128xf32>
      %c0_11 = arith.constant 0 : index
      %c0_12 = arith.constant 0 : index
      %16 = vector.load %arg4[%c0_11, %c0_12] : memref<1x128xf32, #tpu.memory_space<vmem>>, vector<1x128xf32>
      %17 = vector.broadcast %16 : vector<1x128xf32> to vector<512x128xf32>
      %18 = arith.addf %15, %17 : vector<512x128xf32>
      %c0_13 = arith.constant 0 : index
      %c0_14 = arith.constant 0 : index
      %19 = vector.load %arg5[%c0_13, %c0_14] : memref<512x128xf32, #tpu.memory_space<vmem>>, vector<512x128xf32>
      tpu.vector_store %arg5[%c0_13, %c0_14], %18 {strides = array<i32>} : memref<512x128xf32, #tpu.memory_space<vmem>>, vector<512x128xf32>,
    } else {
    }
    return
  }
  func.func @transform_0(%arg0: i32, %arg1: i32) -> (i32, i32) {
    %c0_i32 = arith.constant 0 : i32
    return %arg0, %arg1 : i32, i32
  }
  func.func @transform_1(%arg0: i32, %arg1: i32) -> (i32, i32) {
    %c0_i32 = arith.constant 0 : i32
    %c0_i32_0 = arith.constant 0 : i32
    %c0_i32_1 = arith.constant 0 : i32
    return %c0_i32, %c0_i32_0 : i32, i32
  }
  func.func @transform_2(%arg0: i32, %arg1: i32) -> (i32, i32) {
    %c0_i32 = arith.constant 0 : i32
    %c0_i32_0 = arith.constant 0 : i32
    %c0_i32_1 = arith.constant 0 : i32
    return %c0_i32, %c0_i32_0 : i32, i32
  }
  func.func @transform_3(%arg0: i32, %arg1: i32) -> (i32, i32) {
    %c0_i32 = arith.constant 0 : i32
    %c0_i32_0 = arith.constant 0 : i32
    return %arg0, %c0_i32 : i32, i32
  }
}

</mosaic_0001>

<bundles_post_ra>
// kernel: gnn_forward.2
= control target key start
LH: loop header
LB: loop body
LE: loop exit
PB: predicated region body
PF: predicated region fallthrough
CT: control target
= control target key end

     0   :  { %s8646_s12 = smov 0   ;;  %s8648_s13 = smov 0   ;;  %s10480_s0 = inlined_call_operand.vmem [shape: bf16[2048,2048], index: 0, kind: input, shape index: {}]   ;;  %s10481_s1 = inlined_call_operand.vmem [shape: bf16[2048,128], index: 1, kind: input, shape index: {}]   ;;  %s10482_s2 = inlined_call_operand.vmem [shape: f32[1,128], index: 2, kind: input, shape index: {}]   ;;  %s10483_s3 = inlined_call_operand.vmem [shape: bf16[2048,128], index: 3, kind: output, shape index: {}]  }
   0x1   :  { %s8650_s14 = smov 0  }
   0x2 LB: > { %s25_s15 = sadd.s32 1, %s8619_s13  ;;  %p7478_p0 = scmp.ge.s32.totalorder %s8623_s14, 1  ;;  %s8623_s14 = sphi %s8650_s14, %s13_s14   ;;  %s8619_s13 = sphi %s8648_s13, %s10626_s13   ;;  %s8615_s12 = sphi %s8646_s12, %s10625_s12  }
   0x3   : > { %p27_p1 = scmp.ge.s32.totalorder %s25_s15, 4  ;;  %p158_p2 = scmp.lt.s32.totalorder %s8623_s14, 5 }
   0x5   : > { %s10628_s15 = smov (%p27_p1, %s25_s15), 0  ;;  %p159_p3 = pnand %p7478_p0, %p158_p2 }
   0x7   : > { %162 = sbr.rel (%p159_p3) target bundleno = 1320 (0x528), region = 32 }
   0xe   : > { %v8472_v0 = vld [vmem:[%s10481_s1] sm:$0xff]   ;;  %v10484_v1 = vmov 0   ;;  %v8474_v3 = vld [vmem:[%s10481_s1 + $0x8] sm:$0xff]   ;;  %v8476_v5 = vld [vmem:[%s10481_s1 + $0x10] sm:$0xff]   ;;  %s7479_s9 = sshll.u32 %s8615_s12, 6 }
   0xf   : > { %4439 = vmatprep.subr.bf16.mxu0 %v10484_v1  ;;  %4728 = vmatprep.subr.bf16.mxu1 %v10484_v1  ;;  %v8473_v2 = vld [vmem:[%s10481_s1 + $0x80] sm:$0xff]   ;;  %v8475_v4 = vld [vmem:[%s10481_s1 + $0x88] sm:$0xff]   ;;  %v8477_v6 = vld [vmem:[%s10481_s1 + $0x90] sm:$0xff]   ;;  %p189_p4 = scmp.lt.s32.totalorder %s7479_s9, 255 }
  0x10   : > { %4440 = vmatpush1.bf16.msra.mxu0 %v8472_v0  ;;  %4729 = vmatpush1.bf16.msra.mxu1 %v8473_v2  ;;  %v8478_v7 = vld [vmem:[%s10481_s1 + $0x18] sm:$0xff]   ;;  %v8480_v9 = vld [vmem:[%s10481_s1 + $0x20] sm:$0xff]   ;;  %v8482_v11 = vld [vmem:[%s10481_s1 + $0x28] sm:$0xff]  }
  0x11   : > { %4441 = vmatprep.subr.bf16.mxu0 %v10484_v1  ;;  %4730 = vmatprep.subr.bf16.mxu1 %v10484_v1  ;;  %v8479_v8 = vld [vmem:[%s10481_s1 + $0x98] sm:$0xff]   ;;  %v8481_v10 = vld [vmem:[%s10481_s1 + $0xa0] sm:$0xff]   ;;  %v8483_v12 = vld [vmem:[%s10481_s1 + $0xa8] sm:$0xff]   ;;  %s10630_s9 = smov (!%p189_p4, %s7479_s9), 255 }
  0x12   : > { %v8484_v13 = vld [vmem:[%s10481_s1 + $0x30] sm:$0xff]   ;;  %v8486_v15 = vld [vmem:[%s10481_s1 + $0x38] sm:$0xff]   ;;  %s8191_s23 = sshll.u32 %s10630_s9, 6  ;;  %v8488_v17 = vld [vmem:[%s10481_s1 + $0x40] sm:$0xff]   ;;  %s7483_s8 = sshll.u32 %s10630_s9, 2 }
  0x13   : > { %v8485_v14 = vld [vmem:[%s10481_s1 + $0xb0] sm:$0xff]   ;;  %v8487_v16 = vld [vmem:[%s10481_s1 + $0xb8] sm:$0xff]   ;;  %s8737_s28 = scalar_lea.vmem %s10480_s0, %s8191_s23  ;;  %v8489_v18 = vld [vmem:[%s10481_s1 + $0xc0] sm:$0xff]   ;;  %s10301_s16 = scalar_lea.vmem %s10483_s3, %s7483_s8 }
  0x14   : > { %4442 = vmatpush1.bf16.msra.mxu0 %v8474_v3  ;;  %4731 = vmatpush1.bf16.msra.mxu1 %v8475_v4  ;;  %v8748_v19 = vld [vmem:[%s8737_s28] sm:$0xff]  ;;  %v8754_v21 = vld [vmem:[%s8737_s28 + $0x8] sm:$0xff]  ;;  %v8492_v27 = vld [vmem:[%s10481_s1 + $0x50] sm:$0xff]  }
  0x15   : > { %4443 = vmatprep.subr.bf16.mxu0 %v10484_v1  ;;  %4732 = vmatprep.subr.bf16.mxu1 %v10484_v1  ;;  %v8751_v20 = vld [vmem:[%s8737_s28 + $0x40] sm:$0xff]  ;;  %v8759_v23 = vld [vmem:[%s8737_s28 + $0x48] sm:$0xff]  ;;  %v8493_v28 = vld [vmem:[%s10481_s1 + $0xd0] sm:$0xff]  }
  0x16   : > { %v7485_v22 = vcombine.high %v8748_v19, %v8751_v20  ;;  %v8490_v24 = vld [vmem:[%s10481_s1 + $0x48] sm:$0xff]   ;;  %v7487_v25 = vcombine.high %v8754_v21, %v8759_v23  ;;  %v8494_v29 = vld [vmem:[%s10481_s1 + $0x58] sm:$0xff]   ;;  %v8496_v31 = vld [vmem:[%s10481_s1 + $0x60] sm:$0xff]   ;;  %v7484_v42 = vcombine.low %v8748_v19, %v8751_v20  ;;  %v7486_v44 = vcombine.low %v8754_v21, %v8759_v23 }
  0x17   : > { %v8491_v26 = vld [vmem:[%s10481_s1 + $0xc8] sm:$0xff]   ;;  %v8495_v30 = vld [vmem:[%s10481_s1 + $0xd8] sm:$0xff]   ;;  %v8497_v32 = vld [vmem:[%s10481_s1 + $0xe0] sm:$0xff]  }
  0x18   : > { %4444 = vmatpush1.bf16.msra.mxu0 %v8476_v5  ;;  %4733 = vmatpush1.bf16.msra.mxu1 %v8477_v6  ;;  %v8498_v33 = vld [vmem:[%s10481_s1 + $0x68] sm:$0xff]   ;;  %v8500_v35 = vld [vmem:[%s10481_s1 + $0x70] sm:$0xff]   ;;  %v8502_v37 = vld [vmem:[%s10481_s1 + $0x78] sm:$0xff]  }
  0x19   : > { %4445 = vmatprep.subr.bf16.mxu0 %v10484_v1  ;;  %4734 = vmatprep.subr.bf16.mxu1 %v10484_v1  ;;  %v8499_v34 = vld [vmem:[%s10481_s1 + $0xe8] sm:$0xff]   ;;  %v8501_v36 = vld [vmem:[%s10481_s1 + $0xf0] sm:$0xff]   ;;  %v8503_v38 = vld [vmem:[%s10481_s1 + $0xf8] sm:$0xff]  }
  0x1a   : > { %4471 = vmatprep.mubr.bf16.mxu0 %v7485_v22  ;;  %4760 = vmatprep.mubr.bf16.mxu1 %v7487_v25  ;;  %v615_v39 = vld [vmem:[%s8737_s28 + $0x80] sm:$0xff]  ;;  %v616_v41 = vld [vmem:[%s8737_s28 + $0x88] sm:$0xff]  ;;  %v8508_v59 = vld [vmem:[%s10481_s1 + $0x110] sm:$0xff]  }
  0x1b   : > { %v623_v40 = vld [vmem:[%s8737_s28 + $0xc0] sm:$0xff]  ;;  %v624_v43 = vld [vmem:[%s8737_s28 + $0xc8] sm:$0xff]  ;;  %v8509_v60 = vld [vmem:[%s10481_s1 + $0x190] sm:$0xff]  }
  0x1c   : > { %4446 = vmatpush1.bf16.msra.mxu0 %v8478_v7  ;;  %4735 = vmatpush1.bf16.msra.mxu1 %v8479_v8  ;;  %v8504_v45 = vld [vmem:[%s10481_s1 + $0x100] sm:$0xff]   ;;  %v7501_v47 = vcombine.high %v615_v39, %v623_v40  ;;  %v7503_v48 = vcombine.high %v616_v41, %v624_v43  ;;  %v8506_v51 = vld [vmem:[%s10481_s1 + $0x108] sm:$0xff]   ;;  %v7500_v55 = vcombine.low %v615_v39, %v623_v40  ;;  %v8510_v2 = vld [vmem:[%s10481_s1 + $0x118] sm:$0xff]  }
  0x1d   : > { %4447 = vmatprep.subr.bf16.mxu0 %v10484_v1  ;;  %4736 = vmatprep.subr.bf16.mxu1 %v10484_v1  ;;  %v8505_v46 = vld [vmem:[%s10481_s1 + $0x180] sm:$0xff]   ;;  %v8507_v52 = vld [vmem:[%s10481_s1 + $0x188] sm:$0xff]   ;;  %v7502_v56 = vcombine.low %v616_v41, %v624_v43  ;;  %v8511_v3 = vld [vmem:[%s10481_s1 + $0x198] sm:$0xff]  }
  0x1e   : > { %v631_v49 = vld [vmem:[%s8737_s28 + $0x100] sm:$0xff]  ;;  %v632_v53 = vld [vmem:[%s8737_s28 + $0x108] sm:$0xff]  ;;  %v8517_v20 = vld [vmem:[%s10481_s1 + $0x1b0] sm:$0xff]  }
  0x1f   : > { %v639_v50 = vld [vmem:[%s8737_s28 + $0x140] sm:$0xff]  ;;  %v640_v54 = vld [vmem:[%s8737_s28 + $0x148] sm:$0xff]  ;;  %v8524_v41 = vld [vmem:[%s10481_s1 + $0x150] sm:$0xff]  }
  0x20   : > { %4448 = vmatpush1.bf16.msra.mxu0 %v8480_v9  ;;  %4737 = vmatpush1.bf16.msra.mxu1 %v8481_v10  ;;  %v7517_v57 = vcombine.high %v631_v49, %v639_v50  ;;  %v7519_v58 = vcombine.high %v632_v53, %v640_v54  ;;  %v647_v61 = vld [vmem:[%s8737_s28 + $0x180] sm:$0xff]  ;;  %v648_v63 = vld [vmem:[%s8737_s28 + $0x188] sm:$0xff]  ;;  %v7516_v4 = vcombine.low %v631_v49, %v639_v50 }
  0x21   : > { %4449 = vmatprep.subr.bf16.mxu0 %v10484_v1  ;;  %4738 = vmatprep.subr.bf16.mxu1 %v10484_v1  ;;  %v655_v62 = vld [vmem:[%s8737_s28 + $0x1c0] sm:$0xff]  ;;  %v656_v0 = vld [vmem:[%s8737_s28 + $0x1c8] sm:$0xff]  ;;  %v7518_v6 = vcombine.low %v632_v53, %v640_v54 }
  0x22   : > { %v8512_v5 = vld [vmem:[%s10481_s1 + $0x120] sm:$0xff]   ;;  %v7533_v7 = vcombine.high %v647_v61, %v655_v62  ;;  %v7535_v9 = vcombine.high %v648_v63, %v656_v0  ;;  %v688_v25 = vld [vmem:[%s8737_s28 + $0x2c8] sm:$0xff] }
  0x23   : > { %v8513_v8 = vld [vmem:[%s10481_s1 + $0x1a0] sm:$0xff]   ;;  %v8523_v39 = vld [vmem:[%s10481_s1 + $0x1c8] sm:$0xff]  }
  0x24   : > { %4450 = vmatpush1.bf16.msra.mxu0 %v8482_v11  ;;  %4739 = vmatpush1.bf16.msra.mxu1 %v8483_v12  ;;  %v663_v10 = vld [vmem:[%s8737_s28 + $0x200] sm:$0xff]  ;;  %v664_v12 = vld [vmem:[%s8737_s28 + $0x208] sm:$0xff] }
  0x25   : > { %4451 = vmatprep.subr.bf16.mxu0 %v10484_v1  ;;  %4740 = vmatprep.subr.bf16.mxu1 %v10484_v1  ;;  %v671_v11 = vld [vmem:[%s8737_s28 + $0x240] sm:$0xff]  ;;  %v720_v49 = vld [vmem:[%s8737_s28 + $0x3c8] sm:$0xff] }
  0x26   : > { %v7549_v19 = vcombine.high %v663_v10, %v671_v11  ;;  %v679_v22 = vld [vmem:[%s8737_s28 + $0x280] sm:$0xff] }
  0x27   : > { %v687_v23 = vld [vmem:[%s8737_s28 + $0x2c0] sm:$0xff] }
  0x28   : > { %4452 = vmatpush1.bf16.msra.mxu0 %v8484_v13  ;;  %4741 = vmatpush1.bf16.msra.mxu1 %v8485_v14  ;;  %v672_v13 = vld [vmem:[%s8737_s28 + $0x248] sm:$0xff]  ;;  %v7564_v40 = vcombine.low %v679_v22, %v687_v23  ;;  %v727_v54 = vld [vmem:[%s8737_s28 + $0x400] sm:$0xff] }
  0x29   : > { %4453 = vmatprep.subr.bf16.mxu0 %v10484_v1  ;;  %4742 = vmatprep.subr.bf16.mxu1 %v10484_v1  ;;  %v8514_v14 = vld [vmem:[%s10481_s1 + $0x128] sm:$0xff]   ;;  %v7551_v21 = vcombine.high %v664_v12, %v672_v13 }
  0x2c   : > { %4454 = vmatpush1.bf16.msra.mxu0 %v8486_v15  ;;  %4743 = vmatpush1.bf16.msra.mxu1 %v8487_v16  ;;  %v8515_v15 = vld [vmem:[%s10481_s1 + $0x1a8] sm:$0xff]   ;;  %v7532_v16 = vcombine.low %v647_v61, %v655_v62 }
  0x2d   : > { %4455 = vmatprep.subr.bf16.mxu0 %v10484_v1  ;;  %4744 = vmatprep.subr.bf16.mxu1 %v10484_v1 }
  0x30   : > { %4456 = vmatpush1.bf16.msra.mxu0 %v8488_v17  ;;  %4745 = vmatpush1.bf16.msra.mxu1 %v8489_v18  ;;  %v8516_v17 = vld [vmem:[%s10481_s1 + $0x130] sm:$0xff]   ;;  %v7534_v18 = vcombine.low %v648_v63, %v656_v0  ;;  %v743_v0 = vld [vmem:[%s8737_s28 + $0x480] sm:$0xff] }
  0x31   : > { %4457 = vmatprep.subr.bf16.mxu0 %v10484_v1  ;;  %4746 = vmatprep.subr.bf16.mxu1 %v10484_v1 }
  0x34   : > { %4458 = vmatpush1.bf16.msra.mxu0 %v8490_v24  ;;  %4747 = vmatpush1.bf16.msra.mxu1 %v8491_v26  ;;  %v680_v24 = vld [vmem:[%s8737_s28 + $0x288] sm:$0xff]  ;;  %v8518_v26 = vld [vmem:[%s10481_s1 + $0x138] sm:$0xff]  }
  0x35   : > { %4459 = vmatprep.subr.bf16.mxu0 %v10484_v1  ;;  %4748 = vmatprep.subr.bf16.mxu1 %v10484_v1 }
  0x38   : > { %4460 = vmatpush1.bf16.msra.mxu0 %v8492_v27  ;;  %4749 = vmatpush1.bf16.msra.mxu1 %v8493_v28  ;;  %v8519_v27 = vld [vmem:[%s10481_s1 + $0x1b8] sm:$0xff]   ;;  %v7548_v28 = vcombine.low %v663_v10, %v671_v11  ;;  %v8528_v10 = vld [vmem:[%s10481_s1 + $0x160] sm:$0xff]  }
  0x39   : > { %4461 = vmatprep.subr.bf16.mxu0 %v10484_v1  ;;  %4750 = vmatprep.subr.bf16.mxu1 %v10484_v1  ;;  %v8529_v11 = vld [vmem:[%s10481_s1 + $0x1e0] sm:$0xff]  }
  0x3c   : > { %4462 = vmatpush1.bf16.msra.mxu0 %v8494_v29  ;;  %4751 = vmatpush1.bf16.msra.mxu1 %v8495_v30  ;;  %v8520_v29 = vld [vmem:[%s10481_s1 + $0x140] sm:$0xff]   ;;  %v7550_v30 = vcombine.low %v664_v12, %v672_v13  ;;  %v760_v13 = vld [vmem:[%s8737_s28 + $0x508] sm:$0xff] }
  0x3d   : > { %4463 = vmatprep.subr.bf16.mxu0 %v10484_v1  ;;  %4752 = vmatprep.subr.bf16.mxu1 %v10484_v1  ;;  %v767_v12 = vld [vmem:[%s8737_s28 + $0x540] sm:$0xff] }
  0x40   : > { %4464 = vmatpush1.bf16.msra.mxu0 %v8496_v31  ;;  %4753 = vmatpush1.bf16.msra.mxu1 %v8497_v32  ;;  %v7565_v31 = vcombine.high %v679_v22, %v687_v23  ;;  %v8521_v32 = vld [vmem:[%s10481_s1 + $0x1c0] sm:$0xff]   ;;  %v784_v22 = vld [vmem:[%s8737_s28 + $0x5c8] sm:$0xff] }
  0x41   : > { %4465 = vmatprep.subr.bf16.mxu0 %v10484_v1  ;;  %4754 = vmatprep.subr.bf16.mxu1 %v10484_v1 }
  0x44   : > { %4466 = vmatpush1.bf16.msra.mxu0 %v8498_v33  ;;  %4755 = vmatpush1.bf16.msra.mxu1 %v8499_v34  ;;  %v7567_v33 = vcombine.high %v680_v24, %v688_v25  ;;  %v695_v34 = vld [vmem:[%s8737_s28 + $0x300] sm:$0xff] }
  0x45   : > { %4467 = vmatprep.subr.bf16.mxu0 %v10484_v1  ;;  %4756 = vmatprep.subr.bf16.mxu1 %v10484_v1 }
  0x48   : > { %4468 = vmatpush1.bf16.msra.mxu0 %v8500_v35  ;;  %4757 = vmatpush1.bf16.msra.mxu1 %v8501_v36  ;;  %v703_v35 = vld [vmem:[%s8737_s28 + $0x340] sm:$0xff]  ;;  %v696_v36 = vld [vmem:[%s8737_s28 + $0x308] sm:$0xff] }
  0x49   : > { %4469 = vmatprep.subr.bf16.mxu0 %v10484_v1  ;;  %4758 = vmatprep.subr.bf16.mxu1 %v10484_v1  ;;  %v7581_v43 = vcombine.high %v695_v34, %v703_v35  ;;  %v7580_v50 = vcombine.low %v695_v34, %v703_v35  ;;  %v8531_v35 = vld [vmem:[%s10481_s1 + $0x1e8] sm:$0xff]  }
  0x4c   : > { %4470 = vmatpush1.bf16.msra.mxu0 %v8502_v37  ;;  %4759 = vmatpush1.bf16.msra.mxu1 %v8503_v38  ;;  %v704_v37 = vld [vmem:[%s8737_s28 + $0x348] sm:$0xff] }
  0x4d   : > { %5017 = vmatprep.subr.bf16.mxu0 %v10484_v1  ;;  %5306 = vmatprep.subr.bf16.mxu1 %v10484_v1  ;;  %v8522_v38 = vld [vmem:[%s10481_s1 + $0x148] sm:$0xff]  }
  0x4f   : > { %4472 = vmatmul.mubr.bf16.vlgmr.msra.gmra.mrb[0].mxu0 %v7484_v42  ;;  %4761 = vmatmul.mubr.bf16.vlgmr.msra.gmra.mrb[0].mxu1 %v7486_v44  ;;  %v7566_v42 = vcombine.low %v680_v24, %v688_v25  ;;  %v8525_v44 = vld [vmem:[%s10481_s1 + $0x1d0] sm:$0xff]  }
  0x50   : > { %5018 = vmatpush1.bf16.msra.mxu0 %v8504_v45  ;;  %5307 = vmatpush1.bf16.msra.mxu1 %v8505_v46  ;;  %v7583_v45 = vcombine.high %v696_v36, %v704_v37  ;;  %v711_v46 = vld [vmem:[%s8737_s28 + $0x380] sm:$0xff] }
  0x51   : > { %4479 = vmatprep.mubr.bf16.mxu0 %v7501_v47  ;;  %4768 = vmatprep.mubr.bf16.mxu1 %v7503_v48  ;;  %v719_v47 = vld [vmem:[%s8737_s28 + $0x3c0] sm:$0xff]  ;;  %v712_v48 = vld [vmem:[%s8737_s28 + $0x388] sm:$0xff] }
  0x52   : > { %5019 = vmatprep.subr.bf16.mxu0 %v10484_v1  ;;  %5308 = vmatprep.subr.bf16.mxu1 %v10484_v1  ;;  %v7599_v53 = vcombine.high %v712_v48, %v720_v49  ;;  %v7598_v61 = vcombine.low %v712_v48, %v720_v49  ;;  %v824_v48 = vld [vmem:[%s8737_s28 + $0x708] sm:$0xff] }
  0x53   : > { %v832_v49 = vld [vmem:[%s8737_s28 + $0x748] sm:$0xff] }
  0x54   : > { %5020 = vmatpush1.bf16.msra.mxu0 %v8506_v51  ;;  %5309 = vmatpush1.bf16.msra.mxu1 %v8507_v52  ;;  %v7582_v51 = vcombine.low %v696_v36, %v704_v37  ;;  %v7597_v52 = vcombine.high %v711_v46, %v719_v47  ;;  %v807_v37 = vld [vmem:[%s8737_s28 + $0x680] sm:$0xff] }
  0x55   : > { %5021 = vmatprep.subr.bf16.mxu0 %v10484_v1  ;;  %5310 = vmatprep.subr.bf16.mxu1 %v10484_v1 }
  0x57   : > { %4480 = vmatmul.mubr.bf16.gmra.mrb[4].mxu0 %v7500_v55  ;;  %4769 = vmatmul.mubr.bf16.gmra.mrb[4].mxu1 %v7502_v56  ;;  %v8526_v55 = vld [vmem:[%s10481_s1 + $0x158] sm:$0xff]  }
  0x58   : > { %4487 = vmatprep.mubr.bf16.mxu0 %v7517_v57  ;;  %4776 = vmatprep.mubr.bf16.mxu1 %v7519_v58  ;;  %v8527_v56 = vld [vmem:[%s10481_s1 + $0x1d8] sm:$0xff]   ;;  %v735_v57 = vld [vmem:[%s8737_s28 + $0x440] sm:$0xff]  ;;  %v728_v58 = vld [vmem:[%s8737_s28 + $0x408] sm:$0xff] }
  0x59   : > { %5022 = vmatpush1.bf16.msra.mxu0 %v8508_v59  ;;  %5311 = vmatpush1.bf16.msra.mxu1 %v8509_v60  ;;  %v736_v59 = vld [vmem:[%s8737_s28 + $0x448] sm:$0xff]  ;;  %v7596_v60 = vcombine.low %v711_v46, %v719_v47  ;;  %v7613_v62 = vcombine.high %v727_v54, %v735_v57  ;;  %v823_v46 = vld [vmem:[%s8737_s28 + $0x700] sm:$0xff] }
  0x5a   : > { %5023 = vmatprep.subr.bf16.mxu0 %v10484_v1  ;;  %5312 = vmatprep.subr.bf16.mxu1 %v10484_v1  ;;  %v7615_v63 = vcombine.high %v728_v58, %v736_v59  ;;  %v831_v47 = vld [vmem:[%s8737_s28 + $0x740] sm:$0xff] }
  0x5d   : > { %5024 = vmatpush1.bf16.msra.mxu0 %v8510_v2  ;;  %5313 = vmatpush1.bf16.msra.mxu1 %v8511_v3  ;;  %v751_v2 = vld [vmem:[%s8737_s28 + $0x4c0] sm:$0xff]  ;;  %v744_v3 = vld [vmem:[%s8737_s28 + $0x488] sm:$0xff] }
  0x5e   : > { %5025 = vmatprep.subr.bf16.mxu0 %v10484_v1  ;;  %5314 = vmatprep.subr.bf16.mxu1 %v10484_v1 }
  0x5f   : > { %4488 = vmatmul.mubr.bf16.gmra.mrb[8].mxu0 %v7516_v4  ;;  %4777 = vmatmul.mubr.bf16.gmra.mrb[8].mxu1 %v7518_v6  ;;  %v752_v4 = vld [vmem:[%s8737_s28 + $0x4c8] sm:$0xff]  ;;  %v7614_v6 = vcombine.low %v728_v58, %v736_v59  ;;  %v7708_v59 = vcombine.low %v823_v46, %v831_v47 }
  0x60   : > { %4495 = vmatprep.mubr.bf16.mxu0 %v7533_v7  ;;  %4784 = vmatprep.mubr.bf16.mxu1 %v7535_v9  ;;  %v7629_v7 = vcombine.high %v743_v0, %v751_v2  ;;  %v759_v9 = vld [vmem:[%s8737_s28 + $0x500] sm:$0xff]  ;;  %v848_v58 = vld [vmem:[%s8737_s28 + $0x7c8] sm:$0xff] }
  0x61   : > { %5026 = vmatpush1.bf16.msra.mxu0 %v8512_v5  ;;  %5315 = vmatpush1.bf16.msra.mxu1 %v8513_v8  ;;  %v7612_v5 = vcombine.low %v727_v54, %v735_v57  ;;  %v7631_v8 = vcombine.high %v744_v3, %v752_v4  ;;  %v7644_v23 = vcombine.low %v759_v9, %v767_v12  ;;  %v840_v57 = vld [vmem:[%s8737_s28 + $0x788] sm:$0xff] }
  0x62   : > { %5027 = vmatprep.subr.bf16.mxu0 %v10484_v1  ;;  %5316 = vmatprep.subr.bf16.mxu1 %v10484_v1  ;;  %v7711_v54 = vcombine.high %v824_v48, %v832_v49 }
  0x65   : > { %5028 = vmatpush1.bf16.msra.mxu0 %v8514_v14  ;;  %5317 = vmatpush1.bf16.msra.mxu1 %v8515_v15  ;;  %v768_v14 = vld [vmem:[%s8737_s28 + $0x548] sm:$0xff]  ;;  %v7628_v15 = vcombine.low %v743_v0, %v751_v2  ;;  %v855_v0 = vld [vmem:[%s8737_s28 + $0x800] sm:$0xff] }
  0x66   : > { %5029 = vmatprep.subr.bf16.mxu0 %v10484_v1  ;;  %5318 = vmatprep.subr.bf16.mxu1 %v10484_v1  ;;  %v7646_v24 = vcombine.low %v760_v13, %v768_v14  ;;  %v863_v2 = vld [vmem:[%s8737_s28 + $0x840] sm:$0xff] }
  0x67   : > { %4496 = vmatmul.mubr.bf16.gmra.mrb[12].mxu0 %v7532_v16  ;;  %4785 = vmatmul.mubr.bf16.gmra.mrb[12].mxu1 %v7534_v18  ;;  %v7630_v16 = vcombine.low %v744_v3, %v752_v4  ;;  %v7647_v18 = vcombine.high %v760_v13, %v768_v14  ;;  %v856_v3 = vld [vmem:[%s8737_s28 + $0x808] sm:$0xff]  ;;  %v7740_v14 = vcombine.low %v855_v0, %v863_v2 }
  0x68   : > { %4503 = vmatprep.mubr.bf16.mxu0 %v7549_v19  ;;  %4792 = vmatprep.mubr.bf16.mxu1 %v7551_v21  ;;  %v775_v19 = vld [vmem:[%s8737_s28 + $0x580] sm:$0xff]  ;;  %v776_v21 = vld [vmem:[%s8737_s28 + $0x588] sm:$0xff] }
  0x69   : > { %5030 = vmatpush1.bf16.msra.mxu0 %v8516_v17  ;;  %5319 = vmatpush1.bf16.msra.mxu1 %v8517_v20  ;;  %v7645_v17 = vcombine.high %v759_v9, %v767_v12  ;;  %v783_v20 = vld [vmem:[%s8737_s28 + $0x5c0] sm:$0xff]  ;;  %v864_v4 = vld [vmem:[%s8737_s28 + $0x848] sm:$0xff] }
  0x6a   : > { %5031 = vmatprep.subr.bf16.mxu0 %v10484_v1  ;;  %5320 = vmatprep.subr.bf16.mxu1 %v10484_v1  ;;  %v7661_v25 = vcombine.high %v775_v19, %v783_v20  ;;  %v7743_v9 = vcombine.high %v856_v3, %v864_v4  ;;  %v872_v12 = vld [vmem:[%s8737_s28 + $0x888] sm:$0xff] }
  0x6b   : > { %v880_v13 = vld [vmem:[%s8737_s28 + $0x8c8] sm:$0xff] }
  0x6d   : > { %5032 = vmatpush1.bf16.msra.mxu0 %v8518_v26  ;;  %5321 = vmatpush1.bf16.msra.mxu1 %v8519_v27  ;;  %v7663_v26 = vcombine.high %v776_v21, %v784_v22  ;;  %v8530_v27 = vld [vmem:[%s10481_s1 + $0x168] sm:$0xff]  }
  0x6e   : > { %5033 = vmatprep.subr.bf16.mxu0 %v10484_v1  ;;  %5322 = vmatprep.subr.bf16.mxu1 %v10484_v1 }
  0x6f   : > { %4504 = vmatmul.mubr.bf16.gmra.mrb[16].mxu0 %v7548_v28  ;;  %4793 = vmatmul.mubr.bf16.gmra.mrb[16].mxu1 %v7550_v30  ;;  %v791_v28 = vld [vmem:[%s8737_s28 + $0x600] sm:$0xff]  ;;  %v792_v30 = vld [vmem:[%s8737_s28 + $0x608] sm:$0xff] }
  0x70   : > { %4511 = vmatprep.mubr.bf16.mxu0 %v7565_v31  ;;  %4800 = vmatprep.mubr.bf16.mxu1 %v7567_v33  ;;  %v800_v31 = vld [vmem:[%s8737_s28 + $0x648] sm:$0xff]  ;;  %v7662_v33 = vcombine.low %v776_v21, %v784_v22 }
  0x71   : > { %5034 = vmatpush1.bf16.msra.mxu0 %v8520_v29  ;;  %5323 = vmatpush1.bf16.msra.mxu1 %v8521_v32  ;;  %v799_v29 = vld [vmem:[%s8737_s28 + $0x640] sm:$0xff]  ;;  %v7660_v32 = vcombine.low %v775_v19, %v783_v20  ;;  %v7679_v36 = vcombine.high %v792_v30, %v800_v31  ;;  %v888_v20 = vld [vmem:[%s8737_s28 + $0x908] sm:$0xff] }
  0x72   : > { %5035 = vmatprep.subr.bf16.mxu0 %v10484_v1  ;;  %5324 = vmatprep.subr.bf16.mxu1 %v10484_v1  ;;  %v7677_v34 = vcombine.high %v791_v28, %v799_v29  ;;  %v895_v19 = vld [vmem:[%s8737_s28 + $0x940] sm:$0xff]  ;;  %v896_v21 = vld [vmem:[%s8737_s28 + $0x948] sm:$0xff] }
  0x75   : > { %5036 = vmatpush1.bf16.msra.mxu0 %v8522_v38  ;;  %5325 = vmatpush1.bf16.msra.mxu1 %v8523_v39  ;;  %v815_v38 = vld [vmem:[%s8737_s28 + $0x6c0] sm:$0xff]  ;;  %v808_v39 = vld [vmem:[%s8737_s28 + $0x688] sm:$0xff] }
  0x76   : > { %5037 = vmatprep.subr.bf16.mxu0 %v10484_v1  ;;  %5326 = vmatprep.subr.bf16.mxu1 %v10484_v1 }
  0x77   : > { %4512 = vmatmul.mubr.bf16.gmra.mrb[20].mxu0 %v7564_v40  ;;  %4801 = vmatmul.mubr.bf16.gmra.mrb[20].mxu1 %v7566_v42  ;;  %v816_v40 = vld [vmem:[%s8737_s28 + $0x6c8] sm:$0xff]  ;;  %v7678_v42 = vcombine.low %v792_v30, %v800_v31  ;;  %v7774_v31 = vcombine.low %v888_v20, %v896_v21 }
  0x78   : > { %4519 = vmatprep.mubr.bf16.mxu0 %v7581_v43  ;;  %4808 = vmatprep.mubr.bf16.mxu1 %v7583_v45  ;;  %v7693_v43 = vcombine.high %v807_v37, %v815_v38  ;;  %v8532_v45 = vld [vmem:[%s10481_s1 + $0x170] sm:$0xff]  }
  0x79   : > { %5038 = vmatpush1.bf16.msra.mxu0 %v8524_v41  ;;  %5327 = vmatpush1.bf16.msra.mxu1 %v8525_v44  ;;  %v7676_v41 = vcombine.low %v791_v28, %v799_v29  ;;  %v7695_v44 = vcombine.high %v808_v39, %v816_v40  ;;  %v904_v28 = vld [vmem:[%s8737_s28 + $0x988] sm:$0xff] }
  0x7a   : > { %5039 = vmatprep.subr.bf16.mxu0 %v10484_v1  ;;  %5328 = vmatprep.subr.bf16.mxu1 %v10484_v1  ;;  %v912_v29 = vld [vmem:[%s8737_s28 + $0x9c8] sm:$0xff] }
  0x7d   : > { %5040 = vmatpush1.bf16.msra.mxu0 %v8526_v55  ;;  %5329 = vmatpush1.bf16.msra.mxu1 %v8527_v56  ;;  %v839_v55 = vld [vmem:[%s8737_s28 + $0x780] sm:$0xff] }
  0x7e   : > { %5041 = vmatprep.subr.bf16.mxu0 %v10484_v1  ;;  %5330 = vmatprep.subr.bf16.mxu1 %v10484_v1  ;;  %v847_v56 = vld [vmem:[%s8737_s28 + $0x7c0] sm:$0xff] }
  0x7f   : > { %4520 = vmatmul.mubr.bf16.gmra.mrb[24].mxu0 %v7580_v50  ;;  %4809 = vmatmul.mubr.bf16.gmra.mrb[24].mxu1 %v7582_v51  ;;  %v7692_v50 = vcombine.low %v807_v37, %v815_v38  ;;  %v7694_v51 = vcombine.low %v808_v39, %v816_v40  ;;  %v928_v37 = vld [vmem:[%s8737_s28 + $0xa48] sm:$0xff]  ;;  %v7790_v39 = vcombine.low %v904_v28, %v912_v29 }
  0x80   : > { %4527 = vmatprep.mubr.bf16.mxu0 %v7597_v52  ;;  %4816 = vmatprep.mubr.bf16.mxu1 %v7599_v53  ;;  %v7709_v52 = vcombine.high %v823_v46, %v831_v47  ;;  %v8533_v53 = vld [vmem:[%s10481_s1 + $0x1f0] sm:$0xff]  }
  0x81   : > { %5042 = vmatpush1.bf16.msra.mxu0 %v8528_v10  ;;  %5331 = vmatpush1.bf16.msra.mxu1 %v8529_v11  ;;  %v871_v10 = vld [vmem:[%s8737_s28 + $0x880] sm:$0xff] }
  0x82   : > { %5043 = vmatprep.subr.bf16.mxu0 %v10484_v1  ;;  %5332 = vmatprep.subr.bf16.mxu1 %v10484_v1  ;;  %v879_v11 = vld [vmem:[%s8737_s28 + $0x8c0] sm:$0xff] }
  0x83   : > { %v7756_v22 = vcombine.low %v871_v10, %v879_v11 }
  0x85   : > { %5044 = vmatpush1.bf16.msra.mxu0 %v8530_v27  ;;  %5333 = vmatpush1.bf16.msra.mxu1 %v8531_v35  ;;  %v911_v27 = vld [vmem:[%s8737_s28 + $0x9c0] sm:$0xff] }
  0x86   : > { %5045 = vmatprep.subr.bf16.mxu0 %v10484_v1  ;;  %5334 = vmatprep.subr.bf16.mxu1 %v10484_v1  ;;  %v927_v35 = vld [vmem:[%s8737_s28 + $0xa40] sm:$0xff] }
  0x87   : > { %4528 = vmatmul.mubr.bf16.gmra.mrb[28].mxu0 %v7596_v60  ;;  %4817 = vmatmul.mubr.bf16.gmra.mrb[28].mxu1 %v7598_v61  ;;  %v7710_v60 = vcombine.low %v824_v48, %v832_v49  ;;  %v7725_v61 = vcombine.high %v839_v55, %v847_v56 }
  0x88   : > { %4535 = vmatprep.mubr.bf16.mxu0 %v7613_v62  ;;  %4824 = vmatprep.mubr.bf16.mxu1 %v7615_v63  ;;  %v7727_v62 = vcombine.high %v840_v57, %v848_v58  ;;  %v8534_v63 = vld [vmem:[%s10481_s1 + $0x178] sm:$0xff]  }
  0x89   : > { %5046 = vmatpush1.bf16.msra.mxu0 %v8532_v45  ;;  %5335 = vmatpush1.bf16.msra.mxu1 %v8533_v53  ;;  %v944_v45 = vld [vmem:[%s8737_s28 + $0xac8] sm:$0xff] }
  0x8a   : > { %5047 = vmatprep.subr.bf16.mxu0 %v10484_v1  ;;  %5336 = vmatprep.subr.bf16.mxu1 %v10484_v1  ;;  %v960_v53 = vld [vmem:[%s8737_s28 + $0xb48] sm:$0xff] }
  0x8d   : > { %5048 = vmatpush1.bf16.msra.mxu0 %v8534_v63 }
  0x8e   : > { %5595 = vmatprep.subr.bf16.mxu0 %v10484_v1 }
  0x8f   : > { %4536 = vmatmul.mubr.bf16.gmra.mrb[32].mxu0 %v7612_v5  ;;  %4825 = vmatmul.mubr.bf16.gmra.mrb[32].mxu1 %v7614_v6  ;;  %v7724_v5 = vcombine.low %v839_v55, %v847_v56  ;;  %v7726_v6 = vcombine.low %v840_v57, %v848_v58  ;;  %v967_v58 = vld [vmem:[%s8737_s28 + $0xb80] sm:$0xff] }
  0x90   : > { %4543 = vmatprep.mubr.bf16.mxu0 %v7629_v7  ;;  %4832 = vmatprep.mubr.bf16.mxu1 %v7631_v8  ;;  %v7741_v7 = vcombine.high %v855_v0, %v863_v2  ;;  %v8535_v8 = vld [vmem:[%s10481_s1 + $0x1f8] sm:$0xff]  }
  0x91   : > { %5337 = vmatpush1.bf16.msra.mxu1 %v8535_v8 }
  0x92   : > { %5884 = vmatprep.subr.bf16.mxu1 %v10484_v1 }
  0x97   : > { %4544 = vmatmul.mubr.bf16.gmra.mrb[36].mxu0 %v7628_v15  ;;  %4833 = vmatmul.mubr.bf16.gmra.mrb[36].mxu1 %v7630_v16  ;;  %v7742_v15 = vcombine.low %v856_v3, %v864_v4  ;;  %v7757_v16 = vcombine.high %v871_v10, %v879_v11  ;;  %v983_v3 = vld [vmem:[%s8737_s28 + $0xc00] sm:$0xff] }
  0x98   : > { %4551 = vmatprep.mubr.bf16.mxu0 %v7645_v17  ;;  %4840 = vmatprep.mubr.bf16.mxu1 %v7647_v18  ;;  %v7759_v17 = vcombine.high %v872_v12, %v880_v13  ;;  %v887_v18 = vld [vmem:[%s8737_s28 + $0x900] sm:$0xff] }
  0x99   : > { %v7772_v30 = vcombine.low %v887_v18, %v895_v19  ;;  %v991_v4 = vld [vmem:[%s8737_s28 + $0xc40] sm:$0xff] }
  0x9a   : > { %v999_v11 = vld [vmem:[%s8737_s28 + $0xc80] sm:$0xff] }
  0x9f   : > { %4552 = vmatmul.mubr.bf16.gmra.mrb[40].mxu0 %v7644_v23  ;;  %4841 = vmatmul.mubr.bf16.gmra.mrb[40].mxu1 %v7646_v24  ;;  %v7758_v23 = vcombine.low %v872_v12, %v880_v13  ;;  %v7773_v24 = vcombine.high %v887_v18, %v895_v19  ;;  %v1007_v12 = vld [vmem:[%s8737_s28 + $0xcc0] sm:$0xff]  ;;  %v1000_v13 = vld [vmem:[%s8737_s28 + $0xc88] sm:$0xff] }
  0xa0   : > { %4559 = vmatprep.mubr.bf16.mxu0 %v7661_v25  ;;  %4848 = vmatprep.mubr.bf16.mxu1 %v7663_v26  ;;  %v7775_v25 = vcombine.high %v888_v20, %v896_v21  ;;  %v903_v26 = vld [vmem:[%s8737_s28 + $0x980] sm:$0xff]  ;;  %v1016_v21 = vld [vmem:[%s8737_s28 + $0xd08] sm:$0xff] }
  0xa1   : > { %v7788_v38 = vcombine.low %v903_v26, %v911_v27  ;;  %v1015_v19 = vld [vmem:[%s8737_s28 + $0xd00] sm:$0xff] }
  0xa2   : > { %v1023_v20 = vld [vmem:[%s8737_s28 + $0xd40] sm:$0xff] }
  0xa7   : > { %4560 = vmatmul.mubr.bf16.gmra.mrb[44].mxu0 %v7660_v32  ;;  %4849 = vmatmul.mubr.bf16.gmra.mrb[44].mxu1 %v7662_v33  ;;  %v7789_v32 = vcombine.high %v903_v26, %v911_v27  ;;  %v7791_v33 = vcombine.high %v904_v28, %v912_v29  ;;  %v1031_v27 = vld [vmem:[%s8737_s28 + $0xd80] sm:$0xff]  ;;  %v1032_v29 = vld [vmem:[%s8737_s28 + $0xd88] sm:$0xff] }
  0xa8   : > { %4567 = vmatprep.mubr.bf16.mxu0 %v7677_v34  ;;  %4856 = vmatprep.mubr.bf16.mxu1 %v7679_v36  ;;  %v919_v34 = vld [vmem:[%s8737_s28 + $0xa00] sm:$0xff]  ;;  %v920_v36 = vld [vmem:[%s8737_s28 + $0xa08] sm:$0xff] }
  0xa9   : > { %v7805_v40 = vcombine.high %v919_v34, %v927_v35  ;;  %v7804_v46 = vcombine.low %v919_v34, %v927_v35  ;;  %v7806_v47 = vcombine.low %v920_v36, %v928_v37  ;;  %v1039_v28 = vld [vmem:[%s8737_s28 + $0xdc0] sm:$0xff] }
  0xaa   : > { %v1047_v35 = vld [vmem:[%s8737_s28 + $0xe00] sm:$0xff] }
  0xaf   : > { %4568 = vmatmul.mubr.bf16.gmra.mrb[48].mxu0 %v7676_v41  ;;  %4857 = vmatmul.mubr.bf16.gmra.mrb[48].mxu1 %v7678_v42  ;;  %v7807_v41 = vcombine.high %v920_v36, %v928_v37  ;;  %v935_v42 = vld [vmem:[%s8737_s28 + $0xa80] sm:$0xff] }
  0xb0   : > { %4575 = vmatprep.mubr.bf16.mxu0 %v7693_v43  ;;  %4864 = vmatprep.mubr.bf16.mxu1 %v7695_v44  ;;  %v943_v43 = vld [vmem:[%s8737_s28 + $0xac0] sm:$0xff]  ;;  %v936_v44 = vld [vmem:[%s8737_s28 + $0xa88] sm:$0xff] }
  0xb1   : > { %v7821_v48 = vcombine.high %v935_v42, %v943_v43  ;;  %v7823_v49 = vcombine.high %v936_v44, %v944_v45  ;;  %v7822_v55 = vcombine.low %v936_v44, %v944_v45  ;;  %v1055_v36 = vld [vmem:[%s8737_s28 + $0xe40] sm:$0xff] }
  0xb7   : > { %4576 = vmatmul.mubr.bf16.gmra.mrb[52].mxu0 %v7692_v50  ;;  %4865 = vmatmul.mubr.bf16.gmra.mrb[52].mxu1 %v7694_v51  ;;  %v951_v50 = vld [vmem:[%s8737_s28 + $0xb00] sm:$0xff] }
  0xb8   : > { %4583 = vmatprep.mubr.bf16.mxu0 %v7709_v52  ;;  %4872 = vmatprep.mubr.bf16.mxu1 %v7711_v54  ;;  %v959_v51 = vld [vmem:[%s8737_s28 + $0xb40] sm:$0xff]  ;;  %v952_v52 = vld [vmem:[%s8737_s28 + $0xb08] sm:$0xff]  ;;  %v7820_v54 = vcombine.low %v935_v42, %v943_v43  ;;  %v7916_v42 = vcombine.low %v1031_v27, %v1039_v28 }
  0xb9   : > { %v7837_v56 = vcombine.high %v951_v50, %v959_v51  ;;  %v7839_v57 = vcombine.high %v952_v52, %v960_v53  ;;  %v7838_v63 = vcombine.low %v952_v52, %v960_v53  ;;  %v1063_v53 = vld [vmem:[%s8737_s28 + $0xe80] sm:$0xff] }
  0xbf   : > { %4584 = vmatmul.mubr.bf16.gmra.mrb[56].mxu0 %v7708_v59  ;;  %4873 = vmatmul.mubr.bf16.gmra.mrb[56].mxu1 %v7710_v60  ;;  %v975_v59 = vld [vmem:[%s8737_s28 + $0xbc0] sm:$0xff]  ;;  %v968_v60 = vld [vmem:[%s8737_s28 + $0xb88] sm:$0xff] }
  0xc0   : > { %4591 = vmatprep.mubr.bf16.mxu0 %v7725_v61  ;;  %4880 = vmatprep.mubr.bf16.mxu1 %v7727_v62  ;;  %v976_v61 = vld [vmem:[%s8737_s28 + $0xbc8] sm:$0xff]  ;;  %v7836_v62 = vcombine.low %v951_v50, %v959_v51  ;;  %v7853_v0 = vcombine.high %v967_v58, %v975_v59 }
  0xc1   : > { %v7855_v2 = vcombine.high %v968_v60, %v976_v61  ;;  %v7854_v8 = vcombine.low %v968_v60, %v976_v61  ;;  %v7932_v60 = vcombine.low %v1047_v35, %v1055_v36 }
  0xc7   : > { %4592 = vmatmul.mubr.bf16.gmra.mrb[60].mxu0 %v7724_v5  ;;  %4881 = vmatmul.mubr.bf16.gmra.mrb[60].mxu1 %v7726_v6  ;;  %v984_v5 = vld [vmem:[%s8737_s28 + $0xc08] sm:$0xff] }
  0xc8   : > { %4599 = vmatprep.mubr.bf16.mxu0 %v7741_v7  ;;  %4888 = vmatprep.mubr.bf16.mxu1 %v7743_v9  ;;  %v992_v6 = vld [vmem:[%s8737_s28 + $0xc48] sm:$0xff]  ;;  %v7852_v7 = vcombine.low %v967_v58, %v975_v59  ;;  %v7869_v9 = vcombine.high %v983_v3, %v991_v4 }
  0xc9   : > { %v7871_v10 = vcombine.high %v984_v5, %v992_v6 }
  0xcf   : > { %4600 = vmatmul.mubr.bf16.gmra.mrb[64].mxu0 %v7740_v14  ;;  %4889 = vmatmul.mubr.bf16.gmra.mrb[64].mxu1 %v7742_v15  ;;  %v1008_v14 = vld [vmem:[%s8737_s28 + $0xcc8] sm:$0xff]  ;;  %v7868_v15 = vcombine.low %v983_v3, %v991_v4 }
  0xd0   : > { %4607 = vmatprep.mubr.bf16.mxu0 %v7757_v16  ;;  %4896 = vmatprep.mubr.bf16.mxu1 %v7759_v17  ;;  %v7870_v16 = vcombine.low %v984_v5, %v992_v6  ;;  %v7885_v17 = vcombine.high %v999_v11, %v1007_v12  ;;  %v7887_v18 = vcombine.high %v1000_v13, %v1008_v14 }
  0xd7   : > { %4608 = vmatmul.mubr.bf16.gmra.mrb[68].mxu0 %v7756_v22  ;;  %4897 = vmatmul.mubr.bf16.gmra.mrb[68].mxu1 %v7758_v23  ;;  %v1024_v22 = vld [vmem:[%s8737_s28 + $0xd48] sm:$0xff]  ;;  %v7884_v23 = vcombine.low %v999_v11, %v1007_v12 }
  0xd8   : > { %4615 = vmatprep.mubr.bf16.mxu0 %v7773_v24  ;;  %4904 = vmatprep.mubr.bf16.mxu1 %v7775_v25  ;;  %v7886_v24 = vcombine.low %v1000_v13, %v1008_v14  ;;  %v7901_v25 = vcombine.high %v1015_v19, %v1023_v20  ;;  %v7903_v26 = vcombine.high %v1016_v21, %v1024_v22  ;;  %v1080_v11 = vld [vmem:[%s8737_s28 + $0xf08] sm:$0xff] }
  0xd9   : > { %v1088_v12 = vld [vmem:[%s8737_s28 + $0xf48] sm:$0xff] }
  0xdf   : > { %4616 = vmatmul.mubr.bf16.gmra.mrb[72].mxu0 %v7772_v30  ;;  %4905 = vmatmul.mubr.bf16.gmra.mrb[72].mxu1 %v7774_v31  ;;  %v1040_v30 = vld [vmem:[%s8737_s28 + $0xdc8] sm:$0xff]  ;;  %v7900_v31 = vcombine.low %v1015_v19, %v1023_v20 }
  0xe0   : > { %4623 = vmatprep.mubr.bf16.mxu0 %v7789_v32  ;;  %4912 = vmatprep.mubr.bf16.mxu1 %v7791_v33  ;;  %v7902_v32 = vcombine.low %v1016_v21, %v1024_v22  ;;  %v7917_v33 = vcombine.high %v1031_v27, %v1039_v28  ;;  %v7919_v34 = vcombine.high %v1032_v29, %v1040_v30  ;;  %v1103_v27 = vld [vmem:[%s8737_s28 + $0xfc0] sm:$0xff] }
  0xe7   : > { %4624 = vmatmul.mubr.bf16.gmra.mrb[76].mxu0 %v7788_v38  ;;  %4913 = vmatmul.mubr.bf16.gmra.mrb[76].mxu1 %v7790_v39  ;;  %v1048_v38 = vld [vmem:[%s8737_s28 + $0xe08] sm:$0xff] }
  0xe8   : > { %4631 = vmatprep.mubr.bf16.mxu0 %v7805_v40  ;;  %4920 = vmatprep.mubr.bf16.mxu1 %v7807_v41  ;;  %v1056_v39 = vld [vmem:[%s8737_s28 + $0xe48] sm:$0xff] }
  0xe9   : > { %v7935_v50 = vcombine.high %v1048_v38, %v1056_v39 }
  0xef   : > { %4632 = vmatmul.mubr.bf16.gmra.mrb[80].mxu0 %v7804_v46  ;;  %4921 = vmatmul.mubr.bf16.gmra.mrb[80].mxu1 %v7806_v47  ;;  %v7918_v46 = vcombine.low %v1032_v29, %v1040_v30  ;;  %v7933_v47 = vcombine.high %v1047_v35, %v1055_v36  ;;  %v1096_v29 = vld [vmem:[%s8737_s28 + $0xf88] sm:$0xff] }
  0xf0   : > { %4639 = vmatprep.mubr.bf16.mxu0 %v7821_v48  ;;  %4928 = vmatprep.mubr.bf16.mxu1 %v7823_v49  ;;  %v1104_v30 = vld [vmem:[%s8737_s28 + $0xfc8] sm:$0xff] }
  0xf7   : > { %4640 = vmatmul.mubr.bf16.gmra.mrb[84].mxu0 %v7820_v54  ;;  %4929 = vmatmul.mubr.bf16.gmra.mrb[84].mxu1 %v7822_v55  ;;  %v1071_v54 = vld [vmem:[%s8737_s28 + $0xec0] sm:$0xff] }
  0xf8   : > { %4647 = vmatprep.mubr.bf16.mxu0 %v7837_v56  ;;  %4936 = vmatprep.mubr.bf16.mxu1 %v7839_v57  ;;  %v1064_v56 = vld [vmem:[%s8737_s28 + $0xe88] sm:$0xff] }
  0xf9   : > { %v1072_v57 = vld [vmem:[%s8737_s28 + $0xec8] sm:$0xff] }
  0xfa   : > { %v7951_v5 = vcombine.high %v1064_v56, %v1072_v57  ;;  %v7950_v19 = vcombine.low %v1064_v56, %v1072_v57  ;;  %v7982_v57 = vcombine.low %v1096_v29, %v1104_v30 }
  0xff   : > { %4648 = vmatmul.mubr.bf16.gmra.mrb[88].mxu0 %v7836_v62  ;;  %4937 = vmatmul.mubr.bf16.gmra.mrb[88].mxu1 %v7838_v63 }
 0x100   : > { %4655 = vmatprep.mubr.bf16.mxu0 %v7853_v0  ;;  %4944 = vmatprep.mubr.bf16.mxu1 %v7855_v2  ;;  %v7934_v0 = vcombine.low %v1048_v38, %v1056_v39  ;;  %v7949_v2 = vcombine.high %v1063_v53, %v1071_v54 }
 0x107   : > { %4656 = vmatmul.mubr.bf16.gmra.mrb[92].mxu0 %v7852_v7  ;;  %4945 = vmatmul.mubr.bf16.gmra.mrb[92].mxu1 %v7854_v8  ;;  %v1079_v8 = vld [vmem:[%s8737_s28 + $0xf00] sm:$0xff] }
 0x108   : > { %4663 = vmatprep.mubr.bf16.mxu0 %v7869_v9  ;;  %4952 = vmatprep.mubr.bf16.mxu1 %v7871_v10  ;;  %v1087_v9 = vld [vmem:[%s8737_s28 + $0xf40] sm:$0xff] }
 0x109   : > { %v7965_v20 = vcombine.high %v1079_v8, %v1087_v9 }
 0x10f   : > { %4664 = vmatmul.mubr.bf16.gmra.mrb[96].mxu0 %v7868_v15  ;;  %4953 = vmatmul.mubr.bf16.gmra.mrb[96].mxu1 %v7870_v16  ;;  %v7948_v15 = vcombine.low %v1063_v53, %v1071_v54 }
 0x110   : > { %4671 = vmatprep.mubr.bf16.mxu0 %v7885_v17  ;;  %4960 = vmatprep.mubr.bf16.mxu1 %v7887_v18 }
 0x117   : > { %4672 = vmatmul.mubr.bf16.gmra.mrb[100].mxu0 %v7884_v23  ;;  %4961 = vmatmul.mubr.bf16.gmra.mrb[100].mxu1 %v7886_v24  ;;  %v7967_v23 = vcombine.high %v1080_v11, %v1088_v12 }
 0x118   : > { %4679 = vmatprep.mubr.bf16.mxu0 %v7901_v25  ;;  %4968 = vmatprep.mubr.bf16.mxu1 %v7903_v26  ;;  %v1095_v26 = vld [vmem:[%s8737_s28 + $0xf80] sm:$0xff] }
 0x119   : > { %v7981_v38 = vcombine.high %v1095_v26, %v1103_v27  ;;  %v7980_v53 = vcombine.low %v1095_v26, %v1103_v27  ;;  %v633_v26 = vld [vmem:[%s8737_s28 + $0x110] sm:$0xff] }
 0x11a   : > { %v641_v27 = vld [vmem:[%s8737_s28 + $0x150] sm:$0xff] }
 0x11f   : > { %4680 = vmatmul.mubr.bf16.gmra.mrb[104].mxu0 %v7900_v31  ;;  %4969 = vmatmul.mubr.bf16.gmra.mrb[104].mxu1 %v7902_v32 }
 0x120   : > { %4687 = vmatprep.mubr.bf16.mxu0 %v7917_v33  ;;  %4976 = vmatprep.mubr.bf16.mxu1 %v7919_v34  ;;  %v7964_v33 = vcombine.low %v1079_v8, %v1087_v9  ;;  %v618_v9 = vld [vmem:[%s8737_s28 + $0x98] sm:$0xff] }
 0x122   : > { %v4473_v37 = vpop.f32.mrb[0].mxu0  ;;  %v4762_v40 = vpop.f32.mrb[0].mxu1 }
 0x123   : > { %v4475_v41 = vpop.f32.mrb[1].mxu0  ;;  %v9065_v43 = vadd.f32 %v4762_v40, %v4473_v37  ;;  %v4764_v44 = vpop.f32.mrb[1].mxu1  ;;  %v7966_v37 = vcombine.low %v1080_v11, %v1088_v12 }
 0x124   : > { %v4476_v45 = vpop.f32.mrb[2].mxu0  ;;  %v4765_v48 = vpop.f32.mrb[2].mxu1  ;;  %v7983_v41 = vcombine.high %v1096_v29, %v1104_v30  ;;  %v634_v30 = vld [vmem:[%s8737_s28 + $0x118] sm:$0xff] }
 0x125   : > { %v4478_v49 = vpop.f32.mrb[3].mxu0  ;;  %v9067_v51 = vadd.f32 %v4765_v48, %v4476_v45  ;;  %v4767_v52 = vpop.f32.mrb[3].mxu1  ;;  %v601_v45 = vld [vmem:[%s8737_s28 + $0x10] sm:$0xff]  ;;  %v602_v48 = vld [vmem:[%s8737_s28 + $0x18] sm:$0xff] }
 0x126   : > { %v610_v49 = vld [vmem:[%s8737_s28 + $0x58] sm:$0xff] }
 0x127   : > { %4688 = vmatmul.mubr.bf16.gmra.mrb[108].mxu0 %v7916_v42  ;;  %4977 = vmatmul.mubr.bf16.gmra.mrb[108].mxu1 %v7918_v46  ;;  %v609_v46 = vld [vmem:[%s8737_s28 + $0x50] sm:$0xff] }
 0x128   : > { %4695 = vmatprep.mubr.bf16.mxu0 %v7933_v47  ;;  %4984 = vmatprep.mubr.bf16.mxu1 %v7935_v50  ;;  %v7488_v8 = vcombine.low %v601_v45, %v609_v46 }
 0x12a   : > { %v4481_v55 = vpop.f32.mrb[4].mxu0  ;;  %v4770_v58 = vpop.f32.mrb[4].mxu1 }
 0x12b   : > { %v4483_v59 = vpop.f32.mrb[5].mxu0  ;;  %v9073_v61 = vadd.f32 %v4770_v58, %v4481_v55  ;;  %v4772_v62 = vpop.f32.mrb[5].mxu1  ;;  %v7489_v58 = vcombine.high %v601_v45, %v609_v46  ;;  %v8540_v46 = vld [vmem:[%s10481_s1 + $0x210] sm:$0xff]  }
 0x12c   : > { %v4484_v63 = vpop.f32.mrb[6].mxu0  ;;  %v4773_v3 = vpop.f32.mrb[6].mxu1  ;;  %v7491_v62 = vcombine.high %v602_v48, %v610_v49 }
 0x12d   : > { %v4486_v4 = vpop.f32.mrb[7].mxu0  ;;  %v9075_v6 = vadd.f32 %v4773_v3, %v4484_v63  ;;  %v4775_v7 = vpop.f32.mrb[7].mxu1  ;;  %v617_v3 = vld [vmem:[%s8737_s28 + $0x90] sm:$0xff] }
 0x12e   : > { %v625_v4 = vld [vmem:[%s8737_s28 + $0xd0] sm:$0xff] }
 0x12f   : > { %4696 = vmatmul.mubr.bf16.gmra.mrb[112].mxu0 %v7932_v60  ;;  %4985 = vmatmul.mubr.bf16.gmra.mrb[112].mxu1 %v7934_v0 }
 0x130   : > { %4703 = vmatprep.mubr.bf16.mxu0 %v7949_v2  ;;  %4992 = vmatprep.mubr.bf16.mxu1 %v7951_v5 }
 0x132   : > { %v4489_v10 = vpop.f32.mrb[8].mxu0  ;;  %v4778_v13 = vpop.f32.mrb[8].mxu1 }
 0x133   : > { %v4491_v14 = vpop.f32.mrb[9].mxu0  ;;  %v9081_v16 = vadd.f32 %v4778_v13, %v4489_v10  ;;  %v4780_v17 = vpop.f32.mrb[9].mxu1  ;;  %v626_v10 = vld [vmem:[%s8737_s28 + $0xd8] sm:$0xff] }
 0x134   : > { %v4492_v18 = vpop.f32.mrb[10].mxu0  ;;  %v4781_v21 = vpop.f32.mrb[10].mxu1  ;;  %v7490_v14 = vcombine.low %v602_v48, %v610_v49  ;;  %v8541_v49 = vld [vmem:[%s10481_s1 + $0x290] sm:$0xff]  }
 0x135   : > { %v4494_v22 = vpop.f32.mrb[11].mxu0  ;;  %v9083_v24 = vadd.f32 %v4781_v21, %v4492_v18  ;;  %v4783_v25 = vpop.f32.mrb[11].mxu1 }
 0x136   : > { %v8538_v25 = vld [vmem:[%s10481_s1 + $0x208] sm:$0xff]  }
 0x137   : > { %4704 = vmatmul.mubr.bf16.gmra.mrb[116].mxu0 %v7948_v15  ;;  %4993 = vmatmul.mubr.bf16.gmra.mrb[116].mxu1 %v7950_v19  ;;  %v8536_v15 = vld [vmem:[%s10481_s1 + $0x200] sm:$0xff]  }
 0x138   : > { %4711 = vmatprep.mubr.bf16.mxu0 %v7965_v20  ;;  %5000 = vmatprep.mubr.bf16.mxu1 %v7967_v23  ;;  %v8537_v19 = vld [vmem:[%s10481_s1 + $0x280] sm:$0xff]   ;;  %v7505_v20 = vcombine.high %v617_v3, %v625_v4  ;;  %v7507_v23 = vcombine.high %v618_v9, %v626_v10 }
 0x13a   : > { %v4497_v28 = vpop.f32.mrb[12].mxu0  ;;  %v4786_v31 = vpop.f32.mrb[12].mxu1 }
 0x13b   : > { %v4499_v32 = vpop.f32.mrb[13].mxu0  ;;  %v9089_v34 = vadd.f32 %v4786_v31, %v4497_v28  ;;  %v4788_v35 = vpop.f32.mrb[13].mxu1  ;;  %v8539_v28 = vld [vmem:[%s10481_s1 + $0x288] sm:$0xff]   ;;  %v642_v31 = vld [vmem:[%s8737_s28 + $0x158] sm:$0xff] }
 0x13c   : > { %v4500_v36 = vpop.f32.mrb[14].mxu0  ;;  %v4789_v39 = vpop.f32.mrb[14].mxu1  ;;  %v7504_v35 = vcombine.low %v617_v3, %v625_v4  ;;  %v7523_v45 = vcombine.high %v634_v30, %v642_v31  ;;  %v7522_v4 = vcombine.low %v634_v30, %v642_v31 }
 0x13d   : > { %v4502_v40 = vpop.f32.mrb[15].mxu0  ;;  %v9091_v42 = vadd.f32 %v4789_v39, %v4500_v36  ;;  %v4791_v44 = vpop.f32.mrb[15].mxu1  ;;  %v7506_v39 = vcombine.low %v618_v9, %v626_v10  ;;  %v8544_v10 = vld [vmem:[%s10481_s1 + $0x220] sm:$0xff]  }
 0x13e   : > { %v7521_v40 = vcombine.high %v633_v26, %v641_v27 }
 0x13f   : > { %4712 = vmatmul.mubr.bf16.gmra.mrb[120].mxu0 %v7964_v33  ;;  %5001 = vmatmul.mubr.bf16.gmra.mrb[120].mxu1 %v7966_v37 }
 0x140   : > { %4719 = vmatprep.mubr.bf16.mxu0 %v7981_v38  ;;  %5008 = vmatprep.mubr.bf16.mxu1 %v7983_v41 }
 0x142   : > { %v4505_v47 = vpop.f32.mrb[16].mxu0  ;;  %v4794_v50 = vpop.f32.mrb[16].mxu1 }
 0x143   : > { %v4507_v52 = vpop.f32.mrb[17].mxu0  ;;  %v9097_v54 = vadd.f32 %v4794_v50, %v4505_v47  ;;  %v4796_v55 = vpop.f32.mrb[17].mxu1  ;;  %v9140_v50 = vld [vmem:[%s8737_s28 + $0x190] sm:$0xff] }
 0x144   : > { %v4508_v56 = vpop.f32.mrb[18].mxu0  ;;  %v4797_v59 = vpop.f32.mrb[18].mxu1  ;;  %v657_v52 = vld [vmem:[%s8737_s28 + $0x1d0] sm:$0xff] }
 0x145   : > { %v4510_v60 = vpop.f32.mrb[19].mxu0  ;;  %v9099_v63 = vadd.f32 %v4797_v59, %v4508_v56  ;;  %v4799_v0 = vpop.f32.mrb[19].mxu1  ;;  %v650_v56 = vld [vmem:[%s8737_s28 + $0x198] sm:$0xff] }
 0x147   : > { %4720 = vmatmul.mubr.bf16.gmra.mrb[124].mxu0 %v7980_v53  ;;  %5009 = vmatmul.mubr.bf16.gmra.mrb[124].mxu1 %v7982_v57  ;;  %v8542_v53 = vld [vmem:[%s10481_s1 + $0x218] sm:$0xff]  }
 0x148   : > { %5049 = vmatprep.mubr.bf16.mxu0 %v7489_v58  ;;  %5338 = vmatprep.mubr.bf16.mxu1 %v7491_v62  ;;  %v658_v57 = vld [vmem:[%s8737_s28 + $0x1d8] sm:$0xff]  ;;  %v7520_v62 = vcombine.low %v633_v26, %v641_v27  ;;  %v7536_v27 = vcombine.low %v9140_v50, %v657_v52 }
 0x149   : > { %v8543_v58 = vld [vmem:[%s10481_s1 + $0x298] sm:$0xff]   ;;  %v7539_v9 = vcombine.high %v650_v56, %v658_v57  ;;  %v7538_v31 = vcombine.low %v650_v56, %v658_v57 }
 0x14a   : > { %v4513_v2 = vpop.f32.mrb[20].mxu0  ;;  %v4802_v5 = vpop.f32.mrb[20].mxu1 }
 0x14b   : > { %v4515_v7 = vpop.f32.mrb[21].mxu0  ;;  %v9105_v11 = vadd.f32 %v4802_v5, %v4513_v2  ;;  %v4804_v12 = vpop.f32.mrb[21].mxu1  ;;  %v7537_v5 = vcombine.high %v9140_v50, %v657_v52  ;;  %v690_v50 = vld [vmem:[%s8737_s28 + $0x2d8] sm:$0xff] }
 0x14c   : > { %v4516_v13 = vpop.f32.mrb[22].mxu0  ;;  %v4805_v17 = vpop.f32.mrb[22].mxu1  ;;  %v8551_v52 = vld [vmem:[%s10481_s1 + $0x2b8] sm:$0xff]  }
 0x14d   : > { %v4518_v18 = vpop.f32.mrb[23].mxu0  ;;  %v9113_v21 = vadd.f32 %v4805_v17, %v4516_v13  ;;  %v4807_v22 = vpop.f32.mrb[23].mxu1  ;;  %v673_v17 = vld [vmem:[%s8737_s28 + $0x250] sm:$0xff] }
 0x14e   : > { %v8546_v18 = vld [vmem:[%s10481_s1 + $0x228] sm:$0xff]   ;;  %v674_v22 = vld [vmem:[%s8737_s28 + $0x258] sm:$0xff] }
 0x14f   : > { %5050 = vmatmul.mubr.bf16.vlgmr.msra.gmra.mrb[128].mxu0 %v7488_v8  ;;  %5339 = vmatmul.mubr.bf16.vlgmr.msra.gmra.mrb[128].mxu1 %v7490_v14  ;;  %v8545_v14 = vld [vmem:[%s10481_s1 + $0x2a0] sm:$0xff]  }
 0x150   : > { %5596 = vmatpush1.bf16.msra.mxu0 %v8536_v15  ;;  %5885 = vmatpush1.bf16.msra.mxu1 %v8537_v19  ;;  %v9167_v15 = vld [vmem:[%s8737_s28 + $0x210] sm:$0xff] }
 0x151   : > { %5057 = vmatprep.mubr.bf16.mxu0 %v7505_v20  ;;  %5346 = vmatprep.mubr.bf16.mxu1 %v7507_v23  ;;  %v666_v20 = vld [vmem:[%s8737_s28 + $0x218] sm:$0xff]  ;;  %v8547_v23 = vld [vmem:[%s10481_s1 + $0x2a8] sm:$0xff]   ;;  %v7552_v56 = vcombine.low %v9167_v15, %v673_v17 }
 0x152   : > { %v4521_v29 = vpop.f32.mrb[24].mxu0  ;;  %5597 = vmatprep.subr.bf16.mxu0 %v10484_v1  ;;  %v4810_v32 = vpop.f32.mrb[24].mxu1  ;;  %5886 = vmatprep.subr.bf16.mxu1 %v10484_v1 }
 0x153   : > { %v4523_v33 = vpop.f32.mrb[25].mxu0  ;;  %v9127_v36 = vadd.f32 %v4810_v32, %v4521_v29  ;;  %v4812_v37 = vpop.f32.mrb[25].mxu1  ;;  %v7553_v32 = vcombine.high %v9167_v15, %v673_v17  ;;  %v698_v17 = vld [vmem:[%s8737_s28 + $0x318] sm:$0xff] }
 0x154   : > { %v4524_v38 = vpop.f32.mrb[26].mxu0  ;;  %5598 = vmatpush1.bf16.msra.mxu0 %v8538_v25  ;;  %v4813_v41 = vpop.f32.mrb[26].mxu1  ;;  %5887 = vmatpush1.bf16.msra.mxu1 %v8539_v28  ;;  %v7555_v37 = vcombine.high %v666_v20, %v674_v22 }
 0x155   : > { %v4526_v44 = vpop.f32.mrb[27].mxu0  ;;  %5599 = vmatprep.subr.bf16.mxu0 %v10484_v1  ;;  %v9133_v47 = vadd.f32 %v4813_v41, %v4524_v38  ;;  %v4815_v48 = vpop.f32.mrb[27].mxu1  ;;  %5888 = vmatprep.subr.bf16.mxu1 %v10484_v1  ;;  %v8548_v38 = vld [vmem:[%s10481_s1 + $0x230] sm:$0xff]  }
 0x156   : > { %v8549_v41 = vld [vmem:[%s10481_s1 + $0x2b0] sm:$0xff]  }
 0x157   : > { %5058 = vmatmul.mubr.bf16.gmra.mrb[132].mxu0 %v7504_v35  ;;  %5347 = vmatmul.mubr.bf16.gmra.mrb[132].mxu1 %v7506_v39  ;;  %v9195_v44 = vld [vmem:[%s8737_s28 + $0x290] sm:$0xff] }
 0x158   : > { %5065 = vmatprep.mubr.bf16.mxu0 %v7521_v40  ;;  %5354 = vmatprep.mubr.bf16.mxu1 %v7523_v45  ;;  %v689_v45 = vld [vmem:[%s8737_s28 + $0x2d0] sm:$0xff] }
 0x159   : > { %5600 = vmatpush1.bf16.msra.mxu0 %v8540_v46  ;;  %5889 = vmatpush1.bf16.msra.mxu1 %v8541_v49  ;;  %v8550_v46 = vld [vmem:[%s10481_s1 + $0x238] sm:$0xff]  }
 0x15a   : > { %v4529_v55 = vpop.f32.mrb[28].mxu0  ;;  %5601 = vmatprep.subr.bf16.mxu0 %v10484_v1  ;;  %v4818_v59 = vpop.f32.mrb[28].mxu1  ;;  %5890 = vmatprep.subr.bf16.mxu1 %v10484_v1  ;;  %v682_v49 = vld [vmem:[%s8737_s28 + $0x298] sm:$0xff] }
 0x15b   : > { %v4531_v60 = vpop.f32.mrb[29].mxu0  ;;  %v9153_v0 = vadd.f32 %v4818_v59, %v4529_v55  ;;  %v4820_v2 = vpop.f32.mrb[29].mxu1 }
 0x15c   : > { %v4532_v3 = vpop.f32.mrb[30].mxu0  ;;  %v4821_v7 = vpop.f32.mrb[30].mxu1  ;;  %v7554_v60 = vcombine.low %v666_v20, %v674_v22 }
 0x15d   : > { %v4534_v8 = vpop.f32.mrb[31].mxu0  ;;  %5602 = vmatpush1.bf16.msra.mxu0 %v8542_v53  ;;  %v9159_v12 = vadd.f32 %v4821_v7, %v4532_v3  ;;  %v4823_v13 = vpop.f32.mrb[31].mxu1  ;;  %5891 = vmatpush1.bf16.msra.mxu1 %v8543_v58 }
 0x15e   : > { %5603 = vmatprep.subr.bf16.mxu0 %v10484_v1  ;;  %5892 = vmatprep.subr.bf16.mxu1 %v10484_v1  ;;  %v705_v13 = vld [vmem:[%s8737_s28 + $0x350] sm:$0xff] }
 0x15f   : > { %5066 = vmatmul.mubr.bf16.gmra.mrb[136].mxu0 %v7520_v62  ;;  %5355 = vmatmul.mubr.bf16.gmra.mrb[136].mxu1 %v7522_v4  ;;  %v7569_v62 = vcombine.high %v9195_v44, %v689_v45  ;;  %v7571_v4 = vcombine.high %v682_v49, %v690_v50 }
 0x160   : > { %5073 = vmatprep.mubr.bf16.mxu0 %v7537_v5  ;;  %5362 = vmatprep.mubr.bf16.mxu1 %v7539_v9  ;;  %v8552_v5 = vld [vmem:[%s10481_s1 + $0x240] sm:$0xff]  }
 0x161   : > { %5604 = vmatpush1.bf16.msra.mxu0 %v8544_v10  ;;  %5893 = vmatpush1.bf16.msra.mxu1 %v8545_v14  ;;  %v8553_v9 = vld [vmem:[%s10481_s1 + $0x2c0] sm:$0xff]   ;;  %v697_v10 = vld [vmem:[%s8737_s28 + $0x310] sm:$0xff]  ;;  %v8554_v14 = vld [vmem:[%s10481_s1 + $0x248] sm:$0xff]  }
 0x162   : > { %v4537_v19 = vpop.f32.mrb[32].mxu0  ;;  %5605 = vmatprep.subr.bf16.mxu0 %v10484_v1  ;;  %v4826_v25 = vpop.f32.mrb[32].mxu1  ;;  %5894 = vmatprep.subr.bf16.mxu1 %v10484_v1 }
 0x163   : > { %v4539_v26 = vpop.f32.mrb[33].mxu0  ;;  %v9181_v28 = vadd.f32 %v4826_v25, %v4537_v19  ;;  %v4828_v29 = vpop.f32.mrb[33].mxu1  ;;  %v8555_v19 = vld [vmem:[%s10481_s1 + $0x2c8] sm:$0xff]  }
 0x164   : > { %v4540_v30 = vpop.f32.mrb[34].mxu0  ;;  %v4829_v33 = vpop.f32.mrb[34].mxu1  ;;  %v7570_v29 = vcombine.low %v682_v49, %v690_v50 }
 0x165   : > { %v4542_v35 = vpop.f32.mrb[35].mxu0  ;;  %5606 = vmatpush1.bf16.msra.mxu0 %v8546_v18  ;;  %v9187_v39 = vadd.f32 %v4829_v33, %v4540_v30  ;;  %v4831_v40 = vpop.f32.mrb[35].mxu1  ;;  %5895 = vmatpush1.bf16.msra.mxu1 %v8547_v23  ;;  %v706_v18 = vld [vmem:[%s8737_s28 + $0x358] sm:$0xff]  ;;  %v7568_v23 = vcombine.low %v9195_v44, %v689_v45  ;;  %v7585_v30 = vcombine.high %v697_v10, %v705_v13  ;;  %v721_v44 = vld [vmem:[%s8737_s28 + $0x3d0] sm:$0xff] }
 0x166   : > { %5607 = vmatprep.subr.bf16.mxu0 %v10484_v1  ;;  %5896 = vmatprep.subr.bf16.mxu1 %v10484_v1  ;;  %v7587_v33 = vcombine.high %v698_v17, %v706_v18  ;;  %v8556_v35 = vld [vmem:[%s10481_s1 + $0x250] sm:$0xff]  }
 0x167   : > { %5074 = vmatmul.mubr.bf16.gmra.mrb[140].mxu0 %v7536_v27  ;;  %5363 = vmatmul.mubr.bf16.gmra.mrb[140].mxu1 %v7538_v31  ;;  %v8557_v40 = vld [vmem:[%s10481_s1 + $0x2d0] sm:$0xff]  }
 0x168   : > { %5081 = vmatprep.mubr.bf16.mxu0 %v7553_v32  ;;  %5370 = vmatprep.mubr.bf16.mxu1 %v7555_v37 }
 0x169   : > { %5608 = vmatpush1.bf16.msra.mxu0 %v8548_v38  ;;  %5897 = vmatpush1.bf16.msra.mxu1 %v8549_v41  ;;  %v713_v41 = vld [vmem:[%s8737_s28 + $0x390] sm:$0xff] }
 0x16a   : > { %v4545_v48 = vpop.f32.mrb[36].mxu0  ;;  %5609 = vmatprep.subr.bf16.mxu0 %v10484_v1  ;;  %v4834_v53 = vpop.f32.mrb[36].mxu1  ;;  %5898 = vmatprep.subr.bf16.mxu1 %v10484_v1 }
 0x16b   : > { %v4547_v55 = vpop.f32.mrb[37].mxu0  ;;  %v9209_v57 = vadd.f32 %v4834_v53, %v4545_v48  ;;  %v4836_v58 = vpop.f32.mrb[37].mxu1  ;;  %v722_v48 = vld [vmem:[%s8737_s28 + $0x3d8] sm:$0xff] }
 0x16c   : > { %v4548_v59 = vpop.f32.mrb[38].mxu0  ;;  %v4837_v2 = vpop.f32.mrb[38].mxu1  ;;  %v7586_v58 = vcombine.low %v698_v17, %v706_v18  ;;  %v7600_v18 = vcombine.low %v713_v41, %v721_v44 }
 0x16d   : > { %v4550_v3 = vpop.f32.mrb[39].mxu0  ;;  %5610 = vmatpush1.bf16.msra.mxu0 %v8550_v46  ;;  %v9215_v7 = vadd.f32 %v4837_v2, %v4548_v59  ;;  %v4839_v8 = vpop.f32.mrb[39].mxu1  ;;  %5899 = vmatpush1.bf16.msra.mxu1 %v8551_v52  ;;  %v714_v46 = vld [vmem:[%s8737_s28 + $0x398] sm:$0xff]  ;;  %v7584_v52 = vcombine.low %v697_v10, %v705_v13  ;;  %v7601_v59 = vcombine.high %v713_v41, %v721_v44 }
 0x16e   : > { %5611 = vmatprep.subr.bf16.mxu0 %v10484_v1  ;;  %5900 = vmatprep.subr.bf16.mxu1 %v10484_v1  ;;  %v7603_v2 = vcombine.high %v714_v46, %v722_v48  ;;  %v729_v8 = vld [vmem:[%s8737_s28 + $0x410] sm:$0xff]  ;;  %v730_v13 = vld [vmem:[%s8737_s28 + $0x418] sm:$0xff] }
 0x16f   : > { %5082 = vmatmul.mubr.bf16.gmra.mrb[144].mxu0 %v7552_v56  ;;  %5371 = vmatmul.mubr.bf16.gmra.mrb[144].mxu1 %v7554_v60  ;;  %v746_v41 = vld [vmem:[%s8737_s28 + $0x498] sm:$0xff] }
 0x170   : > { %5089 = vmatprep.mubr.bf16.mxu0 %v7569_v62  ;;  %5378 = vmatprep.mubr.bf16.mxu1 %v7571_v4  ;;  %v754_v44 = vld [vmem:[%s8737_s28 + $0x4d8] sm:$0xff] }
 0x171   : > { %5612 = vmatpush1.bf16.msra.mxu0 %v8552_v5  ;;  %5901 = vmatpush1.bf16.msra.mxu1 %v8553_v9  ;;  %v8558_v5 = vld [vmem:[%s10481_s1 + $0x258] sm:$0xff]   ;;  %v737_v9 = vld [vmem:[%s8737_s28 + $0x450] sm:$0xff] }
 0x172   : > { %v4553_v15 = vpop.f32.mrb[40].mxu0  ;;  %5613 = vmatprep.subr.bf16.mxu0 %v10484_v1  ;;  %v4842_v20 = vpop.f32.mrb[40].mxu1  ;;  %5902 = vmatprep.subr.bf16.mxu1 %v10484_v1 }
 0x173   : > { %v4555_v22 = vpop.f32.mrb[41].mxu0  ;;  %v9235_v25 = vadd.f32 %v4842_v20, %v4553_v15  ;;  %v4844_v26 = vpop.f32.mrb[41].mxu1 }
 0x174   : > { %v4556_v27 = vpop.f32.mrb[42].mxu0  ;;  %v4845_v31 = vpop.f32.mrb[42].mxu1  ;;  %v7617_v26 = vcombine.high %v729_v8, %v737_v9 }
 0x175   : > { %v4558_v32 = vpop.f32.mrb[43].mxu0  ;;  %5614 = vmatpush1.bf16.msra.mxu0 %v8554_v14  ;;  %v9240_v37 = vadd.f32 %v4845_v31, %v4556_v27  ;;  %v4847_v38 = vpop.f32.mrb[43].mxu1  ;;  %5903 = vmatpush1.bf16.msra.mxu1 %v8555_v19  ;;  %v738_v14 = vld [vmem:[%s8737_s28 + $0x458] sm:$0xff] }
 0x176   : > { %5615 = vmatprep.subr.bf16.mxu0 %v10484_v1  ;;  %5904 = vmatprep.subr.bf16.mxu1 %v10484_v1  ;;  %v8559_v27 = vld [vmem:[%s10481_s1 + $0x2d8] sm:$0xff]   ;;  %v7619_v31 = vcombine.high %v730_v13, %v738_v14  ;;  %v753_v38 = vld [vmem:[%s8737_s28 + $0x4d0] sm:$0xff] }
 0x177   : > { %5090 = vmatmul.mubr.bf16.gmra.mrb[148].mxu0 %v7568_v23  ;;  %5379 = vmatmul.mubr.bf16.gmra.mrb[148].mxu1 %v7570_v29  ;;  %v7602_v23 = vcombine.low %v714_v46, %v722_v48  ;;  %v7616_v48 = vcombine.low %v729_v8, %v737_v9  ;;  %v769_v8 = vld [vmem:[%s8737_s28 + $0x550] sm:$0xff] }
 0x178   : > { %5097 = vmatprep.mubr.bf16.mxu0 %v7585_v30  ;;  %5386 = vmatprep.mubr.bf16.mxu1 %v7587_v33 }
 0x179   : > { %5616 = vmatpush1.bf16.msra.mxu0 %v8556_v35  ;;  %5905 = vmatpush1.bf16.msra.mxu1 %v8557_v40  ;;  %v745_v35 = vld [vmem:[%s8737_s28 + $0x490] sm:$0xff] }
 0x17a   : > { %v4561_v45 = vpop.f32.mrb[44].mxu0  ;;  %5617 = vmatprep.subr.bf16.mxu0 %v10484_v1  ;;  %v4850_v49 = vpop.f32.mrb[44].mxu1  ;;  %5906 = vmatprep.subr.bf16.mxu1 %v10484_v1 }
 0x17b   : > { %v4563_v50 = vpop.f32.mrb[45].mxu0  ;;  %v9253_v53 = vadd.f32 %v4850_v49, %v4561_v45  ;;  %v4852_v55 = vpop.f32.mrb[45].mxu1 }
 0x17c   : > { %v4564_v56 = vpop.f32.mrb[46].mxu0  ;;  %v4853_v60 = vpop.f32.mrb[46].mxu1  ;;  %v7618_v55 = vcombine.low %v730_v13, %v738_v14  ;;  %v770_v13 = vld [vmem:[%s8737_s28 + $0x558] sm:$0xff] }
 0x17d   : > { %v4566_v62 = vpop.f32.mrb[47].mxu0  ;;  %v9255_v3 = vadd.f32 %v4853_v60, %v4564_v56  ;;  %v4855_v4 = vpop.f32.mrb[47].mxu1  ;;  %5618 = vmatpush1.bf16.msra.mxu0 %v8558_v5  ;;  %5907 = vmatpush1.bf16.msra.mxu1 %v8559_v27  ;;  %v7633_v56 = vcombine.high %v745_v35, %v753_v38  ;;  %v7635_v60 = vcombine.high %v746_v41, %v754_v44  ;;  %v761_v5 = vld [vmem:[%s8737_s28 + $0x510] sm:$0xff]  ;;  %v8561_v27 = vld [vmem:[%s10481_s1 + $0x2e0] sm:$0xff]  }
 0x17e   : > { %5619 = vmatprep.subr.bf16.mxu0 %v10484_v1  ;;  %5908 = vmatprep.subr.bf16.mxu1 %v10484_v1  ;;  %v8560_v4 = vld [vmem:[%s10481_s1 + $0x260] sm:$0xff]  }
 0x17f   : > { %5098 = vmatmul.mubr.bf16.gmra.mrb[152].mxu0 %v7584_v52  ;;  %5387 = vmatmul.mubr.bf16.gmra.mrb[152].mxu1 %v7586_v58 }
 0x180   : > { %5105 = vmatprep.mubr.bf16.mxu0 %v7601_v59  ;;  %5394 = vmatprep.mubr.bf16.mxu1 %v7603_v2 }
 0x181   : > { %5620 = vmatpush1.bf16.msra.mxu0 %v8560_v4  ;;  %5909 = vmatpush1.bf16.msra.mxu1 %v8561_v27 }
 0x182   : > { %v4569_v10 = vpop.f32.mrb[48].mxu0  ;;  %v4858_v15 = vpop.f32.mrb[48].mxu1  ;;  %5621 = vmatprep.subr.bf16.mxu0 %v10484_v1  ;;  %5910 = vmatprep.subr.bf16.mxu1 %v10484_v1 }
 0x183   : > { %v4571_v17 = vpop.f32.mrb[49].mxu0  ;;  %v9265_v19 = vadd.f32 %v4858_v15, %v4569_v10  ;;  %v4860_v20 = vpop.f32.mrb[49].mxu1  ;;  %v762_v10 = vld [vmem:[%s8737_s28 + $0x518] sm:$0xff] }
 0x184   : > { %v4572_v22 = vpop.f32.mrb[50].mxu0  ;;  %v4861_v29 = vpop.f32.mrb[50].mxu1  ;;  %v7632_v17 = vcombine.low %v745_v35, %v753_v38  ;;  %v777_v38 = vld [vmem:[%s8737_s28 + $0x590] sm:$0xff] }
 0x185   : > { %v4574_v30 = vpop.f32.mrb[51].mxu0  ;;  %v9270_v32 = vadd.f32 %v4861_v29, %v4572_v22  ;;  %v4863_v33 = vpop.f32.mrb[51].mxu1 }
 0x187   : > { %5106 = vmatmul.mubr.bf16.gmra.mrb[156].mxu0 %v7600_v18  ;;  %5395 = vmatmul.mubr.bf16.gmra.mrb[156].mxu1 %v7602_v23  ;;  %v7634_v23 = vcombine.low %v746_v41, %v754_v44  ;;  %v778_v44 = vld [vmem:[%s8737_s28 + $0x598] sm:$0xff] }
 0x188   : > { %5113 = vmatprep.mubr.bf16.mxu0 %v7617_v26  ;;  %5402 = vmatprep.mubr.bf16.mxu1 %v7619_v31  ;;  %v7649_v26 = vcombine.high %v761_v5, %v769_v8  ;;  %v7651_v31 = vcombine.high %v762_v10, %v770_v13 }
 0x18a   : > { %v4577_v40 = vpop.f32.mrb[52].mxu0  ;;  %v4866_v45 = vpop.f32.mrb[52].mxu1 }
 0x18b   : > { %v4579_v46 = vpop.f32.mrb[53].mxu0  ;;  %v9277_v49 = vadd.f32 %v4866_v45, %v4577_v40  ;;  %v4868_v50 = vpop.f32.mrb[53].mxu1  ;;  %v785_v40 = vld [vmem:[%s8737_s28 + $0x5d0] sm:$0xff]  ;;  %v786_v45 = vld [vmem:[%s8737_s28 + $0x5d8] sm:$0xff] }
 0x18c   : > { %v4580_v52 = vpop.f32.mrb[54].mxu0  ;;  %v4869_v58 = vpop.f32.mrb[54].mxu1  ;;  %v7648_v50 = vcombine.low %v761_v5, %v769_v8  ;;  %v7667_v4 = vcombine.high %v778_v44, %v786_v45  ;;  %v8562_v5 = vld [vmem:[%s10481_s1 + $0x268] sm:$0xff]   ;;  %v793_v8 = vld [vmem:[%s8737_s28 + $0x610] sm:$0xff] }
 0x18d   : > { %v4582_v59 = vpop.f32.mrb[55].mxu0  ;;  %v9279_v62 = vadd.f32 %v4869_v58, %v4580_v52  ;;  %v4871_v2 = vpop.f32.mrb[55].mxu1  ;;  %v7650_v58 = vcombine.low %v762_v10, %v770_v13  ;;  %v794_v10 = vld [vmem:[%s8737_s28 + $0x618] sm:$0xff]  ;;  %5622 = vmatpush1.bf16.msra.mxu0 %v8562_v5 }
 0x18e   : > { %v7665_v59 = vcombine.high %v777_v38, %v785_v40  ;;  %v802_v13 = vld [vmem:[%s8737_s28 + $0x658] sm:$0xff]  ;;  %5623 = vmatprep.subr.bf16.mxu0 %v10484_v1 }
 0x18f   : > { %5114 = vmatmul.mubr.bf16.gmra.mrb[160].mxu0 %v7616_v48  ;;  %5403 = vmatmul.mubr.bf16.gmra.mrb[160].mxu1 %v7618_v55  ;;  %v7682_v5 = vcombine.low %v794_v10, %v802_v13 }
 0x190   : > { %5121 = vmatprep.mubr.bf16.mxu0 %v7633_v56  ;;  %5410 = vmatprep.mubr.bf16.mxu1 %v7635_v60 }
 0x192   : > { %v4585_v9 = vpop.f32.mrb[56].mxu0  ;;  %v4874_v14 = vpop.f32.mrb[56].mxu1 }
 0x193   : > { %v4587_v15 = vpop.f32.mrb[57].mxu0  ;;  %v9289_v18 = vadd.f32 %v4874_v14, %v4585_v9  ;;  %v4876_v20 = vpop.f32.mrb[57].mxu1 }
 0x194   : > { %v4588_v22 = vpop.f32.mrb[58].mxu0  ;;  %v4877_v29 = vpop.f32.mrb[58].mxu1  ;;  %v801_v15 = vld [vmem:[%s8737_s28 + $0x650] sm:$0xff] }
 0x195   : > { %v4590_v30 = vpop.f32.mrb[59].mxu0  ;;  %v9294_v33 = vadd.f32 %v4877_v29, %v4588_v22  ;;  %v4879_v35 = vpop.f32.mrb[59].mxu1 }
 0x196   : > { %v7681_v35 = vcombine.high %v793_v8, %v801_v15 }
 0x197   : > { %5122 = vmatmul.mubr.bf16.gmra.mrb[164].mxu0 %v7632_v17  ;;  %5411 = vmatmul.mubr.bf16.gmra.mrb[164].mxu1 %v7634_v23  ;;  %v7664_v23 = vcombine.low %v777_v38, %v785_v40 }
 0x198   : > { %5129 = vmatprep.mubr.bf16.mxu0 %v7649_v26  ;;  %5418 = vmatprep.mubr.bf16.mxu1 %v7651_v31  ;;  %v8563_v26 = vld [vmem:[%s10481_s1 + $0x2e8] sm:$0xff]   ;;  %v7666_v31 = vcombine.low %v778_v44, %v786_v45  ;;  %v810_v44 = vld [vmem:[%s8737_s28 + $0x698] sm:$0xff] }
 0x199   : > { %5911 = vmatpush1.bf16.msra.mxu1 %v8563_v26  ;;  %v818_v45 = vld [vmem:[%s8737_s28 + $0x6d8] sm:$0xff] }
 0x19a   : > { %v4593_v41 = vpop.f32.mrb[60].mxu0  ;;  %v4882_v46 = vpop.f32.mrb[60].mxu1  ;;  %5912 = vmatprep.subr.bf16.mxu1 %v10484_v1 }
 0x19b   : > { %v4595_v48 = vpop.f32.mrb[61].mxu0  ;;  %v9301_v52 = vadd.f32 %v4882_v46, %v4593_v41  ;;  %v4884_v55 = vpop.f32.mrb[61].mxu1 }
 0x19c   : > { %v4596_v56 = vpop.f32.mrb[62].mxu0  ;;  %v4885_v60 = vpop.f32.mrb[62].mxu1  ;;  %v7683_v48 = vcombine.high %v794_v10, %v802_v13  ;;  %v817_v55 = vld [vmem:[%s8737_s28 + $0x6d0] sm:$0xff]  ;;  %v826_v10 = vld [vmem:[%s8737_s28 + $0x718] sm:$0xff] }
 0x19d   : > { %v4598_v2 = vpop.f32.mrb[63].mxu0  ;;  %v9303_v9 = vadd.f32 %v4885_v60, %v4596_v56  ;;  %v4887_v14 = vpop.f32.mrb[63].mxu1  ;;  %v7680_v60 = vcombine.low %v793_v8, %v801_v15  ;;  %v8564_v8 = vld [vmem:[%s10481_s1 + $0x270] sm:$0xff]   ;;  %v834_v13 = vld [vmem:[%s8737_s28 + $0x758] sm:$0xff] }
 0x19e   : > { %v825_v15 = vld [vmem:[%s8737_s28 + $0x710] sm:$0xff]  ;;  %5624 = vmatpush1.bf16.msra.mxu0 %v8564_v8 }
 0x19f   : > { %5130 = vmatmul.mubr.bf16.gmra.mrb[168].mxu0 %v7648_v50  ;;  %5419 = vmatmul.mubr.bf16.gmra.mrb[168].mxu1 %v7650_v58  ;;  %v809_v50 = vld [vmem:[%s8737_s28 + $0x690] sm:$0xff] }
 0x1a0   : > { %5137 = vmatprep.mubr.bf16.mxu0 %v7665_v59  ;;  %5426 = vmatprep.mubr.bf16.mxu1 %v7667_v4 }
 0x1a1   : > { %5625 = vmatprep.subr.bf16.mxu0 %v10484_v1 }
 0x1a2   : > { %v4601_v17 = vpop.f32.mrb[64].mxu0  ;;  %v4890_v20 = vpop.f32.mrb[64].mxu1 }
 0x1a3   : > { %v4603_v22 = vpop.f32.mrb[65].mxu0  ;;  %v9316_v27 = vadd.f32 %v4890_v20, %v4601_v17  ;;  %v4892_v29 = vpop.f32.mrb[65].mxu1  ;;  %v7697_v17 = vcombine.high %v809_v50, %v817_v55 }
 0x1a4   : > { %v4604_v30 = vpop.f32.mrb[66].mxu0  ;;  %v4893_v41 = vpop.f32.mrb[66].mxu1 }
 0x1a5   : > { %v4606_v46 = vpop.f32.mrb[67].mxu0  ;;  %v9318_v38 = vadd.f32 %v4893_v41, %v4604_v30  ;;  %v4895_v40 = vpop.f32.mrb[67].mxu1  ;;  %v833_v30 = vld [vmem:[%s8737_s28 + $0x750] sm:$0xff] }
 0x1a6   : > { %v7696_v46 = vcombine.low %v809_v50, %v817_v55  ;;  %v7712_v8 = vcombine.low %v825_v15, %v833_v30 }
 0x1a7   : > { %5138 = vmatmul.mubr.bf16.gmra.mrb[172].mxu0 %v7664_v23  ;;  %5427 = vmatmul.mubr.bf16.gmra.mrb[172].mxu1 %v7666_v31  ;;  %v7699_v23 = vcombine.high %v810_v44, %v818_v45 }
 0x1a8   : > { %5145 = vmatprep.mubr.bf16.mxu0 %v7681_v35  ;;  %5434 = vmatprep.mubr.bf16.mxu1 %v7683_v48  ;;  %v8565_v48 = vld [vmem:[%s10481_s1 + $0x2f0] sm:$0xff]  }
 0x1a9   : > { %5913 = vmatpush1.bf16.msra.mxu1 %v8565_v48  ;;  %v7714_v48 = vcombine.low %v826_v10, %v834_v13 }
 0x1aa   : > { %v4609_v56 = vpop.f32.mrb[68].mxu0  ;;  %v4898_v58 = vpop.f32.mrb[68].mxu1  ;;  %5914 = vmatprep.subr.bf16.mxu1 %v10484_v1 }
 0x1ab   : > { %v4611_v59 = vpop.f32.mrb[69].mxu0  ;;  %v9325_v2 = vadd.f32 %v4898_v58, %v4609_v56  ;;  %v4900_v4 = vpop.f32.mrb[69].mxu1 }
 0x1ac   : > { %v4612_v14 = vpop.f32.mrb[70].mxu0  ;;  %v4901_v20 = vpop.f32.mrb[70].mxu1  ;;  %v7698_v59 = vcombine.low %v810_v44, %v818_v45  ;;  %v842_v44 = vld [vmem:[%s8737_s28 + $0x798] sm:$0xff] }
 0x1ad   : > { %v4614_v22 = vpop.f32.mrb[71].mxu0  ;;  %v9327_v26 = vadd.f32 %v4901_v20, %v4612_v14  ;;  %v4903_v29 = vpop.f32.mrb[71].mxu1  ;;  %v849_v20 = vld [vmem:[%s8737_s28 + $0x7d0] sm:$0xff]  ;;  %v850_v45 = vld [vmem:[%s8737_s28 + $0x7d8] sm:$0xff] }
 0x1af   : > { %5146 = vmatmul.mubr.bf16.gmra.mrb[176].mxu0 %v7680_v60  ;;  %5435 = vmatmul.mubr.bf16.gmra.mrb[176].mxu1 %v7682_v5  ;;  %v7713_v60 = vcombine.high %v825_v15, %v833_v30  ;;  %v7715_v5 = vcombine.high %v826_v10, %v834_v13  ;;  %v8566_v15 = vld [vmem:[%s10481_s1 + $0x278] sm:$0xff]   ;;  %v857_v30 = vld [vmem:[%s8737_s28 + $0x810] sm:$0xff] }
 0x1b0   : > { %5153 = vmatprep.mubr.bf16.mxu0 %v7697_v17  ;;  %5442 = vmatprep.mubr.bf16.mxu1 %v7699_v23  ;;  %v841_v17 = vld [vmem:[%s8737_s28 + $0x790] sm:$0xff]  ;;  %v858_v10 = vld [vmem:[%s8737_s28 + $0x818] sm:$0xff] }
 0x1b1   : > { %v866_v13 = vld [vmem:[%s8737_s28 + $0x858] sm:$0xff]  ;;  %5626 = vmatpush1.bf16.msra.mxu0 %v8566_v15  ;;  %v881_v15 = vld [vmem:[%s8737_s28 + $0x8d0] sm:$0xff] }
 0x1b2   : > { %v4617_v31 = vpop.f32.mrb[72].mxu0  ;;  %v4906_v35 = vpop.f32.mrb[72].mxu1  ;;  %6173 = vmatprep.subr.bf16.mxu0 %v10484_v1 }
 0x1b3   : > { %v4619_v41 = vpop.f32.mrb[73].mxu0  ;;  %v9340_v40 = vadd.f32 %v4906_v35, %v4617_v31  ;;  %v4908_v56 = vpop.f32.mrb[73].mxu1 }
 0x1b4   : > { %v4620_v58 = vpop.f32.mrb[74].mxu0  ;;  %v4909_v4 = vpop.f32.mrb[74].mxu1 }
 0x1b5   : > { %v4622_v14 = vpop.f32.mrb[75].mxu0  ;;  %v9342_v50 = vadd.f32 %v4909_v4, %v4620_v58  ;;  %v4911_v55 = vpop.f32.mrb[75].mxu1 }
 0x1b6   : > { %v865_v14 = vld [vmem:[%s8737_s28 + $0x850] sm:$0xff] }
 0x1b7   : > { %5154 = vmatmul.mubr.bf16.gmra.mrb[180].mxu0 %v7696_v46  ;;  %5443 = vmatmul.mubr.bf16.gmra.mrb[180].mxu1 %v7698_v59  ;;  %v7729_v46 = vcombine.high %v841_v17, %v849_v20  ;;  %v7731_v59 = vcombine.high %v842_v44, %v850_v45 }
 0x1b8   : > { %5161 = vmatprep.mubr.bf16.mxu0 %v7713_v60  ;;  %5450 = vmatprep.mubr.bf16.mxu1 %v7715_v5 }
 0x1ba   : > { %v4625_v22 = vpop.f32.mrb[76].mxu0  ;;  %v4914_v23 = vpop.f32.mrb[76].mxu1 }
 0x1bb   : > { %v4627_v29 = vpop.f32.mrb[77].mxu0  ;;  %v9349_v31 = vadd.f32 %v4914_v23, %v4625_v22  ;;  %v4916_v35 = vpop.f32.mrb[77].mxu1  ;;  %v7728_v23 = vcombine.low %v841_v17, %v849_v20 }
 0x1bc   : > { %v4628_v41 = vpop.f32.mrb[78].mxu0  ;;  %v4917_v56 = vpop.f32.mrb[78].mxu1  ;;  %v8567_v29 = vld [vmem:[%s10481_s1 + $0x2f8] sm:$0xff]  }
 0x1bd   : > { %v4630_v58 = vpop.f32.mrb[79].mxu0  ;;  %v9351_v60 = vadd.f32 %v4917_v56, %v4628_v41  ;;  %v4919_v4 = vpop.f32.mrb[79].mxu1  ;;  %5915 = vmatpush1.bf16.msra.mxu1 %v8567_v29 }
 0x1be   : > { %6462 = vmatprep.subr.bf16.mxu1 %v10484_v1  ;;  %v873_v4 = vld [vmem:[%s8737_s28 + $0x890] sm:$0xff] }
 0x1bf   : > { %5162 = vmatmul.mubr.bf16.gmra.mrb[184].mxu0 %v7712_v8  ;;  %5451 = vmatmul.mubr.bf16.gmra.mrb[184].mxu1 %v7714_v48  ;;  %v7730_v48 = vcombine.low %v842_v44, %v850_v45  ;;  %v874_v44 = vld [vmem:[%s8737_s28 + $0x898] sm:$0xff] }
 0x1c0   : > { %5169 = vmatprep.mubr.bf16.mxu0 %v7729_v46  ;;  %5458 = vmatprep.mubr.bf16.mxu1 %v7731_v59  ;;  %v7745_v46 = vcombine.high %v857_v30, %v865_v14  ;;  %v7747_v59 = vcombine.high %v858_v10, %v866_v13  ;;  %v882_v45 = vld [vmem:[%s8737_s28 + $0x8d8] sm:$0xff] }
 0x1c2   : > { %v4633_v5 = vpop.f32.mrb[80].mxu0  ;;  %v4922_v55 = vpop.f32.mrb[80].mxu1 }
 0x1c3   : > { %v4635_v22 = vpop.f32.mrb[81].mxu0  ;;  %v9364_v8 = vadd.f32 %v4922_v55, %v4633_v5  ;;  %v4924_v35 = vpop.f32.mrb[81].mxu1 }
 0x1c4   : > { %v4636_v41 = vpop.f32.mrb[82].mxu0  ;;  %v4925_v56 = vpop.f32.mrb[82].mxu1  ;;  %v7744_v35 = vcombine.low %v857_v30, %v865_v14  ;;  %v889_v30 = vld [vmem:[%s8737_s28 + $0x910] sm:$0xff] }
 0x1c5   : > { %v4638_v58 = vpop.f32.mrb[83].mxu0  ;;  %v9366_v17 = vadd.f32 %v4925_v56, %v4636_v41  ;;  %v4927_v20 = vpop.f32.mrb[83].mxu1  ;;  %v897_v14 = vld [vmem:[%s8737_s28 + $0x950] sm:$0xff] }
 0x1c7   : > { %10486 = vst [vmem:[#allocation3_spill] sm:$0xff] %v9366_v17  ;;  %5170 = vmatmul.mubr.bf16.gmra.mrb[188].mxu0 %v7728_v23  ;;  %5459 = vmatmul.mubr.bf16.gmra.mrb[188].mxu1 %v7730_v48  ;;  %v7746_v23 = vcombine.low %v858_v10, %v866_v13  ;;  %v7761_v48 = vcombine.high %v873_v4, %v881_v15 }
 0x1c8   : > { %5177 = vmatprep.mubr.bf16.mxu0 %v7745_v46  ;;  %5466 = vmatprep.mubr.bf16.mxu1 %v7747_v59  ;;  %v7763_v59 = vcombine.high %v874_v44, %v882_v45  ;;  %v7760_v10 = vcombine.low %v873_v4, %v881_v15  ;;  %v905_v4 = vld [vmem:[%s8737_s28 + $0x990] sm:$0xff] }
 0x1c9   : > { %v913_v15 = vld [vmem:[%s8737_s28 + $0x9d0] sm:$0xff] }
 0x1ca   : > { %v4641_v5 = vpop.f32.mrb[84].mxu0  ;;  %v4930_v55 = vpop.f32.mrb[84].mxu1 }
 0x1cb   : > { %v4643_v22 = vpop.f32.mrb[85].mxu0  ;;  %v9373_v29 = vadd.f32 %v4930_v55, %v4641_v5  ;;  %v4932_v41 = vpop.f32.mrb[85].mxu1  ;;  %v890_v55 = vld [vmem:[%s8737_s28 + $0x918] sm:$0xff] }
 0x1cc   : > { %v4644_v56 = vpop.f32.mrb[86].mxu0  ;;  %v4933_v46 = vpop.f32.mrb[86].mxu1  ;;  %v898_v22 = vld [vmem:[%s8737_s28 + $0x958] sm:$0xff] }
 0x1cd   : > { %10487 = vst [vmem:[#allocation4_spill] sm:$0xff] %v9373_v29  ;;  %v4646_v58 = vpop.f32.mrb[87].mxu0  ;;  %v9375_v20 = vadd.f32 %v4933_v46, %v4644_v56  ;;  %v4935_v1 = vpop.f32.mrb[87].mxu1  ;;  %v7779_v46 = vcombine.high %v890_v55, %v898_v22 }
 0x1ce   : > { %v7762_v1 = vcombine.low %v874_v44, %v882_v45  ;;  %v7776_v44 = vcombine.low %v889_v30, %v897_v14 }
 0x1cf   : > { %10488 = vst [vmem:[#allocation5_spill] sm:$0xff] %v9375_v20  ;;  %5178 = vmatmul.mubr.bf16.gmra.mrb[192].mxu0 %v7744_v35  ;;  %5467 = vmatmul.mubr.bf16.gmra.mrb[192].mxu1 %v7746_v23  ;;  %v7777_v35 = vcombine.high %v889_v30, %v897_v14  ;;  %v921_v30 = vld [vmem:[%s8737_s28 + $0xa10] sm:$0xff] }
 0x1d0   : > { %5185 = vmatprep.mubr.bf16.mxu0 %v7761_v48  ;;  %5474 = vmatprep.mubr.bf16.mxu1 %v7763_v59  ;;  %v929_v14 = vld [vmem:[%s8737_s28 + $0xa50] sm:$0xff] }
 0x1d2   : > { %v4649_v5 = vpop.f32.mrb[88].mxu0  ;;  %v4938_v41 = vpop.f32.mrb[88].mxu1 }
 0x1d3   : > { %v4651_v29 = vpop.f32.mrb[89].mxu0  ;;  %v9381_v13 = vadd.f32 %v4938_v41, %v4649_v5  ;;  %v4940_v58 = vpop.f32.mrb[89].mxu1  ;;  %v906_v5 = vld [vmem:[%s8737_s28 + $0x998] sm:$0xff] }
 0x1d4   : > { %v4652_v56 = vpop.f32.mrb[90].mxu0  ;;  %v4941_v23 = vpop.f32.mrb[90].mxu1  ;;  %v914_v41 = vld [vmem:[%s8737_s28 + $0x9d8] sm:$0xff] }
 0x1d5   : > { %10489 = vst [vmem:[#allocation6_spill] sm:$0xff] %v9381_v13  ;;  %v4654_v48 = vpop.f32.mrb[91].mxu0  ;;  %v9383_v59 = vadd.f32 %v4941_v23, %v4652_v56  ;;  %v4943_v20 = vpop.f32.mrb[91].mxu1  ;;  %v7795_v23 = vcombine.high %v906_v5, %v914_v41 }
 0x1d6   : > { %v7778_v20 = vcombine.low %v890_v55, %v898_v22  ;;  %v7792_v55 = vcombine.low %v905_v4, %v913_v15 }
 0x1d7   : > { %10490 = vst [vmem:[#allocation7_spill] sm:$0xff] %v9383_v59  ;;  %5186 = vmatmul.mubr.bf16.gmra.mrb[196].mxu0 %v7760_v10  ;;  %5475 = vmatmul.mubr.bf16.gmra.mrb[196].mxu1 %v7762_v1  ;;  %v7793_v10 = vcombine.high %v905_v4, %v913_v15  ;;  %v937_v4 = vld [vmem:[%s8737_s28 + $0xa90] sm:$0xff] }
 0x1d8   : > { %5193 = vmatprep.mubr.bf16.mxu0 %v7777_v35  ;;  %5482 = vmatprep.mubr.bf16.mxu1 %v7779_v46  ;;  %v945_v15 = vld [vmem:[%s8737_s28 + $0xad0] sm:$0xff] }
 0x1da   : > { %v4657_v29 = vpop.f32.mrb[92].mxu0  ;;  %v4946_v58 = vpop.f32.mrb[92].mxu1 }
 0x1db   : > { %v4659_v13 = vpop.f32.mrb[93].mxu0  ;;  %v9389_v45 = vadd.f32 %v4946_v58, %v4657_v29  ;;  %v4948_v48 = vpop.f32.mrb[93].mxu1  ;;  %v922_v29 = vld [vmem:[%s8737_s28 + $0xa18] sm:$0xff] }
 0x1dc   : > { %v4660_v56 = vpop.f32.mrb[94].mxu0  ;;  %v4949_v1 = vpop.f32.mrb[94].mxu1  ;;  %v930_v58 = vld [vmem:[%s8737_s28 + $0xa58] sm:$0xff] }
 0x1dd   : > { %10491 = vst [vmem:[#allocation8_spill] sm:$0xff] %v9389_v45  ;;  %v4662_v35 = vpop.f32.mrb[95].mxu0  ;;  %v9391_v46 = vadd.f32 %v4949_v1, %v4660_v56  ;;  %v4951_v59 = vpop.f32.mrb[95].mxu1  ;;  %v7811_v1 = vcombine.high %v922_v29, %v930_v58 }
 0x1de   : > { %v7794_v59 = vcombine.low %v906_v5, %v914_v41  ;;  %v7808_v5 = vcombine.low %v921_v30, %v929_v14 }
 0x1df   : > { %10492 = vst [vmem:[#allocation9_spill] sm:$0xff] %v9391_v46  ;;  %5194 = vmatmul.mubr.bf16.gmra.mrb[200].mxu0 %v7776_v44  ;;  %5483 = vmatmul.mubr.bf16.gmra.mrb[200].mxu1 %v7778_v20  ;;  %v7809_v44 = vcombine.high %v921_v30, %v929_v14  ;;  %v953_v30 = vld [vmem:[%s8737_s28 + $0xb10] sm:$0xff] }
 0x1e0   : > { %5201 = vmatprep.mubr.bf16.mxu0 %v7793_v10  ;;  %5490 = vmatprep.mubr.bf16.mxu1 %v7795_v23  ;;  %v961_v14 = vld [vmem:[%s8737_s28 + $0xb50] sm:$0xff] }
 0x1e2   : > { %v4665_v13 = vpop.f32.mrb[96].mxu0  ;;  %v4954_v48 = vpop.f32.mrb[96].mxu1 }
 0x1e3   : > { %v4667_v45 = vpop.f32.mrb[97].mxu0  ;;  %v9397_v22 = vadd.f32 %v4954_v48, %v4665_v13  ;;  %v4956_v35 = vpop.f32.mrb[97].mxu1  ;;  %v938_v13 = vld [vmem:[%s8737_s28 + $0xa98] sm:$0xff] }
 0x1e4   : > { %v4668_v56 = vpop.f32.mrb[98].mxu0  ;;  %v4957_v20 = vpop.f32.mrb[98].mxu1  ;;  %v946_v48 = vld [vmem:[%s8737_s28 + $0xad8] sm:$0xff] }
 0x1e5   : > { %10493 = vst [vmem:[#allocation10_spill] sm:$0xff] %v9397_v22  ;;  %v4670_v10 = vpop.f32.mrb[99].mxu0  ;;  %v9399_v23 = vadd.f32 %v4957_v20, %v4668_v56  ;;  %v4959_v46 = vpop.f32.mrb[99].mxu1  ;;  %v7827_v20 = vcombine.high %v938_v13, %v946_v48 }
 0x1e6   : > { %v7810_v46 = vcombine.low %v922_v29, %v930_v58  ;;  %v7824_v29 = vcombine.low %v937_v4, %v945_v15 }
 0x1e7   : > { %10494 = vst [vmem:[#allocation11_spill] sm:$0xff] %v9399_v23  ;;  %5202 = vmatmul.mubr.bf16.gmra.mrb[204].mxu0 %v7792_v55  ;;  %5491 = vmatmul.mubr.bf16.gmra.mrb[204].mxu1 %v7794_v59  ;;  %v7825_v55 = vcombine.high %v937_v4, %v945_v15  ;;  %v969_v4 = vld [vmem:[%s8737_s28 + $0xb90] sm:$0xff] }
 0x1e8   : > { %5209 = vmatprep.mubr.bf16.mxu0 %v7809_v44  ;;  %5498 = vmatprep.mubr.bf16.mxu1 %v7811_v1  ;;  %v977_v15 = vld [vmem:[%s8737_s28 + $0xbd0] sm:$0xff] }
 0x1ea   : > { %v4673_v45 = vpop.f32.mrb[100].mxu0  ;;  %v4962_v35 = vpop.f32.mrb[100].mxu1 }
 0x1eb   : > { %v4675_v22 = vpop.f32.mrb[101].mxu0  ;;  %v9405_v41 = vadd.f32 %v4962_v35, %v4673_v45  ;;  %v4964_v10 = vpop.f32.mrb[101].mxu1  ;;  %v954_v45 = vld [vmem:[%s8737_s28 + $0xb18] sm:$0xff] }
 0x1ec   : > { %v4676_v56 = vpop.f32.mrb[102].mxu0  ;;  %v4965_v59 = vpop.f32.mrb[102].mxu1  ;;  %v962_v35 = vld [vmem:[%s8737_s28 + $0xb58] sm:$0xff] }
 0x1ed   : > { %10495 = vst [vmem:[#allocation12_spill] sm:$0xff] %v9405_v41  ;;  %v4678_v44 = vpop.f32.mrb[103].mxu0  ;;  %v9407_v1 = vadd.f32 %v4965_v59, %v4676_v56  ;;  %v4967_v23 = vpop.f32.mrb[103].mxu1  ;;  %v7843_v59 = vcombine.high %v954_v45, %v962_v35 }
 0x1ee   : > { %v7826_v23 = vcombine.low %v938_v13, %v946_v48  ;;  %v7840_v13 = vcombine.low %v953_v30, %v961_v14 }
 0x1ef   : > { %10496 = vst [vmem:[#allocation13_spill] sm:$0xff] %v9407_v1  ;;  %5210 = vmatmul.mubr.bf16.gmra.mrb[208].mxu0 %v7808_v5  ;;  %5499 = vmatmul.mubr.bf16.gmra.mrb[208].mxu1 %v7810_v46  ;;  %v7841_v5 = vcombine.high %v953_v30, %v961_v14  ;;  %v985_v30 = vld [vmem:[%s8737_s28 + $0xc10] sm:$0xff] }
 0x1f0   : > { %5217 = vmatprep.mubr.bf16.mxu0 %v7825_v55  ;;  %5506 = vmatprep.mubr.bf16.mxu1 %v7827_v20  ;;  %v993_v14 = vld [vmem:[%s8737_s28 + $0xc50] sm:$0xff] }
 0x1f2   : > { %v4681_v22 = vpop.f32.mrb[104].mxu0  ;;  %v4970_v10 = vpop.f32.mrb[104].mxu1 }
 0x1f3   : > { %v4683_v41 = vpop.f32.mrb[105].mxu0  ;;  %v9413_v58 = vadd.f32 %v4970_v10, %v4681_v22  ;;  %v4972_v44 = vpop.f32.mrb[105].mxu1  ;;  %v970_v22 = vld [vmem:[%s8737_s28 + $0xb98] sm:$0xff] }
 0x1f4   : > { %v4684_v56 = vpop.f32.mrb[106].mxu0  ;;  %v4973_v46 = vpop.f32.mrb[106].mxu1  ;;  %v978_v10 = vld [vmem:[%s8737_s28 + $0xbd8] sm:$0xff] }
 0x1f5   : > { %10497 = vst [vmem:[#allocation14_spill] sm:$0xff] %v9413_v58  ;;  %v4686_v55 = vpop.f32.mrb[107].mxu0  ;;  %v9415_v20 = vadd.f32 %v4973_v46, %v4684_v56  ;;  %v4975_v1 = vpop.f32.mrb[107].mxu1  ;;  %v7859_v46 = vcombine.high %v970_v22, %v978_v10 }
 0x1f6   : > { %v7842_v1 = vcombine.low %v954_v45, %v962_v35  ;;  %v7856_v45 = vcombine.low %v969_v4, %v977_v15 }
 0x1f7   : > { %10498 = vst [vmem:[#allocation15_spill] sm:$0xff] %v9415_v20  ;;  %5218 = vmatmul.mubr.bf16.gmra.mrb[212].mxu0 %v7824_v29  ;;  %5507 = vmatmul.mubr.bf16.gmra.mrb[212].mxu1 %v7826_v23  ;;  %v7857_v29 = vcombine.high %v969_v4, %v977_v15  ;;  %v1001_v4 = vld [vmem:[%s8737_s28 + $0xc90] sm:$0xff] }
 0x1f8   : > { %5225 = vmatprep.mubr.bf16.mxu0 %v7841_v5  ;;  %5514 = vmatprep.mubr.bf16.mxu1 %v7843_v59  ;;  %v1009_v15 = vld [vmem:[%s8737_s28 + $0xcd0] sm:$0xff] }
 0x1fa   : > { %v4689_v41 = vpop.f32.mrb[108].mxu0  ;;  %v4978_v44 = vpop.f32.mrb[108].mxu1 }
 0x1fb   : > { %v4691_v58 = vpop.f32.mrb[109].mxu0  ;;  %v9421_v48 = vadd.f32 %v4978_v44, %v4689_v41  ;;  %v4980_v55 = vpop.f32.mrb[109].mxu1  ;;  %v986_v41 = vld [vmem:[%s8737_s28 + $0xc18] sm:$0xff] }
 0x1fc   : > { %v4692_v56 = vpop.f32.mrb[110].mxu0  ;;  %v4981_v23 = vpop.f32.mrb[110].mxu1  ;;  %v994_v44 = vld [vmem:[%s8737_s28 + $0xc58] sm:$0xff] }
 0x1fd   : > { %10499 = vst [vmem:[#allocation16_spill] sm:$0xff] %v9421_v48  ;;  %v4694_v5 = vpop.f32.mrb[111].mxu0  ;;  %v9423_v59 = vadd.f32 %v4981_v23, %v4692_v56  ;;  %v4983_v20 = vpop.f32.mrb[111].mxu1  ;;  %v7875_v23 = vcombine.high %v986_v41, %v994_v44 }
 0x1fe   : > { %v7858_v20 = vcombine.low %v970_v22, %v978_v10  ;;  %v7872_v22 = vcombine.low %v985_v30, %v993_v14 }
 0x1ff   : > { %10500 = vst [vmem:[#allocation17_spill] sm:$0xff] %v9423_v59  ;;  %5226 = vmatmul.mubr.bf16.gmra.mrb[216].mxu0 %v7840_v13  ;;  %5515 = vmatmul.mubr.bf16.gmra.mrb[216].mxu1 %v7842_v1  ;;  %v7873_v13 = vcombine.high %v985_v30, %v993_v14  ;;  %v1017_v30 = vld [vmem:[%s8737_s28 + $0xd10] sm:$0xff] }
 0x200   : > { %5233 = vmatprep.mubr.bf16.mxu0 %v7857_v29  ;;  %5522 = vmatprep.mubr.bf16.mxu1 %v7859_v46  ;;  %v1025_v14 = vld [vmem:[%s8737_s28 + $0xd50] sm:$0xff] }
 0x202   : > { %v4697_v58 = vpop.f32.mrb[112].mxu0  ;;  %v4986_v55 = vpop.f32.mrb[112].mxu1 }
 0x203   : > { %v4699_v48 = vpop.f32.mrb[113].mxu0  ;;  %v9429_v35 = vadd.f32 %v4986_v55, %v4697_v58  ;;  %v4988_v5 = vpop.f32.mrb[113].mxu1  ;;  %v1002_v58 = vld [vmem:[%s8737_s28 + $0xc98] sm:$0xff] }
 0x204   : > { %v4700_v56 = vpop.f32.mrb[114].mxu0  ;;  %v4989_v1 = vpop.f32.mrb[114].mxu1  ;;  %v1010_v55 = vld [vmem:[%s8737_s28 + $0xcd8] sm:$0xff] }
 0x205   : > { %10501 = vst [vmem:[#allocation18_spill] sm:$0xff] %v9429_v35  ;;  %v4702_v29 = vpop.f32.mrb[115].mxu0  ;;  %v9431_v46 = vadd.f32 %v4989_v1, %v4700_v56  ;;  %v4991_v59 = vpop.f32.mrb[115].mxu1  ;;  %v7891_v1 = vcombine.high %v1002_v58, %v1010_v55 }
 0x206   : > { %v7874_v59 = vcombine.low %v986_v41, %v994_v44  ;;  %v7888_v41 = vcombine.low %v1001_v4, %v1009_v15 }
 0x207   : > { %10502 = vst [vmem:[#allocation19_spill] sm:$0xff] %v9431_v46  ;;  %5234 = vmatmul.mubr.bf16.gmra.mrb[220].mxu0 %v7856_v45  ;;  %5523 = vmatmul.mubr.bf16.gmra.mrb[220].mxu1 %v7858_v20  ;;  %v7889_v45 = vcombine.high %v1001_v4, %v1009_v15  ;;  %v1033_v4 = vld [vmem:[%s8737_s28 + $0xd90] sm:$0xff] }
 0x208   : > { %5241 = vmatprep.mubr.bf16.mxu0 %v7873_v13  ;;  %5530 = vmatprep.mubr.bf16.mxu1 %v7875_v23  ;;  %v1041_v15 = vld [vmem:[%s8737_s28 + $0xdd0] sm:$0xff] }
 0x20a   : > { %v4705_v48 = vpop.f32.mrb[116].mxu0  ;;  %v4994_v5 = vpop.f32.mrb[116].mxu1 }
 0x20b   : > { %v4707_v35 = vpop.f32.mrb[117].mxu0  ;;  %v9437_v10 = vadd.f32 %v4994_v5, %v4705_v48  ;;  %v4996_v29 = vpop.f32.mrb[117].mxu1  ;;  %v1018_v48 = vld [vmem:[%s8737_s28 + $0xd18] sm:$0xff] }
 0x20c   : > { %v4708_v56 = vpop.f32.mrb[118].mxu0  ;;  %v4997_v20 = vpop.f32.mrb[118].mxu1  ;;  %v1026_v5 = vld [vmem:[%s8737_s28 + $0xd58] sm:$0xff] }
 0x20d   : > { %10503 = vst [vmem:[#allocation20_spill] sm:$0xff] %v9437_v10  ;;  %v4710_v13 = vpop.f32.mrb[119].mxu0  ;;  %v9439_v23 = vadd.f32 %v4997_v20, %v4708_v56  ;;  %v4999_v46 = vpop.f32.mrb[119].mxu1  ;;  %v7907_v20 = vcombine.high %v1018_v48, %v1026_v5 }
 0x20e   : > { %v7890_v46 = vcombine.low %v1002_v58, %v1010_v55  ;;  %v7904_v58 = vcombine.low %v1017_v30, %v1025_v14 }
 0x20f   : > { %10504 = vst [vmem:[#allocation21_spill] sm:$0xff] %v9439_v23  ;;  %5242 = vmatmul.mubr.bf16.gmra.mrb[224].mxu0 %v7872_v22  ;;  %5531 = vmatmul.mubr.bf16.gmra.mrb[224].mxu1 %v7874_v59  ;;  %v7905_v22 = vcombine.high %v1017_v30, %v1025_v14  ;;  %v1049_v30 = vld [vmem:[%s8737_s28 + $0xe10] sm:$0xff] }
 0x210   : > { %5249 = vmatprep.mubr.bf16.mxu0 %v7889_v45  ;;  %5538 = vmatprep.mubr.bf16.mxu1 %v7891_v1  ;;  %v1057_v14 = vld [vmem:[%s8737_s28 + $0xe50] sm:$0xff] }
 0x212   : > { %v4713_v35 = vpop.f32.mrb[120].mxu0  ;;  %v5002_v29 = vpop.f32.mrb[120].mxu1 }
 0x213   : > { %v4715_v10 = vpop.f32.mrb[121].mxu0  ;;  %v9445_v44 = vadd.f32 %v5002_v29, %v4713_v35  ;;  %v5004_v13 = vpop.f32.mrb[121].mxu1  ;;  %v1034_v35 = vld [vmem:[%s8737_s28 + $0xd98] sm:$0xff] }
 0x214   : > { %v4716_v56 = vpop.f32.mrb[122].mxu0  ;;  %v5005_v59 = vpop.f32.mrb[122].mxu1  ;;  %v1042_v29 = vld [vmem:[%s8737_s28 + $0xdd8] sm:$0xff] }
 0x215   : > { %10505 = vst [vmem:[#allocation22_spill] sm:$0xff] %v9445_v44  ;;  %v4718_v45 = vpop.f32.mrb[123].mxu0  ;;  %v9447_v1 = vadd.f32 %v5005_v59, %v4716_v56  ;;  %v5007_v23 = vpop.f32.mrb[123].mxu1  ;;  %v7923_v59 = vcombine.high %v1034_v35, %v1042_v29 }
 0x216   : > { %v7906_v23 = vcombine.low %v1018_v48, %v1026_v5  ;;  %v7920_v5 = vcombine.low %v1033_v4, %v1041_v15 }
 0x217   : > { %10506 = vst [vmem:[#allocation23_spill] sm:$0xff] %v9447_v1  ;;  %5250 = vmatmul.mubr.bf16.gmra.mrb[228].mxu0 %v7888_v41  ;;  %5539 = vmatmul.mubr.bf16.gmra.mrb[228].mxu1 %v7890_v46  ;;  %v7921_v41 = vcombine.high %v1033_v4, %v1041_v15  ;;  %v1065_v4 = vld [vmem:[%s8737_s28 + $0xe90] sm:$0xff] }
 0x218   : > { %5257 = vmatprep.mubr.bf16.mxu0 %v7905_v22  ;;  %5546 = vmatprep.mubr.bf16.mxu1 %v7907_v20  ;;  %v1073_v15 = vld [vmem:[%s8737_s28 + $0xed0] sm:$0xff] }
 0x21a   : > { %v4721_v10 = vpop.f32.mrb[124].mxu0  ;;  %v5010_v13 = vpop.f32.mrb[124].mxu1 }
 0x21b   : > { %v4723_v44 = vpop.f32.mrb[125].mxu0  ;;  %v9453_v55 = vadd.f32 %v5010_v13, %v4721_v10  ;;  %v5012_v45 = vpop.f32.mrb[125].mxu1  ;;  %v1050_v10 = vld [vmem:[%s8737_s28 + $0xe18] sm:$0xff] }
 0x21c   : > { %v4724_v56 = vpop.f32.mrb[126].mxu0  ;;  %v5013_v46 = vpop.f32.mrb[126].mxu1  ;;  %v1058_v13 = vld [vmem:[%s8737_s28 + $0xe58] sm:$0xff] }
 0x21d   : > { %10507 = vst [vmem:[#allocation24_spill] sm:$0xff] %v9453_v55  ;;  %v4726_v22 = vpop.f32.mrb[127].mxu0  ;;  %v9455_v20 = vadd.f32 %v5013_v46, %v4724_v56  ;;  %v5015_v1 = vpop.f32.mrb[127].mxu1  ;;  %v7922_v46 = vcombine.low %v1034_v35, %v1042_v29  ;;  %v1066_v29 = vld [vmem:[%s8737_s28 + $0xe98] sm:$0xff] }
 0x21e   : > { %v7937_v1 = vcombine.high %v1049_v30, %v1057_v14 }
 0x21f   : > { %10508 = vst [vmem:[#allocation25_spill] sm:$0xff] %v9455_v20  ;;  %5258 = vmatmul.mubr.bf16.gmra.mrb[232].mxu0 %v7904_v58  ;;  %5547 = vmatmul.mubr.bf16.gmra.mrb[232].mxu1 %v7906_v23 }
 0x220   : > { %5265 = vmatprep.mubr.bf16.mxu0 %v7921_v41  ;;  %5554 = vmatprep.mubr.bf16.mxu1 %v7923_v59  ;;  %v7939_v59 = vcombine.high %v1050_v10, %v1058_v13 }
 0x222   : > { %v5051_v44 = vpop.f32.mrb[128].mxu0  ;;  %v5340_v55 = vpop.f32.mrb[128].mxu1 }
 0x223   : > { %v5052_v45 = vadd.f32 %v5051_v44, %v9065_v43  ;;  %v5053_v48 = vpop.f32.mrb[129].mxu0  ;;  %v5342_v22 = vpop.f32.mrb[129].mxu1  ;;  %v1074_v44 = vld [vmem:[%s8737_s28 + $0xed8] sm:$0xff] }
 0x224   : > { %v5054_v56 = vpop.f32.mrb[130].mxu0  ;;  %v5343_v23 = vpop.f32.mrb[130].mxu1 }
 0x225   : > { %v5055_v58 = vadd.f32 %v5054_v56, %v9067_v51  ;;  %v5056_v41 = vpop.f32.mrb[131].mxu0  ;;  %v9463_v20 = vadd.f32 %v5340_v55, %v5052_v45  ;;  %v5345_v17 = vpop.f32.mrb[131].mxu1  ;;  %v7936_v56 = vcombine.low %v1049_v30, %v1057_v14  ;;  %v7938_v45 = vcombine.low %v1050_v10, %v1058_v13  ;;  %v1081_v30 = vld [vmem:[%s8737_s28 + $0xf10] sm:$0xff]  ;;  %v1082_v13 = vld [vmem:[%s8737_s28 + $0xf18] sm:$0xff] }
 0x226   : > { %v1089_v14 = vld [vmem:[%s8737_s28 + $0xf50] sm:$0xff] }
 0x227   : > { %5266 = vmatmul.mubr.bf16.gmra.mrb[236].mxu0 %v7920_v5  ;;  %v9465_v43 = vadd.f32 %v5343_v23, %v5055_v58  ;;  %5555 = vmatmul.mubr.bf16.gmra.mrb[236].mxu1 %v7922_v46  ;;  %v7953_v5 = vcombine.high %v1065_v4, %v1073_v15  ;;  %v7955_v23 = vcombine.high %v1066_v29, %v1074_v44 }
 0x228   : > { %5273 = vmatprep.mubr.bf16.mxu0 %v7937_v1  ;;  %5562 = vmatprep.mubr.bf16.mxu1 %v7939_v59 }
 0x22a   : > { %v5059_v35 = vpop.f32.mrb[132].mxu0  ;;  %v5348_v51 = vpop.f32.mrb[132].mxu1 }
 0x22b   : > { %v5060_v48 = vadd.f32 %v5059_v35, %v9073_v61  ;;  %v5061_v22 = vpop.f32.mrb[133].mxu0  ;;  %v5350_v55 = vpop.f32.mrb[133].mxu1  ;;  %v1090_v35 = vld [vmem:[%s8737_s28 + $0xf58] sm:$0xff] }
 0x22c   : > { %v5062_v17 = vpop.f32.mrb[134].mxu0  ;;  %v5351_v1 = vpop.f32.mrb[134].mxu1 }
 0x22d   : > { %v5063_v46 = vadd.f32 %v5062_v17, %v9075_v6  ;;  %v5064_v58 = vpop.f32.mrb[135].mxu0  ;;  %v9473_v41 = vadd.f32 %v5348_v51, %v5060_v48  ;;  %v5353_v59 = vpop.f32.mrb[135].mxu1  ;;  %v7952_v17 = vcombine.low %v1065_v4, %v1073_v15  ;;  %v1097_v4 = vld [vmem:[%s8737_s28 + $0xf90] sm:$0xff] }
 0x22e   : > { %v7971_v58 = vcombine.high %v1082_v13, %v1090_v35  ;;  %v1105_v15 = vld [vmem:[%s8737_s28 + $0xfd0] sm:$0xff] }
 0x22f   : > { %5274 = vmatmul.mubr.bf16.gmra.mrb[240].mxu0 %v7936_v56  ;;  %v9475_v61 = vadd.f32 %v5351_v1, %v5063_v46  ;;  %5563 = vmatmul.mubr.bf16.gmra.mrb[240].mxu1 %v7938_v45  ;;  %v7954_v56 = vcombine.low %v1066_v29, %v1074_v44  ;;  %v7969_v46 = vcombine.high %v1081_v30, %v1089_v14  ;;  %v1098_v44 = vld [vmem:[%s8737_s28 + $0xf98] sm:$0xff] }
 0x230   : > { %5281 = vmatprep.mubr.bf16.mxu0 %v7953_v5  ;;  %5570 = vmatprep.mubr.bf16.mxu1 %v7955_v23 }
 0x232   : > { %v5067_v10 = vpop.f32.mrb[136].mxu0  ;;  %v5356_v6 = vpop.f32.mrb[136].mxu1 }
 0x233   : > { %v5068_v22 = vadd.f32 %v5067_v10, %v9081_v16  ;;  %v5069_v55 = vpop.f32.mrb[137].mxu0  ;;  %v5358_v48 = vpop.f32.mrb[137].mxu1  ;;  %v1106_v10 = vld [vmem:[%s8737_s28 + $0xfd8] sm:$0xff] }
 0x234   : > { %v5070_v51 = vpop.f32.mrb[138].mxu0  ;;  %v5359_v5 = vpop.f32.mrb[138].mxu1 }
 0x235   : > { %v5071_v45 = vadd.f32 %v5070_v51, %v9083_v24  ;;  %v5072_v1 = vpop.f32.mrb[139].mxu0  ;;  %v9483_v23 = vadd.f32 %v5356_v6, %v5068_v22  ;;  %v5361_v59 = vpop.f32.mrb[139].mxu1  ;;  %v7968_v51 = vcombine.low %v1081_v30, %v1089_v14  ;;  %v603_v30 = vld [vmem:[%s8737_s28 + $0x20] sm:$0xff] }
 0x236   : > { %v7987_v1 = vcombine.high %v1098_v44, %v1106_v10  ;;  %v611_v14 = vld [vmem:[%s8737_s28 + $0x60] sm:$0xff] }
 0x237   : > { %5282 = vmatmul.mubr.bf16.gmra.mrb[244].mxu0 %v7952_v17  ;;  %v9485_v16 = vadd.f32 %v5359_v5, %v5071_v45  ;;  %5571 = vmatmul.mubr.bf16.gmra.mrb[244].mxu1 %v7954_v56  ;;  %v7970_v17 = vcombine.low %v1082_v13, %v1090_v35  ;;  %v7985_v45 = vcombine.high %v1097_v4, %v1105_v15  ;;  %v604_v35 = vld [vmem:[%s8737_s28 + $0x28] sm:$0xff] }
 0x238   : > { %5289 = vmatprep.mubr.bf16.mxu0 %v7969_v46  ;;  %5578 = vmatprep.mubr.bf16.mxu1 %v7971_v58 }
 0x23a   : > { %v5075_v29 = vpop.f32.mrb[140].mxu0  ;;  %v5364_v24 = vpop.f32.mrb[140].mxu1 }
 0x23b   : > { %v5076_v55 = vadd.f32 %v5075_v29, %v9089_v34  ;;  %v5077_v48 = vpop.f32.mrb[141].mxu0  ;;  %v5366_v22 = vpop.f32.mrb[141].mxu1  ;;  %v612_v29 = vld [vmem:[%s8737_s28 + $0x68] sm:$0xff] }
 0x23c   : > { %v5078_v6 = vpop.f32.mrb[142].mxu0  ;;  %v5367_v46 = vpop.f32.mrb[142].mxu1 }
 0x23d   : > { %v5079_v56 = vadd.f32 %v5078_v6, %v9091_v42  ;;  %v5080_v5 = vpop.f32.mrb[143].mxu0  ;;  %v9493_v58 = vadd.f32 %v5364_v24, %v5076_v55  ;;  %v5369_v59 = vpop.f32.mrb[143].mxu1  ;;  %v7984_v6 = vcombine.low %v1097_v4, %v1105_v15  ;;  %v7986_v24 = vcombine.low %v1098_v44, %v1106_v10  ;;  %v619_v15 = vld [vmem:[%s8737_s28 + $0xa0] sm:$0xff] }
 0x23e   : > { %v627_v44 = vld [vmem:[%s8737_s28 + $0xe0] sm:$0xff] }
 0x23f   : > { %5290 = vmatmul.mubr.bf16.gmra.mrb[248].mxu0 %v7968_v51  ;;  %v9495_v34 = vadd.f32 %v5367_v46, %v5079_v56  ;;  %5579 = vmatmul.mubr.bf16.gmra.mrb[248].mxu1 %v7970_v17  ;;  %v7493_v51 = vcombine.high %v603_v30, %v611_v14  ;;  %v7495_v46 = vcombine.high %v604_v35, %v612_v29 }
 0x240   : > { %5297 = vmatprep.mubr.bf16.mxu0 %v7985_v45  ;;  %5586 = vmatprep.mubr.bf16.mxu1 %v7987_v1 }
 0x242   : > { %v5083_v13 = vpop.f32.mrb[144].mxu0  ;;  %v5372_v42 = vpop.f32.mrb[144].mxu1 }
 0x243   : > { %v5084_v48 = vadd.f32 %v5083_v13, %v9097_v54  ;;  %v5085_v22 = vpop.f32.mrb[145].mxu0  ;;  %v5374_v5 = vpop.f32.mrb[145].mxu1 }
 0x244   : > { %v5086_v55 = vpop.f32.mrb[146].mxu0  ;;  %v5375_v45 = vpop.f32.mrb[146].mxu1  ;;  %v7492_v22 = vcombine.low %v603_v30, %v611_v14  ;;  %v620_v5 = vld [vmem:[%s8737_s28 + $0xa8] sm:$0xff]  ;;  %v7509_v30 = vcombine.high %v619_v15, %v627_v44 }
 0x245   : > { %v5087_v17 = vadd.f32 %v5086_v55, %v9099_v63  ;;  %v5088_v56 = vpop.f32.mrb[147].mxu0  ;;  %v9503_v1 = vadd.f32 %v5372_v42, %v5084_v48  ;;  %v5377_v59 = vpop.f32.mrb[147].mxu1  ;;  %v628_v55 = vld [vmem:[%s8737_s28 + $0xe8] sm:$0xff]  ;;  %v7494_v42 = vcombine.low %v604_v35, %v612_v29 }
 0x246   : > { %v7511_v29 = vcombine.high %v620_v5, %v628_v55  ;;  %v9530_v59 = vld [vmem:[%s8737_s28 + $0x160] sm:$0xff] }
 0x247   : > { %5298 = vmatmul.mubr.bf16.gmra.mrb[252].mxu0 %v7984_v6  ;;  %v9505_v54 = vadd.f32 %v5375_v45, %v5087_v17  ;;  %5587 = vmatmul.mubr.bf16.gmra.mrb[252].mxu1 %v7986_v24  ;;  %v8568_v6 = vld [vmem:[%s10481_s1 + $0x300] sm:$0xff]  }
 0x248   : > { %5627 = vmatprep.mubr.bf16.mxu0 %v7493_v51  ;;  %5916 = vmatprep.mubr.bf16.mxu1 %v7495_v46  ;;  %v9527_v46 = vld [vmem:[%s8737_s28 + $0x120] sm:$0xff] }
 0x24a   : > { %v5091_v4 = vpop.f32.mrb[148].mxu0  ;;  %v5380_v63 = vpop.f32.mrb[148].mxu1 }
 0x24b   : > { %v5092_v10 = vadd.f32 %v5091_v4, %v9105_v11  ;;  %v5093_v13 = vpop.f32.mrb[149].mxu0  ;;  %v5382_v56 = vpop.f32.mrb[149].mxu1  ;;  %v8569_v11 = vld [vmem:[%s10481_s1 + $0x380] sm:$0xff]   ;;  %v8571_v4 = vld [vmem:[%s10481_s1 + $0x388] sm:$0xff]  }
 0x24c   : > { %v5094_v48 = vpop.f32.mrb[150].mxu0  ;;  %v5383_v51 = vpop.f32.mrb[150].mxu1  ;;  %v644_v13 = vld [vmem:[%s8737_s28 + $0x168] sm:$0xff] }
 0x24d   : > { %v5095_v24 = vadd.f32 %v5094_v48, %v9113_v21  ;;  %v5096_v17 = vpop.f32.mrb[151].mxu0  ;;  %v9519_v14 = vadd.f32 %v5380_v63, %v5092_v10  ;;  %v5385_v35 = vpop.f32.mrb[151].mxu1  ;;  %v8570_v21 = vld [vmem:[%s10481_s1 + $0x308] sm:$0xff]  }
 0x24e   : > { %v636_v63 = vld [vmem:[%s8737_s28 + $0x128] sm:$0xff]  ;;  %v7510_v17 = vcombine.low %v620_v5, %v628_v55  ;;  %v9556_v55 = vld [vmem:[%s8737_s28 + $0x1a0] sm:$0xff] }
 0x24f   : > { %5628 = vmatmul.mubr.bf16.vlgmr.msra.gmra.mrb[0].mxu0 %v7492_v22  ;;  %v9521_v45 = vadd.f32 %v5383_v51, %v5095_v24  ;;  %5917 = vmatmul.mubr.bf16.vlgmr.msra.gmra.mrb[0].mxu1 %v7494_v42  ;;  %v10510_v22 = vmov 0  }
 0x250   : > { %6174 = vmatpush1.bf16.msra.mxu0 %v8568_v6  ;;  %6463 = vmatpush1.bf16.msra.mxu1 %v8569_v11  ;;  %v7508_v6 = vcombine.low %v619_v15, %v627_v44  ;;  %v7525_v11 = vcombine.high %v9527_v46, %v9530_v59 }
 0x251   : > { %10509 = vst [vmem:[#allocation26_spill] sm:$0xff] %v9521_v45  ;;  %5635 = vmatprep.mubr.bf16.mxu0 %v7509_v30  ;;  %5924 = vmatprep.mubr.bf16.mxu1 %v7511_v29  ;;  %v7527_v45 = vcombine.high %v636_v63, %v644_v13 }
 0x252   : > { %v5099_v10 = vpop.f32.mrb[152].mxu0  ;;  %6175 = vmatprep.subr.bf16.mxu0 %v10510_v22  ;;  %v5388_v48 = vpop.f32.mrb[152].mxu1  ;;  %6464 = vmatprep.subr.bf16.mxu1 %v10510_v22 }
 0x253   : > { %v5100_v56 = vadd.f32 %v5099_v10, %v9127_v36  ;;  %v5101_v42 = vpop.f32.mrb[153].mxu0  ;;  %v5390_v24 = vpop.f32.mrb[153].mxu1  ;;  %v8572_v36 = vld [vmem:[%s10481_s1 + $0x310] sm:$0xff]  }
 0x254   : > { %v5102_v51 = vpop.f32.mrb[154].mxu0  ;;  %6176 = vmatpush1.bf16.msra.mxu0 %v8570_v21  ;;  %v5391_v35 = vpop.f32.mrb[154].mxu1  ;;  %6465 = vmatpush1.bf16.msra.mxu1 %v8571_v4  ;;  %v9559_v21 = vld [vmem:[%s8737_s28 + $0x1e0] sm:$0xff]  ;;  %v8574_v4 = vld [vmem:[%s10481_s1 + $0x318] sm:$0xff]  }
 0x255   : > { %v5103_v30 = vadd.f32 %v5102_v51, %v9133_v47  ;;  %v5104_v29 = vpop.f32.mrb[155].mxu0  ;;  %6177 = vmatprep.subr.bf16.mxu0 %v10510_v22  ;;  %v9547_v15 = vadd.f32 %v5388_v48, %v5100_v56  ;;  %v5393_v44 = vpop.f32.mrb[155].mxu1  ;;  %6466 = vmatprep.subr.bf16.mxu1 %v10510_v22  ;;  %v8573_v47 = vld [vmem:[%s10481_s1 + $0x390] sm:$0xff]   ;;  %v9565_v56 = vld [vmem:[%s8737_s28 + $0x1a8] sm:$0xff]  ;;  %v7524_v51 = vcombine.low %v9527_v46, %v9530_v59  ;;  %v8576_v46 = vld [vmem:[%s10481_s1 + $0x320] sm:$0xff]  }
 0x256   : > { %v9568_v48 = vld [vmem:[%s8737_s28 + $0x1e8] sm:$0xff] }
 0x257   : > { %5636 = vmatmul.mubr.bf16.gmra.mrb[4].mxu0 %v7508_v6  ;;  %v9553_v5 = vadd.f32 %v5391_v35, %v5103_v30  ;;  %5925 = vmatmul.mubr.bf16.gmra.mrb[4].mxu1 %v7510_v17  ;;  %v7526_v30 = vcombine.low %v636_v63, %v644_v13  ;;  %v7541_v35 = vcombine.high %v9556_v55, %v9559_v21 }
 0x258   : > { %5643 = vmatprep.mubr.bf16.mxu0 %v7525_v11  ;;  %5932 = vmatprep.mubr.bf16.mxu1 %v7527_v45  ;;  %v8575_v45 = vld [vmem:[%s10481_s1 + $0x398] sm:$0xff]  }
 0x259   : > { %6178 = vmatpush1.bf16.msra.mxu0 %v8572_v36  ;;  %6467 = vmatpush1.bf16.msra.mxu1 %v8573_v47  ;;  %v9596_v47 = vld [vmem:[%s8737_s28 + $0x220] sm:$0xff] }
 0x25a   : > { %v5107_v10 = vpop.f32.mrb[156].mxu0  ;;  %6179 = vmatprep.subr.bf16.mxu0 %v10510_v22  ;;  %v5396_v6 = vpop.f32.mrb[156].mxu1  ;;  %6468 = vmatprep.subr.bf16.mxu1 %v10510_v22 }
 0x25b   : > { %v5108_v42 = vadd.f32 %v5107_v10, %v9153_v0  ;;  %v5109_v24 = vpop.f32.mrb[157].mxu0  ;;  %v5398_v17 = vpop.f32.mrb[157].mxu1  ;;  %v7543_v0 = vcombine.high %v9565_v56, %v9568_v48  ;;  %v8578_v10 = vld [vmem:[%s10481_s1 + $0x328] sm:$0xff]  }
 0x25c   : > { %v5110_v11 = vpop.f32.mrb[158].mxu0  ;;  %v5399_v36 = vpop.f32.mrb[158].mxu1  ;;  %v8579_v24 = vld [vmem:[%s10481_s1 + $0x3a8] sm:$0xff]  }
 0x25d   : > { %v5111_v29 = vadd.f32 %v5110_v11, %v9159_v12  ;;  %v5112_v44 = vpop.f32.mrb[159].mxu0  ;;  %6180 = vmatpush1.bf16.msra.mxu0 %v8574_v4  ;;  %v9586_v59 = vadd.f32 %v5396_v6, %v5108_v42  ;;  %v5401_v63 = vpop.f32.mrb[159].mxu1  ;;  %6469 = vmatpush1.bf16.msra.mxu1 %v8575_v45  ;;  %v8577_v12 = vld [vmem:[%s10481_s1 + $0x3a0] sm:$0xff]   ;;  %v9605_v42 = vld [vmem:[%s8737_s28 + $0x228] sm:$0xff] }
 0x25e   : > { %6181 = vmatprep.subr.bf16.mxu0 %v10510_v22  ;;  %6470 = vmatprep.subr.bf16.mxu1 %v10510_v22  ;;  %v9599_v4 = vld [vmem:[%s8737_s28 + $0x260] sm:$0xff]  ;;  %v9608_v6 = vld [vmem:[%s8737_s28 + $0x268] sm:$0xff] }
 0x25f   : > { %5644 = vmatmul.mubr.bf16.gmra.mrb[8].mxu0 %v7524_v51  ;;  %v9593_v13 = vadd.f32 %v5399_v36, %v5111_v29  ;;  %5933 = vmatmul.mubr.bf16.gmra.mrb[8].mxu1 %v7526_v30  ;;  %v7540_v30 = vcombine.low %v9556_v55, %v9559_v21  ;;  %v7542_v36 = vcombine.low %v9565_v56, %v9568_v48  ;;  %v8580_v55 = vld [vmem:[%s10481_s1 + $0x330] sm:$0xff]  }
 0x260   : > { %5651 = vmatprep.mubr.bf16.mxu0 %v7541_v35  ;;  %5940 = vmatprep.mubr.bf16.mxu1 %v7543_v0  ;;  %v7557_v44 = vcombine.high %v9596_v47, %v9599_v4  ;;  %v7559_v63 = vcombine.high %v9605_v42, %v9608_v6 }
 0x261   : > { %6182 = vmatpush1.bf16.msra.mxu0 %v8576_v46  ;;  %6471 = vmatpush1.bf16.msra.mxu1 %v8577_v12  ;;  %v9638_v12 = vld [vmem:[%s8737_s28 + $0x2a0] sm:$0xff] }
 0x262   : > { %v5115_v45 = vpop.f32.mrb[160].mxu0  ;;  %6183 = vmatprep.subr.bf16.mxu0 %v10510_v22  ;;  %v5404_v17 = vpop.f32.mrb[160].mxu1  ;;  %6472 = vmatprep.subr.bf16.mxu1 %v10510_v22 }
 0x263   : > { %v5116_v51 = vadd.f32 %v5115_v45, %v9181_v28  ;;  %v5117_v11 = vpop.f32.mrb[161].mxu0  ;;  %v5406_v35 = vpop.f32.mrb[161].mxu1  ;;  %v8582_v45 = vld [vmem:[%s10481_s1 + $0x338] sm:$0xff]  }
 0x264   : > { %v5118_v29 = vpop.f32.mrb[162].mxu0  ;;  %v5407_v46 = vpop.f32.mrb[162].mxu1  ;;  %v8583_v11 = vld [vmem:[%s10481_s1 + $0x3b8] sm:$0xff]  }
 0x265   : > { %v5119_v0 = vadd.f32 %v5118_v29, %v9187_v39  ;;  %v5120_v28 = vpop.f32.mrb[163].mxu0  ;;  %6184 = vmatpush1.bf16.msra.mxu0 %v8578_v10  ;;  %v9628_v21 = vadd.f32 %v5404_v17, %v5116_v51  ;;  %v5409_v56 = vpop.f32.mrb[163].mxu1  ;;  %6473 = vmatpush1.bf16.msra.mxu1 %v8579_v24  ;;  %v8581_v39 = vld [vmem:[%s10481_s1 + $0x3b0] sm:$0xff]   ;;  %v9641_v10 = vld [vmem:[%s8737_s28 + $0x2e0] sm:$0xff]  ;;  %v9647_v51 = vld [vmem:[%s8737_s28 + $0x2a8] sm:$0xff] }
 0x266   : > { %6185 = vmatprep.subr.bf16.mxu0 %v10510_v22  ;;  %6474 = vmatprep.subr.bf16.mxu1 %v10510_v22  ;;  %v9650_v17 = vld [vmem:[%s8737_s28 + $0x2e8] sm:$0xff]  ;;  %v7573_v28 = vcombine.high %v9638_v12, %v9641_v10 }
 0x267   : > { %5652 = vmatmul.mubr.bf16.gmra.mrb[12].mxu0 %v7540_v30  ;;  %v9635_v48 = vadd.f32 %v5407_v46, %v5119_v0  ;;  %5941 = vmatmul.mubr.bf16.gmra.mrb[12].mxu1 %v7542_v36  ;;  %v7556_v36 = vcombine.low %v9596_v47, %v9599_v4  ;;  %v7558_v46 = vcombine.low %v9605_v42, %v9608_v6  ;;  %v8584_v47 = vld [vmem:[%s10481_s1 + $0x340] sm:$0xff]  }
 0x268   : > { %5659 = vmatprep.mubr.bf16.mxu0 %v7557_v44  ;;  %5948 = vmatprep.mubr.bf16.mxu1 %v7559_v63  ;;  %v7575_v56 = vcombine.high %v9647_v51, %v9650_v17 }
 0x269   : > { %6186 = vmatpush1.bf16.msra.mxu0 %v8580_v55  ;;  %6475 = vmatpush1.bf16.msra.mxu1 %v8581_v39  ;;  %v699_v39 = vld [vmem:[%s8737_s28 + $0x320] sm:$0xff] }
 0x26a   : > { %v5123_v24 = vpop.f32.mrb[164].mxu0  ;;  %6187 = vmatprep.subr.bf16.mxu0 %v10510_v22  ;;  %v5412_v35 = vpop.f32.mrb[164].mxu1  ;;  %6476 = vmatprep.subr.bf16.mxu1 %v10510_v22 }
 0x26b   : > { %v5124_v30 = vadd.f32 %v5123_v24, %v9209_v57  ;;  %v5125_v29 = vpop.f32.mrb[165].mxu0  ;;  %v5414_v44 = vpop.f32.mrb[165].mxu1  ;;  %v8586_v24 = vld [vmem:[%s10481_s1 + $0x348] sm:$0xff]  }
 0x26c   : > { %v5126_v0 = vpop.f32.mrb[166].mxu0  ;;  %v5415_v55 = vpop.f32.mrb[166].mxu1  ;;  %v8587_v29 = vld [vmem:[%s10481_s1 + $0x3c8] sm:$0xff]  }
 0x26d   : > { %v5127_v63 = vadd.f32 %v5126_v0, %v9215_v7  ;;  %v5128_v57 = vpop.f32.mrb[167].mxu0  ;;  %6188 = vmatpush1.bf16.msra.mxu0 %v8582_v45  ;;  %v9670_v4 = vadd.f32 %v5412_v35, %v5124_v30  ;;  %v5417_v42 = vpop.f32.mrb[167].mxu1  ;;  %6477 = vmatpush1.bf16.msra.mxu1 %v8583_v11  ;;  %v8585_v7 = vld [vmem:[%s10481_s1 + $0x3c0] sm:$0xff]   ;;  %v700_v30 = vld [vmem:[%s8737_s28 + $0x328] sm:$0xff] }
 0x26e   : > { %6189 = vmatprep.subr.bf16.mxu0 %v10510_v22  ;;  %6478 = vmatprep.subr.bf16.mxu1 %v10510_v22  ;;  %v707_v45 = vld [vmem:[%s8737_s28 + $0x360] sm:$0xff]  ;;  %v708_v35 = vld [vmem:[%s8737_s28 + $0x368] sm:$0xff] }
 0x26f   : > { %5660 = vmatmul.mubr.bf16.gmra.mrb[16].mxu0 %v7556_v36  ;;  %v9677_v6 = vadd.f32 %v5415_v55, %v5127_v63  ;;  %5949 = vmatmul.mubr.bf16.gmra.mrb[16].mxu1 %v7558_v46  ;;  %v7572_v46 = vcombine.low %v9638_v12, %v9641_v10  ;;  %v7574_v55 = vcombine.low %v9647_v51, %v9650_v17  ;;  %v8588_v12 = vld [vmem:[%s10481_s1 + $0x350] sm:$0xff]   ;;  %v715_v17 = vld [vmem:[%s8737_s28 + $0x3a0] sm:$0xff] }
 0x270   : > { %5667 = vmatprep.mubr.bf16.mxu0 %v7573_v28  ;;  %5956 = vmatprep.mubr.bf16.mxu1 %v7575_v56  ;;  %v7589_v57 = vcombine.high %v699_v39, %v707_v45 }
 0x271   : > { %6190 = vmatpush1.bf16.msra.mxu0 %v8584_v47  ;;  %6479 = vmatpush1.bf16.msra.mxu1 %v8585_v7 }
 0x272   : > { %v5131_v11 = vpop.f32.mrb[168].mxu0  ;;  %6191 = vmatprep.subr.bf16.mxu0 %v10510_v22  ;;  %v5420_v44 = vpop.f32.mrb[168].mxu1  ;;  %6480 = vmatprep.subr.bf16.mxu1 %v10510_v22 }
 0x273   : > { %v5132_v36 = vadd.f32 %v5131_v11, %v9235_v25  ;;  %v5133_v0 = vpop.f32.mrb[169].mxu0  ;;  %v5422_v28 = vpop.f32.mrb[169].mxu1  ;;  %v7591_v25 = vcombine.high %v700_v30, %v708_v35 }
 0x274   : > { %v5134_v63 = vpop.f32.mrb[170].mxu0  ;;  %v5423_v47 = vpop.f32.mrb[170].mxu1  ;;  %v7588_v28 = vcombine.low %v699_v39, %v707_v45  ;;  %v8590_v45 = vld [vmem:[%s10481_s1 + $0x358] sm:$0xff]  }
 0x275   : > { %v5135_v56 = vadd.f32 %v5134_v63, %v9240_v37  ;;  %v5136_v42 = vpop.f32.mrb[171].mxu0  ;;  %6192 = vmatpush1.bf16.msra.mxu0 %v8586_v24  ;;  %v9700_v10 = vadd.f32 %v5420_v44, %v5132_v36  ;;  %v5425_v7 = vpop.f32.mrb[171].mxu1  ;;  %6481 = vmatpush1.bf16.msra.mxu1 %v8587_v29  ;;  %v8589_v37 = vld [vmem:[%s10481_s1 + $0x3d0] sm:$0xff]   ;;  %v723_v24 = vld [vmem:[%s8737_s28 + $0x3e0] sm:$0xff]  ;;  %v716_v36 = vld [vmem:[%s8737_s28 + $0x3a8] sm:$0xff] }
 0x276   : > { %6193 = vmatprep.subr.bf16.mxu0 %v10510_v22  ;;  %6482 = vmatprep.subr.bf16.mxu1 %v10510_v22  ;;  %v724_v29 = vld [vmem:[%s8737_s28 + $0x3e8] sm:$0xff] }
 0x277   : > { %5668 = vmatmul.mubr.bf16.gmra.mrb[20].mxu0 %v7572_v46  ;;  %v9707_v51 = vadd.f32 %v5423_v47, %v5135_v56  ;;  %5957 = vmatmul.mubr.bf16.gmra.mrb[20].mxu1 %v7574_v55  ;;  %v7605_v56 = vcombine.high %v715_v17, %v723_v24 }
 0x278   : > { %5675 = vmatprep.mubr.bf16.mxu0 %v7589_v57  ;;  %5964 = vmatprep.mubr.bf16.mxu1 %v7591_v25  ;;  %v7590_v57 = vcombine.low %v700_v30, %v708_v35  ;;  %v731_v30 = vld [vmem:[%s8737_s28 + $0x420] sm:$0xff] }
 0x279   : > { %6194 = vmatpush1.bf16.msra.mxu0 %v8588_v12  ;;  %6483 = vmatpush1.bf16.msra.mxu1 %v8589_v37  ;;  %v7607_v12 = vcombine.high %v716_v36, %v724_v29  ;;  %v739_v35 = vld [vmem:[%s8737_s28 + $0x460] sm:$0xff]  ;;  %v732_v37 = vld [vmem:[%s8737_s28 + $0x428] sm:$0xff] }
 0x27a   : > { %v5139_v11 = vpop.f32.mrb[172].mxu0  ;;  %6195 = vmatprep.subr.bf16.mxu0 %v10510_v22  ;;  %v5428_v0 = vpop.f32.mrb[172].mxu1  ;;  %6484 = vmatprep.subr.bf16.mxu1 %v10510_v22 }
 0x27b   : > { %v5140_v44 = vadd.f32 %v5139_v11, %v9253_v53  ;;  %v5141_v46 = vpop.f32.mrb[173].mxu0  ;;  %v5430_v63 = vpop.f32.mrb[173].mxu1  ;;  %v740_v11 = vld [vmem:[%s8737_s28 + $0x468] sm:$0xff] }
 0x27c   : > { %v5142_v55 = vpop.f32.mrb[174].mxu0  ;;  %v5431_v42 = vpop.f32.mrb[174].mxu1  ;;  %v8591_v63 = vld [vmem:[%s10481_s1 + $0x3d8] sm:$0xff]  }
 0x27d   : > { %v5143_v47 = vadd.f32 %v5142_v55, %v9255_v3  ;;  %v5144_v25 = vpop.f32.mrb[175].mxu0  ;;  %v9717_v7 = vadd.f32 %v5428_v0, %v5140_v44  ;;  %v5433_v53 = vpop.f32.mrb[175].mxu1  ;;  %6196 = vmatpush1.bf16.msra.mxu0 %v8590_v45  ;;  %6485 = vmatpush1.bf16.msra.mxu1 %v8591_v63  ;;  %v748_v45 = vld [vmem:[%s8737_s28 + $0x4a8] sm:$0xff] }
 0x27e   : > { %6197 = vmatprep.subr.bf16.mxu0 %v10510_v22  ;;  %6486 = vmatprep.subr.bf16.mxu1 %v10510_v22 }
 0x27f   : > { %5676 = vmatmul.mubr.bf16.gmra.mrb[24].mxu0 %v7588_v28  ;;  %v9719_v39 = vadd.f32 %v5431_v42, %v5143_v47  ;;  %5965 = vmatmul.mubr.bf16.gmra.mrb[24].mxu1 %v7590_v57  ;;  %v7604_v28 = vcombine.low %v715_v17, %v723_v24  ;;  %v7621_v47 = vcombine.high %v731_v30, %v739_v35 }
 0x280   : > { %5683 = vmatprep.mubr.bf16.mxu0 %v7605_v56  ;;  %5972 = vmatprep.mubr.bf16.mxu1 %v7607_v12  ;;  %v7606_v56 = vcombine.low %v716_v36, %v724_v29  ;;  %v7623_v12 = vcombine.high %v732_v37, %v740_v11  ;;  %v747_v36 = vld [vmem:[%s8737_s28 + $0x4a0] sm:$0xff] }
 0x281   : > { %v755_v29 = vld [vmem:[%s8737_s28 + $0x4e0] sm:$0xff] }
 0x282   : > { %v5147_v3 = vpop.f32.mrb[176].mxu0  ;;  %v5436_v0 = vpop.f32.mrb[176].mxu1 }
 0x283   : > { %v5148_v44 = vadd.f32 %v5147_v3, %v9265_v19  ;;  %v5149_v46 = vpop.f32.mrb[177].mxu0  ;;  %v5438_v55 = vpop.f32.mrb[177].mxu1  ;;  %v756_v3 = vld [vmem:[%s8737_s28 + $0x4e8] sm:$0xff] }
 0x284   : > { %v5150_v57 = vpop.f32.mrb[178].mxu0  ;;  %v5439_v25 = vpop.f32.mrb[178].mxu1 }
 0x285   : > { %v5151_v42 = vadd.f32 %v5150_v57, %v9270_v32  ;;  %v5152_v19 = vpop.f32.mrb[179].mxu0  ;;  %v9734_v17 = vadd.f32 %v5436_v0, %v5148_v44  ;;  %v5441_v24 = vpop.f32.mrb[179].mxu1  ;;  %v7620_v44 = vcombine.low %v731_v30, %v739_v35  ;;  %v8592_v30 = vld [vmem:[%s10481_s1 + $0x360] sm:$0xff]  }
 0x286   : > { %v7639_v19 = vcombine.high %v748_v45, %v756_v3  ;;  %v763_v35 = vld [vmem:[%s8737_s28 + $0x520] sm:$0xff]  ;;  %6198 = vmatpush1.bf16.msra.mxu0 %v8592_v30  ;;  %v780_v30 = vld [vmem:[%s8737_s28 + $0x5a8] sm:$0xff] }
 0x287   : > { %5684 = vmatmul.mubr.bf16.gmra.mrb[28].mxu0 %v7604_v28  ;;  %v9737_v53 = vadd.f32 %v5439_v25, %v5151_v42  ;;  %5973 = vmatmul.mubr.bf16.gmra.mrb[28].mxu1 %v7606_v56  ;;  %v7622_v28 = vcombine.low %v732_v37, %v740_v11  ;;  %v7637_v42 = vcombine.high %v747_v36, %v755_v29  ;;  %v771_v37 = vld [vmem:[%s8737_s28 + $0x560] sm:$0xff]  ;;  %v764_v11 = vld [vmem:[%s8737_s28 + $0x528] sm:$0xff] }
 0x288   : > { %5691 = vmatprep.mubr.bf16.mxu0 %v7621_v47  ;;  %5980 = vmatprep.mubr.bf16.mxu1 %v7623_v12 }
 0x289   : > { %6199 = vmatprep.subr.bf16.mxu0 %v10510_v22 }
 0x28a   : > { %v5155_v32 = vpop.f32.mrb[180].mxu0  ;;  %v5444_v55 = vpop.f32.mrb[180].mxu1 }
 0x28b   : > { %v5156_v46 = vadd.f32 %v5155_v32, %v9277_v49  ;;  %v5157_v63 = vpop.f32.mrb[181].mxu0  ;;  %v5446_v0 = vpop.f32.mrb[181].mxu1  ;;  %v772_v32 = vld [vmem:[%s8737_s28 + $0x568] sm:$0xff] }
 0x28c   : > { %v5158_v57 = vpop.f32.mrb[182].mxu0  ;;  %v5447_v47 = vpop.f32.mrb[182].mxu1  ;;  %v8593_v0 = vld [vmem:[%s10481_s1 + $0x3e0] sm:$0xff]  }
 0x28d   : > { %v5159_v56 = vadd.f32 %v5158_v57, %v9279_v62  ;;  %v5160_v25 = vpop.f32.mrb[183].mxu0  ;;  %v9745_v12 = vadd.f32 %v5444_v55, %v5156_v46  ;;  %v5449_v24 = vpop.f32.mrb[183].mxu1  ;;  %6487 = vmatpush1.bf16.msra.mxu1 %v8593_v0 }
 0x28e   : > { %6488 = vmatprep.subr.bf16.mxu1 %v10510_v22 }
 0x28f   : > { %5692 = vmatmul.mubr.bf16.gmra.mrb[32].mxu0 %v7620_v44  ;;  %v9747_v49 = vadd.f32 %v5447_v47, %v5159_v56  ;;  %5981 = vmatmul.mubr.bf16.gmra.mrb[32].mxu1 %v7622_v28  ;;  %v7636_v44 = vcombine.low %v747_v36, %v755_v29  ;;  %v7653_v56 = vcombine.high %v763_v35, %v771_v37 }
 0x290   : > { %5699 = vmatprep.mubr.bf16.mxu0 %v7637_v42  ;;  %5988 = vmatprep.mubr.bf16.mxu1 %v7639_v19  ;;  %v7638_v42 = vcombine.low %v748_v45, %v756_v3  ;;  %v7655_v19 = vcombine.high %v764_v11, %v772_v32  ;;  %v779_v45 = vld [vmem:[%s8737_s28 + $0x5a0] sm:$0xff] }
 0x291   : > { %v787_v3 = vld [vmem:[%s8737_s28 + $0x5e0] sm:$0xff] }
 0x292   : > { %v5163_v62 = vpop.f32.mrb[184].mxu0  ;;  %v5452_v55 = vpop.f32.mrb[184].mxu1 }
 0x293   : > { %v5164_v46 = vadd.f32 %v5163_v62, %v9289_v18  ;;  %v5165_v63 = vpop.f32.mrb[185].mxu0  ;;  %v5454_v57 = vpop.f32.mrb[185].mxu1  ;;  %v788_v62 = vld [vmem:[%s8737_s28 + $0x5e8] sm:$0xff] }
 0x294   : > { %v5166_v28 = vpop.f32.mrb[186].mxu0  ;;  %v5455_v25 = vpop.f32.mrb[186].mxu1 }
 0x295   : > { %v5167_v47 = vadd.f32 %v5166_v28, %v9294_v33  ;;  %v5168_v18 = vpop.f32.mrb[187].mxu0  ;;  %v9762_v36 = vadd.f32 %v5452_v55, %v5164_v46  ;;  %v5457_v29 = vpop.f32.mrb[187].mxu1  ;;  %v7652_v46 = vcombine.low %v763_v35, %v771_v37  ;;  %v8594_v35 = vld [vmem:[%s10481_s1 + $0x368] sm:$0xff]   ;;  %v795_v37 = vld [vmem:[%s8737_s28 + $0x620] sm:$0xff] }
 0x296   : > { %v7671_v18 = vcombine.high %v780_v30, %v788_v62  ;;  %6200 = vmatpush1.bf16.msra.mxu0 %v8594_v35  ;;  %v812_v35 = vld [vmem:[%s8737_s28 + $0x6a8] sm:$0xff] }
 0x297   : > { %5700 = vmatmul.mubr.bf16.gmra.mrb[36].mxu0 %v7636_v44  ;;  %v9765_v24 = vadd.f32 %v5455_v25, %v5167_v47  ;;  %5989 = vmatmul.mubr.bf16.gmra.mrb[36].mxu1 %v7638_v42  ;;  %v7654_v44 = vcombine.low %v764_v11, %v772_v32  ;;  %v7669_v47 = vcombine.high %v779_v45, %v787_v3  ;;  %v803_v11 = vld [vmem:[%s8737_s28 + $0x660] sm:$0xff]  ;;  %v796_v32 = vld [vmem:[%s8737_s28 + $0x628] sm:$0xff] }
 0x298   : > { %5707 = vmatprep.mubr.bf16.mxu0 %v7653_v56  ;;  %5996 = vmatprep.mubr.bf16.mxu1 %v7655_v19 }
 0x299   : > { %6201 = vmatprep.subr.bf16.mxu0 %v10510_v22 }
 0x29a   : > { %v5171_v33 = vpop.f32.mrb[188].mxu0  ;;  %v5460_v57 = vpop.f32.mrb[188].mxu1 }
 0x29b   : > { %v5172_v63 = vadd.f32 %v5171_v33, %v9301_v52  ;;  %v5173_v0 = vpop.f32.mrb[189].mxu0  ;;  %v5462_v55 = vpop.f32.mrb[189].mxu1  ;;  %v804_v33 = vld [vmem:[%s8737_s28 + $0x668] sm:$0xff] }
 0x29c   : > { %v5174_v28 = vpop.f32.mrb[190].mxu0  ;;  %v5463_v56 = vpop.f32.mrb[190].mxu1 }
 0x29d   : > { %v5175_v42 = vadd.f32 %v5174_v28, %v9303_v9  ;;  %v5176_v25 = vpop.f32.mrb[191].mxu0  ;;  %v9773_v19 = vadd.f32 %v5460_v57, %v5172_v63  ;;  %v5465_v29 = vpop.f32.mrb[191].mxu1 }
 0x29f   : > { %5708 = vmatmul.mubr.bf16.gmra.mrb[40].mxu0 %v7652_v46  ;;  %v9775_v52 = vadd.f32 %v5463_v56, %v5175_v42  ;;  %5997 = vmatmul.mubr.bf16.gmra.mrb[40].mxu1 %v7654_v44  ;;  %v7668_v46 = vcombine.low %v779_v45, %v787_v3  ;;  %v7670_v44 = vcombine.low %v780_v30, %v788_v62  ;;  %v819_v30 = vld [vmem:[%s8737_s28 + $0x6e0] sm:$0xff] }
 0x2a0   : > { %5715 = vmatprep.mubr.bf16.mxu0 %v7669_v47  ;;  %6004 = vmatprep.mubr.bf16.mxu1 %v7671_v18  ;;  %v7685_v47 = vcombine.high %v795_v37, %v803_v11  ;;  %v7687_v18 = vcombine.high %v796_v32, %v804_v33 }
 0x2a2   : > { %v5179_v9 = vpop.f32.mrb[192].mxu0  ;;  %v5468_v57 = vpop.f32.mrb[192].mxu1 }
 0x2a3   : > { %v5180_v63 = vadd.f32 %v5179_v9, %v9316_v27  ;;  %v5181_v0 = vpop.f32.mrb[193].mxu0  ;;  %v5470_v55 = vpop.f32.mrb[193].mxu1  ;;  %v8595_v27 = vld [vmem:[%s10481_s1 + $0x3e8] sm:$0xff]  }
 0x2a4   : > { %v5182_v28 = vpop.f32.mrb[194].mxu0  ;;  %v5471_v56 = vpop.f32.mrb[194].mxu1  ;;  %6489 = vmatpush1.bf16.msra.mxu1 %v8595_v27  ;;  %v820_v9 = vld [vmem:[%s8737_s28 + $0x6e8] sm:$0xff] }
 0x2a5   : > { %v5183_v42 = vadd.f32 %v5182_v28, %v9318_v38  ;;  %v5184_v25 = vpop.f32.mrb[195].mxu0  ;;  %v9790_v45 = vadd.f32 %v5468_v57, %v5180_v63  ;;  %v5473_v3 = vpop.f32.mrb[195].mxu1  ;;  %v811_v38 = vld [vmem:[%s8737_s28 + $0x6a0] sm:$0xff]  ;;  %6490 = vmatprep.subr.bf16.mxu1 %v10510_v22  ;;  %v7684_v57 = vcombine.low %v795_v37, %v803_v11  ;;  %v8596_v37 = vld [vmem:[%s10481_s1 + $0x370] sm:$0xff]  }
 0x2a6   : > { %v827_v11 = vld [vmem:[%s8737_s28 + $0x720] sm:$0xff]  ;;  %6202 = vmatpush1.bf16.msra.mxu0 %v8596_v37  ;;  %v844_v37 = vld [vmem:[%s8737_s28 + $0x7a8] sm:$0xff] }
 0x2a7   : > { %5716 = vmatmul.mubr.bf16.gmra.mrb[44].mxu0 %v7668_v46  ;;  %v9792_v29 = vadd.f32 %v5471_v56, %v5183_v42  ;;  %6005 = vmatmul.mubr.bf16.gmra.mrb[44].mxu1 %v7670_v44  ;;  %v7686_v42 = vcombine.low %v796_v32, %v804_v33  ;;  %v7701_v44 = vcombine.high %v811_v38, %v819_v30  ;;  %v835_v32 = vld [vmem:[%s8737_s28 + $0x760] sm:$0xff]  ;;  %v828_v33 = vld [vmem:[%s8737_s28 + $0x728] sm:$0xff] }
 0x2a8   : > { %5723 = vmatprep.mubr.bf16.mxu0 %v7685_v47  ;;  %6012 = vmatprep.mubr.bf16.mxu1 %v7687_v18  ;;  %v7703_v18 = vcombine.high %v812_v35, %v820_v9 }
 0x2a9   : > { %6203 = vmatprep.subr.bf16.mxu0 %v10510_v22 }
 0x2aa   : > { %v5187_v62 = vpop.f32.mrb[196].mxu0  ;;  %v5476_v55 = vpop.f32.mrb[196].mxu1 }
 0x2ab   : > { %v5188_v0 = vadd.f32 %v5187_v62, %v9325_v2  ;;  %v5189_v63 = vpop.f32.mrb[197].mxu0  ;;  %v5478_v28 = vpop.f32.mrb[197].mxu1  ;;  %v836_v62 = vld [vmem:[%s8737_s28 + $0x768] sm:$0xff] }
 0x2ac   : > { %v5190_v46 = vpop.f32.mrb[198].mxu0  ;;  %v5479_v56 = vpop.f32.mrb[198].mxu1 }
 0x2ad   : > { %v5191_v47 = vadd.f32 %v5190_v46, %v9327_v26  ;;  %v5192_v25 = vpop.f32.mrb[199].mxu0  ;;  %v9801_v27 = vadd.f32 %v5476_v55, %v5188_v0  ;;  %v5481_v3 = vpop.f32.mrb[199].mxu1 }
 0x2af   : > { %5724 = vmatmul.mubr.bf16.gmra.mrb[48].mxu0 %v7684_v57  ;;  %v9803_v2 = vadd.f32 %v5479_v56, %v5191_v47  ;;  %6013 = vmatmul.mubr.bf16.gmra.mrb[48].mxu1 %v7686_v42  ;;  %v7700_v57 = vcombine.low %v811_v38, %v819_v30  ;;  %v7702_v42 = vcombine.low %v812_v35, %v820_v9  ;;  %v851_v35 = vld [vmem:[%s8737_s28 + $0x7e0] sm:$0xff] }
 0x2b0   : > { %5731 = vmatprep.mubr.bf16.mxu0 %v7701_v44  ;;  %6020 = vmatprep.mubr.bf16.mxu1 %v7703_v18  ;;  %v7717_v44 = vcombine.high %v827_v11, %v835_v32  ;;  %v7719_v18 = vcombine.high %v828_v33, %v836_v62 }
 0x2b2   : > { %v5195_v26 = vpop.f32.mrb[200].mxu0  ;;  %v5484_v55 = vpop.f32.mrb[200].mxu1 }
 0x2b3   : > { %v5196_v0 = vadd.f32 %v5195_v26, %v9340_v40  ;;  %v5197_v63 = vpop.f32.mrb[201].mxu0  ;;  %v5486_v28 = vpop.f32.mrb[201].mxu1  ;;  %v8597_v40 = vld [vmem:[%s10481_s1 + $0x3f0] sm:$0xff]   ;;  %v852_v26 = vld [vmem:[%s8737_s28 + $0x7e8] sm:$0xff] }
 0x2b4   : > { %v5198_v46 = vpop.f32.mrb[202].mxu0  ;;  %v5487_v56 = vpop.f32.mrb[202].mxu1  ;;  %6491 = vmatpush1.bf16.msra.mxu1 %v8597_v40 }
 0x2b5   : > { %v5199_v47 = vadd.f32 %v5198_v46, %v9342_v50  ;;  %v5200_v25 = vpop.f32.mrb[203].mxu0  ;;  %v9818_v38 = vadd.f32 %v5484_v55, %v5196_v0  ;;  %v5489_v30 = vpop.f32.mrb[203].mxu1  ;;  %v843_v50 = vld [vmem:[%s8737_s28 + $0x7a0] sm:$0xff]  ;;  %6492 = vmatprep.subr.bf16.mxu1 %v10510_v22  ;;  %v7716_v55 = vcombine.low %v827_v11, %v835_v32  ;;  %v8598_v11 = vld [vmem:[%s10481_s1 + $0x378] sm:$0xff]  }
 0x2b6   : > { %v7735_v25 = vcombine.high %v844_v37, %v852_v26  ;;  %v859_v32 = vld [vmem:[%s8737_s28 + $0x820] sm:$0xff]  ;;  %v868_v30 = vld [vmem:[%s8737_s28 + $0x868] sm:$0xff]  ;;  %6204 = vmatpush1.bf16.msra.mxu0 %v8598_v11 }
 0x2b7   : > { %5732 = vmatmul.mubr.bf16.gmra.mrb[52].mxu0 %v7700_v57  ;;  %v9820_v3 = vadd.f32 %v5487_v56, %v5199_v47  ;;  %6021 = vmatmul.mubr.bf16.gmra.mrb[52].mxu1 %v7702_v42  ;;  %v7718_v47 = vcombine.low %v828_v33, %v836_v62  ;;  %v7733_v42 = vcombine.high %v843_v50, %v851_v35  ;;  %v867_v33 = vld [vmem:[%s8737_s28 + $0x860] sm:$0xff]  ;;  %v860_v62 = vld [vmem:[%s8737_s28 + $0x828] sm:$0xff] }
 0x2b8   : > { %5739 = vmatprep.mubr.bf16.mxu0 %v7717_v44  ;;  %6028 = vmatprep.mubr.bf16.mxu1 %v7719_v18 }
 0x2ba   : > { %v5203_v9 = vpop.f32.mrb[204].mxu0  ;;  %v5492_v28 = vpop.f32.mrb[204].mxu1 }
 0x2bb   : > { %v5204_v63 = vadd.f32 %v5203_v9, %v9349_v31  ;;  %v5205_v0 = vpop.f32.mrb[205].mxu0  ;;  %v5494_v46 = vpop.f32.mrb[205].mxu1 }
 0x2bc   : > { %v5206_v57 = vpop.f32.mrb[206].mxu0  ;;  %v5495_v56 = vpop.f32.mrb[206].mxu1  ;;  %v7732_v0 = vcombine.low %v843_v50, %v851_v35 }
 0x2bd   : > { %v5207_v44 = vadd.f32 %v5206_v57, %v9351_v60  ;;  %v5208_v22 = vpop.f32.mrb[207].mxu0  ;;  %v9829_v18 = vadd.f32 %v5492_v28, %v5204_v63  ;;  %v5497_v40 = vpop.f32.mrb[207].mxu1  ;;  %v7734_v57 = vcombine.low %v844_v37, %v852_v26  ;;  %v875_v37 = vld [vmem:[%s8737_s28 + $0x8a0] sm:$0xff] }
 0x2be   : > { %v883_v26 = vld [vmem:[%s8737_s28 + $0x8e0] sm:$0xff] }
 0x2bf   : > { %5740 = vmatmul.mubr.bf16.gmra.mrb[56].mxu0 %v7716_v55  ;;  %v9831_v31 = vadd.f32 %v5495_v56, %v5207_v44  ;;  %6029 = vmatmul.mubr.bf16.gmra.mrb[56].mxu1 %v7718_v47  ;;  %v7749_v47 = vcombine.high %v859_v32, %v867_v33 }
 0x2c0   : > { %5747 = vmatprep.mubr.bf16.mxu0 %v7733_v42  ;;  %6036 = vmatprep.mubr.bf16.mxu1 %v7735_v25  ;;  %v10512_v42 = vld [vmem:[#allocation3_spill] sm:$0xff]  ;;  %v7751_v25 = vcombine.high %v860_v62, %v868_v30 }
 0x2c1   : > { %10511 = vst [vmem:[#allocation27_spill] sm:$0xff] %v9831_v31  ;;  %v7748_v31 = vcombine.low %v859_v32, %v867_v33  ;;  %v891_v32 = vld [vmem:[%s8737_s28 + $0x920] sm:$0xff] }
 0x2c2   : > { %v5211_v60 = vpop.f32.mrb[208].mxu0  ;;  %v5500_v63 = vpop.f32.mrb[208].mxu1  ;;  %v899_v33 = vld [vmem:[%s8737_s28 + $0x960] sm:$0xff] }
 0x2c3   : > { %v5212_v9 = vadd.f32 %v5211_v60, %v9364_v8  ;;  %v5213_v28 = vpop.f32.mrb[209].mxu0  ;;  %v5502_v55 = vpop.f32.mrb[209].mxu1  ;;  %v8599_v8 = vld [vmem:[%s10481_s1 + $0x3f8] sm:$0xff]   ;;  %v876_v60 = vld [vmem:[%s8737_s28 + $0x8a8] sm:$0xff] }
 0x2c4   : > { %v5214_v46 = vpop.f32.mrb[210].mxu0  ;;  %v5503_v56 = vpop.f32.mrb[210].mxu1  ;;  %6493 = vmatpush1.bf16.msra.mxu1 %v8599_v8  ;;  %v884_v28 = vld [vmem:[%s8737_s28 + $0x8e8] sm:$0xff] }
 0x2c5   : > { %v5215_v44 = vadd.f32 %v5214_v46, %v10512_v42  ;;  %v5216_v22 = vpop.f32.mrb[211].mxu0  ;;  %v9845_v40 = vadd.f32 %v5500_v63, %v5212_v9  ;;  %v5505_v50 = vpop.f32.mrb[211].mxu1  ;;  %v10514_v55 = vld [vmem:[#allocation4_spill] sm:$0xff]  ;;  %v7767_v8 = vcombine.high %v876_v60, %v884_v28 }
 0x2c7   : > { %5748 = vmatmul.mubr.bf16.gmra.mrb[60].mxu0 %v7732_v0  ;;  %v9847_v35 = vadd.f32 %v5503_v56, %v5215_v44  ;;  %6037 = vmatmul.mubr.bf16.gmra.mrb[60].mxu1 %v7734_v57  ;;  %v7750_v0 = vcombine.low %v860_v62, %v868_v30  ;;  %v7765_v44 = vcombine.high %v875_v37, %v883_v26  ;;  %v10515_v57 = vld [vmem:[#allocation5_spill] sm:$0xff]  ;;  %v892_v30 = vld [vmem:[%s8737_s28 + $0x928] sm:$0xff] }
 0x2c8   : > { %5755 = vmatprep.mubr.bf16.mxu0 %v7749_v47  ;;  %6044 = vmatprep.mubr.bf16.mxu1 %v7751_v25 }
 0x2c9   : > { %10513 = vst [vmem:[#allocation3_spill] sm:$0xff] %v9847_v35 }
 0x2ca   : > { %v5219_v11 = vpop.f32.mrb[212].mxu0  ;;  %v5508_v42 = vpop.f32.mrb[212].mxu1 }
 0x2cb   : > { %v5220_v46 = vadd.f32 %v5219_v11, %v10514_v55  ;;  %v5221_v22 = vpop.f32.mrb[213].mxu0  ;;  %v5510_v9 = vpop.f32.mrb[213].mxu1  ;;  %v900_v55 = vld [vmem:[%s8737_s28 + $0x968] sm:$0xff] }
 0x2cc   : > { %v5222_v63 = vpop.f32.mrb[214].mxu0  ;;  %v5511_v56 = vpop.f32.mrb[214].mxu1  ;;  %v10518_v22 = vld [vmem:[#allocation6_spill] sm:$0xff] }
 0x2cd   : > { %v5223_v47 = vadd.f32 %v5222_v63, %v10515_v57  ;;  %v5224_v25 = vpop.f32.mrb[215].mxu0  ;;  %v9855_v50 = vadd.f32 %v5508_v42, %v5220_v46  ;;  %v5513_v35 = vpop.f32.mrb[215].mxu1  ;;  %v7781_v42 = vcombine.high %v891_v32, %v899_v33 }
 0x2ce   : > { %v7764_v25 = vcombine.low %v875_v37, %v883_v26  ;;  %v907_v37 = vld [vmem:[%s8737_s28 + $0x9a0] sm:$0xff] }
 0x2cf   : > { %10516 = vst [vmem:[#allocation4_spill] sm:$0xff] %v9855_v50  ;;  %5756 = vmatmul.mubr.bf16.gmra.mrb[64].mxu0 %v7748_v31  ;;  %v9857_v11 = vadd.f32 %v5511_v56, %v5223_v47  ;;  %6045 = vmatmul.mubr.bf16.gmra.mrb[64].mxu1 %v7750_v0  ;;  %v7766_v31 = vcombine.low %v876_v60, %v884_v28  ;;  %v10519_v0 = vld [vmem:[#allocation7_spill] sm:$0xff]  ;;  %v908_v28 = vld [vmem:[%s8737_s28 + $0x9a8] sm:$0xff] }
 0x2d0   : > { %5763 = vmatprep.mubr.bf16.mxu0 %v7765_v44  ;;  %6052 = vmatprep.mubr.bf16.mxu1 %v7767_v8  ;;  %v7783_v8 = vcombine.high %v892_v30, %v900_v55  ;;  %v915_v26 = vld [vmem:[%s8737_s28 + $0x9e0] sm:$0xff] }
 0x2d1   : > { %10517 = vst [vmem:[#allocation5_spill] sm:$0xff] %v9857_v11 }
 0x2d2   : > { %v5227_v62 = vpop.f32.mrb[216].mxu0  ;;  %v5516_v63 = vpop.f32.mrb[216].mxu1 }
 0x2d3   : > { %v5228_v9 = vadd.f32 %v5227_v62, %v10518_v22  ;;  %v5229_v57 = vpop.f32.mrb[217].mxu0  ;;  %v5518_v46 = vpop.f32.mrb[217].mxu1  ;;  %v916_v22 = vld [vmem:[%s8737_s28 + $0x9e8] sm:$0xff] }
 0x2d4   : > { %v5230_v35 = vpop.f32.mrb[218].mxu0  ;;  %v5519_v47 = vpop.f32.mrb[218].mxu1  ;;  %v10522_v57 = vld [vmem:[#allocation8_spill] sm:$0xff] }
 0x2d5   : > { %v5231_v44 = vadd.f32 %v5230_v35, %v10519_v0  ;;  %v5232_v56 = vpop.f32.mrb[219].mxu0  ;;  %v9865_v11 = vadd.f32 %v5516_v63, %v5228_v9  ;;  %v5521_v50 = vpop.f32.mrb[219].mxu1  ;;  %v7782_v63 = vcombine.low %v892_v30, %v900_v55  ;;  %v924_v55 = vld [vmem:[%s8737_s28 + $0xa28] sm:$0xff] }
 0x2d6   : > { %v7780_v56 = vcombine.low %v891_v32, %v899_v33  ;;  %v923_v32 = vld [vmem:[%s8737_s28 + $0xa20] sm:$0xff] }
 0x2d7   : > { %10520 = vst [vmem:[#allocation6_spill] sm:$0xff] %v9865_v11  ;;  %5764 = vmatmul.mubr.bf16.gmra.mrb[68].mxu0 %v7764_v25  ;;  %v9867_v62 = vadd.f32 %v5519_v47, %v5231_v44  ;;  %6053 = vmatmul.mubr.bf16.gmra.mrb[68].mxu1 %v7766_v31  ;;  %v7797_v25 = vcombine.high %v907_v37, %v915_v26  ;;  %v10523_v31 = vld [vmem:[#allocation9_spill] sm:$0xff]  ;;  %v931_v33 = vld [vmem:[%s8737_s28 + $0xa60] sm:$0xff] }
 0x2d8   : > { %5771 = vmatprep.mubr.bf16.mxu0 %v7781_v42  ;;  %6060 = vmatprep.mubr.bf16.mxu1 %v7783_v8  ;;  %v7799_v8 = vcombine.high %v908_v28, %v916_v22 }
 0x2d9   : > { %10521 = vst [vmem:[#allocation7_spill] sm:$0xff] %v9867_v62 }
 0x2da   : > { %v5235_v60 = vpop.f32.mrb[220].mxu0  ;;  %v5524_v35 = vpop.f32.mrb[220].mxu1 }
 0x2db   : > { %v5236_v46 = vadd.f32 %v5235_v60, %v10522_v57  ;;  %v5237_v0 = vpop.f32.mrb[221].mxu0  ;;  %v5526_v9 = vpop.f32.mrb[221].mxu1  ;;  %v932_v57 = vld [vmem:[%s8737_s28 + $0xa68] sm:$0xff] }
 0x2dc   : > { %v5238_v50 = vpop.f32.mrb[222].mxu0  ;;  %v5527_v44 = vpop.f32.mrb[222].mxu1  ;;  %v10526_v0 = vld [vmem:[#allocation10_spill] sm:$0xff] }
 0x2dd   : > { %v5239_v42 = vadd.f32 %v5238_v50, %v10523_v31  ;;  %v5240_v47 = vpop.f32.mrb[223].mxu0  ;;  %v9875_v62 = vadd.f32 %v5524_v35, %v5236_v46  ;;  %v5529_v11 = vpop.f32.mrb[223].mxu1  ;;  %v7798_v35 = vcombine.low %v908_v28, %v916_v22  ;;  %v940_v22 = vld [vmem:[%s8737_s28 + $0xaa8] sm:$0xff] }
 0x2de   : > { %v7796_v47 = vcombine.low %v907_v37, %v915_v26  ;;  %v939_v37 = vld [vmem:[%s8737_s28 + $0xaa0] sm:$0xff] }
 0x2df   : > { %10524 = vst [vmem:[#allocation8_spill] sm:$0xff] %v9875_v62  ;;  %5772 = vmatmul.mubr.bf16.gmra.mrb[72].mxu0 %v7780_v56  ;;  %v9877_v60 = vadd.f32 %v5527_v44, %v5239_v42  ;;  %6061 = vmatmul.mubr.bf16.gmra.mrb[72].mxu1 %v7782_v63  ;;  %v7813_v56 = vcombine.high %v923_v32, %v931_v33  ;;  %v10527_v63 = vld [vmem:[#allocation11_spill] sm:$0xff] }
 0x2e0   : > { %5779 = vmatprep.mubr.bf16.mxu0 %v7797_v25  ;;  %6068 = vmatprep.mubr.bf16.mxu1 %v7799_v8  ;;  %v7815_v8 = vcombine.high %v924_v55, %v932_v57  ;;  %v947_v26 = vld [vmem:[%s8737_s28 + $0xae0] sm:$0xff] }
 0x2e1   : > { %10525 = vst [vmem:[#allocation9_spill] sm:$0xff] %v9877_v60 }
 0x2e2   : > { %v5243_v30 = vpop.f32.mrb[224].mxu0  ;;  %v5532_v50 = vpop.f32.mrb[224].mxu1 }
 0x2e3   : > { %v5244_v9 = vadd.f32 %v5243_v30, %v10526_v0  ;;  %v5245_v31 = vpop.f32.mrb[225].mxu0  ;;  %v5534_v46 = vpop.f32.mrb[225].mxu1  ;;  %v948_v0 = vld [vmem:[%s8737_s28 + $0xae8] sm:$0xff] }
 0x2e4   : > { %v5246_v11 = vpop.f32.mrb[226].mxu0  ;;  %v5535_v42 = vpop.f32.mrb[226].mxu1  ;;  %v10530_v31 = vld [vmem:[#allocation12_spill] sm:$0xff] }
 0x2e5   : > { %v5247_v25 = vadd.f32 %v5246_v11, %v10527_v63  ;;  %v5248_v44 = vpop.f32.mrb[227].mxu0  ;;  %v9885_v60 = vadd.f32 %v5532_v50, %v5244_v9  ;;  %v5537_v62 = vpop.f32.mrb[227].mxu1  ;;  %v7814_v50 = vcombine.low %v924_v55, %v932_v57  ;;  %v956_v57 = vld [vmem:[%s8737_s28 + $0xb28] sm:$0xff] }
 0x2e6   : > { %v7812_v44 = vcombine.low %v923_v32, %v931_v33  ;;  %v955_v32 = vld [vmem:[%s8737_s28 + $0xb20] sm:$0xff] }
 0x2e7   : > { %10528 = vst [vmem:[#allocation10_spill] sm:$0xff] %v9885_v60  ;;  %5780 = vmatmul.mubr.bf16.gmra.mrb[76].mxu0 %v7796_v47  ;;  %v9887_v30 = vadd.f32 %v5535_v42, %v5247_v25  ;;  %6069 = vmatmul.mubr.bf16.gmra.mrb[76].mxu1 %v7798_v35  ;;  %v7829_v47 = vcombine.high %v939_v37, %v947_v26  ;;  %v10531_v35 = vld [vmem:[#allocation13_spill] sm:$0xff]  ;;  %v963_v33 = vld [vmem:[%s8737_s28 + $0xb60] sm:$0xff] }
 0x2e8   : > { %5787 = vmatprep.mubr.bf16.mxu0 %v7813_v56  ;;  %6076 = vmatprep.mubr.bf16.mxu1 %v7815_v8  ;;  %v7831_v8 = vcombine.high %v940_v22, %v948_v0 }
 0x2e9   : > { %10529 = vst [vmem:[#allocation11_spill] sm:$0xff] %v9887_v30 }
 0x2ea   : > { %v5251_v28 = vpop.f32.mrb[228].mxu0  ;;  %v5540_v11 = vpop.f32.mrb[228].mxu1 }
 0x2eb   : > { %v5252_v46 = vadd.f32 %v5251_v28, %v10530_v31  ;;  %v5253_v63 = vpop.f32.mrb[229].mxu0  ;;  %v5542_v9 = vpop.f32.mrb[229].mxu1  ;;  %v964_v31 = vld [vmem:[%s8737_s28 + $0xb68] sm:$0xff] }
 0x2ec   : > { %v5254_v62 = vpop.f32.mrb[230].mxu0  ;;  %v5543_v25 = vpop.f32.mrb[230].mxu1  ;;  %v10534_v63 = vld [vmem:[#allocation14_spill] sm:$0xff] }
 0x2ed   : > { %v5255_v56 = vadd.f32 %v5254_v62, %v10531_v35  ;;  %v5256_v42 = vpop.f32.mrb[231].mxu0  ;;  %v9895_v30 = vadd.f32 %v5540_v11, %v5252_v46  ;;  %v5545_v60 = vpop.f32.mrb[231].mxu1  ;;  %v7830_v11 = vcombine.low %v940_v22, %v948_v0  ;;  %v972_v0 = vld [vmem:[%s8737_s28 + $0xba8] sm:$0xff] }
 0x2ee   : > { %v7828_v42 = vcombine.low %v939_v37, %v947_v26  ;;  %v971_v37 = vld [vmem:[%s8737_s28 + $0xba0] sm:$0xff] }
 0x2ef   : > { %10532 = vst [vmem:[#allocation12_spill] sm:$0xff] %v9895_v30  ;;  %5788 = vmatmul.mubr.bf16.gmra.mrb[80].mxu0 %v7812_v44  ;;  %v9897_v28 = vadd.f32 %v5543_v25, %v5255_v56  ;;  %6077 = vmatmul.mubr.bf16.gmra.mrb[80].mxu1 %v7814_v50  ;;  %v7845_v44 = vcombine.high %v955_v32, %v963_v33  ;;  %v10535_v50 = vld [vmem:[#allocation15_spill] sm:$0xff] }
 0x2f0   : > { %5795 = vmatprep.mubr.bf16.mxu0 %v7829_v47  ;;  %6084 = vmatprep.mubr.bf16.mxu1 %v7831_v8  ;;  %v7847_v8 = vcombine.high %v956_v57, %v964_v31  ;;  %v979_v26 = vld [vmem:[%s8737_s28 + $0xbe0] sm:$0xff] }
 0x2f1   : > { %10533 = vst [vmem:[#allocation13_spill] sm:$0xff] %v9897_v28 }
 0x2f2   : > { %v5259_v55 = vpop.f32.mrb[232].mxu0  ;;  %v5548_v62 = vpop.f32.mrb[232].mxu1 }
 0x2f3   : > { %v5260_v9 = vadd.f32 %v5259_v55, %v10534_v63  ;;  %v5261_v35 = vpop.f32.mrb[233].mxu0  ;;  %v5550_v46 = vpop.f32.mrb[233].mxu1  ;;  %v980_v63 = vld [vmem:[%s8737_s28 + $0xbe8] sm:$0xff] }
 0x2f4   : > { %v5262_v60 = vpop.f32.mrb[234].mxu0  ;;  %v5551_v56 = vpop.f32.mrb[234].mxu1  ;;  %v10538_v35 = vld [vmem:[#allocation16_spill] sm:$0xff] }
 0x2f5   : > { %v5263_v47 = vadd.f32 %v5262_v60, %v10535_v50  ;;  %v5264_v25 = vpop.f32.mrb[235].mxu0  ;;  %v9905_v28 = vadd.f32 %v5548_v62, %v5260_v9  ;;  %v5553_v30 = vpop.f32.mrb[235].mxu1  ;;  %v7846_v62 = vcombine.low %v956_v57, %v964_v31  ;;  %v988_v31 = vld [vmem:[%s8737_s28 + $0xc28] sm:$0xff] }
 0x2f6   : > { %v7844_v25 = vcombine.low %v955_v32, %v963_v33  ;;  %v987_v32 = vld [vmem:[%s8737_s28 + $0xc20] sm:$0xff] }
 0x2f7   : > { %10536 = vst [vmem:[#allocation14_spill] sm:$0xff] %v9905_v28  ;;  %5796 = vmatmul.mubr.bf16.gmra.mrb[84].mxu0 %v7828_v42  ;;  %v9907_v55 = vadd.f32 %v5551_v56, %v5263_v47  ;;  %6085 = vmatmul.mubr.bf16.gmra.mrb[84].mxu1 %v7830_v11  ;;  %v7861_v42 = vcombine.high %v971_v37, %v979_v26  ;;  %v10539_v11 = vld [vmem:[#allocation17_spill] sm:$0xff]  ;;  %v995_v33 = vld [vmem:[%s8737_s28 + $0xc60] sm:$0xff] }
 0x2f8   : > { %5803 = vmatprep.mubr.bf16.mxu0 %v7845_v44  ;;  %6092 = vmatprep.mubr.bf16.mxu1 %v7847_v8  ;;  %v7863_v8 = vcombine.high %v972_v0, %v980_v63 }
 0x2f9   : > { %10537 = vst [vmem:[#allocation15_spill] sm:$0xff] %v9907_v55 }
 0x2fa   : > { %v5267_v22 = vpop.f32.mrb[236].mxu0  ;;  %v5556_v60 = vpop.f32.mrb[236].mxu1 }
 0x2fb   : > { %v5268_v46 = vadd.f32 %v5267_v22, %v10538_v35  ;;  %v5269_v50 = vpop.f32.mrb[237].mxu0  ;;  %v5558_v9 = vpop.f32.mrb[237].mxu1  ;;  %v996_v35 = vld [vmem:[%s8737_s28 + $0xc68] sm:$0xff] }
 0x2fc   : > { %v5270_v30 = vpop.f32.mrb[238].mxu0  ;;  %v5559_v47 = vpop.f32.mrb[238].mxu1  ;;  %v10542_v50 = vld [vmem:[#allocation18_spill] sm:$0xff] }
 0x2fd   : > { %v5271_v44 = vadd.f32 %v5270_v30, %v10539_v11  ;;  %v5272_v56 = vpop.f32.mrb[239].mxu0  ;;  %v9915_v55 = vadd.f32 %v5556_v60, %v5268_v46  ;;  %v5561_v28 = vpop.f32.mrb[239].mxu1  ;;  %v7862_v60 = vcombine.low %v972_v0, %v980_v63  ;;  %v1004_v63 = vld [vmem:[%s8737_s28 + $0xca8] sm:$0xff] }
 0x2fe   : > { %v7860_v56 = vcombine.low %v971_v37, %v979_v26  ;;  %v1003_v37 = vld [vmem:[%s8737_s28 + $0xca0] sm:$0xff] }
 0x2ff   : > { %10540 = vst [vmem:[#allocation16_spill] sm:$0xff] %v9915_v55  ;;  %5804 = vmatmul.mubr.bf16.gmra.mrb[88].mxu0 %v7844_v25  ;;  %v9917_v22 = vadd.f32 %v5559_v47, %v5271_v44  ;;  %6093 = vmatmul.mubr.bf16.gmra.mrb[88].mxu1 %v7846_v62  ;;  %v7877_v25 = vcombine.high %v987_v32, %v995_v33  ;;  %v10543_v62 = vld [vmem:[#allocation19_spill] sm:$0xff] }
 0x300   : > { %5811 = vmatprep.mubr.bf16.mxu0 %v7861_v42  ;;  %6100 = vmatprep.mubr.bf16.mxu1 %v7863_v8  ;;  %v7879_v8 = vcombine.high %v988_v31, %v996_v35  ;;  %v1011_v26 = vld [vmem:[%s8737_s28 + $0xce0] sm:$0xff] }
 0x301   : > { %10541 = vst [vmem:[#allocation17_spill] sm:$0xff] %v9917_v22 }
 0x302   : > { %v5275_v57 = vpop.f32.mrb[240].mxu0  ;;  %v5564_v30 = vpop.f32.mrb[240].mxu1 }
 0x303   : > { %v5276_v9 = vadd.f32 %v5275_v57, %v10542_v50  ;;  %v5277_v11 = vpop.f32.mrb[241].mxu0  ;;  %v5566_v46 = vpop.f32.mrb[241].mxu1  ;;  %v1012_v50 = vld [vmem:[%s8737_s28 + $0xce8] sm:$0xff] }
 0x304   : > { %v5278_v28 = vpop.f32.mrb[242].mxu0  ;;  %v5567_v44 = vpop.f32.mrb[242].mxu1  ;;  %v10546_v11 = vld [vmem:[#allocation20_spill] sm:$0xff] }
 0x305   : > { %v5279_v42 = vadd.f32 %v5278_v28, %v10543_v62  ;;  %v5280_v47 = vpop.f32.mrb[243].mxu0  ;;  %v9925_v22 = vadd.f32 %v5564_v30, %v5276_v9  ;;  %v5569_v55 = vpop.f32.mrb[243].mxu1  ;;  %v7878_v30 = vcombine.low %v988_v31, %v996_v35  ;;  %v1020_v35 = vld [vmem:[%s8737_s28 + $0xd28] sm:$0xff] }
 0x306   : > { %v7876_v47 = vcombine.low %v987_v32, %v995_v33  ;;  %v1019_v32 = vld [vmem:[%s8737_s28 + $0xd20] sm:$0xff] }
 0x307   : > { %10544 = vst [vmem:[#allocation18_spill] sm:$0xff] %v9925_v22  ;;  %5812 = vmatmul.mubr.bf16.gmra.mrb[92].mxu0 %v7860_v56  ;;  %v9927_v57 = vadd.f32 %v5567_v44, %v5279_v42  ;;  %6101 = vmatmul.mubr.bf16.gmra.mrb[92].mxu1 %v7862_v60  ;;  %v7893_v56 = vcombine.high %v1003_v37, %v1011_v26  ;;  %v10547_v60 = vld [vmem:[#allocation21_spill] sm:$0xff]  ;;  %v1027_v33 = vld [vmem:[%s8737_s28 + $0xd60] sm:$0xff] }
 0x308   : > { %5819 = vmatprep.mubr.bf16.mxu0 %v7877_v25  ;;  %6108 = vmatprep.mubr.bf16.mxu1 %v7879_v8  ;;  %v7895_v8 = vcombine.high %v1004_v63, %v1012_v50 }
 0x309   : > { %10545 = vst [vmem:[#allocation19_spill] sm:$0xff] %v9927_v57 }
 0x30a   : > { %v5283_v0 = vpop.f32.mrb[244].mxu0  ;;  %v5572_v28 = vpop.f32.mrb[244].mxu1 }
 0x30b   : > { %v5284_v46 = vadd.f32 %v5283_v0, %v10546_v11  ;;  %v5285_v62 = vpop.f32.mrb[245].mxu0  ;;  %v5574_v9 = vpop.f32.mrb[245].mxu1  ;;  %v1028_v11 = vld [vmem:[%s8737_s28 + $0xd68] sm:$0xff] }
 0x30c   : > { %v5286_v55 = vpop.f32.mrb[246].mxu0  ;;  %v5575_v42 = vpop.f32.mrb[246].mxu1  ;;  %v10550_v62 = vld [vmem:[#allocation22_spill] sm:$0xff] }
 0x30d   : > { %v5287_v25 = vadd.f32 %v5286_v55, %v10547_v60  ;;  %v5288_v44 = vpop.f32.mrb[247].mxu0  ;;  %v9935_v57 = vadd.f32 %v5572_v28, %v5284_v46  ;;  %v5577_v22 = vpop.f32.mrb[247].mxu1  ;;  %v7894_v28 = vcombine.low %v1004_v63, %v1012_v50  ;;  %v1036_v50 = vld [vmem:[%s8737_s28 + $0xda8] sm:$0xff] }
 0x30e   : > { %v7892_v44 = vcombine.low %v1003_v37, %v1011_v26  ;;  %v1035_v37 = vld [vmem:[%s8737_s28 + $0xda0] sm:$0xff] }
 0x30f   : > { %10548 = vst [vmem:[#allocation20_spill] sm:$0xff] %v9935_v57  ;;  %5820 = vmatmul.mubr.bf16.gmra.mrb[96].mxu0 %v7876_v47  ;;  %v9937_v0 = vadd.f32 %v5575_v42, %v5287_v25  ;;  %6109 = vmatmul.mubr.bf16.gmra.mrb[96].mxu1 %v7878_v30  ;;  %v7909_v47 = vcombine.high %v1019_v32, %v1027_v33  ;;  %v10551_v30 = vld [vmem:[#allocation23_spill] sm:$0xff] }
 0x310   : > { %5827 = vmatprep.mubr.bf16.mxu0 %v7893_v56  ;;  %6116 = vmatprep.mubr.bf16.mxu1 %v7895_v8  ;;  %v7911_v8 = vcombine.high %v1020_v35, %v1028_v11  ;;  %v1043_v26 = vld [vmem:[%s8737_s28 + $0xde0] sm:$0xff] }
 0x311   : > { %10549 = vst [vmem:[#allocation21_spill] sm:$0xff] %v9937_v0 }
 0x312   : > { %v5291_v31 = vpop.f32.mrb[248].mxu0  ;;  %v5580_v55 = vpop.f32.mrb[248].mxu1 }
 0x313   : > { %v5292_v9 = vadd.f32 %v5291_v31, %v10550_v62  ;;  %v5293_v60 = vpop.f32.mrb[249].mxu0  ;;  %v5582_v46 = vpop.f32.mrb[249].mxu1  ;;  %v1044_v62 = vld [vmem:[%s8737_s28 + $0xde8] sm:$0xff] }
 0x314   : > { %v5294_v22 = vpop.f32.mrb[250].mxu0  ;;  %v5583_v25 = vpop.f32.mrb[250].mxu1  ;;  %v10554_v60 = vld [vmem:[#allocation24_spill] sm:$0xff] }
 0x315   : > { %v5295_v56 = vadd.f32 %v5294_v22, %v10551_v30  ;;  %v5296_v42 = vpop.f32.mrb[251].mxu0  ;;  %v9945_v0 = vadd.f32 %v5580_v55, %v5292_v9  ;;  %v5585_v57 = vpop.f32.mrb[251].mxu1  ;;  %v7910_v55 = vcombine.low %v1020_v35, %v1028_v11  ;;  %v1052_v11 = vld [vmem:[%s8737_s28 + $0xe28] sm:$0xff] }
 0x316   : > { %v7908_v42 = vcombine.low %v1019_v32, %v1027_v33  ;;  %v1051_v32 = vld [vmem:[%s8737_s28 + $0xe20] sm:$0xff] }
 0x317   : > { %10552 = vst [vmem:[#allocation22_spill] sm:$0xff] %v9945_v0  ;;  %5828 = vmatmul.mubr.bf16.gmra.mrb[100].mxu0 %v7892_v44  ;;  %v9947_v31 = vadd.f32 %v5583_v25, %v5295_v56  ;;  %6117 = vmatmul.mubr.bf16.gmra.mrb[100].mxu1 %v7894_v28  ;;  %v7925_v44 = vcombine.high %v1035_v37, %v1043_v26  ;;  %v10555_v28 = vld [vmem:[#allocation25_spill] sm:$0xff]  ;;  %v1059_v33 = vld [vmem:[%s8737_s28 + $0xe60] sm:$0xff] }
 0x318   : > { %5835 = vmatprep.mubr.bf16.mxu0 %v7909_v47  ;;  %6124 = vmatprep.mubr.bf16.mxu1 %v7911_v8  ;;  %v7927_v8 = vcombine.high %v1036_v50, %v1044_v62 }
 0x319   : > { %10553 = vst [vmem:[#allocation23_spill] sm:$0xff] %v9947_v31 }
 0x31a   : > { %v5299_v63 = vpop.f32.mrb[252].mxu0  ;;  %v5588_v22 = vpop.f32.mrb[252].mxu1 }
 0x31b   : > { %v5300_v46 = vadd.f32 %v5299_v63, %v10554_v60  ;;  %v5301_v30 = vpop.f32.mrb[253].mxu0  ;;  %v5590_v9 = vpop.f32.mrb[253].mxu1  ;;  %v1060_v60 = vld [vmem:[%s8737_s28 + $0xe68] sm:$0xff] }
 0x31c   : > { %v5302_v57 = vpop.f32.mrb[254].mxu0  ;;  %v5591_v56 = vpop.f32.mrb[254].mxu1 }
 0x31d   : > { %v5303_v47 = vadd.f32 %v5302_v57, %v10555_v28  ;;  %v5304_v25 = vpop.f32.mrb[255].mxu0  ;;  %v9955_v31 = vadd.f32 %v5588_v22, %v5300_v46  ;;  %v5593_v0 = vpop.f32.mrb[255].mxu1  ;;  %v7924_v28 = vcombine.low %v1035_v37, %v1043_v26  ;;  %v7926_v22 = vcombine.low %v1036_v50, %v1044_v62  ;;  %v1067_v37 = vld [vmem:[%s8737_s28 + $0xea0] sm:$0xff]  ;;  %v1068_v62 = vld [vmem:[%s8737_s28 + $0xea8] sm:$0xff] }
 0x31e   : > { %v7943_v25 = vcombine.high %v1052_v11, %v1060_v60  ;;  %v1075_v26 = vld [vmem:[%s8737_s28 + $0xee0] sm:$0xff] }
 0x31f   : > { %5836 = vmatmul.mubr.bf16.gmra.mrb[104].mxu0 %v7908_v42  ;;  %v9957_v63 = vadd.f32 %v5591_v56, %v5303_v47  ;;  %6125 = vmatmul.mubr.bf16.gmra.mrb[104].mxu1 %v7910_v55  ;;  %v7941_v42 = vcombine.high %v1051_v32, %v1059_v33 }
 0x320   : > { %5843 = vmatprep.mubr.bf16.mxu0 %v7925_v44  ;;  %6132 = vmatprep.mubr.bf16.mxu1 %v7927_v8 }
 0x322   : > { %v5629_v35 = vpop.f32.mrb[0].mxu0  ;;  %v5918_v9 = vpop.f32.mrb[0].mxu1 }
 0x323   : > { %v5630_v30 = vadd.f32 %v5629_v35, %v9463_v20  ;;  %v5631_v57 = vpop.f32.mrb[1].mxu0  ;;  %v5920_v46 = vpop.f32.mrb[1].mxu1  ;;  %v1076_v35 = vld [vmem:[%s8737_s28 + $0xee8] sm:$0xff] }
 0x324   : > { %v5632_v0 = vpop.f32.mrb[2].mxu0  ;;  %v5921_v47 = vpop.f32.mrb[2].mxu1 }
 0x325   : > { %v9964_v55 = vadd.f32 %v5918_v9, %v5630_v30  ;;  %v5633_v44 = vadd.f32 %v5632_v0, %v9465_v43  ;;  %v5634_v56 = vpop.f32.mrb[3].mxu0  ;;  %v5923_v8 = vpop.f32.mrb[3].mxu1  ;;  %v7940_v43 = vcombine.low %v1051_v32, %v1059_v33  ;;  %v1083_v32 = vld [vmem:[%s8737_s28 + $0xf20] sm:$0xff] }
 0x326   : > { %v1091_v33 = vld [vmem:[%s8737_s28 + $0xf60] sm:$0xff] }
 0x327   : > { %v9967_v20 = vadd.f32 %v5921_v47, %v5633_v44  ;;  %5844 = vmatmul.mubr.bf16.gmra.mrb[108].mxu0 %v7924_v28  ;;  %6133 = vmatmul.mubr.bf16.gmra.mrb[108].mxu1 %v7926_v22  ;;  %v7942_v44 = vcombine.low %v1052_v11, %v1060_v60  ;;  %v7957_v28 = vcombine.high %v1067_v37, %v1075_v26  ;;  %v1084_v60 = vld [vmem:[%s8737_s28 + $0xf28] sm:$0xff] }
 0x328   : > { %5851 = vmatprep.mubr.bf16.mxu0 %v7941_v42  ;;  %6140 = vmatprep.mubr.bf16.mxu1 %v7943_v25  ;;  %v7959_v25 = vcombine.high %v1068_v62, %v1076_v35 }
 0x32a   : > { %v5637_v50 = vpop.f32.mrb[4].mxu0  ;;  %v5926_v9 = vpop.f32.mrb[4].mxu1 }
 0x32b   : > { %v5638_v30 = vadd.f32 %v5637_v50, %v9473_v41  ;;  %v5639_v57 = vpop.f32.mrb[5].mxu0  ;;  %v5928_v46 = vpop.f32.mrb[5].mxu1  ;;  %v1092_v50 = vld [vmem:[%s8737_s28 + $0xf68] sm:$0xff] }
 0x32c   : > { %v5640_v0 = vpop.f32.mrb[6].mxu0  ;;  %v5929_v47 = vpop.f32.mrb[6].mxu1 }
 0x32d   : > { %v9974_v22 = vadd.f32 %v5926_v9, %v5638_v30  ;;  %v5641_v42 = vadd.f32 %v5640_v0, %v9475_v61  ;;  %v5642_v56 = vpop.f32.mrb[7].mxu0  ;;  %v5931_v8 = vpop.f32.mrb[7].mxu1  ;;  %v7956_v61 = vcombine.low %v1067_v37, %v1075_v26  ;;  %v1099_v37 = vld [vmem:[%s8737_s28 + $0xfa0] sm:$0xff] }
 0x32e   : > { %v1107_v26 = vld [vmem:[%s8737_s28 + $0xfe0] sm:$0xff] }
 0x32f   : > { %v9977_v41 = vadd.f32 %v5929_v47, %v5641_v42  ;;  %5852 = vmatmul.mubr.bf16.gmra.mrb[112].mxu0 %v7940_v43  ;;  %6141 = vmatmul.mubr.bf16.gmra.mrb[112].mxu1 %v7942_v44  ;;  %v7958_v42 = vcombine.low %v1068_v62, %v1076_v35  ;;  %v7973_v43 = vcombine.high %v1083_v32, %v1091_v33  ;;  %v1100_v35 = vld [vmem:[%s8737_s28 + $0xfa8] sm:$0xff] }
 0x330   : > { %5859 = vmatprep.mubr.bf16.mxu0 %v7957_v28  ;;  %6148 = vmatprep.mubr.bf16.mxu1 %v7959_v25  ;;  %v7975_v25 = vcombine.high %v1084_v60, %v1092_v50 }
 0x332   : > { %v5645_v11 = vpop.f32.mrb[8].mxu0  ;;  %v5934_v9 = vpop.f32.mrb[8].mxu1 }
 0x333   : > { %v5646_v30 = vadd.f32 %v5645_v11, %v9483_v23  ;;  %v5647_v57 = vpop.f32.mrb[9].mxu0  ;;  %v5936_v46 = vpop.f32.mrb[9].mxu1  ;;  %v1108_v11 = vld [vmem:[%s8737_s28 + $0xfe8] sm:$0xff] }
 0x334   : > { %v5648_v0 = vpop.f32.mrb[10].mxu0  ;;  %v5937_v47 = vpop.f32.mrb[10].mxu1 }
 0x335   : > { %v9984_v44 = vadd.f32 %v5934_v9, %v5646_v30  ;;  %v5649_v28 = vadd.f32 %v5648_v0, %v9485_v16  ;;  %v5650_v56 = vpop.f32.mrb[11].mxu0  ;;  %v5939_v8 = vpop.f32.mrb[11].mxu1  ;;  %v7972_v16 = vcombine.low %v1083_v32, %v1091_v33  ;;  %v605_v32 = vld [vmem:[%s8737_s28 + $0x30] sm:$0xff] }
 0x336   : > { %v613_v33 = vld [vmem:[%s8737_s28 + $0x70] sm:$0xff] }
 0x337   : > { %v9987_v23 = vadd.f32 %v5937_v47, %v5649_v28  ;;  %5860 = vmatmul.mubr.bf16.gmra.mrb[116].mxu0 %v7956_v61  ;;  %6149 = vmatmul.mubr.bf16.gmra.mrb[116].mxu1 %v7958_v42  ;;  %v7974_v28 = vcombine.low %v1084_v60, %v1092_v50  ;;  %v7989_v61 = vcombine.high %v1099_v37, %v1107_v26  ;;  %v606_v50 = vld [vmem:[%s8737_s28 + $0x38] sm:$0xff] }
 0x338   : > { %5867 = vmatprep.mubr.bf16.mxu0 %v7973_v43  ;;  %6156 = vmatprep.mubr.bf16.mxu1 %v7975_v25  ;;  %v7991_v25 = vcombine.high %v1100_v35, %v1108_v11 }
 0x33a   : > { %v5653_v62 = vpop.f32.mrb[12].mxu0  ;;  %v5942_v9 = vpop.f32.mrb[12].mxu1 }
 0x33b   : > { %v5654_v30 = vadd.f32 %v5653_v62, %v9493_v58  ;;  %v5655_v57 = vpop.f32.mrb[13].mxu0  ;;  %v5944_v46 = vpop.f32.mrb[13].mxu1  ;;  %v614_v62 = vld [vmem:[%s8737_s28 + $0x78] sm:$0xff] }
 0x33c   : > { %v5656_v0 = vpop.f32.mrb[14].mxu0  ;;  %v5945_v47 = vpop.f32.mrb[14].mxu1 }
 0x33d   : > { %v9994_v42 = vadd.f32 %v5942_v9, %v5654_v30  ;;  %v5657_v43 = vadd.f32 %v5656_v0, %v9495_v34  ;;  %v5658_v56 = vpop.f32.mrb[15].mxu0  ;;  %v5947_v8 = vpop.f32.mrb[15].mxu1  ;;  %v7988_v34 = vcombine.low %v1099_v37, %v1107_v26  ;;  %v621_v37 = vld [vmem:[%s8737_s28 + $0xb0] sm:$0xff] }
 0x33e   : > { %v629_v26 = vld [vmem:[%s8737_s28 + $0xf0] sm:$0xff] }
 0x33f   : > { %v9997_v58 = vadd.f32 %v5945_v47, %v5657_v43  ;;  %5868 = vmatmul.mubr.bf16.gmra.mrb[120].mxu0 %v7972_v16  ;;  %6157 = vmatmul.mubr.bf16.gmra.mrb[120].mxu1 %v7974_v28  ;;  %v7990_v43 = vcombine.low %v1100_v35, %v1108_v11  ;;  %v7497_v16 = vcombine.high %v605_v32, %v613_v33  ;;  %v622_v11 = vld [vmem:[%s8737_s28 + $0xb8] sm:$0xff] }
 0x340   : > { %5875 = vmatprep.mubr.bf16.mxu0 %v7989_v61  ;;  %6164 = vmatprep.mubr.bf16.mxu1 %v7991_v25  ;;  %v7499_v25 = vcombine.high %v606_v50, %v614_v62 }
 0x342   : > { %v5661_v60 = vpop.f32.mrb[16].mxu0  ;;  %v5950_v9 = vpop.f32.mrb[16].mxu1 }
 0x343   : > { %v5662_v30 = vadd.f32 %v5661_v60, %v9503_v1  ;;  %v5663_v57 = vpop.f32.mrb[17].mxu0  ;;  %v5952_v46 = vpop.f32.mrb[17].mxu1  ;;  %v630_v60 = vld [vmem:[%s8737_s28 + $0xf8] sm:$0xff] }
 0x344   : > { %v5664_v0 = vpop.f32.mrb[18].mxu0  ;;  %v5953_v47 = vpop.f32.mrb[18].mxu1 }
 0x345   : > { %v10004_v28 = vadd.f32 %v5950_v9, %v5662_v30  ;;  %v5665_v61 = vadd.f32 %v5664_v0, %v9505_v54  ;;  %v5666_v56 = vpop.f32.mrb[19].mxu0  ;;  %v5955_v8 = vpop.f32.mrb[19].mxu1  ;;  %v7496_v54 = vcombine.low %v605_v32, %v613_v33  ;;  %v637_v32 = vld [vmem:[%s8737_s28 + $0x130] sm:$0xff] }
 0x346   : > { %v7515_v8 = vcombine.high %v622_v11, %v630_v60  ;;  %v645_v33 = vld [vmem:[%s8737_s28 + $0x170] sm:$0xff] }
 0x347   : > { %v10007_v1 = vadd.f32 %v5953_v47, %v5665_v61  ;;  %5876 = vmatmul.mubr.bf16.gmra.mrb[124].mxu0 %v7988_v34  ;;  %6165 = vmatmul.mubr.bf16.gmra.mrb[124].mxu1 %v7990_v43  ;;  %v7498_v61 = vcombine.low %v606_v50, %v614_v62  ;;  %v7513_v34 = vcombine.high %v621_v37, %v629_v26  ;;  %v638_v62 = vld [vmem:[%s8737_s28 + $0x138] sm:$0xff] }
 0x348   : > { %6205 = vmatprep.mubr.bf16.mxu0 %v7497_v16  ;;  %6494 = vmatprep.mubr.bf16.mxu1 %v7499_v25  ;;  %v10557_v16 = vld [vmem:[#allocation26_spill] sm:$0xff] }
 0x349   : > { %10556 = vst [vmem:[#allocation24_spill] sm:$0xff] %v10007_v1 }
 0x34a   : > { %v5669_v35 = vpop.f32.mrb[20].mxu0  ;;  %v5958_v9 = vpop.f32.mrb[20].mxu1 }
 0x34b   : > { %v5670_v30 = vadd.f32 %v5669_v35, %v9519_v14  ;;  %v5671_v57 = vpop.f32.mrb[21].mxu0  ;;  %v5960_v46 = vpop.f32.mrb[21].mxu1  ;;  %v646_v35 = vld [vmem:[%s8737_s28 + $0x178] sm:$0xff] }
 0x34c   : > { %v5672_v0 = vpop.f32.mrb[22].mxu0  ;;  %v5961_v56 = vpop.f32.mrb[22].mxu1  ;;  %v7512_v46 = vcombine.low %v621_v37, %v629_v26  ;;  %v653_v37 = vld [vmem:[%s8737_s28 + $0x1b0] sm:$0xff] }
 0x34d   : > { %v10014_v43 = vadd.f32 %v5958_v9, %v5670_v30  ;;  %v5673_v47 = vadd.f32 %v5672_v0, %v10557_v16  ;;  %v5674_v25 = vpop.f32.mrb[23].mxu0  ;;  %v5963_v1 = vpop.f32.mrb[23].mxu1  ;;  %v7514_v16 = vcombine.low %v622_v11, %v630_v60  ;;  %v661_v26 = vld [vmem:[%s8737_s28 + $0x1f0] sm:$0xff]  ;;  %v654_v60 = vld [vmem:[%s8737_s28 + $0x1b8] sm:$0xff] }
 0x34e   : > { %v7531_v25 = vcombine.high %v638_v62, %v646_v35 }
 0x34f   : > { %v10017_v14 = vadd.f32 %v5961_v56, %v5673_v47  ;;  %6206 = vmatmul.mubr.bf16.vlgmr.msra.gmra.mrb[128].mxu0 %v7496_v54  ;;  %6495 = vmatmul.mubr.bf16.vlgmr.msra.gmra.mrb[128].mxu1 %v7498_v61  ;;  %v7529_v54 = vcombine.high %v637_v32, %v645_v33 }
 0x350   : > { %6213 = vmatprep.mubr.bf16.mxu0 %v7513_v34  ;;  %6502 = vmatprep.mubr.bf16.mxu1 %v7515_v8 }
 0x352   : > { %v5677_v50 = vpop.f32.mrb[24].mxu0  ;;  %v5966_v9 = vpop.f32.mrb[24].mxu1 }
 0x353   : > { %v5678_v30 = vadd.f32 %v5677_v50, %v9547_v15  ;;  %v5679_v57 = vpop.f32.mrb[25].mxu0  ;;  %v5968_v0 = vpop.f32.mrb[25].mxu1  ;;  %v662_v50 = vld [vmem:[%s8737_s28 + $0x1f8] sm:$0xff] }
 0x354   : > { %v5680_v1 = vpop.f32.mrb[26].mxu0  ;;  %v5969_v47 = vpop.f32.mrb[26].mxu1 }
 0x355   : > { %v10024_v61 = vadd.f32 %v5966_v9, %v5678_v30  ;;  %v5681_v34 = vadd.f32 %v5680_v1, %v9553_v5  ;;  %v5682_v56 = vpop.f32.mrb[27].mxu0  ;;  %v5971_v8 = vpop.f32.mrb[27].mxu1  ;;  %v7528_v5 = vcombine.low %v637_v32, %v645_v33  ;;  %v669_v32 = vld [vmem:[%s8737_s28 + $0x230] sm:$0xff] }
 0x356   : > { %v677_v33 = vld [vmem:[%s8737_s28 + $0x270] sm:$0xff] }
 0x357   : > { %v10027_v15 = vadd.f32 %v5969_v47, %v5681_v34  ;;  %6214 = vmatmul.mubr.bf16.gmra.mrb[132].mxu0 %v7512_v46  ;;  %6503 = vmatmul.mubr.bf16.gmra.mrb[132].mxu1 %v7514_v16  ;;  %v7530_v34 = vcombine.low %v638_v62, %v646_v35  ;;  %v7545_v46 = vcombine.high %v653_v37, %v661_v26  ;;  %v670_v35 = vld [vmem:[%s8737_s28 + $0x238] sm:$0xff] }
 0x358   : > { %6221 = vmatprep.mubr.bf16.mxu0 %v7529_v54  ;;  %6510 = vmatprep.mubr.bf16.mxu1 %v7531_v25  ;;  %v7547_v25 = vcombine.high %v654_v60, %v662_v50 }
 0x35a   : > { %v5685_v11 = vpop.f32.mrb[28].mxu0  ;;  %v5974_v9 = vpop.f32.mrb[28].mxu1 }
 0x35b   : > { %v5686_v30 = vadd.f32 %v5685_v11, %v9586_v59  ;;  %v5687_v57 = vpop.f32.mrb[29].mxu0  ;;  %v5976_v0 = vpop.f32.mrb[29].mxu1  ;;  %v678_v11 = vld [vmem:[%s8737_s28 + $0x278] sm:$0xff] }
 0x35c   : > { %v5688_v1 = vpop.f32.mrb[30].mxu0  ;;  %v5977_v47 = vpop.f32.mrb[30].mxu1 }
 0x35d   : > { %v10034_v16 = vadd.f32 %v5974_v9, %v5686_v30  ;;  %v5689_v54 = vadd.f32 %v5688_v1, %v9593_v13  ;;  %v5690_v56 = vpop.f32.mrb[31].mxu0  ;;  %v5979_v8 = vpop.f32.mrb[31].mxu1  ;;  %v7544_v13 = vcombine.low %v653_v37, %v661_v26  ;;  %v685_v37 = vld [vmem:[%s8737_s28 + $0x2b0] sm:$0xff] }
 0x35e   : > { %v693_v26 = vld [vmem:[%s8737_s28 + $0x2f0] sm:$0xff] }
 0x35f   : > { %v10037_v59 = vadd.f32 %v5977_v47, %v5689_v54  ;;  %6222 = vmatmul.mubr.bf16.gmra.mrb[136].mxu0 %v7528_v5  ;;  %6511 = vmatmul.mubr.bf16.gmra.mrb[136].mxu1 %v7530_v34  ;;  %v7546_v54 = vcombine.low %v654_v60, %v662_v50  ;;  %v7561_v5 = vcombine.high %v669_v32, %v677_v33  ;;  %v686_v50 = vld [vmem:[%s8737_s28 + $0x2b8] sm:$0xff] }
 0x360   : > { %6229 = vmatprep.mubr.bf16.mxu0 %v7545_v46  ;;  %6518 = vmatprep.mubr.bf16.mxu1 %v7547_v25  ;;  %v7563_v25 = vcombine.high %v670_v35, %v678_v11 }
 0x362   : > { %v5693_v62 = vpop.f32.mrb[32].mxu0  ;;  %v5982_v9 = vpop.f32.mrb[32].mxu1 }
 0x363   : > { %v5694_v30 = vadd.f32 %v5693_v62, %v9628_v21  ;;  %v5695_v57 = vpop.f32.mrb[33].mxu0  ;;  %v5984_v0 = vpop.f32.mrb[33].mxu1  ;;  %v694_v62 = vld [vmem:[%s8737_s28 + $0x2f8] sm:$0xff] }
 0x364   : > { %v5696_v1 = vpop.f32.mrb[34].mxu0  ;;  %v5985_v47 = vpop.f32.mrb[34].mxu1 }
 0x365   : > { %v10044_v34 = vadd.f32 %v5982_v9, %v5694_v30  ;;  %v5697_v46 = vadd.f32 %v5696_v1, %v9635_v48  ;;  %v5698_v56 = vpop.f32.mrb[35].mxu0  ;;  %v5987_v8 = vpop.f32.mrb[35].mxu1  ;;  %v7560_v48 = vcombine.low %v669_v32, %v677_v33  ;;  %v701_v32 = vld [vmem:[%s8737_s28 + $0x330] sm:$0xff] }
 0x366   : > { %v709_v33 = vld [vmem:[%s8737_s28 + $0x370] sm:$0xff] }
 0x367   : > { %v10047_v21 = vadd.f32 %v5985_v47, %v5697_v46  ;;  %6230 = vmatmul.mubr.bf16.gmra.mrb[140].mxu0 %v7544_v13  ;;  %6519 = vmatmul.mubr.bf16.gmra.mrb[140].mxu1 %v7546_v54  ;;  %v7562_v46 = vcombine.low %v670_v35, %v678_v11  ;;  %v7577_v13 = vcombine.high %v685_v37, %v693_v26  ;;  %v702_v11 = vld [vmem:[%s8737_s28 + $0x338] sm:$0xff] }
 0x368   : > { %6237 = vmatprep.mubr.bf16.mxu0 %v7561_v5  ;;  %6526 = vmatprep.mubr.bf16.mxu1 %v7563_v25  ;;  %v7579_v25 = vcombine.high %v686_v50, %v694_v62 }
 0x36a   : > { %v5701_v60 = vpop.f32.mrb[36].mxu0  ;;  %v5990_v9 = vpop.f32.mrb[36].mxu1 }
 0x36b   : > { %v5702_v30 = vadd.f32 %v5701_v60, %v9670_v4  ;;  %v5703_v57 = vpop.f32.mrb[37].mxu0  ;;  %v5992_v0 = vpop.f32.mrb[37].mxu1  ;;  %v710_v60 = vld [vmem:[%s8737_s28 + $0x378] sm:$0xff] }
 0x36c   : > { %v5704_v1 = vpop.f32.mrb[38].mxu0  ;;  %v5993_v47 = vpop.f32.mrb[38].mxu1 }
 0x36d   : > { %v10054_v54 = vadd.f32 %v5990_v9, %v5702_v30  ;;  %v5705_v5 = vadd.f32 %v5704_v1, %v9677_v6  ;;  %v5706_v56 = vpop.f32.mrb[39].mxu0  ;;  %v5995_v8 = vpop.f32.mrb[39].mxu1  ;;  %v7576_v6 = vcombine.low %v685_v37, %v693_v26  ;;  %v717_v37 = vld [vmem:[%s8737_s28 + $0x3b0] sm:$0xff] }
 0x36e   : > { %v725_v26 = vld [vmem:[%s8737_s28 + $0x3f0] sm:$0xff] }
 0x36f   : > { %v10057_v4 = vadd.f32 %v5993_v47, %v5705_v5  ;;  %6238 = vmatmul.mubr.bf16.gmra.mrb[144].mxu0 %v7560_v48  ;;  %6527 = vmatmul.mubr.bf16.gmra.mrb[144].mxu1 %v7562_v46  ;;  %v7578_v5 = vcombine.low %v686_v50, %v694_v62  ;;  %v7593_v48 = vcombine.high %v701_v32, %v709_v33  ;;  %v718_v62 = vld [vmem:[%s8737_s28 + $0x3b8] sm:$0xff] }
 0x370   : > { %6245 = vmatprep.mubr.bf16.mxu0 %v7577_v13  ;;  %6534 = vmatprep.mubr.bf16.mxu1 %v7579_v25  ;;  %v7595_v25 = vcombine.high %v702_v11, %v710_v60 }
 0x372   : > { %v5709_v35 = vpop.f32.mrb[40].mxu0  ;;  %v5998_v9 = vpop.f32.mrb[40].mxu1 }
 0x373   : > { %v5710_v30 = vadd.f32 %v5709_v35, %v9700_v10  ;;  %v5711_v57 = vpop.f32.mrb[41].mxu0  ;;  %v6000_v0 = vpop.f32.mrb[41].mxu1  ;;  %v726_v35 = vld [vmem:[%s8737_s28 + $0x3f8] sm:$0xff] }
 0x374   : > { %v5712_v1 = vpop.f32.mrb[42].mxu0  ;;  %v6001_v47 = vpop.f32.mrb[42].mxu1 }
 0x375   : > { %v10064_v46 = vadd.f32 %v5998_v9, %v5710_v30  ;;  %v5713_v13 = vadd.f32 %v5712_v1, %v9707_v51  ;;  %v5714_v56 = vpop.f32.mrb[43].mxu0  ;;  %v6003_v8 = vpop.f32.mrb[43].mxu1  ;;  %v7592_v51 = vcombine.low %v701_v32, %v709_v33  ;;  %v733_v32 = vld [vmem:[%s8737_s28 + $0x430] sm:$0xff] }
 0x376   : > { %v741_v33 = vld [vmem:[%s8737_s28 + $0x470] sm:$0xff] }
 0x377   : > { %v10067_v10 = vadd.f32 %v6001_v47, %v5713_v13  ;;  %6246 = vmatmul.mubr.bf16.gmra.mrb[148].mxu0 %v7576_v6  ;;  %6535 = vmatmul.mubr.bf16.gmra.mrb[148].mxu1 %v7578_v5  ;;  %v7594_v13 = vcombine.low %v702_v11, %v710_v60  ;;  %v7609_v6 = vcombine.high %v717_v37, %v725_v26  ;;  %v734_v60 = vld [vmem:[%s8737_s28 + $0x438] sm:$0xff] }
 0x378   : > { %6253 = vmatprep.mubr.bf16.mxu0 %v7593_v48  ;;  %6542 = vmatprep.mubr.bf16.mxu1 %v7595_v25  ;;  %v7611_v25 = vcombine.high %v718_v62, %v726_v35 }
 0x37a   : > { %v5717_v50 = vpop.f32.mrb[44].mxu0  ;;  %v6006_v9 = vpop.f32.mrb[44].mxu1 }
 0x37b   : > { %v5718_v30 = vadd.f32 %v5717_v50, %v9717_v7  ;;  %v5719_v57 = vpop.f32.mrb[45].mxu0  ;;  %v6008_v0 = vpop.f32.mrb[45].mxu1  ;;  %v742_v50 = vld [vmem:[%s8737_s28 + $0x478] sm:$0xff] }
 0x37c   : > { %v5720_v1 = vpop.f32.mrb[46].mxu0  ;;  %v6009_v47 = vpop.f32.mrb[46].mxu1 }
 0x37d   : > { %v10074_v5 = vadd.f32 %v6006_v9, %v5718_v30  ;;  %v5721_v48 = vadd.f32 %v5720_v1, %v9719_v39  ;;  %v5722_v56 = vpop.f32.mrb[47].mxu0  ;;  %v6011_v8 = vpop.f32.mrb[47].mxu1  ;;  %v7608_v39 = vcombine.low %v717_v37, %v725_v26  ;;  %v749_v37 = vld [vmem:[%s8737_s28 + $0x4b0] sm:$0xff] }
 0x37e   : > { %v757_v26 = vld [vmem:[%s8737_s28 + $0x4f0] sm:$0xff] }
 0x37f   : > { %v10077_v7 = vadd.f32 %v6009_v47, %v5721_v48  ;;  %6254 = vmatmul.mubr.bf16.gmra.mrb[152].mxu0 %v7592_v51  ;;  %6543 = vmatmul.mubr.bf16.gmra.mrb[152].mxu1 %v7594_v13  ;;  %v7610_v48 = vcombine.low %v718_v62, %v726_v35  ;;  %v7625_v51 = vcombine.high %v733_v32, %v741_v33  ;;  %v750_v35 = vld [vmem:[%s8737_s28 + $0x4b8] sm:$0xff] }
 0x380   : > { %6261 = vmatprep.mubr.bf16.mxu0 %v7609_v6  ;;  %6550 = vmatprep.mubr.bf16.mxu1 %v7611_v25  ;;  %v7627_v25 = vcombine.high %v734_v60, %v742_v50 }
 0x382   : > { %v5725_v11 = vpop.f32.mrb[48].mxu0  ;;  %v6014_v9 = vpop.f32.mrb[48].mxu1 }
 0x383   : > { %v5726_v30 = vadd.f32 %v5725_v11, %v9734_v17  ;;  %v5727_v57 = vpop.f32.mrb[49].mxu0  ;;  %v6016_v0 = vpop.f32.mrb[49].mxu1  ;;  %v758_v11 = vld [vmem:[%s8737_s28 + $0x4f8] sm:$0xff] }
 0x384   : > { %v5728_v1 = vpop.f32.mrb[50].mxu0  ;;  %v6017_v47 = vpop.f32.mrb[50].mxu1 }
 0x385   : > { %v10084_v13 = vadd.f32 %v6014_v9, %v5726_v30  ;;  %v5729_v6 = vadd.f32 %v5728_v1, %v9737_v53  ;;  %v5730_v56 = vpop.f32.mrb[51].mxu0  ;;  %v6019_v8 = vpop.f32.mrb[51].mxu1  ;;  %v7624_v53 = vcombine.low %v733_v32, %v741_v33  ;;  %v765_v32 = vld [vmem:[%s8737_s28 + $0x530] sm:$0xff] }
 0x386   : > { %v773_v33 = vld [vmem:[%s8737_s28 + $0x570] sm:$0xff] }
 0x387   : > { %v10087_v17 = vadd.f32 %v6017_v47, %v5729_v6  ;;  %6262 = vmatmul.mubr.bf16.gmra.mrb[156].mxu0 %v7608_v39  ;;  %6551 = vmatmul.mubr.bf16.gmra.mrb[156].mxu1 %v7610_v48  ;;  %v7626_v6 = vcombine.low %v734_v60, %v742_v50  ;;  %v7641_v39 = vcombine.high %v749_v37, %v757_v26  ;;  %v766_v50 = vld [vmem:[%s8737_s28 + $0x538] sm:$0xff] }
 0x388   : > { %6269 = vmatprep.mubr.bf16.mxu0 %v7625_v51  ;;  %6558 = vmatprep.mubr.bf16.mxu1 %v7627_v25  ;;  %v7643_v25 = vcombine.high %v750_v35, %v758_v11 }
 0x38a   : > { %v5733_v62 = vpop.f32.mrb[52].mxu0  ;;  %v6022_v9 = vpop.f32.mrb[52].mxu1 }
 0x38b   : > { %v5734_v30 = vadd.f32 %v5733_v62, %v9745_v12  ;;  %v5735_v57 = vpop.f32.mrb[53].mxu0  ;;  %v6024_v0 = vpop.f32.mrb[53].mxu1  ;;  %v774_v62 = vld [vmem:[%s8737_s28 + $0x578] sm:$0xff] }
 0x38c   : > { %v5736_v1 = vpop.f32.mrb[54].mxu0  ;;  %v6025_v47 = vpop.f32.mrb[54].mxu1 }
 0x38d   : > { %v10094_v48 = vadd.f32 %v6022_v9, %v5734_v30  ;;  %v5737_v51 = vadd.f32 %v5736_v1, %v9747_v49  ;;  %v5738_v56 = vpop.f32.mrb[55].mxu0  ;;  %v6027_v8 = vpop.f32.mrb[55].mxu1  ;;  %v7640_v49 = vcombine.low %v749_v37, %v757_v26  ;;  %v781_v37 = vld [vmem:[%s8737_s28 + $0x5b0] sm:$0xff] }
 0x38e   : > { %v789_v26 = vld [vmem:[%s8737_s28 + $0x5f0] sm:$0xff] }
 0x38f   : > { %v10097_v12 = vadd.f32 %v6025_v47, %v5737_v51  ;;  %6270 = vmatmul.mubr.bf16.gmra.mrb[160].mxu0 %v7624_v53  ;;  %6559 = vmatmul.mubr.bf16.gmra.mrb[160].mxu1 %v7626_v6  ;;  %v7642_v51 = vcombine.low %v750_v35, %v758_v11  ;;  %v7657_v53 = vcombine.high %v765_v32, %v773_v33  ;;  %v782_v11 = vld [vmem:[%s8737_s28 + $0x5b8] sm:$0xff] }
 0x390   : > { %6277 = vmatprep.mubr.bf16.mxu0 %v7641_v39  ;;  %6566 = vmatprep.mubr.bf16.mxu1 %v7643_v25  ;;  %v7659_v25 = vcombine.high %v766_v50, %v774_v62 }
 0x392   : > { %v5741_v60 = vpop.f32.mrb[56].mxu0  ;;  %v6030_v9 = vpop.f32.mrb[56].mxu1 }
 0x393   : > { %v5742_v30 = vadd.f32 %v5741_v60, %v9762_v36  ;;  %v5743_v57 = vpop.f32.mrb[57].mxu0  ;;  %v6032_v0 = vpop.f32.mrb[57].mxu1  ;;  %v790_v60 = vld [vmem:[%s8737_s28 + $0x5f8] sm:$0xff] }
 0x394   : > { %v5744_v1 = vpop.f32.mrb[58].mxu0  ;;  %v6033_v47 = vpop.f32.mrb[58].mxu1 }
 0x395   : > { %v10104_v6 = vadd.f32 %v6030_v9, %v5742_v30  ;;  %v5745_v39 = vadd.f32 %v5744_v1, %v9765_v24  ;;  %v5746_v56 = vpop.f32.mrb[59].mxu0  ;;  %v6035_v8 = vpop.f32.mrb[59].mxu1  ;;  %v7656_v24 = vcombine.low %v765_v32, %v773_v33  ;;  %v797_v32 = vld [vmem:[%s8737_s28 + $0x630] sm:$0xff] }
 0x396   : > { %v805_v33 = vld [vmem:[%s8737_s28 + $0x670] sm:$0xff] }
 0x397   : > { %v10107_v36 = vadd.f32 %v6033_v47, %v5745_v39  ;;  %6278 = vmatmul.mubr.bf16.gmra.mrb[164].mxu0 %v7640_v49  ;;  %6567 = vmatmul.mubr.bf16.gmra.mrb[164].mxu1 %v7642_v51  ;;  %v7658_v39 = vcombine.low %v766_v50, %v774_v62  ;;  %v7673_v49 = vcombine.high %v781_v37, %v789_v26  ;;  %v798_v62 = vld [vmem:[%s8737_s28 + $0x638] sm:$0xff] }
 0x398   : > { %6285 = vmatprep.mubr.bf16.mxu0 %v7657_v53  ;;  %6574 = vmatprep.mubr.bf16.mxu1 %v7659_v25  ;;  %v7675_v25 = vcombine.high %v782_v11, %v790_v60 }
 0x39a   : > { %v5749_v35 = vpop.f32.mrb[60].mxu0  ;;  %v6038_v9 = vpop.f32.mrb[60].mxu1 }
 0x39b   : > { %v5750_v30 = vadd.f32 %v5749_v35, %v9773_v19  ;;  %v5751_v57 = vpop.f32.mrb[61].mxu0  ;;  %v6040_v0 = vpop.f32.mrb[61].mxu1  ;;  %v806_v35 = vld [vmem:[%s8737_s28 + $0x678] sm:$0xff] }
 0x39c   : > { %v5752_v1 = vpop.f32.mrb[62].mxu0  ;;  %v6041_v47 = vpop.f32.mrb[62].mxu1 }
 0x39d   : > { %v10114_v51 = vadd.f32 %v6038_v9, %v5750_v30  ;;  %v5753_v53 = vadd.f32 %v5752_v1, %v9775_v52  ;;  %v5754_v56 = vpop.f32.mrb[63].mxu0  ;;  %v6043_v8 = vpop.f32.mrb[63].mxu1  ;;  %v7672_v52 = vcombine.low %v781_v37, %v789_v26  ;;  %v813_v37 = vld [vmem:[%s8737_s28 + $0x6b0] sm:$0xff] }
 0x39e   : > { %v821_v26 = vld [vmem:[%s8737_s28 + $0x6f0] sm:$0xff] }
 0x39f   : > { %v10117_v19 = vadd.f32 %v6041_v47, %v5753_v53  ;;  %6286 = vmatmul.mubr.bf16.gmra.mrb[168].mxu0 %v7656_v24  ;;  %6575 = vmatmul.mubr.bf16.gmra.mrb[168].mxu1 %v7658_v39  ;;  %v7674_v53 = vcombine.low %v782_v11, %v790_v60  ;;  %v7689_v24 = vcombine.high %v797_v32, %v805_v33  ;;  %v814_v60 = vld [vmem:[%s8737_s28 + $0x6b8] sm:$0xff] }
 0x3a0   : > { %6293 = vmatprep.mubr.bf16.mxu0 %v7673_v49  ;;  %6582 = vmatprep.mubr.bf16.mxu1 %v7675_v25  ;;  %v7691_v25 = vcombine.high %v798_v62, %v806_v35 }
 0x3a2   : > { %v5757_v50 = vpop.f32.mrb[64].mxu0  ;;  %v6046_v9 = vpop.f32.mrb[64].mxu1 }
 0x3a3   : > { %v5758_v30 = vadd.f32 %v5757_v50, %v9790_v45  ;;  %v5759_v57 = vpop.f32.mrb[65].mxu0  ;;  %v6048_v0 = vpop.f32.mrb[65].mxu1  ;;  %v822_v50 = vld [vmem:[%s8737_s28 + $0x6f8] sm:$0xff] }
 0x3a4   : > { %v5760_v1 = vpop.f32.mrb[66].mxu0  ;;  %v6049_v47 = vpop.f32.mrb[66].mxu1 }
 0x3a5   : > { %v10124_v39 = vadd.f32 %v6046_v9, %v5758_v30  ;;  %v5761_v49 = vadd.f32 %v5760_v1, %v9792_v29  ;;  %v5762_v56 = vpop.f32.mrb[67].mxu0  ;;  %v6051_v8 = vpop.f32.mrb[67].mxu1  ;;  %v7688_v29 = vcombine.low %v797_v32, %v805_v33  ;;  %v829_v32 = vld [vmem:[%s8737_s28 + $0x730] sm:$0xff] }
 0x3a6   : > { %v837_v33 = vld [vmem:[%s8737_s28 + $0x770] sm:$0xff] }
 0x3a7   : > { %v10127_v45 = vadd.f32 %v6049_v47, %v5761_v49  ;;  %6294 = vmatmul.mubr.bf16.gmra.mrb[172].mxu0 %v7672_v52  ;;  %6583 = vmatmul.mubr.bf16.gmra.mrb[172].mxu1 %v7674_v53  ;;  %v7690_v49 = vcombine.low %v798_v62, %v806_v35  ;;  %v7705_v52 = vcombine.high %v813_v37, %v821_v26  ;;  %v830_v35 = vld [vmem:[%s8737_s28 + $0x738] sm:$0xff] }
 0x3a8   : > { %6301 = vmatprep.mubr.bf16.mxu0 %v7689_v24  ;;  %6590 = vmatprep.mubr.bf16.mxu1 %v7691_v25  ;;  %v7707_v25 = vcombine.high %v814_v60, %v822_v50 }
 0x3aa   : > { %v5765_v11 = vpop.f32.mrb[68].mxu0  ;;  %v6054_v9 = vpop.f32.mrb[68].mxu1 }
 0x3ab   : > { %v5766_v30 = vadd.f32 %v5765_v11, %v9801_v27  ;;  %v5767_v57 = vpop.f32.mrb[69].mxu0  ;;  %v6056_v0 = vpop.f32.mrb[69].mxu1  ;;  %v838_v11 = vld [vmem:[%s8737_s28 + $0x778] sm:$0xff] }
 0x3ac   : > { %v5768_v1 = vpop.f32.mrb[70].mxu0  ;;  %v6057_v47 = vpop.f32.mrb[70].mxu1 }
 0x3ad   : > { %v10134_v53 = vadd.f32 %v6054_v9, %v5766_v30  ;;  %v5769_v24 = vadd.f32 %v5768_v1, %v9803_v2  ;;  %v5770_v56 = vpop.f32.mrb[71].mxu0  ;;  %v6059_v8 = vpop.f32.mrb[71].mxu1  ;;  %v7704_v2 = vcombine.low %v813_v37, %v821_v26  ;;  %v845_v37 = vld [vmem:[%s8737_s28 + $0x7b0] sm:$0xff] }
 0x3ae   : > { %v853_v26 = vld [vmem:[%s8737_s28 + $0x7f0] sm:$0xff] }
 0x3af   : > { %v10137_v27 = vadd.f32 %v6057_v47, %v5769_v24  ;;  %6302 = vmatmul.mubr.bf16.gmra.mrb[176].mxu0 %v7688_v29  ;;  %6591 = vmatmul.mubr.bf16.gmra.mrb[176].mxu1 %v7690_v49  ;;  %v7706_v24 = vcombine.low %v814_v60, %v822_v50  ;;  %v7721_v29 = vcombine.high %v829_v32, %v837_v33  ;;  %v846_v50 = vld [vmem:[%s8737_s28 + $0x7b8] sm:$0xff] }
 0x3b0   : > { %6309 = vmatprep.mubr.bf16.mxu0 %v7705_v52  ;;  %6598 = vmatprep.mubr.bf16.mxu1 %v7707_v25  ;;  %v7723_v25 = vcombine.high %v830_v35, %v838_v11 }
 0x3b2   : > { %v5773_v62 = vpop.f32.mrb[72].mxu0  ;;  %v6062_v9 = vpop.f32.mrb[72].mxu1 }
 0x3b3   : > { %v5774_v30 = vadd.f32 %v5773_v62, %v9818_v38  ;;  %v5775_v57 = vpop.f32.mrb[73].mxu0  ;;  %v6064_v0 = vpop.f32.mrb[73].mxu1  ;;  %v854_v62 = vld [vmem:[%s8737_s28 + $0x7f8] sm:$0xff] }
 0x3b4   : > { %v5776_v1 = vpop.f32.mrb[74].mxu0  ;;  %v6065_v47 = vpop.f32.mrb[74].mxu1 }
 0x3b5   : > { %v10144_v49 = vadd.f32 %v6062_v9, %v5774_v30  ;;  %v5777_v52 = vadd.f32 %v5776_v1, %v9820_v3  ;;  %v5778_v56 = vpop.f32.mrb[75].mxu0  ;;  %v6067_v8 = vpop.f32.mrb[75].mxu1  ;;  %v7720_v3 = vcombine.low %v829_v32, %v837_v33  ;;  %v861_v32 = vld [vmem:[%s8737_s28 + $0x830] sm:$0xff] }
 0x3b6   : > { %v7739_v8 = vcombine.high %v846_v50, %v854_v62  ;;  %v869_v33 = vld [vmem:[%s8737_s28 + $0x870] sm:$0xff] }
 0x3b7   : > { %v10147_v38 = vadd.f32 %v6065_v47, %v5777_v52  ;;  %6310 = vmatmul.mubr.bf16.gmra.mrb[180].mxu0 %v7704_v2  ;;  %6599 = vmatmul.mubr.bf16.gmra.mrb[180].mxu1 %v7706_v24  ;;  %v7722_v52 = vcombine.low %v830_v35, %v838_v11  ;;  %v7737_v2 = vcombine.high %v845_v37, %v853_v26  ;;  %v862_v11 = vld [vmem:[%s8737_s28 + $0x838] sm:$0xff] }
 0x3b8   : > { %6317 = vmatprep.mubr.bf16.mxu0 %v7721_v29  ;;  %6606 = vmatprep.mubr.bf16.mxu1 %v7723_v25  ;;  %v10559_v29 = vld [vmem:[#allocation27_spill] sm:$0xff] }
 0x3b9   : > { %10558 = vst [vmem:[#allocation25_spill] sm:$0xff] %v10147_v38 }
 0x3ba   : > { %v5781_v60 = vpop.f32.mrb[76].mxu0  ;;  %v6070_v9 = vpop.f32.mrb[76].mxu1 }
 0x3bb   : > { %v5782_v30 = vadd.f32 %v5781_v60, %v9829_v18  ;;  %v5783_v57 = vpop.f32.mrb[77].mxu0  ;;  %v6072_v0 = vpop.f32.mrb[77].mxu1  ;;  %v870_v60 = vld [vmem:[%s8737_s28 + $0x878] sm:$0xff] }
 0x3bc   : > { %v5784_v1 = vpop.f32.mrb[78].mxu0  ;;  %v6073_v56 = vpop.f32.mrb[78].mxu1  ;;  %v7736_v0 = vcombine.low %v845_v37, %v853_v26  ;;  %v877_v37 = vld [vmem:[%s8737_s28 + $0x8b0] sm:$0xff] }
 0x3bd   : > { %v10154_v24 = vadd.f32 %v6070_v9, %v5782_v30  ;;  %v5785_v47 = vadd.f32 %v5784_v1, %v10559_v29  ;;  %v5786_v25 = vpop.f32.mrb[79].mxu0  ;;  %v6075_v38 = vpop.f32.mrb[79].mxu1  ;;  %v7738_v29 = vcombine.low %v846_v50, %v854_v62  ;;  %v885_v26 = vld [vmem:[%s8737_s28 + $0x8f0] sm:$0xff]  ;;  %v878_v62 = vld [vmem:[%s8737_s28 + $0x8b8] sm:$0xff] }
 0x3bf   : > { %v10157_v18 = vadd.f32 %v6073_v56, %v5785_v47  ;;  %6318 = vmatmul.mubr.bf16.gmra.mrb[184].mxu0 %v7720_v3  ;;  %6607 = vmatmul.mubr.bf16.gmra.mrb[184].mxu1 %v7722_v52  ;;  %v7753_v3 = vcombine.high %v861_v32, %v869_v33 }
 0x3c0   : > { %6325 = vmatprep.mubr.bf16.mxu0 %v7737_v2  ;;  %6614 = vmatprep.mubr.bf16.mxu1 %v7739_v8  ;;  %v10562_v2 = vld [vmem:[#allocation3_spill] sm:$0xff]  ;;  %v7755_v8 = vcombine.high %v862_v11, %v870_v60 }
 0x3c1   : > { %10560 = vst [vmem:[#allocation26_spill] sm:$0xff] %v10157_v18 }
 0x3c2   : > { %v5789_v35 = vpop.f32.mrb[80].mxu0  ;;  %v6078_v9 = vpop.f32.mrb[80].mxu1 }
 0x3c3   : > { %v5790_v30 = vadd.f32 %v5789_v35, %v9845_v40  ;;  %v5791_v57 = vpop.f32.mrb[81].mxu0  ;;  %v6080_v1 = vpop.f32.mrb[81].mxu1  ;;  %v886_v35 = vld [vmem:[%s8737_s28 + $0x8f8] sm:$0xff] }
 0x3c4   : > { %v5792_v38 = vpop.f32.mrb[82].mxu0  ;;  %v6081_v56 = vpop.f32.mrb[82].mxu1  ;;  %v10564_v57 = vld [vmem:[#allocation4_spill] sm:$0xff] }
 0x3c5   : > { %v10164_v52 = vadd.f32 %v6078_v9, %v5790_v30  ;;  %v5793_v47 = vadd.f32 %v5792_v38, %v10562_v2  ;;  %v5794_v25 = vpop.f32.mrb[83].mxu0  ;;  %v6083_v18 = vpop.f32.mrb[83].mxu1  ;;  %v7752_v38 = vcombine.low %v861_v32, %v869_v33  ;;  %v893_v32 = vld [vmem:[%s8737_s28 + $0x930] sm:$0xff] }
 0x3c6   : > { %v901_v33 = vld [vmem:[%s8737_s28 + $0x970] sm:$0xff] }
 0x3c7   : > { %10561 = vst [vmem:[#allocation27_spill] sm:$0xff] %v10164_v52  ;;  %v10167_v40 = vadd.f32 %v6081_v56, %v5793_v47  ;;  %6326 = vmatmul.mubr.bf16.gmra.mrb[188].mxu0 %v7736_v0  ;;  %6615 = vmatmul.mubr.bf16.gmra.mrb[188].mxu1 %v7738_v29  ;;  %v7754_v47 = vcombine.low %v862_v11, %v870_v60  ;;  %v894_v60 = vld [vmem:[%s8737_s28 + $0x938] sm:$0xff] }
 0x3c8   : > { %6333 = vmatprep.mubr.bf16.mxu0 %v7753_v3  ;;  %6622 = vmatprep.mubr.bf16.mxu1 %v7755_v8  ;;  %v7769_v0 = vcombine.high %v877_v37, %v885_v26  ;;  %v10566_v3 = vld [vmem:[#allocation5_spill] sm:$0xff] }
 0x3c9   : > { %10563 = vst [vmem:[#allocation3_spill] sm:$0xff] %v10167_v40  ;;  %v7771_v40 = vcombine.high %v878_v62, %v886_v35 }
 0x3ca   : > { %v5797_v50 = vpop.f32.mrb[84].mxu0  ;;  %v6086_v9 = vpop.f32.mrb[84].mxu1 }
 0x3cb   : > { %v5798_v30 = vadd.f32 %v5797_v50, %v10564_v57  ;;  %v5799_v1 = vpop.f32.mrb[85].mxu0  ;;  %v6088_v2 = vpop.f32.mrb[85].mxu1  ;;  %v902_v57 = vld [vmem:[%s8737_s28 + $0x978] sm:$0xff] }
 0x3cc   : > { %v5800_v18 = vpop.f32.mrb[86].mxu0  ;;  %v6089_v25 = vpop.f32.mrb[86].mxu1  ;;  %v10568_v1 = vld [vmem:[#allocation6_spill] sm:$0xff] }
 0x3cd   : > { %v10174_v29 = vadd.f32 %v6086_v9, %v5798_v30  ;;  %v5801_v56 = vadd.f32 %v5800_v18, %v10566_v3  ;;  %v5802_v8 = vpop.f32.mrb[87].mxu0  ;;  %v6091_v52 = vpop.f32.mrb[87].mxu1  ;;  %v7768_v18 = vcombine.low %v877_v37, %v885_v26  ;;  %v909_v37 = vld [vmem:[%s8737_s28 + $0x9b0] sm:$0xff] }
 0x3ce   : > { %v917_v26 = vld [vmem:[%s8737_s28 + $0x9f0] sm:$0xff] }
 0x3cf   : > { %10565 = vst [vmem:[#allocation4_spill] sm:$0xff] %v10174_v29  ;;  %v10177_v50 = vadd.f32 %v6089_v25, %v5801_v56  ;;  %6334 = vmatmul.mubr.bf16.gmra.mrb[192].mxu0 %v7752_v38  ;;  %6623 = vmatmul.mubr.bf16.gmra.mrb[192].mxu1 %v7754_v47  ;;  %v7770_v56 = vcombine.low %v878_v62, %v886_v35  ;;  %v910_v35 = vld [vmem:[%s8737_s28 + $0x9b8] sm:$0xff] }
 0x3d0   : > { %6341 = vmatprep.mubr.bf16.mxu0 %v7769_v0  ;;  %6630 = vmatprep.mubr.bf16.mxu1 %v7771_v40  ;;  %v7785_v38 = vcombine.high %v893_v32, %v901_v33  ;;  %v10570_v40 = vld [vmem:[#allocation7_spill] sm:$0xff] }
 0x3d1   : > { %10567 = vst [vmem:[#allocation5_spill] sm:$0xff] %v10177_v50  ;;  %v7787_v50 = vcombine.high %v894_v60, %v902_v57 }
 0x3d2   : > { %v5805_v11 = vpop.f32.mrb[88].mxu0  ;;  %v6094_v9 = vpop.f32.mrb[88].mxu1 }
 0x3d3   : > { %v5806_v30 = vadd.f32 %v5805_v11, %v10568_v1  ;;  %v5807_v2 = vpop.f32.mrb[89].mxu0  ;;  %v6096_v3 = vpop.f32.mrb[89].mxu1  ;;  %v918_v1 = vld [vmem:[%s8737_s28 + $0x9f8] sm:$0xff] }
 0x3d4   : > { %v5808_v52 = vpop.f32.mrb[90].mxu0  ;;  %v6097_v25 = vpop.f32.mrb[90].mxu1  ;;  %v10572_v2 = vld [vmem:[#allocation8_spill] sm:$0xff] }
 0x3d5   : > { %v10184_v47 = vadd.f32 %v6094_v9, %v5806_v30  ;;  %v5809_v0 = vadd.f32 %v5808_v52, %v10570_v40  ;;  %v5810_v8 = vpop.f32.mrb[91].mxu0  ;;  %v6099_v29 = vpop.f32.mrb[91].mxu1  ;;  %v7784_v52 = vcombine.low %v893_v32, %v901_v33  ;;  %v925_v32 = vld [vmem:[%s8737_s28 + $0xa30] sm:$0xff] }
 0x3d6   : > { %v933_v33 = vld [vmem:[%s8737_s28 + $0xa70] sm:$0xff] }
 0x3d7   : > { %10569 = vst [vmem:[#allocation6_spill] sm:$0xff] %v10184_v47  ;;  %v10187_v11 = vadd.f32 %v6097_v25, %v5809_v0  ;;  %6342 = vmatmul.mubr.bf16.gmra.mrb[196].mxu0 %v7768_v18  ;;  %6631 = vmatmul.mubr.bf16.gmra.mrb[196].mxu1 %v7770_v56  ;;  %v7786_v0 = vcombine.low %v894_v60, %v902_v57  ;;  %v926_v57 = vld [vmem:[%s8737_s28 + $0xa38] sm:$0xff] }
 0x3d8   : > { %6349 = vmatprep.mubr.bf16.mxu0 %v7785_v38  ;;  %6638 = vmatprep.mubr.bf16.mxu1 %v7787_v50  ;;  %v7801_v18 = vcombine.high %v909_v37, %v917_v26  ;;  %v10574_v50 = vld [vmem:[#allocation9_spill] sm:$0xff] }
 0x3d9   : > { %10571 = vst [vmem:[#allocation7_spill] sm:$0xff] %v10187_v11  ;;  %v7803_v11 = vcombine.high %v910_v35, %v918_v1 }
 0x3da   : > { %v5813_v62 = vpop.f32.mrb[92].mxu0  ;;  %v6102_v9 = vpop.f32.mrb[92].mxu1 }
 0x3db   : > { %v5814_v30 = vadd.f32 %v5813_v62, %v10572_v2  ;;  %v5815_v3 = vpop.f32.mrb[93].mxu0  ;;  %v6104_v40 = vpop.f32.mrb[93].mxu1  ;;  %v934_v2 = vld [vmem:[%s8737_s28 + $0xa78] sm:$0xff] }
 0x3dc   : > { %v5816_v29 = vpop.f32.mrb[94].mxu0  ;;  %v6105_v25 = vpop.f32.mrb[94].mxu1  ;;  %v10576_v3 = vld [vmem:[#allocation10_spill] sm:$0xff] }
 0x3dd   : > { %v10194_v56 = vadd.f32 %v6102_v9, %v5814_v30  ;;  %v5817_v38 = vadd.f32 %v5816_v29, %v10574_v50  ;;  %v5818_v8 = vpop.f32.mrb[95].mxu0  ;;  %v6107_v47 = vpop.f32.mrb[95].mxu1  ;;  %v7800_v29 = vcombine.low %v909_v37, %v917_v26  ;;  %v941_v37 = vld [vmem:[%s8737_s28 + $0xab0] sm:$0xff] }
 0x3de   : > { %v949_v26 = vld [vmem:[%s8737_s28 + $0xaf0] sm:$0xff] }
 0x3df   : > { %10573 = vst [vmem:[#allocation8_spill] sm:$0xff] %v10194_v56  ;;  %v10197_v62 = vadd.f32 %v6105_v25, %v5817_v38  ;;  %6350 = vmatmul.mubr.bf16.gmra.mrb[200].mxu0 %v7784_v52  ;;  %6639 = vmatmul.mubr.bf16.gmra.mrb[200].mxu1 %v7786_v0  ;;  %v7802_v38 = vcombine.low %v910_v35, %v918_v1  ;;  %v942_v1 = vld [vmem:[%s8737_s28 + $0xab8] sm:$0xff] }
 0x3e0   : > { %6357 = vmatprep.mubr.bf16.mxu0 %v7801_v18  ;;  %6646 = vmatprep.mubr.bf16.mxu1 %v7803_v11  ;;  %v7817_v52 = vcombine.high %v925_v32, %v933_v33  ;;  %v10578_v11 = vld [vmem:[#allocation11_spill] sm:$0xff] }
 0x3e1   : > { %10575 = vst [vmem:[#allocation9_spill] sm:$0xff] %v10197_v62  ;;  %v7819_v62 = vcombine.high %v926_v57, %v934_v2 }
 0x3e2   : > { %v5821_v60 = vpop.f32.mrb[96].mxu0  ;;  %v6110_v9 = vpop.f32.mrb[96].mxu1 }
 0x3e3   : > { %v5822_v30 = vadd.f32 %v5821_v60, %v10576_v3  ;;  %v5823_v40 = vpop.f32.mrb[97].mxu0  ;;  %v6112_v50 = vpop.f32.mrb[97].mxu1  ;;  %v950_v3 = vld [vmem:[%s8737_s28 + $0xaf8] sm:$0xff] }
 0x3e4   : > { %v5824_v47 = vpop.f32.mrb[98].mxu0  ;;  %v6113_v25 = vpop.f32.mrb[98].mxu1  ;;  %v10580_v40 = vld [vmem:[#allocation12_spill] sm:$0xff] }
 0x3e5   : > { %v10204_v0 = vadd.f32 %v6110_v9, %v5822_v30  ;;  %v5825_v18 = vadd.f32 %v5824_v47, %v10578_v11  ;;  %v5826_v8 = vpop.f32.mrb[99].mxu0  ;;  %v6115_v56 = vpop.f32.mrb[99].mxu1  ;;  %v7816_v47 = vcombine.low %v925_v32, %v933_v33  ;;  %v957_v32 = vld [vmem:[%s8737_s28 + $0xb30] sm:$0xff] }
 0x3e6   : > { %v965_v33 = vld [vmem:[%s8737_s28 + $0xb70] sm:$0xff] }
 0x3e7   : > { %10577 = vst [vmem:[#allocation10_spill] sm:$0xff] %v10204_v0  ;;  %v10207_v60 = vadd.f32 %v6113_v25, %v5825_v18  ;;  %6358 = vmatmul.mubr.bf16.gmra.mrb[204].mxu0 %v7800_v29  ;;  %6647 = vmatmul.mubr.bf16.gmra.mrb[204].mxu1 %v7802_v38  ;;  %v7818_v18 = vcombine.low %v926_v57, %v934_v2  ;;  %v958_v2 = vld [vmem:[%s8737_s28 + $0xb38] sm:$0xff] }
 0x3e8   : > { %6365 = vmatprep.mubr.bf16.mxu0 %v7817_v52  ;;  %6654 = vmatprep.mubr.bf16.mxu1 %v7819_v62  ;;  %v7833_v29 = vcombine.high %v941_v37, %v949_v26  ;;  %v10582_v62 = vld [vmem:[#allocation13_spill] sm:$0xff] }
 0x3e9   : > { %10579 = vst [vmem:[#allocation11_spill] sm:$0xff] %v10207_v60  ;;  %v7835_v60 = vcombine.high %v942_v1, %v950_v3 }
 0x3ea   : > { %v5829_v35 = vpop.f32.mrb[100].mxu0  ;;  %v6118_v9 = vpop.f32.mrb[100].mxu1 }
 0x3eb   : > { %v5830_v30 = vadd.f32 %v5829_v35, %v10580_v40  ;;  %v5831_v50 = vpop.f32.mrb[101].mxu0  ;;  %v6120_v11 = vpop.f32.mrb[101].mxu1  ;;  %v966_v40 = vld [vmem:[%s8737_s28 + $0xb78] sm:$0xff] }
 0x3ec   : > { %v5832_v56 = vpop.f32.mrb[102].mxu0  ;;  %v6121_v25 = vpop.f32.mrb[102].mxu1  ;;  %v10584_v50 = vld [vmem:[#allocation14_spill] sm:$0xff] }
 0x3ed   : > { %v10214_v38 = vadd.f32 %v6118_v9, %v5830_v30  ;;  %v5833_v52 = vadd.f32 %v5832_v56, %v10582_v62  ;;  %v5834_v8 = vpop.f32.mrb[103].mxu0  ;;  %v6123_v0 = vpop.f32.mrb[103].mxu1  ;;  %v7832_v56 = vcombine.low %v941_v37, %v949_v26  ;;  %v973_v37 = vld [vmem:[%s8737_s28 + $0xbb0] sm:$0xff] }
 0x3ee   : > { %v981_v26 = vld [vmem:[%s8737_s28 + $0xbf0] sm:$0xff] }
 0x3ef   : > { %10581 = vst [vmem:[#allocation12_spill] sm:$0xff] %v10214_v38  ;;  %v10217_v35 = vadd.f32 %v6121_v25, %v5833_v52  ;;  %6366 = vmatmul.mubr.bf16.gmra.mrb[208].mxu0 %v7816_v47  ;;  %6655 = vmatmul.mubr.bf16.gmra.mrb[208].mxu1 %v7818_v18  ;;  %v7834_v52 = vcombine.low %v942_v1, %v950_v3  ;;  %v974_v3 = vld [vmem:[%s8737_s28 + $0xbb8] sm:$0xff] }
 0x3f0   : > { %6373 = vmatprep.mubr.bf16.mxu0 %v7833_v29  ;;  %6662 = vmatprep.mubr.bf16.mxu1 %v7835_v60  ;;  %v7849_v47 = vcombine.high %v957_v32, %v965_v33  ;;  %v10586_v60 = vld [vmem:[#allocation15_spill] sm:$0xff] }
 0x3f1   : > { %10583 = vst [vmem:[#allocation13_spill] sm:$0xff] %v10217_v35  ;;  %v7851_v35 = vcombine.high %v958_v2, %v966_v40 }
 0x3f2   : > { %v5837_v57 = vpop.f32.mrb[104].mxu0  ;;  %v6126_v9 = vpop.f32.mrb[104].mxu1 }
 0x3f3   : > { %v5838_v30 = vadd.f32 %v5837_v57, %v10584_v50  ;;  %v5839_v11 = vpop.f32.mrb[105].mxu0  ;;  %v6128_v62 = vpop.f32.mrb[105].mxu1  ;;  %v982_v50 = vld [vmem:[%s8737_s28 + $0xbf8] sm:$0xff] }
 0x3f4   : > { %v5840_v0 = vpop.f32.mrb[106].mxu0  ;;  %v6129_v25 = vpop.f32.mrb[106].mxu1  ;;  %v10588_v11 = vld [vmem:[#allocation16_spill] sm:$0xff] }
 0x3f5   : > { %v10224_v18 = vadd.f32 %v6126_v9, %v5838_v30  ;;  %v5841_v29 = vadd.f32 %v5840_v0, %v10586_v60  ;;  %v5842_v8 = vpop.f32.mrb[107].mxu0  ;;  %v6131_v38 = vpop.f32.mrb[107].mxu1  ;;  %v7848_v0 = vcombine.low %v957_v32, %v965_v33  ;;  %v989_v32 = vld [vmem:[%s8737_s28 + $0xc30] sm:$0xff] }
 0x3f6   : > { %v997_v33 = vld [vmem:[%s8737_s28 + $0xc70] sm:$0xff] }
 0x3f7   : > { %10585 = vst [vmem:[#allocation14_spill] sm:$0xff] %v10224_v18  ;;  %v10227_v57 = vadd.f32 %v6129_v25, %v5841_v29  ;;  %6374 = vmatmul.mubr.bf16.gmra.mrb[212].mxu0 %v7832_v56  ;;  %6663 = vmatmul.mubr.bf16.gmra.mrb[212].mxu1 %v7834_v52  ;;  %v7850_v29 = vcombine.low %v958_v2, %v966_v40  ;;  %v990_v40 = vld [vmem:[%s8737_s28 + $0xc38] sm:$0xff] }
 0x3f8   : > { %6381 = vmatprep.mubr.bf16.mxu0 %v7849_v47  ;;  %6670 = vmatprep.mubr.bf16.mxu1 %v7851_v35  ;;  %v7865_v56 = vcombine.high %v973_v37, %v981_v26  ;;  %v10590_v35 = vld [vmem:[#allocation17_spill] sm:$0xff] }
 0x3f9   : > { %10587 = vst [vmem:[#allocation15_spill] sm:$0xff] %v10227_v57  ;;  %v7867_v57 = vcombine.high %v974_v3, %v982_v50 }
 0x3fa   : > { %v5845_v1 = vpop.f32.mrb[108].mxu0  ;;  %v6134_v9 = vpop.f32.mrb[108].mxu1 }
 0x3fb   : > { %v5846_v30 = vadd.f32 %v5845_v1, %v10588_v11  ;;  %v5847_v62 = vpop.f32.mrb[109].mxu0  ;;  %v6136_v60 = vpop.f32.mrb[109].mxu1  ;;  %v998_v11 = vld [vmem:[%s8737_s28 + $0xc78] sm:$0xff] }
 0x3fc   : > { %v5848_v38 = vpop.f32.mrb[110].mxu0  ;;  %v6137_v25 = vpop.f32.mrb[110].mxu1  ;;  %v10592_v62 = vld [vmem:[#allocation18_spill] sm:$0xff] }
 0x3fd   : > { %v10234_v52 = vadd.f32 %v6134_v9, %v5846_v30  ;;  %v5849_v47 = vadd.f32 %v5848_v38, %v10590_v35  ;;  %v5850_v8 = vpop.f32.mrb[111].mxu0  ;;  %v6139_v18 = vpop.f32.mrb[111].mxu1  ;;  %v7864_v38 = vcombine.low %v973_v37, %v981_v26  ;;  %v1005_v37 = vld [vmem:[%s8737_s28 + $0xcb0] sm:$0xff] }
 0x3fe   : > { %v1013_v26 = vld [vmem:[%s8737_s28 + $0xcf0] sm:$0xff] }
 0x3ff   : > { %10589 = vst [vmem:[#allocation16_spill] sm:$0xff] %v10234_v52  ;;  %v10237_v1 = vadd.f32 %v6137_v25, %v5849_v47  ;;  %6382 = vmatmul.mubr.bf16.gmra.mrb[216].mxu0 %v7848_v0  ;;  %6671 = vmatmul.mubr.bf16.gmra.mrb[216].mxu1 %v7850_v29  ;;  %v7866_v47 = vcombine.low %v974_v3, %v982_v50  ;;  %v1006_v50 = vld [vmem:[%s8737_s28 + $0xcb8] sm:$0xff] }
 0x400   : > { %6389 = vmatprep.mubr.bf16.mxu0 %v7865_v56  ;;  %6678 = vmatprep.mubr.bf16.mxu1 %v7867_v57  ;;  %v7881_v0 = vcombine.high %v989_v32, %v997_v33  ;;  %v10594_v57 = vld [vmem:[#allocation19_spill] sm:$0xff] }
 0x401   : > { %10591 = vst [vmem:[#allocation17_spill] sm:$0xff] %v10237_v1  ;;  %v7883_v1 = vcombine.high %v990_v40, %v998_v11 }
 0x402   : > { %v5853_v2 = vpop.f32.mrb[112].mxu0  ;;  %v6142_v9 = vpop.f32.mrb[112].mxu1 }
 0x403   : > { %v5854_v30 = vadd.f32 %v5853_v2, %v10592_v62  ;;  %v5855_v60 = vpop.f32.mrb[113].mxu0  ;;  %v6144_v35 = vpop.f32.mrb[113].mxu1  ;;  %v1014_v62 = vld [vmem:[%s8737_s28 + $0xcf8] sm:$0xff] }
 0x404   : > { %v5856_v18 = vpop.f32.mrb[114].mxu0  ;;  %v6145_v25 = vpop.f32.mrb[114].mxu1  ;;  %v10596_v60 = vld [vmem:[#allocation20_spill] sm:$0xff] }
 0x405   : > { %v10244_v29 = vadd.f32 %v6142_v9, %v5854_v30  ;;  %v5857_v56 = vadd.f32 %v5856_v18, %v10594_v57  ;;  %v5858_v8 = vpop.f32.mrb[115].mxu0  ;;  %v6147_v52 = vpop.f32.mrb[115].mxu1  ;;  %v7880_v18 = vcombine.low %v989_v32, %v997_v33  ;;  %v1021_v32 = vld [vmem:[%s8737_s28 + $0xd30] sm:$0xff] }
 0x406   : > { %v1029_v33 = vld [vmem:[%s8737_s28 + $0xd70] sm:$0xff] }
 0x407   : > { %10593 = vst [vmem:[#allocation18_spill] sm:$0xff] %v10244_v29  ;;  %v10247_v2 = vadd.f32 %v6145_v25, %v5857_v56  ;;  %6390 = vmatmul.mubr.bf16.gmra.mrb[220].mxu0 %v7864_v38  ;;  %6679 = vmatmul.mubr.bf16.gmra.mrb[220].mxu1 %v7866_v47  ;;  %v7882_v56 = vcombine.low %v990_v40, %v998_v11  ;;  %v1022_v11 = vld [vmem:[%s8737_s28 + $0xd38] sm:$0xff] }
 0x408   : > { %6397 = vmatprep.mubr.bf16.mxu0 %v7881_v0  ;;  %6686 = vmatprep.mubr.bf16.mxu1 %v7883_v1  ;;  %v7897_v38 = vcombine.high %v1005_v37, %v1013_v26  ;;  %v10598_v1 = vld [vmem:[#allocation21_spill] sm:$0xff] }
 0x409   : > { %10595 = vst [vmem:[#allocation19_spill] sm:$0xff] %v10247_v2  ;;  %v7899_v2 = vcombine.high %v1006_v50, %v1014_v62 }
 0x40a   : > { %v5861_v3 = vpop.f32.mrb[116].mxu0  ;;  %v6150_v9 = vpop.f32.mrb[116].mxu1 }
 0x40b   : > { %v5862_v30 = vadd.f32 %v5861_v3, %v10596_v60  ;;  %v5863_v35 = vpop.f32.mrb[117].mxu0  ;;  %v6152_v57 = vpop.f32.mrb[117].mxu1  ;;  %v1030_v60 = vld [vmem:[%s8737_s28 + $0xd78] sm:$0xff] }
 0x40c   : > { %v5864_v52 = vpop.f32.mrb[118].mxu0  ;;  %v6153_v25 = vpop.f32.mrb[118].mxu1  ;;  %v10600_v35 = vld [vmem:[#allocation22_spill] sm:$0xff] }
 0x40d   : > { %v10254_v47 = vadd.f32 %v6150_v9, %v5862_v30  ;;  %v5865_v0 = vadd.f32 %v5864_v52, %v10598_v1  ;;  %v5866_v8 = vpop.f32.mrb[119].mxu0  ;;  %v6155_v29 = vpop.f32.mrb[119].mxu1  ;;  %v7896_v52 = vcombine.low %v1005_v37, %v1013_v26  ;;  %v1037_v37 = vld [vmem:[%s8737_s28 + $0xdb0] sm:$0xff] }
 0x40e   : > { %v1045_v26 = vld [vmem:[%s8737_s28 + $0xdf0] sm:$0xff] }
 0x40f   : > { %10597 = vst [vmem:[#allocation20_spill] sm:$0xff] %v10254_v47  ;;  %v10257_v3 = vadd.f32 %v6153_v25, %v5865_v0  ;;  %6398 = vmatmul.mubr.bf16.gmra.mrb[224].mxu0 %v7880_v18  ;;  %6687 = vmatmul.mubr.bf16.gmra.mrb[224].mxu1 %v7882_v56  ;;  %v7898_v0 = vcombine.low %v1006_v50, %v1014_v62  ;;  %v1038_v62 = vld [vmem:[%s8737_s28 + $0xdb8] sm:$0xff] }
 0x410   : > { %6405 = vmatprep.mubr.bf16.mxu0 %v7897_v38  ;;  %6694 = vmatprep.mubr.bf16.mxu1 %v7899_v2  ;;  %v7913_v18 = vcombine.high %v1021_v32, %v1029_v33  ;;  %v10601_v2 = vld [vmem:[#allocation23_spill] sm:$0xff] }
 0x411   : > { %10599 = vst [vmem:[#allocation21_spill] sm:$0xff] %v10257_v3  ;;  %v7915_v3 = vcombine.high %v1022_v11, %v1030_v60 }
 0x412   : > { %v5869_v40 = vpop.f32.mrb[120].mxu0  ;;  %v6158_v9 = vpop.f32.mrb[120].mxu1 }
 0x413   : > { %v5870_v30 = vadd.f32 %v5869_v40, %v10600_v35  ;;  %v5871_v57 = vpop.f32.mrb[121].mxu0  ;;  %v6160_v1 = vpop.f32.mrb[121].mxu1  ;;  %v1046_v35 = vld [vmem:[%s8737_s28 + $0xdf8] sm:$0xff] }
 0x414   : > { %v5872_v29 = vpop.f32.mrb[122].mxu0  ;;  %v6161_v25 = vpop.f32.mrb[122].mxu1  ;;  %v7912_v1 = vcombine.low %v1021_v32, %v1029_v33  ;;  %v1053_v32 = vld [vmem:[%s8737_s28 + $0xe30] sm:$0xff] }
 0x415   : > { %v10264_v56 = vadd.f32 %v6158_v9, %v5870_v30  ;;  %v5873_v38 = vadd.f32 %v5872_v29, %v10601_v2  ;;  %v5874_v8 = vpop.f32.mrb[123].mxu0  ;;  %v6163_v47 = vpop.f32.mrb[123].mxu1  ;;  %v7914_v2 = vcombine.low %v1022_v11, %v1030_v60  ;;  %v1061_v33 = vld [vmem:[%s8737_s28 + $0xe70] sm:$0xff]  ;;  %v1054_v60 = vld [vmem:[%s8737_s28 + $0xe38] sm:$0xff] }
 0x417   : > { %v10267_v40 = vadd.f32 %v6161_v25, %v5873_v38  ;;  %6406 = vmatmul.mubr.bf16.gmra.mrb[228].mxu0 %v7896_v52  ;;  %6695 = vmatmul.mubr.bf16.gmra.mrb[228].mxu1 %v7898_v0  ;;  %v7929_v52 = vcombine.high %v1037_v37, %v1045_v26  ;;  %v7931_v25 = vcombine.high %v1038_v62, %v1046_v35 }
 0x418   : > { %6413 = vmatprep.mubr.bf16.mxu0 %v7913_v18  ;;  %6702 = vmatprep.mubr.bf16.mxu1 %v7915_v3 }
 0x41a   : > { %v5877_v50 = vpop.f32.mrb[124].mxu0  ;;  %v6166_v9 = vpop.f32.mrb[124].mxu1 }
 0x41b   : > { %v5878_v30 = vadd.f32 %v5877_v50, %v9955_v31  ;;  %v5879_v57 = vpop.f32.mrb[125].mxu0  ;;  %v6168_v29 = vpop.f32.mrb[125].mxu1  ;;  %v1062_v50 = vld [vmem:[%s8737_s28 + $0xe78] sm:$0xff] }
 0x41c   : > { %v5880_v47 = vpop.f32.mrb[126].mxu0  ;;  %v6169_v18 = vpop.f32.mrb[126].mxu1  ;;  %v10287_v29 = vld [vmem:[%s10482_s2] ss:$0 sm:$0xff] }
 0x41d   : > { %v10274_v0 = vadd.f32 %v6166_v9, %v5878_v30  ;;  %v5881_v3 = vadd.f32 %v5880_v47, %v9957_v63  ;;  %v5882_v38 = vpop.f32.mrb[127].mxu0  ;;  %v6171_v8 = vpop.f32.mrb[127].mxu1  ;;  %v7928_v63 = vcombine.low %v1037_v37, %v1045_v26  ;;  %v7947_v37 = vcombine.high %v1054_v60, %v1062_v50 }
 0x41f   : > { %v10277_v31 = vadd.f32 %v6169_v18, %v5881_v3  ;;  %6414 = vmatmul.mubr.bf16.gmra.mrb[232].mxu0 %v7912_v1  ;;  %6703 = vmatmul.mubr.bf16.gmra.mrb[232].mxu1 %v7914_v2  ;;  %v7930_v2 = vcombine.low %v1038_v62, %v1046_v35  ;;  %v1069_v35 = vld [vmem:[%s8737_s28 + $0xeb0] sm:$0xff] }
 0x420   : > { %6421 = vmatprep.mubr.bf16.mxu0 %v7929_v52  ;;  %6710 = vmatprep.mubr.bf16.mxu1 %v7931_v25  ;;  %v7945_v52 = vcombine.high %v1053_v32, %v1061_v33 }
 0x422   : > { %v6207_v11 = vpop.f32.mrb[128].mxu0  ;;  %v6496_v9 = vpop.f32.mrb[128].mxu1 }
 0x423   : > { %v6208_v30 = vadd.f32 %v6207_v11, %v9964_v55  ;;  %v6209_v57 = vpop.f32.mrb[129].mxu0  ;;  %v6498_v1 = vpop.f32.mrb[129].mxu1  ;;  %v1077_v11 = vld [vmem:[%s8737_s28 + $0xef0] sm:$0xff] }
 0x424   : > { %v6210_v47 = vpop.f32.mrb[130].mxu0  ;;  %v6499_v55 = vpop.f32.mrb[130].mxu1 }
 0x425   : > { %v6497_v3 = vadd.f32 %v6496_v9, %v6208_v30  ;;  %v6211_v18 = vadd.f32 %v6210_v47, %v9967_v20  ;;  %v6212_v38 = vpop.f32.mrb[131].mxu0  ;;  %v6501_v26 = vpop.f32.mrb[131].mxu1  ;;  %v1070_v20 = vld [vmem:[%s8737_s28 + $0xeb8] sm:$0xff] }
 0x426   : > { %v1078_v9 = vld [vmem:[%s8737_s28 + $0xef8] sm:$0xff] }
 0x427   : > { %v6953_v25 = vadd.f32 %v10287_v29, %v6497_v3  ;;  %v6500_v8 = vadd.f32 %v6499_v55, %v6211_v18  ;;  %6422 = vmatmul.mubr.bf16.gmra.mrb[236].mxu0 %v7928_v63  ;;  %6711 = vmatmul.mubr.bf16.gmra.mrb[236].mxu1 %v7930_v2  ;;  %v7944_v3 = vcombine.low %v1053_v32, %v1061_v33 }
 0x428   : > { %6429 = vmatprep.mubr.bf16.mxu0 %v7945_v52  ;;  %6718 = vmatprep.mubr.bf16.mxu1 %v7947_v37  ;;  %v7946_v52 = vcombine.low %v1054_v60, %v1062_v50  ;;  %v7961_v18 = vcombine.high %v1069_v35, %v1077_v11  ;;  %v7963_v33 = vcombine.high %v1070_v20, %v1078_v9  ;;  %v1085_v50 = vld [vmem:[%s8737_s28 + $0xf30] sm:$0xff] }
 0x429   : > { %v6954_v62 = vadd.f32 %v10287_v29, %v6500_v8  ;;  %v7017_v57 = vmax.f32 %v6953_v25, 0.0 }
 0x42a   : > { %v6215_v30 = vpop.f32.mrb[132].mxu0  ;;  %v6504_v38 = vpop.f32.mrb[132].mxu1 }
 0x42b   : > { %v7018_v1 = vmax.f32 %v6954_v62, 0.0  ;;  %v6216_v47 = vadd.f32 %v6215_v30, %v9974_v22  ;;  %v6217_v26 = vpop.f32.mrb[133].mxu0  ;;  %v6506_v63 = vpop.f32.mrb[133].mxu1 }
 0x42c   : > { %v6218_v2 = vpop.f32.mrb[134].mxu0  ;;  %v6507_v22 = vpop.f32.mrb[134].mxu1 }
 0x42d   : > { %v8259_v55 = vpack.c.bf16 %v7018_v1, %v7017_v57  ;;  %v6505_v37 = vadd.f32 %v6504_v38, %v6216_v47  ;;  %v6219_v25 = vadd.f32 %v6218_v2, %v9977_v41  ;;  %v6220_v32 = vpop.f32.mrb[135].mxu0  ;;  %v6509_v8 = vpop.f32.mrb[135].mxu1  ;;  %v1093_v57 = vld [vmem:[%s8737_s28 + $0xf70] sm:$0xff]  ;;  %v1086_v41 = vld [vmem:[%s8737_s28 + $0xf38] sm:$0xff] }
 0x42e   : > { %v1094_v47 = vld [vmem:[%s8737_s28 + $0xf78] sm:$0xff] }
 0x42f   : > { %8260 = vst [vmem:[%s10301_s16] sm:$0xff] %v8259_v55   ;;  %v6955_v62 = vadd.f32 %v10287_v29, %v6505_v37  ;;  %v6508_v30 = vadd.f32 %v6507_v22, %v6219_v25  ;;  %6430 = vmatmul.mubr.bf16.gmra.mrb[240].mxu0 %v7944_v3  ;;  %6719 = vmatmul.mubr.bf16.gmra.mrb[240].mxu1 %v7946_v52 }
 0x430   : > { %6437 = vmatprep.mubr.bf16.mxu0 %v7961_v18  ;;  %6726 = vmatprep.mubr.bf16.mxu1 %v7963_v33  ;;  %v7960_v37 = vcombine.low %v1069_v35, %v1077_v11  ;;  %v7962_v52 = vcombine.low %v1070_v20, %v1078_v9  ;;  %v7977_v18 = vcombine.high %v1085_v50, %v1093_v57  ;;  %v1101_v20 = vld [vmem:[%s8737_s28 + $0xfb0] sm:$0xff] }
 0x431   : > { %v6956_v60 = vadd.f32 %v10287_v29, %v6508_v30  ;;  %v7019_v38 = vmax.f32 %v6955_v62, 0.0  ;;  %v7979_v30 = vcombine.high %v1086_v41, %v1094_v47  ;;  %v1109_v9 = vld [vmem:[%s8737_s28 + $0xff0] sm:$0xff] }
 0x432   : > { %v6223_v1 = vpop.f32.mrb[136].mxu0  ;;  %v6512_v2 = vpop.f32.mrb[136].mxu1 }
 0x433   : > { %v7020_v26 = vmax.f32 %v6956_v60, 0.0  ;;  %v6224_v63 = vadd.f32 %v6223_v1, %v9984_v44  ;;  %v6225_v55 = vpop.f32.mrb[137].mxu0  ;;  %v6514_v25 = vpop.f32.mrb[137].mxu1 }
 0x434   : > { %v6226_v3 = vpop.f32.mrb[138].mxu0  ;;  %v6515_v8 = vpop.f32.mrb[138].mxu1 }
 0x435   : > { %v8264_v22 = vpack.c.bf16 %v7020_v26, %v7019_v38  ;;  %v6513_v32 = vadd.f32 %v6512_v2, %v6224_v63  ;;  %v6227_v33 = vadd.f32 %v6226_v3, %v9987_v23  ;;  %v6228_v62 = vpop.f32.mrb[139].mxu0  ;;  %v6517_v60 = vpop.f32.mrb[139].mxu1  ;;  %v1102_v23 = vld [vmem:[%s8737_s28 + $0xfb8] sm:$0xff]  ;;  %v7976_v3 = vcombine.low %v1085_v50, %v1093_v57 }
 0x436   : > { %v1110_v38 = vld [vmem:[%s8737_s28 + $0xff8] sm:$0xff] }
 0x437   : > { %8416 = vst [vmem:[%s10301_s16 + $0x8] sm:$0xff] %v8264_v22   ;;  %v6957_v44 = vadd.f32 %v10287_v29, %v6513_v32  ;;  %v6516_v35 = vadd.f32 %v6515_v8, %v6227_v33  ;;  %6438 = vmatmul.mubr.bf16.gmra.mrb[244].mxu0 %v7960_v37  ;;  %6727 = vmatmul.mubr.bf16.gmra.mrb[244].mxu1 %v7962_v52 }
 0x438   : > { %6445 = vmatprep.mubr.bf16.mxu0 %v7977_v18  ;;  %6734 = vmatprep.mubr.bf16.mxu1 %v7979_v30  ;;  %v7978_v52 = vcombine.low %v1086_v41, %v1094_v47  ;;  %v7993_v18 = vcombine.high %v1101_v20, %v1109_v9  ;;  %v7995_v60 = vcombine.high %v1102_v23, %v1110_v38 }
 0x439   : > { %v6958_v11 = vadd.f32 %v10287_v29, %v6516_v35  ;;  %v7021_v26 = vmax.f32 %v6957_v44, 0.0 }
 0x43a   : > { %v6231_v1 = vpop.f32.mrb[140].mxu0  ;;  %v6520_v55 = vpop.f32.mrb[140].mxu1 }
 0x43b   : > { %v7022_v63 = vmax.f32 %v6958_v11, 0.0  ;;  %v6232_v2 = vadd.f32 %v6231_v1, %v9994_v42  ;;  %v6233_v25 = vpop.f32.mrb[141].mxu0  ;;  %v6522_v22 = vpop.f32.mrb[141].mxu1 }
 0x43c   : > { %v6234_v37 = vpop.f32.mrb[142].mxu0  ;;  %v6523_v62 = vpop.f32.mrb[142].mxu1 }
 0x43d   : > { %v8269_v32 = vpack.c.bf16 %v7022_v63, %v7021_v26  ;;  %v6521_v33 = vadd.f32 %v6520_v55, %v6232_v2  ;;  %v6235_v8 = vadd.f32 %v6234_v37, %v9997_v58  ;;  %v6236_v30 = vpop.f32.mrb[143].mxu0  ;;  %v6525_v35 = vpop.f32.mrb[143].mxu1  ;;  %v7992_v26 = vcombine.low %v1101_v20, %v1109_v9 }
 0x43e   : > { %v7994_v55 = vcombine.low %v1102_v23, %v1110_v38 }
 0x43f   : > { %8417 = vst [vmem:[%s10301_s16 + $0x10] sm:$0xff] %v8269_v32   ;;  %v6959_v44 = vadd.f32 %v10287_v29, %v6521_v33  ;;  %v6524_v11 = vadd.f32 %v6523_v62, %v6235_v8  ;;  %6446 = vmatmul.mubr.bf16.gmra.mrb[248].mxu0 %v7976_v3  ;;  %6735 = vmatmul.mubr.bf16.gmra.mrb[248].mxu1 %v7978_v52  ;;  %v10602_v3 = vld [vmem:[#allocation24_spill] sm:$0xff] }
 0x440   : > { %6453 = vmatprep.mubr.bf16.mxu0 %v7993_v18  ;;  %6742 = vmatprep.mubr.bf16.mxu1 %v7995_v60 }
 0x441   : > { %v6960_v42 = vadd.f32 %v10287_v29, %v6524_v11  ;;  %v7023_v57 = vmax.f32 %v6959_v44, 0.0 }
 0x442   : > { %v6239_v50 = vpop.f32.mrb[144].mxu0  ;;  %v6528_v47 = vpop.f32.mrb[144].mxu1 }
 0x443   : > { %v7024_v41 = vmax.f32 %v6960_v42, 0.0  ;;  %v6240_v58 = vadd.f32 %v6239_v50, %v10004_v28  ;;  %v6241_v1 = vpop.f32.mrb[145].mxu0  ;;  %v6530_v63 = vpop.f32.mrb[145].mxu1 }
 0x444   : > { %v6242_v2 = vpop.f32.mrb[146].mxu0  ;;  %v6531_v52 = vpop.f32.mrb[146].mxu1 }
 0x445   : > { %v8274_v25 = vpack.c.bf16 %v7024_v41, %v7023_v57  ;;  %v6529_v22 = vadd.f32 %v6528_v47, %v6240_v58  ;;  %v6243_v37 = vadd.f32 %v6242_v2, %v10602_v3  ;;  %v6244_v18 = vpop.f32.mrb[147].mxu0  ;;  %v6533_v32 = vpop.f32.mrb[147].mxu1 }
 0x447   : > { %8418 = vst [vmem:[%s10301_s16 + $0x18] sm:$0xff] %v8274_v25   ;;  %v6961_v33 = vadd.f32 %v10287_v29, %v6529_v22  ;;  %v6532_v8 = vadd.f32 %v6531_v52, %v6243_v37  ;;  %6454 = vmatmul.mubr.bf16.gmra.mrb[252].mxu0 %v7992_v26  ;;  %6743 = vmatmul.mubr.bf16.gmra.mrb[252].mxu1 %v7994_v55 }
 0x449   : > { %v6962_v28 = vadd.f32 %v10287_v29, %v6532_v8  ;;  %v7025_v9 = vmax.f32 %v6961_v33, 0.0 }
 0x44a   : > { %v6247_v20 = vpop.f32.mrb[148].mxu0  ;;  %v6536_v38 = vpop.f32.mrb[148].mxu1 }
 0x44b   : > { %v7026_v62 = vmax.f32 %v6962_v28, 0.0  ;;  %v6248_v23 = vadd.f32 %v6247_v20, %v10014_v43  ;;  %v6249_v30 = vpop.f32.mrb[149].mxu0  ;;  %v6538_v60 = vpop.f32.mrb[149].mxu1 }
 0x44c   : > { %v6250_v35 = vpop.f32.mrb[150].mxu0  ;;  %v6539_v50 = vpop.f32.mrb[150].mxu1 }
 0x44d   : > { %v8279_v44 = vpack.c.bf16 %v7026_v62, %v7025_v9  ;;  %v6537_v11 = vadd.f32 %v6536_v38, %v6248_v23  ;;  %v6251_v42 = vadd.f32 %v6250_v35, %v10017_v14  ;;  %v6252_v57 = vpop.f32.mrb[151].mxu0  ;;  %v6541_v41 = vpop.f32.mrb[151].mxu1 }
 0x44f   : > { %8419 = vst [vmem:[%s10301_s16 + $0x20] sm:$0xff] %v8279_v44   ;;  %v6963_v58 = vadd.f32 %v10287_v29, %v6537_v11  ;;  %v6540_v47 = vadd.f32 %v6539_v50, %v6251_v42 }
 0x451   : > { %v6964_v1 = vadd.f32 %v10287_v29, %v6540_v47  ;;  %v7027_v43 = vmax.f32 %v6963_v58, 0.0 }
 0x452   : > { %v6255_v26 = vpop.f32.mrb[152].mxu0  ;;  %v6544_v55 = vpop.f32.mrb[152].mxu1 }
 0x453   : > { %v7028_v63 = vmax.f32 %v6964_v1, 0.0  ;;  %v6256_v2 = vadd.f32 %v6255_v26, %v10024_v61  ;;  %v6257_v25 = vpop.f32.mrb[153].mxu0  ;;  %v6546_v22 = vpop.f32.mrb[153].mxu1 }
 0x454   : > { %v6258_v3 = vpop.f32.mrb[154].mxu0  ;;  %v6547_v18 = vpop.f32.mrb[154].mxu1 }
 0x455   : > { %v8284_v14 = vpack.c.bf16 %v7028_v63, %v7027_v43  ;;  %v6545_v37 = vadd.f32 %v6544_v55, %v6256_v2  ;;  %v6259_v52 = vadd.f32 %v6258_v3, %v10027_v15  ;;  %v6260_v32 = vpop.f32.mrb[155].mxu0  ;;  %v6549_v33 = vpop.f32.mrb[155].mxu1 }
 0x457   : > { %8420 = vst [vmem:[%s10301_s16 + $0x28] sm:$0xff] %v8284_v14   ;;  %v6965_v8 = vadd.f32 %v10287_v29, %v6545_v37  ;;  %v6548_v28 = vadd.f32 %v6547_v18, %v6259_v52 }
 0x459   : > { %v6966_v20 = vadd.f32 %v10287_v29, %v6548_v28  ;;  %v7029_v61 = vmax.f32 %v6965_v8, 0.0 }
 0x45a   : > { %v6263_v9 = vpop.f32.mrb[156].mxu0  ;;  %v6552_v38 = vpop.f32.mrb[156].mxu1 }
 0x45b   : > { %v7030_v62 = vmax.f32 %v6966_v20, 0.0  ;;  %v6264_v23 = vadd.f32 %v6263_v9, %v10034_v16  ;;  %v6265_v30 = vpop.f32.mrb[157].mxu0  ;;  %v6554_v60 = vpop.f32.mrb[157].mxu1 }
 0x45c   : > { %v6266_v35 = vpop.f32.mrb[158].mxu0  ;;  %v6555_v42 = vpop.f32.mrb[158].mxu1 }
 0x45d   : > { %v8289_v15 = vpack.c.bf16 %v7030_v62, %v7029_v61  ;;  %v6553_v44 = vadd.f32 %v6552_v38, %v6264_v23  ;;  %v6267_v11 = vadd.f32 %v6266_v35, %v10037_v59  ;;  %v6268_v50 = vpop.f32.mrb[159].mxu0  ;;  %v6557_v57 = vpop.f32.mrb[159].mxu1 }
 0x45f   : > { %8421 = vst [vmem:[%s10301_s16 + $0x30] sm:$0xff] %v8289_v15   ;;  %v6967_v41 = vadd.f32 %v10287_v29, %v6553_v44  ;;  %v6556_v58 = vadd.f32 %v6555_v42, %v6267_v11 }
 0x461   : > { %v6968_v47 = vadd.f32 %v10287_v29, %v6556_v58  ;;  %v7031_v16 = vmax.f32 %v6967_v41, 0.0 }
 0x462   : > { %v6271_v1 = vpop.f32.mrb[160].mxu0  ;;  %v6560_v63 = vpop.f32.mrb[160].mxu1 }
 0x463   : > { %v7032_v26 = vmax.f32 %v6968_v47, 0.0  ;;  %v6272_v43 = vadd.f32 %v6271_v1, %v10044_v34  ;;  %v6273_v2 = vpop.f32.mrb[161].mxu0  ;;  %v6562_v55 = vpop.f32.mrb[161].mxu1 }
 0x464   : > { %v6274_v25 = vpop.f32.mrb[162].mxu0  ;;  %v6563_v14 = vpop.f32.mrb[162].mxu1 }
 0x465   : > { %v8294_v59 = vpack.c.bf16 %v7032_v26, %v7031_v16  ;;  %v6561_v22 = vadd.f32 %v6560_v63, %v6272_v43  ;;  %v6275_v3 = vadd.f32 %v6274_v25, %v10047_v21  ;;  %v6276_v37 = vpop.f32.mrb[163].mxu0  ;;  %v6565_v52 = vpop.f32.mrb[163].mxu1 }
 0x467   : > { %8422 = vst [vmem:[%s10301_s16 + $0x38] sm:$0xff] %v8294_v59   ;;  %v6969_v18 = vadd.f32 %v10287_v29, %v6561_v22  ;;  %v6564_v32 = vadd.f32 %v6563_v14, %v6275_v3 }
 0x469   : > { %v6970_v33 = vadd.f32 %v10287_v29, %v6564_v32  ;;  %v7033_v34 = vmax.f32 %v6969_v18, 0.0 }
 0x46a   : > { %v6279_v8 = vpop.f32.mrb[164].mxu0  ;;  %v6568_v9 = vpop.f32.mrb[164].mxu1 }
 0x46b   : > { %v7034_v28 = vmax.f32 %v6970_v33, 0.0  ;;  %v6280_v20 = vadd.f32 %v6279_v8, %v10054_v54  ;;  %v6281_v61 = vpop.f32.mrb[165].mxu0  ;;  %v6570_v62 = vpop.f32.mrb[165].mxu1 }
 0x46c   : > { %v6282_v23 = vpop.f32.mrb[166].mxu0  ;;  %v6571_v60 = vpop.f32.mrb[166].mxu1 }
 0x46d   : > { %v8299_v21 = vpack.c.bf16 %v7034_v28, %v7033_v34  ;;  %v6569_v38 = vadd.f32 %v6568_v9, %v6280_v20  ;;  %v6283_v30 = vadd.f32 %v6282_v23, %v10057_v4  ;;  %v6284_v35 = vpop.f32.mrb[167].mxu0  ;;  %v6573_v15 = vpop.f32.mrb[167].mxu1 }
 0x46f   : > { %8423 = vst [vmem:[%s10301_s16 + $0x40] sm:$0xff] %v8299_v21   ;;  %v6971_v44 = vadd.f32 %v10287_v29, %v6569_v38  ;;  %v6572_v11 = vadd.f32 %v6571_v60, %v6283_v30 }
 0x471   : > { %v6972_v42 = vadd.f32 %v10287_v29, %v6572_v11  ;;  %v7035_v54 = vmax.f32 %v6971_v44, 0.0 }
 0x472   : > { %v6287_v50 = vpop.f32.mrb[168].mxu0  ;;  %v6576_v58 = vpop.f32.mrb[168].mxu1 }
 0x473   : > { %v7036_v57 = vmax.f32 %v6972_v42, 0.0  ;;  %v6288_v41 = vadd.f32 %v6287_v50, %v10064_v46  ;;  %v6289_v47 = vpop.f32.mrb[169].mxu0  ;;  %v6578_v1 = vpop.f32.mrb[169].mxu1 }
 0x474   : > { %v6290_v16 = vpop.f32.mrb[170].mxu0  ;;  %v6579_v63 = vpop.f32.mrb[170].mxu1 }
 0x475   : > { %v8304_v4 = vpack.c.bf16 %v7036_v57, %v7035_v54  ;;  %v6577_v26 = vadd.f32 %v6576_v58, %v6288_v41  ;;  %v6291_v43 = vadd.f32 %v6290_v16, %v10067_v10  ;;  %v6292_v2 = vpop.f32.mrb[171].mxu0  ;;  %v6581_v55 = vpop.f32.mrb[171].mxu1 }
 0x477   : > { %8424 = vst [vmem:[%s10301_s16 + $0x48] sm:$0xff] %v8304_v4   ;;  %v6973_v25 = vadd.f32 %v10287_v29, %v6577_v26  ;;  %v6580_v59 = vadd.f32 %v6579_v63, %v6291_v43 }
 0x479   : > { %v6974_v22 = vadd.f32 %v10287_v29, %v6580_v59  ;;  %v7037_v46 = vmax.f32 %v6973_v25, 0.0 }
 0x47a   : > { %v6295_v3 = vpop.f32.mrb[172].mxu0  ;;  %v6584_v52 = vpop.f32.mrb[172].mxu1 }
 0x47b   : > { %v7038_v14 = vmax.f32 %v6974_v22, 0.0  ;;  %v6296_v37 = vadd.f32 %v6295_v3, %v10074_v5  ;;  %v6297_v18 = vpop.f32.mrb[173].mxu0  ;;  %v6586_v32 = vpop.f32.mrb[173].mxu1 }
 0x47c   : > { %v6298_v33 = vpop.f32.mrb[174].mxu0  ;;  %v6587_v28 = vpop.f32.mrb[174].mxu1 }
 0x47d   : > { %v8309_v10 = vpack.c.bf16 %v7038_v14, %v7037_v46  ;;  %v6585_v8 = vadd.f32 %v6584_v52, %v6296_v37  ;;  %v6299_v34 = vadd.f32 %v6298_v33, %v10077_v7  ;;  %v6300_v20 = vpop.f32.mrb[175].mxu0  ;;  %v6589_v9 = vpop.f32.mrb[175].mxu1 }
 0x47f   : > { %8425 = vst [vmem:[%s10301_s16 + $0x50] sm:$0xff] %v8309_v10   ;;  %v6975_v61 = vadd.f32 %v10287_v29, %v6585_v8  ;;  %v6588_v62 = vadd.f32 %v6587_v28, %v6299_v34 }
 0x481   : > { %v6976_v23 = vadd.f32 %v10287_v29, %v6588_v62  ;;  %v7039_v5 = vmax.f32 %v6975_v61, 0.0 }
 0x482   : > { %v6303_v21 = vpop.f32.mrb[176].mxu0  ;;  %v6592_v60 = vpop.f32.mrb[176].mxu1 }
 0x483   : > { %v7040_v38 = vmax.f32 %v6976_v23, 0.0  ;;  %v6304_v30 = vadd.f32 %v6303_v21, %v10084_v13  ;;  %v6305_v35 = vpop.f32.mrb[177].mxu0  ;;  %v6594_v15 = vpop.f32.mrb[177].mxu1 }
 0x484   : > { %v6306_v44 = vpop.f32.mrb[178].mxu0  ;;  %v6595_v50 = vpop.f32.mrb[178].mxu1 }
 0x485   : > { %v8314_v7 = vpack.c.bf16 %v7040_v38, %v7039_v5  ;;  %v6593_v11 = vadd.f32 %v6592_v60, %v6304_v30  ;;  %v6307_v42 = vadd.f32 %v6306_v44, %v10087_v17  ;;  %v6308_v54 = vpop.f32.mrb[179].mxu0  ;;  %v6597_v57 = vpop.f32.mrb[179].mxu1 }
 0x487   : > { %8426 = vst [vmem:[%s10301_s16 + $0x58] sm:$0xff] %v8314_v7   ;;  %v6977_v41 = vadd.f32 %v10287_v29, %v6593_v11  ;;  %v6596_v58 = vadd.f32 %v6595_v50, %v6307_v42 }
 0x489   : > { %v6978_v47 = vadd.f32 %v10287_v29, %v6596_v58  ;;  %v7041_v13 = vmax.f32 %v6977_v41, 0.0 }
 0x48a   : > { %v6311_v1 = vpop.f32.mrb[180].mxu0  ;;  %v6600_v26 = vpop.f32.mrb[180].mxu1 }
 0x48b   : > { %v7042_v16 = vmax.f32 %v6978_v47, 0.0  ;;  %v6312_v4 = vadd.f32 %v6311_v1, %v10094_v48  ;;  %v6313_v43 = vpop.f32.mrb[181].mxu0  ;;  %v6602_v63 = vpop.f32.mrb[181].mxu1 }
 0x48c   : > { %v6314_v2 = vpop.f32.mrb[182].mxu0  ;;  %v6603_v59 = vpop.f32.mrb[182].mxu1 }
 0x48d   : > { %v8319_v17 = vpack.c.bf16 %v7042_v16, %v7041_v13  ;;  %v6601_v55 = vadd.f32 %v6600_v26, %v6312_v4  ;;  %v6315_v25 = vadd.f32 %v6314_v2, %v10097_v12  ;;  %v6316_v22 = vpop.f32.mrb[183].mxu0  ;;  %v6605_v3 = vpop.f32.mrb[183].mxu1 }
 0x48f   : > { %8427 = vst [vmem:[%s10301_s16 + $0x60] sm:$0xff] %v8319_v17   ;;  %v6979_v46 = vadd.f32 %v10287_v29, %v6601_v55  ;;  %v6604_v14 = vadd.f32 %v6603_v59, %v6315_v25 }
 0x491   : > { %v6980_v37 = vadd.f32 %v10287_v29, %v6604_v14  ;;  %v7043_v48 = vmax.f32 %v6979_v46, 0.0 }
 0x492   : > { %v6319_v52 = vpop.f32.mrb[184].mxu0  ;;  %v6608_v33 = vpop.f32.mrb[184].mxu1 }
 0x493   : > { %v7044_v18 = vmax.f32 %v6980_v37, 0.0  ;;  %v6320_v32 = vadd.f32 %v6319_v52, %v10104_v6  ;;  %v6321_v10 = vpop.f32.mrb[185].mxu0  ;;  %v6610_v8 = vpop.f32.mrb[185].mxu1 }
 0x494   : > { %v6322_v34 = vpop.f32.mrb[186].mxu0  ;;  %v6611_v9 = vpop.f32.mrb[186].mxu1 }
 0x495   : > { %v8324_v12 = vpack.c.bf16 %v7044_v18, %v7043_v48  ;;  %v6609_v28 = vadd.f32 %v6608_v33, %v6320_v32  ;;  %v6323_v20 = vadd.f32 %v6322_v34, %v10107_v36  ;;  %v6324_v61 = vpop.f32.mrb[187].mxu0  ;;  %v6613_v62 = vpop.f32.mrb[187].mxu1 }
 0x497   : > { %8428 = vst [vmem:[%s10301_s16 + $0x68] sm:$0xff] %v8324_v12   ;;  %v6981_v23 = vadd.f32 %v10287_v29, %v6609_v28  ;;  %v6612_v21 = vadd.f32 %v6611_v9, %v6323_v20 }
 0x499   : > { %v6982_v5 = vadd.f32 %v10287_v29, %v6612_v21  ;;  %v7045_v6 = vmax.f32 %v6981_v23, 0.0 }
 0x49a   : > { %v6327_v38 = vpop.f32.mrb[188].mxu0  ;;  %v6616_v35 = vpop.f32.mrb[188].mxu1 }
 0x49b   : > { %v7046_v30 = vmax.f32 %v6982_v5, 0.0  ;;  %v6328_v60 = vadd.f32 %v6327_v38, %v10114_v51  ;;  %v6329_v15 = vpop.f32.mrb[189].mxu0  ;;  %v6618_v44 = vpop.f32.mrb[189].mxu1 }
 0x49c   : > { %v6330_v7 = vpop.f32.mrb[190].mxu0  ;;  %v6619_v50 = vpop.f32.mrb[190].mxu1 }
 0x49d   : > { %v8329_v36 = vpack.c.bf16 %v7046_v30, %v7045_v6  ;;  %v6617_v11 = vadd.f32 %v6616_v35, %v6328_v60  ;;  %v6331_v42 = vadd.f32 %v6330_v7, %v10117_v19  ;;  %v6332_v54 = vpop.f32.mrb[191].mxu0  ;;  %v6621_v57 = vpop.f32.mrb[191].mxu1  ;;  %v10603_v35 = vld [vmem:[#allocation25_spill] sm:$0xff] }
 0x49f   : > { %8429 = vst [vmem:[%s10301_s16 + $0x70] sm:$0xff] %v8329_v36   ;;  %v6983_v41 = vadd.f32 %v10287_v29, %v6617_v11  ;;  %v6620_v58 = vadd.f32 %v6619_v50, %v6331_v42 }
 0x4a1   : > { %v6984_v47 = vadd.f32 %v10287_v29, %v6620_v58  ;;  %v7047_v51 = vmax.f32 %v6983_v41, 0.0 }
 0x4a2   : > { %v6335_v1 = vpop.f32.mrb[192].mxu0  ;;  %v6624_v4 = vpop.f32.mrb[192].mxu1 }
 0x4a3   : > { %v7048_v13 = vmax.f32 %v6984_v47, 0.0  ;;  %v6336_v16 = vadd.f32 %v6335_v1, %v10124_v39  ;;  %v6337_v26 = vpop.f32.mrb[193].mxu0  ;;  %v6626_v43 = vpop.f32.mrb[193].mxu1 }
 0x4a4   : > { %v6338_v63 = vpop.f32.mrb[194].mxu0  ;;  %v6627_v55 = vpop.f32.mrb[194].mxu1 }
 0x4a5   : > { %v8334_v19 = vpack.c.bf16 %v7048_v13, %v7047_v51  ;;  %v6625_v2 = vadd.f32 %v6624_v4, %v6336_v16  ;;  %v6339_v17 = vadd.f32 %v6338_v63, %v10127_v45  ;;  %v6340_v25 = vpop.f32.mrb[195].mxu0  ;;  %v6629_v59 = vpop.f32.mrb[195].mxu1  ;;  %v10604_v4 = vld [vmem:[#allocation26_spill] sm:$0xff] }
 0x4a7   : > { %8430 = vst [vmem:[%s10301_s16 + $0x78] sm:$0xff] %v8334_v19   ;;  %v6985_v22 = vadd.f32 %v10287_v29, %v6625_v2  ;;  %v6628_v3 = vadd.f32 %v6627_v55, %v6339_v17 }
 0x4a9   : > { %v6986_v46 = vadd.f32 %v10287_v29, %v6628_v3  ;;  %v7049_v39 = vmax.f32 %v6985_v22, 0.0  ;;  %v10605_v22 = vld [vmem:[#allocation27_spill] sm:$0xff] }
 0x4aa   : > { %v6343_v14 = vpop.f32.mrb[196].mxu0  ;;  %v6632_v48 = vpop.f32.mrb[196].mxu1 }
 0x4ab   : > { %v7050_v37 = vmax.f32 %v6986_v46, 0.0  ;;  %v6344_v52 = vadd.f32 %v6343_v14, %v10134_v53  ;;  %v6345_v18 = vpop.f32.mrb[197].mxu0  ;;  %v6634_v32 = vpop.f32.mrb[197].mxu1 }
 0x4ac   : > { %v6346_v33 = vpop.f32.mrb[198].mxu0  ;;  %v6635_v34 = vpop.f32.mrb[198].mxu1  ;;  %v10606_v18 = vld [vmem:[#allocation3_spill] sm:$0xff] }
 0x4ad   : > { %v8339_v45 = vpack.c.bf16 %v7050_v37, %v7049_v39  ;;  %v6633_v10 = vadd.f32 %v6632_v48, %v6344_v52  ;;  %v6347_v8 = vadd.f32 %v6346_v33, %v10137_v27  ;;  %v6348_v12 = vpop.f32.mrb[199].mxu0  ;;  %v6637_v28 = vpop.f32.mrb[199].mxu1 }
 0x4af   : > { %8431 = vst [vmem:[%s10301_s16 + $0x80] sm:$0xff] %v8339_v45   ;;  %v6987_v20 = vadd.f32 %v10287_v29, %v6633_v10  ;;  %v6636_v9 = vadd.f32 %v6635_v34, %v6347_v8 }
 0x4b1   : > { %v6988_v61 = vadd.f32 %v10287_v29, %v6636_v9  ;;  %v7051_v53 = vmax.f32 %v6987_v20, 0.0 }
 0x4b2   : > { %v6351_v62 = vpop.f32.mrb[200].mxu0  ;;  %v6640_v5 = vpop.f32.mrb[200].mxu1 }
 0x4b3   : > { %v7052_v23 = vmax.f32 %v6988_v61, 0.0  ;;  %v6352_v21 = vadd.f32 %v6351_v62, %v10144_v49  ;;  %v6353_v38 = vpop.f32.mrb[201].mxu0  ;;  %v6642_v6 = vpop.f32.mrb[201].mxu1  ;;  %v10607_v61 = vld [vmem:[#allocation4_spill] sm:$0xff] }
 0x4b4   : > { %v6354_v30 = vpop.f32.mrb[202].mxu0  ;;  %v6643_v44 = vpop.f32.mrb[202].mxu1 }
 0x4b5   : > { %v8344_v27 = vpack.c.bf16 %v7052_v23, %v7051_v53  ;;  %v6641_v60 = vadd.f32 %v6640_v5, %v6352_v21  ;;  %v6355_v15 = vadd.f32 %v6354_v30, %v10603_v35  ;;  %v6356_v7 = vpop.f32.mrb[203].mxu0  ;;  %v6645_v36 = vpop.f32.mrb[203].mxu1  ;;  %v10608_v30 = vld [vmem:[#allocation5_spill] sm:$0xff] }
 0x4b7   : > { %8432 = vst [vmem:[%s10301_s16 + $0x88] sm:$0xff] %v8344_v27   ;;  %v6989_v11 = vadd.f32 %v10287_v29, %v6641_v60  ;;  %v6644_v42 = vadd.f32 %v6643_v44, %v6355_v15 }
 0x4b9   : > { %v6990_v50 = vadd.f32 %v10287_v29, %v6644_v42  ;;  %v7053_v49 = vmax.f32 %v6989_v11, 0.0 }
 0x4ba   : > { %v6359_v54 = vpop.f32.mrb[204].mxu0  ;;  %v6648_v58 = vpop.f32.mrb[204].mxu1 }
 0x4bb   : > { %v7054_v57 = vmax.f32 %v6990_v50, 0.0  ;;  %v6360_v41 = vadd.f32 %v6359_v54, %v10154_v24  ;;  %v6361_v47 = vpop.f32.mrb[205].mxu0  ;;  %v6650_v1 = vpop.f32.mrb[205].mxu1  ;;  %v10609_v54 = vld [vmem:[#allocation6_spill] sm:$0xff] }
 0x4bc   : > { %v6362_v51 = vpop.f32.mrb[206].mxu0  ;;  %v6651_v43 = vpop.f32.mrb[206].mxu1 }
 0x4bd   : > { %v8349_v13 = vpack.c.bf16 %v7054_v57, %v7053_v49  ;;  %v6649_v16 = vadd.f32 %v6648_v58, %v6360_v41  ;;  %v6363_v26 = vadd.f32 %v6362_v51, %v10604_v4  ;;  %v6364_v63 = vpop.f32.mrb[207].mxu0  ;;  %v6653_v19 = vpop.f32.mrb[207].mxu1 }
 0x4bf   : > { %8433 = vst [vmem:[%s10301_s16 + $0x90] sm:$0xff] %v8349_v13   ;;  %v6991_v2 = vadd.f32 %v10287_v29, %v6649_v16  ;;  %v6652_v17 = vadd.f32 %v6651_v43, %v6363_v26  ;;  %v10610_v13 = vld [vmem:[#allocation7_spill] sm:$0xff] }
 0x4c1   : > { %v6992_v55 = vadd.f32 %v10287_v29, %v6652_v17  ;;  %v7055_v24 = vmax.f32 %v6991_v2, 0.0 }
 0x4c2   : > { %v6367_v25 = vpop.f32.mrb[208].mxu0  ;;  %v6656_v46 = vpop.f32.mrb[208].mxu1 }
 0x4c3   : > { %v7056_v59 = vmax.f32 %v6992_v55, 0.0  ;;  %v6368_v3 = vadd.f32 %v6367_v25, %v10605_v22  ;;  %v6369_v14 = vpop.f32.mrb[209].mxu0  ;;  %v6658_v39 = vpop.f32.mrb[209].mxu1 }
 0x4c4   : > { %v6370_v37 = vpop.f32.mrb[210].mxu0  ;;  %v6659_v33 = vpop.f32.mrb[210].mxu1 }
 0x4c5   : > { %v8354_v52 = vpack.c.bf16 %v7056_v59, %v7055_v24  ;;  %v6657_v48 = vadd.f32 %v6656_v46, %v6368_v3  ;;  %v6371_v32 = vadd.f32 %v6370_v37, %v10606_v18  ;;  %v6372_v45 = vpop.f32.mrb[211].mxu0  ;;  %v6661_v10 = vpop.f32.mrb[211].mxu1  ;;  %v10611_v24 = vld [vmem:[#allocation8_spill] sm:$0xff] }
 0x4c7   : > { %8434 = vst [vmem:[%s10301_s16 + $0x98] sm:$0xff] %v8354_v52   ;;  %v6993_v8 = vadd.f32 %v10287_v29, %v6657_v48  ;;  %v6660_v34 = vadd.f32 %v6659_v33, %v6371_v32  ;;  %v10612_v52 = vld [vmem:[#allocation9_spill] sm:$0xff] }
 0x4c9   : > { %v6994_v12 = vadd.f32 %v10287_v29, %v6660_v34  ;;  %v7057_v20 = vmax.f32 %v6993_v8, 0.0 }
 0x4ca   : > { %v6375_v28 = vpop.f32.mrb[212].mxu0  ;;  %v6664_v53 = vpop.f32.mrb[212].mxu1 }
 0x4cb   : > { %v7058_v9 = vmax.f32 %v6994_v12, 0.0  ;;  %v6376_v62 = vadd.f32 %v6375_v28, %v10607_v61  ;;  %v6377_v23 = vpop.f32.mrb[213].mxu0  ;;  %v6666_v21 = vpop.f32.mrb[213].mxu1 }
 0x4cc   : > { %v6378_v5 = vpop.f32.mrb[214].mxu0  ;;  %v6667_v60 = vpop.f32.mrb[214].mxu1 }
 0x4cd   : > { %v8359_v38 = vpack.c.bf16 %v7058_v9, %v7057_v20  ;;  %v6665_v6 = vadd.f32 %v6664_v53, %v6376_v62  ;;  %v6379_v27 = vadd.f32 %v6378_v5, %v10608_v30  ;;  %v6380_v35 = vpop.f32.mrb[215].mxu0  ;;  %v6669_v15 = vpop.f32.mrb[215].mxu1  ;;  %v10613_v20 = vld [vmem:[#allocation10_spill] sm:$0xff] }
 0x4cf   : > { %8435 = vst [vmem:[%s10301_s16 + $0xa0] sm:$0xff] %v8359_v38   ;;  %v6995_v44 = vadd.f32 %v10287_v29, %v6665_v6  ;;  %v6668_v7 = vadd.f32 %v6667_v60, %v6379_v27  ;;  %v10614_v38 = vld [vmem:[#allocation11_spill] sm:$0xff] }
 0x4d1   : > { %v6996_v36 = vadd.f32 %v10287_v29, %v6668_v7  ;;  %v7059_v42 = vmax.f32 %v6995_v44, 0.0 }
 0x4d2   : > { %v6383_v11 = vpop.f32.mrb[216].mxu0  ;;  %v6672_v57 = vpop.f32.mrb[216].mxu1 }
 0x4d3   : > { %v7060_v50 = vmax.f32 %v6996_v36, 0.0  ;;  %v6384_v49 = vadd.f32 %v6383_v11, %v10609_v54  ;;  %v6385_v41 = vpop.f32.mrb[217].mxu0  ;;  %v6674_v58 = vpop.f32.mrb[217].mxu1 }
 0x4d4   : > { %v6386_v47 = vpop.f32.mrb[218].mxu0  ;;  %v6675_v4 = vpop.f32.mrb[218].mxu1 }
 0x4d5   : > { %v8364_v1 = vpack.c.bf16 %v7060_v50, %v7059_v42  ;;  %v6673_v51 = vadd.f32 %v6672_v57, %v6384_v49  ;;  %v6387_v16 = vadd.f32 %v6386_v47, %v10610_v13  ;;  %v6388_v26 = vpop.f32.mrb[219].mxu0  ;;  %v6677_v43 = vpop.f32.mrb[219].mxu1  ;;  %v10615_v42 = vld [vmem:[#allocation12_spill] sm:$0xff] }
 0x4d7   : > { %8436 = vst [vmem:[%s10301_s16 + $0xa8] sm:$0xff] %v8364_v1   ;;  %v6997_v63 = vadd.f32 %v10287_v29, %v6673_v51  ;;  %v6676_v19 = vadd.f32 %v6675_v4, %v6387_v16  ;;  %v10616_v1 = vld [vmem:[#allocation13_spill] sm:$0xff] }
 0x4d9   : > { %v6998_v2 = vadd.f32 %v10287_v29, %v6676_v19  ;;  %v7061_v55 = vmax.f32 %v6997_v63, 0.0 }
 0x4da   : > { %v6391_v17 = vpop.f32.mrb[220].mxu0  ;;  %v6680_v22 = vpop.f32.mrb[220].mxu1 }
 0x4db   : > { %v7062_v25 = vmax.f32 %v6998_v2, 0.0  ;;  %v6392_v59 = vadd.f32 %v6391_v17, %v10611_v24  ;;  %v6393_v3 = vpop.f32.mrb[221].mxu0  ;;  %v6682_v46 = vpop.f32.mrb[221].mxu1 }
 0x4dc   : > { %v6394_v14 = vpop.f32.mrb[222].mxu0  ;;  %v6683_v18 = vpop.f32.mrb[222].mxu1 }
 0x4dd   : > { %v8369_v39 = vpack.c.bf16 %v7062_v25, %v7061_v55  ;;  %v6681_v37 = vadd.f32 %v6680_v22, %v6392_v59  ;;  %v6395_v48 = vadd.f32 %v6394_v14, %v10612_v52  ;;  %v6396_v32 = vpop.f32.mrb[223].mxu0  ;;  %v6685_v33 = vpop.f32.mrb[223].mxu1  ;;  %v10617_v55 = vld [vmem:[#allocation14_spill] sm:$0xff] }
 0x4df   : > { %8437 = vst [vmem:[%s10301_s16 + $0xb0] sm:$0xff] %v8369_v39   ;;  %v6999_v45 = vadd.f32 %v10287_v29, %v6681_v37  ;;  %v6684_v10 = vadd.f32 %v6683_v18, %v6395_v48  ;;  %v10618_v39 = vld [vmem:[#allocation15_spill] sm:$0xff] }
 0x4e1   : > { %v7000_v8 = vadd.f32 %v10287_v29, %v6684_v10  ;;  %v7063_v12 = vmax.f32 %v6999_v45, 0.0 }
 0x4e2   : > { %v6399_v34 = vpop.f32.mrb[224].mxu0  ;;  %v6688_v61 = vpop.f32.mrb[224].mxu1 }
 0x4e3   : > { %v7064_v28 = vmax.f32 %v7000_v8, 0.0  ;;  %v6400_v9 = vadd.f32 %v6399_v34, %v10613_v20  ;;  %v6401_v62 = vpop.f32.mrb[225].mxu0  ;;  %v6690_v53 = vpop.f32.mrb[225].mxu1 }
 0x4e4   : > { %v6402_v23 = vpop.f32.mrb[226].mxu0  ;;  %v6691_v30 = vpop.f32.mrb[226].mxu1 }
 0x4e5   : > { %v8374_v21 = vpack.c.bf16 %v7064_v28, %v7063_v12  ;;  %v6689_v5 = vadd.f32 %v6688_v61, %v6400_v9  ;;  %v6403_v6 = vadd.f32 %v6402_v23, %v10614_v38  ;;  %v6404_v27 = vpop.f32.mrb[227].mxu0  ;;  %v6693_v60 = vpop.f32.mrb[227].mxu1  ;;  %v10619_v12 = vld [vmem:[#allocation16_spill] sm:$0xff] }
 0x4e7   : > { %8438 = vst [vmem:[%s10301_s16 + $0xb8] sm:$0xff] %v8374_v21   ;;  %v7001_v35 = vadd.f32 %v10287_v29, %v6689_v5  ;;  %v6692_v15 = vadd.f32 %v6691_v30, %v6403_v6  ;;  %v10620_v21 = vld [vmem:[#allocation17_spill] sm:$0xff] }
 0x4e9   : > { %v7002_v44 = vadd.f32 %v10287_v29, %v6692_v15  ;;  %v7065_v36 = vmax.f32 %v7001_v35, 0.0 }
 0x4ea   : > { %v6407_v7 = vpop.f32.mrb[228].mxu0  ;;  %v6696_v54 = vpop.f32.mrb[228].mxu1 }
 0x4eb   : > { %v7066_v11 = vmax.f32 %v7002_v44, 0.0  ;;  %v6408_v50 = vadd.f32 %v6407_v7, %v10615_v42  ;;  %v6409_v49 = vpop.f32.mrb[229].mxu0  ;;  %v6698_v57 = vpop.f32.mrb[229].mxu1 }
 0x4ec   : > { %v6410_v41 = vpop.f32.mrb[230].mxu0  ;;  %v6699_v13 = vpop.f32.mrb[230].mxu1 }
 0x4ed   : > { %v8379_v58 = vpack.c.bf16 %v7066_v11, %v7065_v36  ;;  %v6697_v47 = vadd.f32 %v6696_v54, %v6408_v50  ;;  %v6411_v51 = vadd.f32 %v6410_v41, %v10616_v1  ;;  %v6412_v16 = vpop.f32.mrb[231].mxu0  ;;  %v6701_v4 = vpop.f32.mrb[231].mxu1  ;;  %v10621_v36 = vld [vmem:[#allocation18_spill] sm:$0xff] }
 0x4ef   : > { %8439 = vst [vmem:[%s10301_s16 + $0xc0] sm:$0xff] %v8379_v58   ;;  %v7003_v26 = vadd.f32 %v10287_v29, %v6697_v47  ;;  %v6700_v43 = vadd.f32 %v6699_v13, %v6411_v51  ;;  %v10622_v58 = vld [vmem:[#allocation19_spill] sm:$0xff] }
 0x4f1   : > { %v7004_v63 = vadd.f32 %v10287_v29, %v6700_v43  ;;  %v7067_v2 = vmax.f32 %v7003_v26, 0.0  ;;  %v10441_v29 = vld [vmem:[%s10482_s2] ss:$0 sm:$0xff] }
 0x4f2   : > { %v6415_v19 = vpop.f32.mrb[232].mxu0  ;;  %v6704_v24 = vpop.f32.mrb[232].mxu1 }
 0x4f3   : > { %v7068_v17 = vmax.f32 %v7004_v63, 0.0  ;;  %v6416_v25 = vadd.f32 %v6415_v19, %v10617_v55  ;;  %v6417_v59 = vpop.f32.mrb[233].mxu0  ;;  %v6706_v22 = vpop.f32.mrb[233].mxu1 }
 0x4f4   : > { %v6418_v3 = vpop.f32.mrb[234].mxu0  ;;  %v6707_v52 = vpop.f32.mrb[234].mxu1 }
 0x4f5   : > { %v8384_v46 = vpack.c.bf16 %v7068_v17, %v7067_v2  ;;  %v6705_v14 = vadd.f32 %v6704_v24, %v6416_v25  ;;  %v6419_v37 = vadd.f32 %v6418_v3, %v10618_v39  ;;  %v6420_v48 = vpop.f32.mrb[235].mxu0  ;;  %v6709_v18 = vpop.f32.mrb[235].mxu1  ;;  %v10623_v2 = vld [vmem:[#allocation20_spill] sm:$0xff] }
 0x4f7   : > { %8440 = vst [vmem:[%s10301_s16 + $0xc8] sm:$0xff] %v8384_v46   ;;  %v7005_v32 = vadd.f32 %v10441_v29, %v6705_v14  ;;  %v6708_v33 = vadd.f32 %v6707_v52, %v6419_v37  ;;  %v10624_v46 = vld [vmem:[#allocation21_spill] sm:$0xff] }
 0x4f9   : > { %v7006_v45 = vadd.f32 %v10441_v29, %v6708_v33  ;;  %v7069_v8 = vmax.f32 %v7005_v32, 0.0 }
 0x4fa   : > { %v6423_v10 = vpop.f32.mrb[236].mxu0  ;;  %v6712_v20 = vpop.f32.mrb[236].mxu1 }
 0x4fb   : > { %v7070_v34 = vmax.f32 %v7006_v45, 0.0  ;;  %v6424_v28 = vadd.f32 %v6423_v10, %v10619_v12  ;;  %v6425_v9 = vpop.f32.mrb[237].mxu0  ;;  %v6714_v61 = vpop.f32.mrb[237].mxu1 }
 0x4fc   : > { %v6426_v62 = vpop.f32.mrb[238].mxu0  ;;  %v6715_v38 = vpop.f32.mrb[238].mxu1 }
 0x4fd   : > { %v8389_v53 = vpack.c.bf16 %v7070_v34, %v7069_v8  ;;  %v6713_v23 = vadd.f32 %v6712_v20, %v6424_v28  ;;  %v6427_v5 = vadd.f32 %v6426_v62, %v10620_v21  ;;  %v6428_v6 = vpop.f32.mrb[239].mxu0  ;;  %v6717_v30 = vpop.f32.mrb[239].mxu1 }
 0x4ff   : > { %8441 = vst [vmem:[%s10301_s16 + $0xd0] sm:$0xff] %v8389_v53   ;;  %v7007_v27 = vadd.f32 %v10441_v29, %v6713_v23  ;;  %v6716_v60 = vadd.f32 %v6715_v38, %v6427_v5 }
 0x501   : > { %v7008_v35 = vadd.f32 %v10441_v29, %v6716_v60  ;;  %v7071_v44 = vmax.f32 %v7007_v27, 0.0 }
 0x502   : > { %v6431_v15 = vpop.f32.mrb[240].mxu0  ;;  %v6720_v42 = vpop.f32.mrb[240].mxu1 }
 0x503   : > { %v7072_v7 = vmax.f32 %v7008_v35, 0.0  ;;  %v6432_v11 = vadd.f32 %v6431_v15, %v10621_v36  ;;  %v6433_v50 = vpop.f32.mrb[241].mxu0  ;;  %v6722_v54 = vpop.f32.mrb[241].mxu1 }
 0x504   : > { %v6434_v49 = vpop.f32.mrb[242].mxu0  ;;  %v6723_v1 = vpop.f32.mrb[242].mxu1 }
 0x505   : > { %v8394_v57 = vpack.c.bf16 %v7072_v7, %v7071_v44  ;;  %v6721_v41 = vadd.f32 %v6720_v42, %v6432_v11  ;;  %v6435_v47 = vadd.f32 %v6434_v49, %v10622_v58  ;;  %v6436_v51 = vpop.f32.mrb[243].mxu0  ;;  %v6725_v13 = vpop.f32.mrb[243].mxu1 }
 0x507   : > { %8442 = vst [vmem:[%s10301_s16 + $0xd8] sm:$0xff] %v8394_v57   ;;  %v7009_v16 = vadd.f32 %v10441_v29, %v6721_v41  ;;  %v6724_v4 = vadd.f32 %v6723_v1, %v6435_v47 }
 0x509   : > { %v7010_v26 = vadd.f32 %v10441_v29, %v6724_v4  ;;  %v7073_v63 = vmax.f32 %v7009_v16, 0.0 }
 0x50a   : > { %v6439_v43 = vpop.f32.mrb[244].mxu0  ;;  %v6728_v55 = vpop.f32.mrb[244].mxu1 }
 0x50b   : > { %v7074_v19 = vmax.f32 %v7010_v26, 0.0  ;;  %v6440_v17 = vadd.f32 %v6439_v43, %v10623_v2  ;;  %v6441_v25 = vpop.f32.mrb[245].mxu0  ;;  %v6730_v24 = vpop.f32.mrb[245].mxu1 }
 0x50c   : > { %v6442_v59 = vpop.f32.mrb[246].mxu0  ;;  %v6731_v39 = vpop.f32.mrb[246].mxu1 }
 0x50d   : > { %v8399_v22 = vpack.c.bf16 %v7074_v19, %v7073_v63  ;;  %v6729_v3 = vadd.f32 %v6728_v55, %v6440_v17  ;;  %v6443_v14 = vadd.f32 %v6442_v59, %v10624_v46  ;;  %v6444_v37 = vpop.f32.mrb[247].mxu0  ;;  %v6733_v52 = vpop.f32.mrb[247].mxu1 }
 0x50f   : > { %8443 = vst [vmem:[%s10301_s16 + $0xe0] sm:$0xff] %v8399_v22   ;;  %v7011_v48 = vadd.f32 %v10441_v29, %v6729_v3  ;;  %v6732_v18 = vadd.f32 %v6731_v39, %v6443_v14 }
 0x511   : > { %v7012_v32 = vadd.f32 %v10441_v29, %v6732_v18  ;;  %v7075_v45 = vmax.f32 %v7011_v48, 0.0 }
 0x512   : > { %v6447_v33 = vpop.f32.mrb[248].mxu0  ;;  %v6736_v34 = vpop.f32.mrb[248].mxu1 }
 0x513   : > { %v7076_v10 = vmax.f32 %v7012_v32, 0.0  ;;  %v6448_v8 = vadd.f32 %v6447_v33, %v10264_v56  ;;  %v6449_v12 = vpop.f32.mrb[249].mxu0  ;;  %v6738_v28 = vpop.f32.mrb[249].mxu1 }
 0x514   : > { %v6450_v20 = vpop.f32.mrb[250].mxu0  ;;  %v6739_v53 = vpop.f32.mrb[250].mxu1 }
 0x515   : > { %v8404_v9 = vpack.c.bf16 %v7076_v10, %v7075_v45  ;;  %v6737_v61 = vadd.f32 %v6736_v34, %v6448_v8  ;;  %v6451_v62 = vadd.f32 %v6450_v20, %v10267_v40  ;;  %v6452_v23 = vpop.f32.mrb[251].mxu0  ;;  %v6741_v21 = vpop.f32.mrb[251].mxu1 }
 0x517   : > { %8444 = vst [vmem:[%s10301_s16 + $0xe8] sm:$0xff] %v8404_v9   ;;  %v7013_v5 = vadd.f32 %v10441_v29, %v6737_v61  ;;  %v6740_v38 = vadd.f32 %v6739_v53, %v6451_v62 }
 0x519   : > { %v7014_v6 = vadd.f32 %v10441_v29, %v6740_v38  ;;  %v7077_v56 = vmax.f32 %v7013_v5, 0.0 }
 0x51a   : > { %v6455_v30 = vpop.f32.mrb[252].mxu0  ;;  %v6744_v35 = vpop.f32.mrb[252].mxu1 }
 0x51b   : > { %v7078_v27 = vmax.f32 %v7014_v6, 0.0  ;;  %v6456_v60 = vadd.f32 %v6455_v30, %v10274_v0  ;;  %v6457_v15 = vpop.f32.mrb[253].mxu0  ;;  %v6746_v44 = vpop.f32.mrb[253].mxu1 }
 0x51c   : > { %v6458_v40 = vpop.f32.mrb[254].mxu0  ;;  %v6747_v42 = vpop.f32.mrb[254].mxu1 }
 0x51d   : > { %v8409_v7 = vpack.c.bf16 %v7078_v27, %v7077_v56  ;;  %v6745_v36 = vadd.f32 %v6744_v35, %v6456_v60  ;;  %v6459_v11 = vadd.f32 %v6458_v40, %v10277_v31  ;;  %v6460_v50 = vpop.f32.mrb[255].mxu0  ;;  %v6749_v54 = vpop.f32.mrb[255].mxu1 }
 0x51f   : > { %8445 = vst [vmem:[%s10301_s16 + $0xf0] sm:$0xff] %v8409_v7   ;;  %v7015_v49 = vadd.f32 %v10441_v29, %v6745_v36  ;;  %v6748_v57 = vadd.f32 %v6747_v42, %v6459_v11 }
 0x521   : > { %v7016_v41 = vadd.f32 %v10441_v29, %v6748_v57  ;;  %v7079_v58 = vmax.f32 %v7015_v49, 0.0 }
 0x523   : > { %v7080_v0 = vmax.f32 %v7016_v41, 0.0 }
 0x525   : > { %v8414_v47 = vpack.c.bf16 %v7080_v0, %v7079_v58 }
 0x527   : > { %8446 = vst [vmem:[%s10301_s16 + $0xf8] sm:$0xff] %v8414_v47  }
 0x528 PF: > { %s13_s14 = sadd.s32 1, %s8623_s14   ;;  %s10625_s12 = smov %s8619_s13 }
 0x529   : > { %p10_p5 = scmp.ge.s32.totalorder %s13_s14, 6   ;;  %s10626_s13 = smov %s10628_s15 }
 0x52b   :  { %12 = sbr.rel (!%p10_p5) target bundleno = 2 (0x2), region = 71 }

// kernel: gnn_forward.3
= control target key start
LH: loop header
LB: loop body
LE: loop exit
PB: predicated region body
PF: predicated region fallthrough
CT: control target
= control target key end

     0   :  { %s8007_s12 = smov 0   ;;  %s8009_s13 = smov 0   ;;  %s9865_s0 = inlined_call_operand.vmem [shape: bf16[2048,2048], index: 0, kind: input, shape index: {}]   ;;  %s9866_s1 = inlined_call_operand.vmem [shape: bf16[2048,128], index: 1, kind: input, shape index: {}]   ;;  %s9867_s2 = inlined_call_operand.vmem [shape: f32[1,128], index: 2, kind: input, shape index: {}]   ;;  %s9868_s3 = inlined_call_operand.vmem [shape: f32[2048,128], index: 3, kind: output, shape index: {}]  }
   0x1   :  { %s8011_s14 = smov 0  }
   0x2 LB: > { %s25_s15 = sadd.s32 1, %s7980_s13  ;;  %p7158_p0 = scmp.ge.s32.totalorder %s7984_s14, 1  ;;  %s7984_s14 = sphi %s8011_s14, %s13_s14   ;;  %s7980_s13 = sphi %s8009_s13, %s10011_s13   ;;  %s7976_s12 = sphi %s8007_s12, %s10010_s12  }
   0x3   : > { %p27_p1 = scmp.ge.s32.totalorder %s25_s15, 4  ;;  %p158_p2 = scmp.lt.s32.totalorder %s7984_s14, 5 }
   0x5   : > { %s10013_s15 = smov (%p27_p1, %s25_s15), 0  ;;  %p159_p3 = pnand %p7158_p0, %p158_p2 }
   0x7   : > { %162 = sbr.rel (%p159_p3) target bundleno = 1316 (0x524), region = 32 }
   0xe   : > { %v7833_v0 = vld [vmem:[%s9866_s1] sm:$0xff]   ;;  %v9869_v1 = vmov 0   ;;  %v7835_v3 = vld [vmem:[%s9866_s1 + $0x8] sm:$0xff]   ;;  %v7837_v5 = vld [vmem:[%s9866_s1 + $0x10] sm:$0xff]   ;;  %s7159_s9 = sshll.u32 %s7976_s12, 6 }
   0xf   : > { %4439 = vmatprep.subr.bf16.mxu0 %v9869_v1  ;;  %4728 = vmatprep.subr.bf16.mxu1 %v9869_v1  ;;  %v7834_v2 = vld [vmem:[%s9866_s1 + $0x80] sm:$0xff]   ;;  %v7836_v4 = vld [vmem:[%s9866_s1 + $0x88] sm:$0xff]   ;;  %v7838_v6 = vld [vmem:[%s9866_s1 + $0x90] sm:$0xff]   ;;  %p189_p4 = scmp.lt.s32.totalorder %s7159_s9, 255 }
  0x10   : > { %4440 = vmatpush1.bf16.msra.mxu0 %v7833_v0  ;;  %4729 = vmatpush1.bf16.msra.mxu1 %v7834_v2  ;;  %v7839_v7 = vld [vmem:[%s9866_s1 + $0x18] sm:$0xff]   ;;  %v7841_v9 = vld [vmem:[%s9866_s1 + $0x20] sm:$0xff]   ;;  %v7843_v11 = vld [vmem:[%s9866_s1 + $0x28] sm:$0xff]  }
  0x11   : > { %4441 = vmatprep.subr.bf16.mxu0 %v9869_v1  ;;  %4730 = vmatprep.subr.bf16.mxu1 %v9869_v1  ;;  %v7840_v8 = vld [vmem:[%s9866_s1 + $0x98] sm:$0xff]   ;;  %v7842_v10 = vld [vmem:[%s9866_s1 + $0xa0] sm:$0xff]   ;;  %v7844_v12 = vld [vmem:[%s9866_s1 + $0xa8] sm:$0xff]   ;;  %s10015_s9 = smov (!%p189_p4, %s7159_s9), 255 }
  0x12   : > { %v7845_v13 = vld [vmem:[%s9866_s1 + $0x30] sm:$0xff]   ;;  %v7847_v15 = vld [vmem:[%s9866_s1 + $0x38] sm:$0xff]   ;;  %s7807_s23 = sshll.u32 %s10015_s9, 6  ;;  %v7849_v17 = vld [vmem:[%s9866_s1 + $0x40] sm:$0xff]   ;;  %s7163_s6 = sshll.u32 %s10015_s9, 3 }
  0x13   : > { %v7846_v14 = vld [vmem:[%s9866_s1 + $0xb0] sm:$0xff]   ;;  %v7848_v16 = vld [vmem:[%s9866_s1 + $0xb8] sm:$0xff]   ;;  %s8098_s28 = scalar_lea.vmem %s9865_s0, %s7807_s23  ;;  %v7850_v18 = vld [vmem:[%s9866_s1 + $0xc0] sm:$0xff]   ;;  %s9655_s11 = scalar_lea.vmem %s9868_s3, %s7163_s6 }
  0x14   : > { %4442 = vmatpush1.bf16.msra.mxu0 %v7835_v3  ;;  %4731 = vmatpush1.bf16.msra.mxu1 %v7836_v4  ;;  %v8109_v19 = vld [vmem:[%s8098_s28] sm:$0xff]  ;;  %v8115_v21 = vld [vmem:[%s8098_s28 + $0x8] sm:$0xff]  ;;  %v7853_v27 = vld [vmem:[%s9866_s1 + $0x50] sm:$0xff]  }
  0x15   : > { %4443 = vmatprep.subr.bf16.mxu0 %v9869_v1  ;;  %4732 = vmatprep.subr.bf16.mxu1 %v9869_v1  ;;  %v8112_v20 = vld [vmem:[%s8098_s28 + $0x40] sm:$0xff]  ;;  %v8120_v23 = vld [vmem:[%s8098_s28 + $0x48] sm:$0xff]  ;;  %v7854_v28 = vld [vmem:[%s9866_s1 + $0xd0] sm:$0xff]  }
  0x16   : > { %v7165_v22 = vcombine.high %v8109_v19, %v8112_v20  ;;  %v7851_v24 = vld [vmem:[%s9866_s1 + $0x48] sm:$0xff]   ;;  %v7167_v25 = vcombine.high %v8115_v21, %v8120_v23  ;;  %v7855_v29 = vld [vmem:[%s9866_s1 + $0x58] sm:$0xff]   ;;  %v7857_v31 = vld [vmem:[%s9866_s1 + $0x60] sm:$0xff]   ;;  %v7164_v42 = vcombine.low %v8109_v19, %v8112_v20  ;;  %v7166_v44 = vcombine.low %v8115_v21, %v8120_v23 }
  0x17   : > { %v7852_v26 = vld [vmem:[%s9866_s1 + $0xc8] sm:$0xff]   ;;  %v7856_v30 = vld [vmem:[%s9866_s1 + $0xd8] sm:$0xff]   ;;  %v7858_v32 = vld [vmem:[%s9866_s1 + $0xe0] sm:$0xff]  }
  0x18   : > { %4444 = vmatpush1.bf16.msra.mxu0 %v7837_v5  ;;  %4733 = vmatpush1.bf16.msra.mxu1 %v7838_v6  ;;  %v7859_v33 = vld [vmem:[%s9866_s1 + $0x68] sm:$0xff]   ;;  %v7861_v35 = vld [vmem:[%s9866_s1 + $0x70] sm:$0xff]   ;;  %v7863_v37 = vld [vmem:[%s9866_s1 + $0x78] sm:$0xff]  }
  0x19   : > { %4445 = vmatprep.subr.bf16.mxu0 %v9869_v1  ;;  %4734 = vmatprep.subr.bf16.mxu1 %v9869_v1  ;;  %v7860_v34 = vld [vmem:[%s9866_s1 + $0xe8] sm:$0xff]   ;;  %v7862_v36 = vld [vmem:[%s9866_s1 + $0xf0] sm:$0xff]   ;;  %v7864_v38 = vld [vmem:[%s9866_s1 + $0xf8] sm:$0xff]  }
  0x1a   : > { %4471 = vmatprep.mubr.bf16.mxu0 %v7165_v22  ;;  %4760 = vmatprep.mubr.bf16.mxu1 %v7167_v25  ;;  %v615_v39 = vld [vmem:[%s8098_s28 + $0x80] sm:$0xff]  ;;  %v616_v41 = vld [vmem:[%s8098_s28 + $0x88] sm:$0xff]  ;;  %v7869_v59 = vld [vmem:[%s9866_s1 + $0x110] sm:$0xff]  }
  0x1b   : > { %v623_v40 = vld [vmem:[%s8098_s28 + $0xc0] sm:$0xff]  ;;  %v624_v43 = vld [vmem:[%s8098_s28 + $0xc8] sm:$0xff]  ;;  %v7870_v60 = vld [vmem:[%s9866_s1 + $0x190] sm:$0xff]  }
  0x1c   : > { %4446 = vmatpush1.bf16.msra.mxu0 %v7839_v7  ;;  %4735 = vmatpush1.bf16.msra.mxu1 %v7840_v8  ;;  %v7865_v45 = vld [vmem:[%s9866_s1 + $0x100] sm:$0xff]   ;;  %v7181_v47 = vcombine.high %v615_v39, %v623_v40  ;;  %v7183_v48 = vcombine.high %v616_v41, %v624_v43  ;;  %v7867_v51 = vld [vmem:[%s9866_s1 + $0x108] sm:$0xff]   ;;  %v7180_v55 = vcombine.low %v615_v39, %v623_v40  ;;  %v7871_v2 = vld [vmem:[%s9866_s1 + $0x118] sm:$0xff]  }
  0x1d   : > { %4447 = vmatprep.subr.bf16.mxu0 %v9869_v1  ;;  %4736 = vmatprep.subr.bf16.mxu1 %v9869_v1  ;;  %v7866_v46 = vld [vmem:[%s9866_s1 + $0x180] sm:$0xff]   ;;  %v7868_v52 = vld [vmem:[%s9866_s1 + $0x188] sm:$0xff]   ;;  %v7182_v56 = vcombine.low %v616_v41, %v624_v43  ;;  %v7872_v3 = vld [vmem:[%s9866_s1 + $0x198] sm:$0xff]  }
  0x1e   : > { %v631_v49 = vld [vmem:[%s8098_s28 + $0x100] sm:$0xff]  ;;  %v632_v53 = vld [vmem:[%s8098_s28 + $0x108] sm:$0xff]  ;;  %v7878_v20 = vld [vmem:[%s9866_s1 + $0x1b0] sm:$0xff]  }
  0x1f   : > { %v639_v50 = vld [vmem:[%s8098_s28 + $0x140] sm:$0xff]  ;;  %v640_v54 = vld [vmem:[%s8098_s28 + $0x148] sm:$0xff]  ;;  %v7885_v41 = vld [vmem:[%s9866_s1 + $0x150] sm:$0xff]  }
  0x20   : > { %4448 = vmatpush1.bf16.msra.mxu0 %v7841_v9  ;;  %4737 = vmatpush1.bf16.msra.mxu1 %v7842_v10  ;;  %v7197_v57 = vcombine.high %v631_v49, %v639_v50  ;;  %v7199_v58 = vcombine.high %v632_v53, %v640_v54  ;;  %v647_v61 = vld [vmem:[%s8098_s28 + $0x180] sm:$0xff]  ;;  %v648_v63 = vld [vmem:[%s8098_s28 + $0x188] sm:$0xff]  ;;  %v7196_v4 = vcombine.low %v631_v49, %v639_v50 }
  0x21   : > { %4449 = vmatprep.subr.bf16.mxu0 %v9869_v1  ;;  %4738 = vmatprep.subr.bf16.mxu1 %v9869_v1  ;;  %v655_v62 = vld [vmem:[%s8098_s28 + $0x1c0] sm:$0xff]  ;;  %v656_v0 = vld [vmem:[%s8098_s28 + $0x1c8] sm:$0xff]  ;;  %v7198_v6 = vcombine.low %v632_v53, %v640_v54 }
  0x22   : > { %v7873_v5 = vld [vmem:[%s9866_s1 + $0x120] sm:$0xff]   ;;  %v7213_v7 = vcombine.high %v647_v61, %v655_v62  ;;  %v7215_v9 = vcombine.high %v648_v63, %v656_v0  ;;  %v688_v25 = vld [vmem:[%s8098_s28 + $0x2c8] sm:$0xff] }
  0x23   : > { %v7874_v8 = vld [vmem:[%s9866_s1 + $0x1a0] sm:$0xff]   ;;  %v7884_v39 = vld [vmem:[%s9866_s1 + $0x1c8] sm:$0xff]  }
  0x24   : > { %4450 = vmatpush1.bf16.msra.mxu0 %v7843_v11  ;;  %4739 = vmatpush1.bf16.msra.mxu1 %v7844_v12  ;;  %v663_v10 = vld [vmem:[%s8098_s28 + $0x200] sm:$0xff]  ;;  %v664_v12 = vld [vmem:[%s8098_s28 + $0x208] sm:$0xff] }
  0x25   : > { %4451 = vmatprep.subr.bf16.mxu0 %v9869_v1  ;;  %4740 = vmatprep.subr.bf16.mxu1 %v9869_v1  ;;  %v671_v11 = vld [vmem:[%s8098_s28 + $0x240] sm:$0xff]  ;;  %v720_v49 = vld [vmem:[%s8098_s28 + $0x3c8] sm:$0xff] }
  0x26   : > { %v7229_v19 = vcombine.high %v663_v10, %v671_v11  ;;  %v679_v22 = vld [vmem:[%s8098_s28 + $0x280] sm:$0xff] }
  0x27   : > { %v687_v23 = vld [vmem:[%s8098_s28 + $0x2c0] sm:$0xff] }
  0x28   : > { %4452 = vmatpush1.bf16.msra.mxu0 %v7845_v13  ;;  %4741 = vmatpush1.bf16.msra.mxu1 %v7846_v14  ;;  %v672_v13 = vld [vmem:[%s8098_s28 + $0x248] sm:$0xff]  ;;  %v7244_v40 = vcombine.low %v679_v22, %v687_v23  ;;  %v727_v54 = vld [vmem:[%s8098_s28 + $0x400] sm:$0xff] }
  0x29   : > { %4453 = vmatprep.subr.bf16.mxu0 %v9869_v1  ;;  %4742 = vmatprep.subr.bf16.mxu1 %v9869_v1  ;;  %v7875_v14 = vld [vmem:[%s9866_s1 + $0x128] sm:$0xff]   ;;  %v7231_v21 = vcombine.high %v664_v12, %v672_v13 }
  0x2c   : > { %4454 = vmatpush1.bf16.msra.mxu0 %v7847_v15  ;;  %4743 = vmatpush1.bf16.msra.mxu1 %v7848_v16  ;;  %v7876_v15 = vld [vmem:[%s9866_s1 + $0x1a8] sm:$0xff]   ;;  %v7212_v16 = vcombine.low %v647_v61, %v655_v62 }
  0x2d   : > { %4455 = vmatprep.subr.bf16.mxu0 %v9869_v1  ;;  %4744 = vmatprep.subr.bf16.mxu1 %v9869_v1 }
  0x30   : > { %4456 = vmatpush1.bf16.msra.mxu0 %v7849_v17  ;;  %4745 = vmatpush1.bf16.msra.mxu1 %v7850_v18  ;;  %v7877_v17 = vld [vmem:[%s9866_s1 + $0x130] sm:$0xff]   ;;  %v7214_v18 = vcombine.low %v648_v63, %v656_v0  ;;  %v743_v0 = vld [vmem:[%s8098_s28 + $0x480] sm:$0xff] }
  0x31   : > { %4457 = vmatprep.subr.bf16.mxu0 %v9869_v1  ;;  %4746 = vmatprep.subr.bf16.mxu1 %v9869_v1 }
  0x34   : > { %4458 = vmatpush1.bf16.msra.mxu0 %v7851_v24  ;;  %4747 = vmatpush1.bf16.msra.mxu1 %v7852_v26  ;;  %v680_v24 = vld [vmem:[%s8098_s28 + $0x288] sm:$0xff]  ;;  %v7879_v26 = vld [vmem:[%s9866_s1 + $0x138] sm:$0xff]  }
  0x35   : > { %4459 = vmatprep.subr.bf16.mxu0 %v9869_v1  ;;  %4748 = vmatprep.subr.bf16.mxu1 %v9869_v1 }
  0x38   : > { %4460 = vmatpush1.bf16.msra.mxu0 %v7853_v27  ;;  %4749 = vmatpush1.bf16.msra.mxu1 %v7854_v28  ;;  %v7880_v27 = vld [vmem:[%s9866_s1 + $0x1b8] sm:$0xff]   ;;  %v7228_v28 = vcombine.low %v663_v10, %v671_v11  ;;  %v7889_v10 = vld [vmem:[%s9866_s1 + $0x160] sm:$0xff]  }
  0x39   : > { %4461 = vmatprep.subr.bf16.mxu0 %v9869_v1  ;;  %4750 = vmatprep.subr.bf16.mxu1 %v9869_v1  ;;  %v7890_v11 = vld [vmem:[%s9866_s1 + $0x1e0] sm:$0xff]  }
  0x3c   : > { %4462 = vmatpush1.bf16.msra.mxu0 %v7855_v29  ;;  %4751 = vmatpush1.bf16.msra.mxu1 %v7856_v30  ;;  %v7881_v29 = vld [vmem:[%s9866_s1 + $0x140] sm:$0xff]   ;;  %v7230_v30 = vcombine.low %v664_v12, %v672_v13  ;;  %v760_v13 = vld [vmem:[%s8098_s28 + $0x508] sm:$0xff] }
  0x3d   : > { %4463 = vmatprep.subr.bf16.mxu0 %v9869_v1  ;;  %4752 = vmatprep.subr.bf16.mxu1 %v9869_v1  ;;  %v767_v12 = vld [vmem:[%s8098_s28 + $0x540] sm:$0xff] }
  0x40   : > { %4464 = vmatpush1.bf16.msra.mxu0 %v7857_v31  ;;  %4753 = vmatpush1.bf16.msra.mxu1 %v7858_v32  ;;  %v7245_v31 = vcombine.high %v679_v22, %v687_v23  ;;  %v7882_v32 = vld [vmem:[%s9866_s1 + $0x1c0] sm:$0xff]   ;;  %v784_v22 = vld [vmem:[%s8098_s28 + $0x5c8] sm:$0xff] }
  0x41   : > { %4465 = vmatprep.subr.bf16.mxu0 %v9869_v1  ;;  %4754 = vmatprep.subr.bf16.mxu1 %v9869_v1 }
  0x44   : > { %4466 = vmatpush1.bf16.msra.mxu0 %v7859_v33  ;;  %4755 = vmatpush1.bf16.msra.mxu1 %v7860_v34  ;;  %v7247_v33 = vcombine.high %v680_v24, %v688_v25  ;;  %v695_v34 = vld [vmem:[%s8098_s28 + $0x300] sm:$0xff] }
  0x45   : > { %4467 = vmatprep.subr.bf16.mxu0 %v9869_v1  ;;  %4756 = vmatprep.subr.bf16.mxu1 %v9869_v1 }
  0x48   : > { %4468 = vmatpush1.bf16.msra.mxu0 %v7861_v35  ;;  %4757 = vmatpush1.bf16.msra.mxu1 %v7862_v36  ;;  %v703_v35 = vld [vmem:[%s8098_s28 + $0x340] sm:$0xff]  ;;  %v696_v36 = vld [vmem:[%s8098_s28 + $0x308] sm:$0xff] }
  0x49   : > { %4469 = vmatprep.subr.bf16.mxu0 %v9869_v1  ;;  %4758 = vmatprep.subr.bf16.mxu1 %v9869_v1  ;;  %v7261_v43 = vcombine.high %v695_v34, %v703_v35  ;;  %v7260_v50 = vcombine.low %v695_v34, %v703_v35  ;;  %v7892_v35 = vld [vmem:[%s9866_s1 + $0x1e8] sm:$0xff]  }
  0x4c   : > { %4470 = vmatpush1.bf16.msra.mxu0 %v7863_v37  ;;  %4759 = vmatpush1.bf16.msra.mxu1 %v7864_v38  ;;  %v704_v37 = vld [vmem:[%s8098_s28 + $0x348] sm:$0xff] }
  0x4d   : > { %5017 = vmatprep.subr.bf16.mxu0 %v9869_v1  ;;  %5306 = vmatprep.subr.bf16.mxu1 %v9869_v1  ;;  %v7883_v38 = vld [vmem:[%s9866_s1 + $0x148] sm:$0xff]  }
  0x4f   : > { %4472 = vmatmul.mubr.bf16.vlgmr.msra.gmra.mrb[0].mxu0 %v7164_v42  ;;  %4761 = vmatmul.mubr.bf16.vlgmr.msra.gmra.mrb[0].mxu1 %v7166_v44  ;;  %v7246_v42 = vcombine.low %v680_v24, %v688_v25  ;;  %v7886_v44 = vld [vmem:[%s9866_s1 + $0x1d0] sm:$0xff]  }
  0x50   : > { %5018 = vmatpush1.bf16.msra.mxu0 %v7865_v45  ;;  %5307 = vmatpush1.bf16.msra.mxu1 %v7866_v46  ;;  %v7263_v45 = vcombine.high %v696_v36, %v704_v37  ;;  %v711_v46 = vld [vmem:[%s8098_s28 + $0x380] sm:$0xff] }
  0x51   : > { %4479 = vmatprep.mubr.bf16.mxu0 %v7181_v47  ;;  %4768 = vmatprep.mubr.bf16.mxu1 %v7183_v48  ;;  %v719_v47 = vld [vmem:[%s8098_s28 + $0x3c0] sm:$0xff]  ;;  %v712_v48 = vld [vmem:[%s8098_s28 + $0x388] sm:$0xff] }
  0x52   : > { %5019 = vmatprep.subr.bf16.mxu0 %v9869_v1  ;;  %5308 = vmatprep.subr.bf16.mxu1 %v9869_v1  ;;  %v7279_v53 = vcombine.high %v712_v48, %v720_v49  ;;  %v7278_v61 = vcombine.low %v712_v48, %v720_v49  ;;  %v824_v48 = vld [vmem:[%s8098_s28 + $0x708] sm:$0xff] }
  0x53   : > { %v832_v49 = vld [vmem:[%s8098_s28 + $0x748] sm:$0xff] }
  0x54   : > { %5020 = vmatpush1.bf16.msra.mxu0 %v7867_v51  ;;  %5309 = vmatpush1.bf16.msra.mxu1 %v7868_v52  ;;  %v7262_v51 = vcombine.low %v696_v36, %v704_v37  ;;  %v7277_v52 = vcombine.high %v711_v46, %v719_v47  ;;  %v807_v37 = vld [vmem:[%s8098_s28 + $0x680] sm:$0xff] }
  0x55   : > { %5021 = vmatprep.subr.bf16.mxu0 %v9869_v1  ;;  %5310 = vmatprep.subr.bf16.mxu1 %v9869_v1 }
  0x57   : > { %4480 = vmatmul.mubr.bf16.gmra.mrb[4].mxu0 %v7180_v55  ;;  %4769 = vmatmul.mubr.bf16.gmra.mrb[4].mxu1 %v7182_v56  ;;  %v7887_v55 = vld [vmem:[%s9866_s1 + $0x158] sm:$0xff]  }
  0x58   : > { %4487 = vmatprep.mubr.bf16.mxu0 %v7197_v57  ;;  %4776 = vmatprep.mubr.bf16.mxu1 %v7199_v58  ;;  %v7888_v56 = vld [vmem:[%s9866_s1 + $0x1d8] sm:$0xff]   ;;  %v735_v57 = vld [vmem:[%s8098_s28 + $0x440] sm:$0xff]  ;;  %v728_v58 = vld [vmem:[%s8098_s28 + $0x408] sm:$0xff] }
  0x59   : > { %5022 = vmatpush1.bf16.msra.mxu0 %v7869_v59  ;;  %5311 = vmatpush1.bf16.msra.mxu1 %v7870_v60  ;;  %v736_v59 = vld [vmem:[%s8098_s28 + $0x448] sm:$0xff]  ;;  %v7276_v60 = vcombine.low %v711_v46, %v719_v47  ;;  %v7293_v62 = vcombine.high %v727_v54, %v735_v57  ;;  %v823_v46 = vld [vmem:[%s8098_s28 + $0x700] sm:$0xff] }
  0x5a   : > { %5023 = vmatprep.subr.bf16.mxu0 %v9869_v1  ;;  %5312 = vmatprep.subr.bf16.mxu1 %v9869_v1  ;;  %v7295_v63 = vcombine.high %v728_v58, %v736_v59  ;;  %v831_v47 = vld [vmem:[%s8098_s28 + $0x740] sm:$0xff] }
  0x5d   : > { %5024 = vmatpush1.bf16.msra.mxu0 %v7871_v2  ;;  %5313 = vmatpush1.bf16.msra.mxu1 %v7872_v3  ;;  %v751_v2 = vld [vmem:[%s8098_s28 + $0x4c0] sm:$0xff]  ;;  %v744_v3 = vld [vmem:[%s8098_s28 + $0x488] sm:$0xff] }
  0x5e   : > { %5025 = vmatprep.subr.bf16.mxu0 %v9869_v1  ;;  %5314 = vmatprep.subr.bf16.mxu1 %v9869_v1 }
  0x5f   : > { %4488 = vmatmul.mubr.bf16.gmra.mrb[8].mxu0 %v7196_v4  ;;  %4777 = vmatmul.mubr.bf16.gmra.mrb[8].mxu1 %v7198_v6  ;;  %v752_v4 = vld [vmem:[%s8098_s28 + $0x4c8] sm:$0xff]  ;;  %v7294_v6 = vcombine.low %v728_v58, %v736_v59  ;;  %v7388_v59 = vcombine.low %v823_v46, %v831_v47 }
  0x60   : > { %4495 = vmatprep.mubr.bf16.mxu0 %v7213_v7  ;;  %4784 = vmatprep.mubr.bf16.mxu1 %v7215_v9  ;;  %v7309_v7 = vcombine.high %v743_v0, %v751_v2  ;;  %v759_v9 = vld [vmem:[%s8098_s28 + $0x500] sm:$0xff]  ;;  %v848_v58 = vld [vmem:[%s8098_s28 + $0x7c8] sm:$0xff] }
  0x61   : > { %5026 = vmatpush1.bf16.msra.mxu0 %v7873_v5  ;;  %5315 = vmatpush1.bf16.msra.mxu1 %v7874_v8  ;;  %v7292_v5 = vcombine.low %v727_v54, %v735_v57  ;;  %v7311_v8 = vcombine.high %v744_v3, %v752_v4  ;;  %v7324_v23 = vcombine.low %v759_v9, %v767_v12  ;;  %v840_v57 = vld [vmem:[%s8098_s28 + $0x788] sm:$0xff] }
  0x62   : > { %5027 = vmatprep.subr.bf16.mxu0 %v9869_v1  ;;  %5316 = vmatprep.subr.bf16.mxu1 %v9869_v1  ;;  %v7391_v54 = vcombine.high %v824_v48, %v832_v49 }
  0x65   : > { %5028 = vmatpush1.bf16.msra.mxu0 %v7875_v14  ;;  %5317 = vmatpush1.bf16.msra.mxu1 %v7876_v15  ;;  %v768_v14 = vld [vmem:[%s8098_s28 + $0x548] sm:$0xff]  ;;  %v7308_v15 = vcombine.low %v743_v0, %v751_v2  ;;  %v855_v0 = vld [vmem:[%s8098_s28 + $0x800] sm:$0xff] }
  0x66   : > { %5029 = vmatprep.subr.bf16.mxu0 %v9869_v1  ;;  %5318 = vmatprep.subr.bf16.mxu1 %v9869_v1  ;;  %v7326_v24 = vcombine.low %v760_v13, %v768_v14  ;;  %v863_v2 = vld [vmem:[%s8098_s28 + $0x840] sm:$0xff] }
  0x67   : > { %4496 = vmatmul.mubr.bf16.gmra.mrb[12].mxu0 %v7212_v16  ;;  %4785 = vmatmul.mubr.bf16.gmra.mrb[12].mxu1 %v7214_v18  ;;  %v7310_v16 = vcombine.low %v744_v3, %v752_v4  ;;  %v7327_v18 = vcombine.high %v760_v13, %v768_v14  ;;  %v856_v3 = vld [vmem:[%s8098_s28 + $0x808] sm:$0xff]  ;;  %v7420_v14 = vcombine.low %v855_v0, %v863_v2 }
  0x68   : > { %4503 = vmatprep.mubr.bf16.mxu0 %v7229_v19  ;;  %4792 = vmatprep.mubr.bf16.mxu1 %v7231_v21  ;;  %v775_v19 = vld [vmem:[%s8098_s28 + $0x580] sm:$0xff]  ;;  %v776_v21 = vld [vmem:[%s8098_s28 + $0x588] sm:$0xff] }
  0x69   : > { %5030 = vmatpush1.bf16.msra.mxu0 %v7877_v17  ;;  %5319 = vmatpush1.bf16.msra.mxu1 %v7878_v20  ;;  %v7325_v17 = vcombine.high %v759_v9, %v767_v12  ;;  %v783_v20 = vld [vmem:[%s8098_s28 + $0x5c0] sm:$0xff]  ;;  %v864_v4 = vld [vmem:[%s8098_s28 + $0x848] sm:$0xff] }
  0x6a   : > { %5031 = vmatprep.subr.bf16.mxu0 %v9869_v1  ;;  %5320 = vmatprep.subr.bf16.mxu1 %v9869_v1  ;;  %v7341_v25 = vcombine.high %v775_v19, %v783_v20  ;;  %v7423_v9 = vcombine.high %v856_v3, %v864_v4  ;;  %v872_v12 = vld [vmem:[%s8098_s28 + $0x888] sm:$0xff] }
  0x6b   : > { %v880_v13 = vld [vmem:[%s8098_s28 + $0x8c8] sm:$0xff] }
  0x6d   : > { %5032 = vmatpush1.bf16.msra.mxu0 %v7879_v26  ;;  %5321 = vmatpush1.bf16.msra.mxu1 %v7880_v27  ;;  %v7343_v26 = vcombine.high %v776_v21, %v784_v22  ;;  %v7891_v27 = vld [vmem:[%s9866_s1 + $0x168] sm:$0xff]  }
  0x6e   : > { %5033 = vmatprep.subr.bf16.mxu0 %v9869_v1  ;;  %5322 = vmatprep.subr.bf16.mxu1 %v9869_v1 }
  0x6f   : > { %4504 = vmatmul.mubr.bf16.gmra.mrb[16].mxu0 %v7228_v28  ;;  %4793 = vmatmul.mubr.bf16.gmra.mrb[16].mxu1 %v7230_v30  ;;  %v791_v28 = vld [vmem:[%s8098_s28 + $0x600] sm:$0xff]  ;;  %v792_v30 = vld [vmem:[%s8098_s28 + $0x608] sm:$0xff] }
  0x70   : > { %4511 = vmatprep.mubr.bf16.mxu0 %v7245_v31  ;;  %4800 = vmatprep.mubr.bf16.mxu1 %v7247_v33  ;;  %v800_v31 = vld [vmem:[%s8098_s28 + $0x648] sm:$0xff]  ;;  %v7342_v33 = vcombine.low %v776_v21, %v784_v22 }
  0x71   : > { %5034 = vmatpush1.bf16.msra.mxu0 %v7881_v29  ;;  %5323 = vmatpush1.bf16.msra.mxu1 %v7882_v32  ;;  %v799_v29 = vld [vmem:[%s8098_s28 + $0x640] sm:$0xff]  ;;  %v7340_v32 = vcombine.low %v775_v19, %v783_v20  ;;  %v7359_v36 = vcombine.high %v792_v30, %v800_v31  ;;  %v888_v20 = vld [vmem:[%s8098_s28 + $0x908] sm:$0xff] }
  0x72   : > { %5035 = vmatprep.subr.bf16.mxu0 %v9869_v1  ;;  %5324 = vmatprep.subr.bf16.mxu1 %v9869_v1  ;;  %v7357_v34 = vcombine.high %v791_v28, %v799_v29  ;;  %v895_v19 = vld [vmem:[%s8098_s28 + $0x940] sm:$0xff]  ;;  %v896_v21 = vld [vmem:[%s8098_s28 + $0x948] sm:$0xff] }
  0x75   : > { %5036 = vmatpush1.bf16.msra.mxu0 %v7883_v38  ;;  %5325 = vmatpush1.bf16.msra.mxu1 %v7884_v39  ;;  %v815_v38 = vld [vmem:[%s8098_s28 + $0x6c0] sm:$0xff]  ;;  %v808_v39 = vld [vmem:[%s8098_s28 + $0x688] sm:$0xff] }
  0x76   : > { %5037 = vmatprep.subr.bf16.mxu0 %v9869_v1  ;;  %5326 = vmatprep.subr.bf16.mxu1 %v9869_v1 }
  0x77   : > { %4512 = vmatmul.mubr.bf16.gmra.mrb[20].mxu0 %v7244_v40  ;;  %4801 = vmatmul.mubr.bf16.gmra.mrb[20].mxu1 %v7246_v42  ;;  %v816_v40 = vld [vmem:[%s8098_s28 + $0x6c8] sm:$0xff]  ;;  %v7358_v42 = vcombine.low %v792_v30, %v800_v31  ;;  %v7454_v31 = vcombine.low %v888_v20, %v896_v21 }
  0x78   : > { %4519 = vmatprep.mubr.bf16.mxu0 %v7261_v43  ;;  %4808 = vmatprep.mubr.bf16.mxu1 %v7263_v45  ;;  %v7373_v43 = vcombine.high %v807_v37, %v815_v38  ;;  %v7893_v45 = vld [vmem:[%s9866_s1 + $0x170] sm:$0xff]  }
  0x79   : > { %5038 = vmatpush1.bf16.msra.mxu0 %v7885_v41  ;;  %5327 = vmatpush1.bf16.msra.mxu1 %v7886_v44  ;;  %v7356_v41 = vcombine.low %v791_v28, %v799_v29  ;;  %v7375_v44 = vcombine.high %v808_v39, %v816_v40  ;;  %v904_v28 = vld [vmem:[%s8098_s28 + $0x988] sm:$0xff] }
  0x7a   : > { %5039 = vmatprep.subr.bf16.mxu0 %v9869_v1  ;;  %5328 = vmatprep.subr.bf16.mxu1 %v9869_v1  ;;  %v912_v29 = vld [vmem:[%s8098_s28 + $0x9c8] sm:$0xff] }
  0x7d   : > { %5040 = vmatpush1.bf16.msra.mxu0 %v7887_v55  ;;  %5329 = vmatpush1.bf16.msra.mxu1 %v7888_v56  ;;  %v839_v55 = vld [vmem:[%s8098_s28 + $0x780] sm:$0xff] }
  0x7e   : > { %5041 = vmatprep.subr.bf16.mxu0 %v9869_v1  ;;  %5330 = vmatprep.subr.bf16.mxu1 %v9869_v1  ;;  %v847_v56 = vld [vmem:[%s8098_s28 + $0x7c0] sm:$0xff] }
  0x7f   : > { %4520 = vmatmul.mubr.bf16.gmra.mrb[24].mxu0 %v7260_v50  ;;  %4809 = vmatmul.mubr.bf16.gmra.mrb[24].mxu1 %v7262_v51  ;;  %v7372_v50 = vcombine.low %v807_v37, %v815_v38  ;;  %v7374_v51 = vcombine.low %v808_v39, %v816_v40  ;;  %v928_v37 = vld [vmem:[%s8098_s28 + $0xa48] sm:$0xff]  ;;  %v7470_v39 = vcombine.low %v904_v28, %v912_v29 }
  0x80   : > { %4527 = vmatprep.mubr.bf16.mxu0 %v7277_v52  ;;  %4816 = vmatprep.mubr.bf16.mxu1 %v7279_v53  ;;  %v7389_v52 = vcombine.high %v823_v46, %v831_v47  ;;  %v7894_v53 = vld [vmem:[%s9866_s1 + $0x1f0] sm:$0xff]  }
  0x81   : > { %5042 = vmatpush1.bf16.msra.mxu0 %v7889_v10  ;;  %5331 = vmatpush1.bf16.msra.mxu1 %v7890_v11  ;;  %v871_v10 = vld [vmem:[%s8098_s28 + $0x880] sm:$0xff] }
  0x82   : > { %5043 = vmatprep.subr.bf16.mxu0 %v9869_v1  ;;  %5332 = vmatprep.subr.bf16.mxu1 %v9869_v1  ;;  %v879_v11 = vld [vmem:[%s8098_s28 + $0x8c0] sm:$0xff] }
  0x83   : > { %v7436_v22 = vcombine.low %v871_v10, %v879_v11 }
  0x85   : > { %5044 = vmatpush1.bf16.msra.mxu0 %v7891_v27  ;;  %5333 = vmatpush1.bf16.msra.mxu1 %v7892_v35  ;;  %v911_v27 = vld [vmem:[%s8098_s28 + $0x9c0] sm:$0xff] }
  0x86   : > { %5045 = vmatprep.subr.bf16.mxu0 %v9869_v1  ;;  %5334 = vmatprep.subr.bf16.mxu1 %v9869_v1  ;;  %v927_v35 = vld [vmem:[%s8098_s28 + $0xa40] sm:$0xff] }
  0x87   : > { %4528 = vmatmul.mubr.bf16.gmra.mrb[28].mxu0 %v7276_v60  ;;  %4817 = vmatmul.mubr.bf16.gmra.mrb[28].mxu1 %v7278_v61  ;;  %v7390_v60 = vcombine.low %v824_v48, %v832_v49  ;;  %v7405_v61 = vcombine.high %v839_v55, %v847_v56 }
  0x88   : > { %4535 = vmatprep.mubr.bf16.mxu0 %v7293_v62  ;;  %4824 = vmatprep.mubr.bf16.mxu1 %v7295_v63  ;;  %v7407_v62 = vcombine.high %v840_v57, %v848_v58  ;;  %v7895_v63 = vld [vmem:[%s9866_s1 + $0x178] sm:$0xff]  }
  0x89   : > { %5046 = vmatpush1.bf16.msra.mxu0 %v7893_v45  ;;  %5335 = vmatpush1.bf16.msra.mxu1 %v7894_v53  ;;  %v944_v45 = vld [vmem:[%s8098_s28 + $0xac8] sm:$0xff] }
  0x8a   : > { %5047 = vmatprep.subr.bf16.mxu0 %v9869_v1  ;;  %5336 = vmatprep.subr.bf16.mxu1 %v9869_v1  ;;  %v960_v53 = vld [vmem:[%s8098_s28 + $0xb48] sm:$0xff] }
  0x8d   : > { %5048 = vmatpush1.bf16.msra.mxu0 %v7895_v63 }
  0x8e   : > { %5595 = vmatprep.subr.bf16.mxu0 %v9869_v1 }
  0x8f   : > { %4536 = vmatmul.mubr.bf16.gmra.mrb[32].mxu0 %v7292_v5  ;;  %4825 = vmatmul.mubr.bf16.gmra.mrb[32].mxu1 %v7294_v6  ;;  %v7404_v5 = vcombine.low %v839_v55, %v847_v56  ;;  %v7406_v6 = vcombine.low %v840_v57, %v848_v58  ;;  %v967_v58 = vld [vmem:[%s8098_s28 + $0xb80] sm:$0xff] }
  0x90   : > { %4543 = vmatprep.mubr.bf16.mxu0 %v7309_v7  ;;  %4832 = vmatprep.mubr.bf16.mxu1 %v7311_v8  ;;  %v7421_v7 = vcombine.high %v855_v0, %v863_v2  ;;  %v7896_v8 = vld [vmem:[%s9866_s1 + $0x1f8] sm:$0xff]  }
  0x91   : > { %5337 = vmatpush1.bf16.msra.mxu1 %v7896_v8 }
  0x92   : > { %5884 = vmatprep.subr.bf16.mxu1 %v9869_v1 }
  0x97   : > { %4544 = vmatmul.mubr.bf16.gmra.mrb[36].mxu0 %v7308_v15  ;;  %4833 = vmatmul.mubr.bf16.gmra.mrb[36].mxu1 %v7310_v16  ;;  %v7422_v15 = vcombine.low %v856_v3, %v864_v4  ;;  %v7437_v16 = vcombine.high %v871_v10, %v879_v11  ;;  %v983_v3 = vld [vmem:[%s8098_s28 + $0xc00] sm:$0xff] }
  0x98   : > { %4551 = vmatprep.mubr.bf16.mxu0 %v7325_v17  ;;  %4840 = vmatprep.mubr.bf16.mxu1 %v7327_v18  ;;  %v7439_v17 = vcombine.high %v872_v12, %v880_v13  ;;  %v887_v18 = vld [vmem:[%s8098_s28 + $0x900] sm:$0xff] }
  0x99   : > { %v7452_v30 = vcombine.low %v887_v18, %v895_v19  ;;  %v991_v4 = vld [vmem:[%s8098_s28 + $0xc40] sm:$0xff] }
  0x9a   : > { %v999_v11 = vld [vmem:[%s8098_s28 + $0xc80] sm:$0xff] }
  0x9f   : > { %4552 = vmatmul.mubr.bf16.gmra.mrb[40].mxu0 %v7324_v23  ;;  %4841 = vmatmul.mubr.bf16.gmra.mrb[40].mxu1 %v7326_v24  ;;  %v7438_v23 = vcombine.low %v872_v12, %v880_v13  ;;  %v7453_v24 = vcombine.high %v887_v18, %v895_v19  ;;  %v1007_v12 = vld [vmem:[%s8098_s28 + $0xcc0] sm:$0xff]  ;;  %v1000_v13 = vld [vmem:[%s8098_s28 + $0xc88] sm:$0xff] }
  0xa0   : > { %4559 = vmatprep.mubr.bf16.mxu0 %v7341_v25  ;;  %4848 = vmatprep.mubr.bf16.mxu1 %v7343_v26  ;;  %v7455_v25 = vcombine.high %v888_v20, %v896_v21  ;;  %v903_v26 = vld [vmem:[%s8098_s28 + $0x980] sm:$0xff]  ;;  %v1016_v21 = vld [vmem:[%s8098_s28 + $0xd08] sm:$0xff] }
  0xa1   : > { %v7468_v38 = vcombine.low %v903_v26, %v911_v27  ;;  %v1015_v19 = vld [vmem:[%s8098_s28 + $0xd00] sm:$0xff] }
  0xa2   : > { %v1023_v20 = vld [vmem:[%s8098_s28 + $0xd40] sm:$0xff] }
  0xa7   : > { %4560 = vmatmul.mubr.bf16.gmra.mrb[44].mxu0 %v7340_v32  ;;  %4849 = vmatmul.mubr.bf16.gmra.mrb[44].mxu1 %v7342_v33  ;;  %v7469_v32 = vcombine.high %v903_v26, %v911_v27  ;;  %v7471_v33 = vcombine.high %v904_v28, %v912_v29  ;;  %v1031_v27 = vld [vmem:[%s8098_s28 + $0xd80] sm:$0xff]  ;;  %v1032_v29 = vld [vmem:[%s8098_s28 + $0xd88] sm:$0xff] }
  0xa8   : > { %4567 = vmatprep.mubr.bf16.mxu0 %v7357_v34  ;;  %4856 = vmatprep.mubr.bf16.mxu1 %v7359_v36  ;;  %v919_v34 = vld [vmem:[%s8098_s28 + $0xa00] sm:$0xff]  ;;  %v920_v36 = vld [vmem:[%s8098_s28 + $0xa08] sm:$0xff] }
  0xa9   : > { %v7485_v40 = vcombine.high %v919_v34, %v927_v35  ;;  %v7484_v46 = vcombine.low %v919_v34, %v927_v35  ;;  %v7486_v47 = vcombine.low %v920_v36, %v928_v37  ;;  %v1039_v28 = vld [vmem:[%s8098_s28 + $0xdc0] sm:$0xff] }
  0xaa   : > { %v1047_v35 = vld [vmem:[%s8098_s28 + $0xe00] sm:$0xff] }
  0xaf   : > { %4568 = vmatmul.mubr.bf16.gmra.mrb[48].mxu0 %v7356_v41  ;;  %4857 = vmatmul.mubr.bf16.gmra.mrb[48].mxu1 %v7358_v42  ;;  %v7487_v41 = vcombine.high %v920_v36, %v928_v37  ;;  %v935_v42 = vld [vmem:[%s8098_s28 + $0xa80] sm:$0xff] }
  0xb0   : > { %4575 = vmatprep.mubr.bf16.mxu0 %v7373_v43  ;;  %4864 = vmatprep.mubr.bf16.mxu1 %v7375_v44  ;;  %v943_v43 = vld [vmem:[%s8098_s28 + $0xac0] sm:$0xff]  ;;  %v936_v44 = vld [vmem:[%s8098_s28 + $0xa88] sm:$0xff] }
  0xb1   : > { %v7501_v48 = vcombine.high %v935_v42, %v943_v43  ;;  %v7503_v49 = vcombine.high %v936_v44, %v944_v45  ;;  %v7502_v55 = vcombine.low %v936_v44, %v944_v45  ;;  %v1055_v36 = vld [vmem:[%s8098_s28 + $0xe40] sm:$0xff] }
  0xb7   : > { %4576 = vmatmul.mubr.bf16.gmra.mrb[52].mxu0 %v7372_v50  ;;  %4865 = vmatmul.mubr.bf16.gmra.mrb[52].mxu1 %v7374_v51  ;;  %v951_v50 = vld [vmem:[%s8098_s28 + $0xb00] sm:$0xff] }
  0xb8   : > { %4583 = vmatprep.mubr.bf16.mxu0 %v7389_v52  ;;  %4872 = vmatprep.mubr.bf16.mxu1 %v7391_v54  ;;  %v959_v51 = vld [vmem:[%s8098_s28 + $0xb40] sm:$0xff]  ;;  %v952_v52 = vld [vmem:[%s8098_s28 + $0xb08] sm:$0xff]  ;;  %v7500_v54 = vcombine.low %v935_v42, %v943_v43  ;;  %v7596_v42 = vcombine.low %v1031_v27, %v1039_v28 }
  0xb9   : > { %v7517_v56 = vcombine.high %v951_v50, %v959_v51  ;;  %v7519_v57 = vcombine.high %v952_v52, %v960_v53  ;;  %v7518_v63 = vcombine.low %v952_v52, %v960_v53  ;;  %v1063_v53 = vld [vmem:[%s8098_s28 + $0xe80] sm:$0xff] }
  0xbf   : > { %4584 = vmatmul.mubr.bf16.gmra.mrb[56].mxu0 %v7388_v59  ;;  %4873 = vmatmul.mubr.bf16.gmra.mrb[56].mxu1 %v7390_v60  ;;  %v975_v59 = vld [vmem:[%s8098_s28 + $0xbc0] sm:$0xff]  ;;  %v968_v60 = vld [vmem:[%s8098_s28 + $0xb88] sm:$0xff] }
  0xc0   : > { %4591 = vmatprep.mubr.bf16.mxu0 %v7405_v61  ;;  %4880 = vmatprep.mubr.bf16.mxu1 %v7407_v62  ;;  %v976_v61 = vld [vmem:[%s8098_s28 + $0xbc8] sm:$0xff]  ;;  %v7516_v62 = vcombine.low %v951_v50, %v959_v51  ;;  %v7533_v0 = vcombine.high %v967_v58, %v975_v59 }
  0xc1   : > { %v7535_v2 = vcombine.high %v968_v60, %v976_v61  ;;  %v7534_v8 = vcombine.low %v968_v60, %v976_v61  ;;  %v7612_v60 = vcombine.low %v1047_v35, %v1055_v36 }
  0xc7   : > { %4592 = vmatmul.mubr.bf16.gmra.mrb[60].mxu0 %v7404_v5  ;;  %4881 = vmatmul.mubr.bf16.gmra.mrb[60].mxu1 %v7406_v6  ;;  %v984_v5 = vld [vmem:[%s8098_s28 + $0xc08] sm:$0xff] }
  0xc8   : > { %4599 = vmatprep.mubr.bf16.mxu0 %v7421_v7  ;;  %4888 = vmatprep.mubr.bf16.mxu1 %v7423_v9  ;;  %v992_v6 = vld [vmem:[%s8098_s28 + $0xc48] sm:$0xff]  ;;  %v7532_v7 = vcombine.low %v967_v58, %v975_v59  ;;  %v7549_v9 = vcombine.high %v983_v3, %v991_v4 }
  0xc9   : > { %v7551_v10 = vcombine.high %v984_v5, %v992_v6 }
  0xcf   : > { %4600 = vmatmul.mubr.bf16.gmra.mrb[64].mxu0 %v7420_v14  ;;  %4889 = vmatmul.mubr.bf16.gmra.mrb[64].mxu1 %v7422_v15  ;;  %v1008_v14 = vld [vmem:[%s8098_s28 + $0xcc8] sm:$0xff]  ;;  %v7548_v15 = vcombine.low %v983_v3, %v991_v4 }
  0xd0   : > { %4607 = vmatprep.mubr.bf16.mxu0 %v7437_v16  ;;  %4896 = vmatprep.mubr.bf16.mxu1 %v7439_v17  ;;  %v7550_v16 = vcombine.low %v984_v5, %v992_v6  ;;  %v7565_v17 = vcombine.high %v999_v11, %v1007_v12  ;;  %v7567_v18 = vcombine.high %v1000_v13, %v1008_v14 }
  0xd7   : > { %4608 = vmatmul.mubr.bf16.gmra.mrb[68].mxu0 %v7436_v22  ;;  %4897 = vmatmul.mubr.bf16.gmra.mrb[68].mxu1 %v7438_v23  ;;  %v1024_v22 = vld [vmem:[%s8098_s28 + $0xd48] sm:$0xff]  ;;  %v7564_v23 = vcombine.low %v999_v11, %v1007_v12 }
  0xd8   : > { %4615 = vmatprep.mubr.bf16.mxu0 %v7453_v24  ;;  %4904 = vmatprep.mubr.bf16.mxu1 %v7455_v25  ;;  %v7566_v24 = vcombine.low %v1000_v13, %v1008_v14  ;;  %v7581_v25 = vcombine.high %v1015_v19, %v1023_v20  ;;  %v7583_v26 = vcombine.high %v1016_v21, %v1024_v22  ;;  %v1080_v11 = vld [vmem:[%s8098_s28 + $0xf08] sm:$0xff] }
  0xd9   : > { %v1088_v12 = vld [vmem:[%s8098_s28 + $0xf48] sm:$0xff] }
  0xdf   : > { %4616 = vmatmul.mubr.bf16.gmra.mrb[72].mxu0 %v7452_v30  ;;  %4905 = vmatmul.mubr.bf16.gmra.mrb[72].mxu1 %v7454_v31  ;;  %v1040_v30 = vld [vmem:[%s8098_s28 + $0xdc8] sm:$0xff]  ;;  %v7580_v31 = vcombine.low %v1015_v19, %v1023_v20 }
  0xe0   : > { %4623 = vmatprep.mubr.bf16.mxu0 %v7469_v32  ;;  %4912 = vmatprep.mubr.bf16.mxu1 %v7471_v33  ;;  %v7582_v32 = vcombine.low %v1016_v21, %v1024_v22  ;;  %v7597_v33 = vcombine.high %v1031_v27, %v1039_v28  ;;  %v7599_v34 = vcombine.high %v1032_v29, %v1040_v30  ;;  %v1103_v27 = vld [vmem:[%s8098_s28 + $0xfc0] sm:$0xff] }
  0xe7   : > { %4624 = vmatmul.mubr.bf16.gmra.mrb[76].mxu0 %v7468_v38  ;;  %4913 = vmatmul.mubr.bf16.gmra.mrb[76].mxu1 %v7470_v39  ;;  %v1048_v38 = vld [vmem:[%s8098_s28 + $0xe08] sm:$0xff] }
  0xe8   : > { %4631 = vmatprep.mubr.bf16.mxu0 %v7485_v40  ;;  %4920 = vmatprep.mubr.bf16.mxu1 %v7487_v41  ;;  %v1056_v39 = vld [vmem:[%s8098_s28 + $0xe48] sm:$0xff] }
  0xe9   : > { %v7615_v50 = vcombine.high %v1048_v38, %v1056_v39 }
  0xef   : > { %4632 = vmatmul.mubr.bf16.gmra.mrb[80].mxu0 %v7484_v46  ;;  %4921 = vmatmul.mubr.bf16.gmra.mrb[80].mxu1 %v7486_v47  ;;  %v7598_v46 = vcombine.low %v1032_v29, %v1040_v30  ;;  %v7613_v47 = vcombine.high %v1047_v35, %v1055_v36  ;;  %v1096_v29 = vld [vmem:[%s8098_s28 + $0xf88] sm:$0xff] }
  0xf0   : > { %4639 = vmatprep.mubr.bf16.mxu0 %v7501_v48  ;;  %4928 = vmatprep.mubr.bf16.mxu1 %v7503_v49  ;;  %v1104_v30 = vld [vmem:[%s8098_s28 + $0xfc8] sm:$0xff] }
  0xf7   : > { %4640 = vmatmul.mubr.bf16.gmra.mrb[84].mxu0 %v7500_v54  ;;  %4929 = vmatmul.mubr.bf16.gmra.mrb[84].mxu1 %v7502_v55  ;;  %v1071_v54 = vld [vmem:[%s8098_s28 + $0xec0] sm:$0xff] }
  0xf8   : > { %4647 = vmatprep.mubr.bf16.mxu0 %v7517_v56  ;;  %4936 = vmatprep.mubr.bf16.mxu1 %v7519_v57  ;;  %v1064_v56 = vld [vmem:[%s8098_s28 + $0xe88] sm:$0xff] }
  0xf9   : > { %v1072_v57 = vld [vmem:[%s8098_s28 + $0xec8] sm:$0xff] }
  0xfa   : > { %v7631_v5 = vcombine.high %v1064_v56, %v1072_v57  ;;  %v7630_v19 = vcombine.low %v1064_v56, %v1072_v57  ;;  %v7662_v57 = vcombine.low %v1096_v29, %v1104_v30 }
  0xff   : > { %4648 = vmatmul.mubr.bf16.gmra.mrb[88].mxu0 %v7516_v62  ;;  %4937 = vmatmul.mubr.bf16.gmra.mrb[88].mxu1 %v7518_v63 }
 0x100   : > { %4655 = vmatprep.mubr.bf16.mxu0 %v7533_v0  ;;  %4944 = vmatprep.mubr.bf16.mxu1 %v7535_v2  ;;  %v7614_v0 = vcombine.low %v1048_v38, %v1056_v39  ;;  %v7629_v2 = vcombine.high %v1063_v53, %v1071_v54 }
 0x107   : > { %4656 = vmatmul.mubr.bf16.gmra.mrb[92].mxu0 %v7532_v7  ;;  %4945 = vmatmul.mubr.bf16.gmra.mrb[92].mxu1 %v7534_v8  ;;  %v1079_v8 = vld [vmem:[%s8098_s28 + $0xf00] sm:$0xff] }
 0x108   : > { %4663 = vmatprep.mubr.bf16.mxu0 %v7549_v9  ;;  %4952 = vmatprep.mubr.bf16.mxu1 %v7551_v10  ;;  %v1087_v9 = vld [vmem:[%s8098_s28 + $0xf40] sm:$0xff] }
 0x109   : > { %v7645_v20 = vcombine.high %v1079_v8, %v1087_v9 }
 0x10f   : > { %4664 = vmatmul.mubr.bf16.gmra.mrb[96].mxu0 %v7548_v15  ;;  %4953 = vmatmul.mubr.bf16.gmra.mrb[96].mxu1 %v7550_v16  ;;  %v7628_v15 = vcombine.low %v1063_v53, %v1071_v54 }
 0x110   : > { %4671 = vmatprep.mubr.bf16.mxu0 %v7565_v17  ;;  %4960 = vmatprep.mubr.bf16.mxu1 %v7567_v18 }
 0x117   : > { %4672 = vmatmul.mubr.bf16.gmra.mrb[100].mxu0 %v7564_v23  ;;  %4961 = vmatmul.mubr.bf16.gmra.mrb[100].mxu1 %v7566_v24  ;;  %v7647_v23 = vcombine.high %v1080_v11, %v1088_v12 }
 0x118   : > { %4679 = vmatprep.mubr.bf16.mxu0 %v7581_v25  ;;  %4968 = vmatprep.mubr.bf16.mxu1 %v7583_v26  ;;  %v1095_v26 = vld [vmem:[%s8098_s28 + $0xf80] sm:$0xff] }
 0x119   : > { %v7661_v38 = vcombine.high %v1095_v26, %v1103_v27  ;;  %v7660_v53 = vcombine.low %v1095_v26, %v1103_v27  ;;  %v633_v26 = vld [vmem:[%s8098_s28 + $0x110] sm:$0xff] }
 0x11a   : > { %v641_v27 = vld [vmem:[%s8098_s28 + $0x150] sm:$0xff] }
 0x11f   : > { %4680 = vmatmul.mubr.bf16.gmra.mrb[104].mxu0 %v7580_v31  ;;  %4969 = vmatmul.mubr.bf16.gmra.mrb[104].mxu1 %v7582_v32 }
 0x120   : > { %4687 = vmatprep.mubr.bf16.mxu0 %v7597_v33  ;;  %4976 = vmatprep.mubr.bf16.mxu1 %v7599_v34  ;;  %v7644_v33 = vcombine.low %v1079_v8, %v1087_v9  ;;  %v618_v9 = vld [vmem:[%s8098_s28 + $0x98] sm:$0xff] }
 0x122   : > { %v4473_v37 = vpop.f32.mrb[0].mxu0  ;;  %v4762_v40 = vpop.f32.mrb[0].mxu1 }
 0x123   : > { %v4475_v41 = vpop.f32.mrb[1].mxu0  ;;  %v8426_v43 = vadd.f32 %v4762_v40, %v4473_v37  ;;  %v4764_v44 = vpop.f32.mrb[1].mxu1  ;;  %v7646_v37 = vcombine.low %v1080_v11, %v1088_v12 }
 0x124   : > { %v4476_v45 = vpop.f32.mrb[2].mxu0  ;;  %v4765_v48 = vpop.f32.mrb[2].mxu1  ;;  %v7663_v41 = vcombine.high %v1096_v29, %v1104_v30  ;;  %v634_v30 = vld [vmem:[%s8098_s28 + $0x118] sm:$0xff] }
 0x125   : > { %v4478_v49 = vpop.f32.mrb[3].mxu0  ;;  %v8428_v51 = vadd.f32 %v4765_v48, %v4476_v45  ;;  %v4767_v52 = vpop.f32.mrb[3].mxu1  ;;  %v601_v45 = vld [vmem:[%s8098_s28 + $0x10] sm:$0xff]  ;;  %v602_v48 = vld [vmem:[%s8098_s28 + $0x18] sm:$0xff] }
 0x126   : > { %v610_v49 = vld [vmem:[%s8098_s28 + $0x58] sm:$0xff] }
 0x127   : > { %4688 = vmatmul.mubr.bf16.gmra.mrb[108].mxu0 %v7596_v42  ;;  %4977 = vmatmul.mubr.bf16.gmra.mrb[108].mxu1 %v7598_v46  ;;  %v609_v46 = vld [vmem:[%s8098_s28 + $0x50] sm:$0xff] }
 0x128   : > { %4695 = vmatprep.mubr.bf16.mxu0 %v7613_v47  ;;  %4984 = vmatprep.mubr.bf16.mxu1 %v7615_v50  ;;  %v7168_v8 = vcombine.low %v601_v45, %v609_v46 }
 0x12a   : > { %v4481_v55 = vpop.f32.mrb[4].mxu0  ;;  %v4770_v58 = vpop.f32.mrb[4].mxu1 }
 0x12b   : > { %v4483_v59 = vpop.f32.mrb[5].mxu0  ;;  %v8434_v61 = vadd.f32 %v4770_v58, %v4481_v55  ;;  %v4772_v62 = vpop.f32.mrb[5].mxu1  ;;  %v7169_v58 = vcombine.high %v601_v45, %v609_v46  ;;  %v7901_v46 = vld [vmem:[%s9866_s1 + $0x210] sm:$0xff]  }
 0x12c   : > { %v4484_v63 = vpop.f32.mrb[6].mxu0  ;;  %v4773_v3 = vpop.f32.mrb[6].mxu1  ;;  %v7171_v62 = vcombine.high %v602_v48, %v610_v49 }
 0x12d   : > { %v4486_v4 = vpop.f32.mrb[7].mxu0  ;;  %v8436_v6 = vadd.f32 %v4773_v3, %v4484_v63  ;;  %v4775_v7 = vpop.f32.mrb[7].mxu1  ;;  %v617_v3 = vld [vmem:[%s8098_s28 + $0x90] sm:$0xff] }
 0x12e   : > { %v625_v4 = vld [vmem:[%s8098_s28 + $0xd0] sm:$0xff] }
 0x12f   : > { %4696 = vmatmul.mubr.bf16.gmra.mrb[112].mxu0 %v7612_v60  ;;  %4985 = vmatmul.mubr.bf16.gmra.mrb[112].mxu1 %v7614_v0 }
 0x130   : > { %4703 = vmatprep.mubr.bf16.mxu0 %v7629_v2  ;;  %4992 = vmatprep.mubr.bf16.mxu1 %v7631_v5 }
 0x132   : > { %v4489_v10 = vpop.f32.mrb[8].mxu0  ;;  %v4778_v13 = vpop.f32.mrb[8].mxu1 }
 0x133   : > { %v4491_v14 = vpop.f32.mrb[9].mxu0  ;;  %v8442_v16 = vadd.f32 %v4778_v13, %v4489_v10  ;;  %v4780_v17 = vpop.f32.mrb[9].mxu1  ;;  %v626_v10 = vld [vmem:[%s8098_s28 + $0xd8] sm:$0xff] }
 0x134   : > { %v4492_v18 = vpop.f32.mrb[10].mxu0  ;;  %v4781_v21 = vpop.f32.mrb[10].mxu1  ;;  %v7170_v14 = vcombine.low %v602_v48, %v610_v49  ;;  %v7902_v49 = vld [vmem:[%s9866_s1 + $0x290] sm:$0xff]  }
 0x135   : > { %v4494_v22 = vpop.f32.mrb[11].mxu0  ;;  %v8444_v24 = vadd.f32 %v4781_v21, %v4492_v18  ;;  %v4783_v25 = vpop.f32.mrb[11].mxu1 }
 0x136   : > { %v7899_v25 = vld [vmem:[%s9866_s1 + $0x208] sm:$0xff]  }
 0x137   : > { %4704 = vmatmul.mubr.bf16.gmra.mrb[116].mxu0 %v7628_v15  ;;  %4993 = vmatmul.mubr.bf16.gmra.mrb[116].mxu1 %v7630_v19  ;;  %v7897_v15 = vld [vmem:[%s9866_s1 + $0x200] sm:$0xff]  }
 0x138   : > { %4711 = vmatprep.mubr.bf16.mxu0 %v7645_v20  ;;  %5000 = vmatprep.mubr.bf16.mxu1 %v7647_v23  ;;  %v7898_v19 = vld [vmem:[%s9866_s1 + $0x280] sm:$0xff]   ;;  %v7185_v20 = vcombine.high %v617_v3, %v625_v4  ;;  %v7187_v23 = vcombine.high %v618_v9, %v626_v10 }
 0x13a   : > { %v4497_v28 = vpop.f32.mrb[12].mxu0  ;;  %v4786_v31 = vpop.f32.mrb[12].mxu1 }
 0x13b   : > { %v4499_v32 = vpop.f32.mrb[13].mxu0  ;;  %v8450_v34 = vadd.f32 %v4786_v31, %v4497_v28  ;;  %v4788_v35 = vpop.f32.mrb[13].mxu1  ;;  %v7900_v28 = vld [vmem:[%s9866_s1 + $0x288] sm:$0xff]   ;;  %v642_v31 = vld [vmem:[%s8098_s28 + $0x158] sm:$0xff] }
 0x13c   : > { %v4500_v36 = vpop.f32.mrb[14].mxu0  ;;  %v4789_v39 = vpop.f32.mrb[14].mxu1  ;;  %v7184_v35 = vcombine.low %v617_v3, %v625_v4  ;;  %v7203_v45 = vcombine.high %v634_v30, %v642_v31  ;;  %v7202_v4 = vcombine.low %v634_v30, %v642_v31 }
 0x13d   : > { %v4502_v40 = vpop.f32.mrb[15].mxu0  ;;  %v8452_v42 = vadd.f32 %v4789_v39, %v4500_v36  ;;  %v4791_v44 = vpop.f32.mrb[15].mxu1  ;;  %v7186_v39 = vcombine.low %v618_v9, %v626_v10  ;;  %v7905_v10 = vld [vmem:[%s9866_s1 + $0x220] sm:$0xff]  }
 0x13e   : > { %v7201_v40 = vcombine.high %v633_v26, %v641_v27 }
 0x13f   : > { %4712 = vmatmul.mubr.bf16.gmra.mrb[120].mxu0 %v7644_v33  ;;  %5001 = vmatmul.mubr.bf16.gmra.mrb[120].mxu1 %v7646_v37 }
 0x140   : > { %4719 = vmatprep.mubr.bf16.mxu0 %v7661_v38  ;;  %5008 = vmatprep.mubr.bf16.mxu1 %v7663_v41 }
 0x142   : > { %v4505_v47 = vpop.f32.mrb[16].mxu0  ;;  %v4794_v50 = vpop.f32.mrb[16].mxu1 }
 0x143   : > { %v4507_v52 = vpop.f32.mrb[17].mxu0  ;;  %v8458_v54 = vadd.f32 %v4794_v50, %v4505_v47  ;;  %v4796_v55 = vpop.f32.mrb[17].mxu1  ;;  %v8501_v50 = vld [vmem:[%s8098_s28 + $0x190] sm:$0xff] }
 0x144   : > { %v4508_v56 = vpop.f32.mrb[18].mxu0  ;;  %v4797_v59 = vpop.f32.mrb[18].mxu1  ;;  %v657_v52 = vld [vmem:[%s8098_s28 + $0x1d0] sm:$0xff] }
 0x145   : > { %v4510_v60 = vpop.f32.mrb[19].mxu0  ;;  %v8460_v63 = vadd.f32 %v4797_v59, %v4508_v56  ;;  %v4799_v0 = vpop.f32.mrb[19].mxu1  ;;  %v650_v56 = vld [vmem:[%s8098_s28 + $0x198] sm:$0xff] }
 0x147   : > { %4720 = vmatmul.mubr.bf16.gmra.mrb[124].mxu0 %v7660_v53  ;;  %5009 = vmatmul.mubr.bf16.gmra.mrb[124].mxu1 %v7662_v57  ;;  %v7903_v53 = vld [vmem:[%s9866_s1 + $0x218] sm:$0xff]  }
 0x148   : > { %5049 = vmatprep.mubr.bf16.mxu0 %v7169_v58  ;;  %5338 = vmatprep.mubr.bf16.mxu1 %v7171_v62  ;;  %v658_v57 = vld [vmem:[%s8098_s28 + $0x1d8] sm:$0xff]  ;;  %v7200_v62 = vcombine.low %v633_v26, %v641_v27  ;;  %v7216_v27 = vcombine.low %v8501_v50, %v657_v52 }
 0x149   : > { %v7904_v58 = vld [vmem:[%s9866_s1 + $0x298] sm:$0xff]   ;;  %v7219_v9 = vcombine.high %v650_v56, %v658_v57  ;;  %v7218_v31 = vcombine.low %v650_v56, %v658_v57 }
 0x14a   : > { %v4513_v2 = vpop.f32.mrb[20].mxu0  ;;  %v4802_v5 = vpop.f32.mrb[20].mxu1 }
 0x14b   : > { %v4515_v7 = vpop.f32.mrb[21].mxu0  ;;  %v8466_v11 = vadd.f32 %v4802_v5, %v4513_v2  ;;  %v4804_v12 = vpop.f32.mrb[21].mxu1  ;;  %v7217_v5 = vcombine.high %v8501_v50, %v657_v52  ;;  %v690_v50 = vld [vmem:[%s8098_s28 + $0x2d8] sm:$0xff] }
 0x14c   : > { %v4516_v13 = vpop.f32.mrb[22].mxu0  ;;  %v4805_v17 = vpop.f32.mrb[22].mxu1  ;;  %v7912_v52 = vld [vmem:[%s9866_s1 + $0x2b8] sm:$0xff]  }
 0x14d   : > { %v4518_v18 = vpop.f32.mrb[23].mxu0  ;;  %v8474_v21 = vadd.f32 %v4805_v17, %v4516_v13  ;;  %v4807_v22 = vpop.f32.mrb[23].mxu1  ;;  %v673_v17 = vld [vmem:[%s8098_s28 + $0x250] sm:$0xff] }
 0x14e   : > { %v7907_v18 = vld [vmem:[%s9866_s1 + $0x228] sm:$0xff]   ;;  %v674_v22 = vld [vmem:[%s8098_s28 + $0x258] sm:$0xff] }
 0x14f   : > { %5050 = vmatmul.mubr.bf16.vlgmr.msra.gmra.mrb[128].mxu0 %v7168_v8  ;;  %5339 = vmatmul.mubr.bf16.vlgmr.msra.gmra.mrb[128].mxu1 %v7170_v14  ;;  %v7906_v14 = vld [vmem:[%s9866_s1 + $0x2a0] sm:$0xff]  }
 0x150   : > { %5596 = vmatpush1.bf16.msra.mxu0 %v7897_v15  ;;  %5885 = vmatpush1.bf16.msra.mxu1 %v7898_v19  ;;  %v8528_v15 = vld [vmem:[%s8098_s28 + $0x210] sm:$0xff] }
 0x151   : > { %5057 = vmatprep.mubr.bf16.mxu0 %v7185_v20  ;;  %5346 = vmatprep.mubr.bf16.mxu1 %v7187_v23  ;;  %v666_v20 = vld [vmem:[%s8098_s28 + $0x218] sm:$0xff]  ;;  %v7908_v23 = vld [vmem:[%s9866_s1 + $0x2a8] sm:$0xff]   ;;  %v7232_v56 = vcombine.low %v8528_v15, %v673_v17 }
 0x152   : > { %v4521_v29 = vpop.f32.mrb[24].mxu0  ;;  %5597 = vmatprep.subr.bf16.mxu0 %v9869_v1  ;;  %v4810_v32 = vpop.f32.mrb[24].mxu1  ;;  %5886 = vmatprep.subr.bf16.mxu1 %v9869_v1 }
 0x153   : > { %v4523_v33 = vpop.f32.mrb[25].mxu0  ;;  %v8488_v36 = vadd.f32 %v4810_v32, %v4521_v29  ;;  %v4812_v37 = vpop.f32.mrb[25].mxu1  ;;  %v7233_v32 = vcombine.high %v8528_v15, %v673_v17  ;;  %v698_v17 = vld [vmem:[%s8098_s28 + $0x318] sm:$0xff] }
 0x154   : > { %v4524_v38 = vpop.f32.mrb[26].mxu0  ;;  %5598 = vmatpush1.bf16.msra.mxu0 %v7899_v25  ;;  %v4813_v41 = vpop.f32.mrb[26].mxu1  ;;  %5887 = vmatpush1.bf16.msra.mxu1 %v7900_v28  ;;  %v7235_v37 = vcombine.high %v666_v20, %v674_v22 }
 0x155   : > { %v4526_v44 = vpop.f32.mrb[27].mxu0  ;;  %5599 = vmatprep.subr.bf16.mxu0 %v9869_v1  ;;  %v8494_v47 = vadd.f32 %v4813_v41, %v4524_v38  ;;  %v4815_v48 = vpop.f32.mrb[27].mxu1  ;;  %5888 = vmatprep.subr.bf16.mxu1 %v9869_v1  ;;  %v7909_v38 = vld [vmem:[%s9866_s1 + $0x230] sm:$0xff]  }
 0x156   : > { %v7910_v41 = vld [vmem:[%s9866_s1 + $0x2b0] sm:$0xff]  }
 0x157   : > { %5058 = vmatmul.mubr.bf16.gmra.mrb[132].mxu0 %v7184_v35  ;;  %5347 = vmatmul.mubr.bf16.gmra.mrb[132].mxu1 %v7186_v39  ;;  %v8556_v44 = vld [vmem:[%s8098_s28 + $0x290] sm:$0xff] }
 0x158   : > { %5065 = vmatprep.mubr.bf16.mxu0 %v7201_v40  ;;  %5354 = vmatprep.mubr.bf16.mxu1 %v7203_v45  ;;  %v689_v45 = vld [vmem:[%s8098_s28 + $0x2d0] sm:$0xff] }
 0x159   : > { %5600 = vmatpush1.bf16.msra.mxu0 %v7901_v46  ;;  %5889 = vmatpush1.bf16.msra.mxu1 %v7902_v49  ;;  %v7911_v46 = vld [vmem:[%s9866_s1 + $0x238] sm:$0xff]  }
 0x15a   : > { %v4529_v55 = vpop.f32.mrb[28].mxu0  ;;  %5601 = vmatprep.subr.bf16.mxu0 %v9869_v1  ;;  %v4818_v59 = vpop.f32.mrb[28].mxu1  ;;  %5890 = vmatprep.subr.bf16.mxu1 %v9869_v1  ;;  %v682_v49 = vld [vmem:[%s8098_s28 + $0x298] sm:$0xff] }
 0x15b   : > { %v4531_v60 = vpop.f32.mrb[29].mxu0  ;;  %v8514_v0 = vadd.f32 %v4818_v59, %v4529_v55  ;;  %v4820_v2 = vpop.f32.mrb[29].mxu1 }
 0x15c   : > { %v4532_v3 = vpop.f32.mrb[30].mxu0  ;;  %v4821_v7 = vpop.f32.mrb[30].mxu1  ;;  %v7234_v60 = vcombine.low %v666_v20, %v674_v22 }
 0x15d   : > { %v4534_v8 = vpop.f32.mrb[31].mxu0  ;;  %5602 = vmatpush1.bf16.msra.mxu0 %v7903_v53  ;;  %v8520_v12 = vadd.f32 %v4821_v7, %v4532_v3  ;;  %v4823_v13 = vpop.f32.mrb[31].mxu1  ;;  %5891 = vmatpush1.bf16.msra.mxu1 %v7904_v58 }
 0x15e   : > { %5603 = vmatprep.subr.bf16.mxu0 %v9869_v1  ;;  %5892 = vmatprep.subr.bf16.mxu1 %v9869_v1  ;;  %v705_v13 = vld [vmem:[%s8098_s28 + $0x350] sm:$0xff] }
 0x15f   : > { %5066 = vmatmul.mubr.bf16.gmra.mrb[136].mxu0 %v7200_v62  ;;  %5355 = vmatmul.mubr.bf16.gmra.mrb[136].mxu1 %v7202_v4  ;;  %v7249_v62 = vcombine.high %v8556_v44, %v689_v45  ;;  %v7251_v4 = vcombine.high %v682_v49, %v690_v50 }
 0x160   : > { %5073 = vmatprep.mubr.bf16.mxu0 %v7217_v5  ;;  %5362 = vmatprep.mubr.bf16.mxu1 %v7219_v9  ;;  %v7913_v5 = vld [vmem:[%s9866_s1 + $0x240] sm:$0xff]  }
 0x161   : > { %5604 = vmatpush1.bf16.msra.mxu0 %v7905_v10  ;;  %5893 = vmatpush1.bf16.msra.mxu1 %v7906_v14  ;;  %v7914_v9 = vld [vmem:[%s9866_s1 + $0x2c0] sm:$0xff]   ;;  %v697_v10 = vld [vmem:[%s8098_s28 + $0x310] sm:$0xff]  ;;  %v7915_v14 = vld [vmem:[%s9866_s1 + $0x248] sm:$0xff]  }
 0x162   : > { %v4537_v19 = vpop.f32.mrb[32].mxu0  ;;  %5605 = vmatprep.subr.bf16.mxu0 %v9869_v1  ;;  %v4826_v25 = vpop.f32.mrb[32].mxu1  ;;  %5894 = vmatprep.subr.bf16.mxu1 %v9869_v1 }
 0x163   : > { %v4539_v26 = vpop.f32.mrb[33].mxu0  ;;  %v8542_v28 = vadd.f32 %v4826_v25, %v4537_v19  ;;  %v4828_v29 = vpop.f32.mrb[33].mxu1  ;;  %v7916_v19 = vld [vmem:[%s9866_s1 + $0x2c8] sm:$0xff]  }
 0x164   : > { %v4540_v30 = vpop.f32.mrb[34].mxu0  ;;  %v4829_v33 = vpop.f32.mrb[34].mxu1  ;;  %v7250_v29 = vcombine.low %v682_v49, %v690_v50 }
 0x165   : > { %v4542_v35 = vpop.f32.mrb[35].mxu0  ;;  %5606 = vmatpush1.bf16.msra.mxu0 %v7907_v18  ;;  %v8548_v39 = vadd.f32 %v4829_v33, %v4540_v30  ;;  %v4831_v40 = vpop.f32.mrb[35].mxu1  ;;  %5895 = vmatpush1.bf16.msra.mxu1 %v7908_v23  ;;  %v706_v18 = vld [vmem:[%s8098_s28 + $0x358] sm:$0xff]  ;;  %v7248_v23 = vcombine.low %v8556_v44, %v689_v45  ;;  %v7265_v30 = vcombine.high %v697_v10, %v705_v13  ;;  %v721_v44 = vld [vmem:[%s8098_s28 + $0x3d0] sm:$0xff] }
 0x166   : > { %5607 = vmatprep.subr.bf16.mxu0 %v9869_v1  ;;  %5896 = vmatprep.subr.bf16.mxu1 %v9869_v1  ;;  %v7267_v33 = vcombine.high %v698_v17, %v706_v18  ;;  %v7917_v35 = vld [vmem:[%s9866_s1 + $0x250] sm:$0xff]  }
 0x167   : > { %5074 = vmatmul.mubr.bf16.gmra.mrb[140].mxu0 %v7216_v27  ;;  %5363 = vmatmul.mubr.bf16.gmra.mrb[140].mxu1 %v7218_v31  ;;  %v7918_v40 = vld [vmem:[%s9866_s1 + $0x2d0] sm:$0xff]  }
 0x168   : > { %5081 = vmatprep.mubr.bf16.mxu0 %v7233_v32  ;;  %5370 = vmatprep.mubr.bf16.mxu1 %v7235_v37 }
 0x169   : > { %5608 = vmatpush1.bf16.msra.mxu0 %v7909_v38  ;;  %5897 = vmatpush1.bf16.msra.mxu1 %v7910_v41  ;;  %v713_v41 = vld [vmem:[%s8098_s28 + $0x390] sm:$0xff] }
 0x16a   : > { %v4545_v48 = vpop.f32.mrb[36].mxu0  ;;  %5609 = vmatprep.subr.bf16.mxu0 %v9869_v1  ;;  %v4834_v53 = vpop.f32.mrb[36].mxu1  ;;  %5898 = vmatprep.subr.bf16.mxu1 %v9869_v1 }
 0x16b   : > { %v4547_v55 = vpop.f32.mrb[37].mxu0  ;;  %v8570_v57 = vadd.f32 %v4834_v53, %v4545_v48  ;;  %v4836_v58 = vpop.f32.mrb[37].mxu1  ;;  %v722_v48 = vld [vmem:[%s8098_s28 + $0x3d8] sm:$0xff] }
 0x16c   : > { %v4548_v59 = vpop.f32.mrb[38].mxu0  ;;  %v4837_v2 = vpop.f32.mrb[38].mxu1  ;;  %v7266_v58 = vcombine.low %v698_v17, %v706_v18  ;;  %v7280_v18 = vcombine.low %v713_v41, %v721_v44 }
 0x16d   : > { %v4550_v3 = vpop.f32.mrb[39].mxu0  ;;  %5610 = vmatpush1.bf16.msra.mxu0 %v7911_v46  ;;  %v8576_v7 = vadd.f32 %v4837_v2, %v4548_v59  ;;  %v4839_v8 = vpop.f32.mrb[39].mxu1  ;;  %5899 = vmatpush1.bf16.msra.mxu1 %v7912_v52  ;;  %v714_v46 = vld [vmem:[%s8098_s28 + $0x398] sm:$0xff]  ;;  %v7264_v52 = vcombine.low %v697_v10, %v705_v13  ;;  %v7281_v59 = vcombine.high %v713_v41, %v721_v44 }
 0x16e   : > { %5611 = vmatprep.subr.bf16.mxu0 %v9869_v1  ;;  %5900 = vmatprep.subr.bf16.mxu1 %v9869_v1  ;;  %v7283_v2 = vcombine.high %v714_v46, %v722_v48  ;;  %v729_v8 = vld [vmem:[%s8098_s28 + $0x410] sm:$0xff]  ;;  %v730_v13 = vld [vmem:[%s8098_s28 + $0x418] sm:$0xff] }
 0x16f   : > { %5082 = vmatmul.mubr.bf16.gmra.mrb[144].mxu0 %v7232_v56  ;;  %5371 = vmatmul.mubr.bf16.gmra.mrb[144].mxu1 %v7234_v60  ;;  %v746_v41 = vld [vmem:[%s8098_s28 + $0x498] sm:$0xff] }
 0x170   : > { %5089 = vmatprep.mubr.bf16.mxu0 %v7249_v62  ;;  %5378 = vmatprep.mubr.bf16.mxu1 %v7251_v4  ;;  %v754_v44 = vld [vmem:[%s8098_s28 + $0x4d8] sm:$0xff] }
 0x171   : > { %5612 = vmatpush1.bf16.msra.mxu0 %v7913_v5  ;;  %5901 = vmatpush1.bf16.msra.mxu1 %v7914_v9  ;;  %v7919_v5 = vld [vmem:[%s9866_s1 + $0x258] sm:$0xff]   ;;  %v737_v9 = vld [vmem:[%s8098_s28 + $0x450] sm:$0xff] }
 0x172   : > { %v4553_v15 = vpop.f32.mrb[40].mxu0  ;;  %5613 = vmatprep.subr.bf16.mxu0 %v9869_v1  ;;  %v4842_v20 = vpop.f32.mrb[40].mxu1  ;;  %5902 = vmatprep.subr.bf16.mxu1 %v9869_v1 }
 0x173   : > { %v4555_v22 = vpop.f32.mrb[41].mxu0  ;;  %v8596_v25 = vadd.f32 %v4842_v20, %v4553_v15  ;;  %v4844_v26 = vpop.f32.mrb[41].mxu1 }
 0x174   : > { %v4556_v27 = vpop.f32.mrb[42].mxu0  ;;  %v4845_v31 = vpop.f32.mrb[42].mxu1  ;;  %v7297_v26 = vcombine.high %v729_v8, %v737_v9 }
 0x175   : > { %v4558_v32 = vpop.f32.mrb[43].mxu0  ;;  %5614 = vmatpush1.bf16.msra.mxu0 %v7915_v14  ;;  %v8601_v37 = vadd.f32 %v4845_v31, %v4556_v27  ;;  %v4847_v38 = vpop.f32.mrb[43].mxu1  ;;  %5903 = vmatpush1.bf16.msra.mxu1 %v7916_v19  ;;  %v738_v14 = vld [vmem:[%s8098_s28 + $0x458] sm:$0xff] }
 0x176   : > { %5615 = vmatprep.subr.bf16.mxu0 %v9869_v1  ;;  %5904 = vmatprep.subr.bf16.mxu1 %v9869_v1  ;;  %v7920_v27 = vld [vmem:[%s9866_s1 + $0x2d8] sm:$0xff]   ;;  %v7299_v31 = vcombine.high %v730_v13, %v738_v14  ;;  %v753_v38 = vld [vmem:[%s8098_s28 + $0x4d0] sm:$0xff] }
 0x177   : > { %5090 = vmatmul.mubr.bf16.gmra.mrb[148].mxu0 %v7248_v23  ;;  %5379 = vmatmul.mubr.bf16.gmra.mrb[148].mxu1 %v7250_v29  ;;  %v7282_v23 = vcombine.low %v714_v46, %v722_v48  ;;  %v7296_v48 = vcombine.low %v729_v8, %v737_v9  ;;  %v769_v8 = vld [vmem:[%s8098_s28 + $0x550] sm:$0xff] }
 0x178   : > { %5097 = vmatprep.mubr.bf16.mxu0 %v7265_v30  ;;  %5386 = vmatprep.mubr.bf16.mxu1 %v7267_v33 }
 0x179   : > { %5616 = vmatpush1.bf16.msra.mxu0 %v7917_v35  ;;  %5905 = vmatpush1.bf16.msra.mxu1 %v7918_v40  ;;  %v745_v35 = vld [vmem:[%s8098_s28 + $0x490] sm:$0xff] }
 0x17a   : > { %v4561_v45 = vpop.f32.mrb[44].mxu0  ;;  %5617 = vmatprep.subr.bf16.mxu0 %v9869_v1  ;;  %v4850_v49 = vpop.f32.mrb[44].mxu1  ;;  %5906 = vmatprep.subr.bf16.mxu1 %v9869_v1 }
 0x17b   : > { %v4563_v50 = vpop.f32.mrb[45].mxu0  ;;  %v8614_v53 = vadd.f32 %v4850_v49, %v4561_v45  ;;  %v4852_v55 = vpop.f32.mrb[45].mxu1 }
 0x17c   : > { %v4564_v56 = vpop.f32.mrb[46].mxu0  ;;  %v4853_v60 = vpop.f32.mrb[46].mxu1  ;;  %v7298_v55 = vcombine.low %v730_v13, %v738_v14  ;;  %v770_v13 = vld [vmem:[%s8098_s28 + $0x558] sm:$0xff] }
 0x17d   : > { %v4566_v62 = vpop.f32.mrb[47].mxu0  ;;  %v8616_v3 = vadd.f32 %v4853_v60, %v4564_v56  ;;  %v4855_v4 = vpop.f32.mrb[47].mxu1  ;;  %5618 = vmatpush1.bf16.msra.mxu0 %v7919_v5  ;;  %5907 = vmatpush1.bf16.msra.mxu1 %v7920_v27  ;;  %v7313_v56 = vcombine.high %v745_v35, %v753_v38  ;;  %v7315_v60 = vcombine.high %v746_v41, %v754_v44  ;;  %v761_v5 = vld [vmem:[%s8098_s28 + $0x510] sm:$0xff]  ;;  %v7922_v27 = vld [vmem:[%s9866_s1 + $0x2e0] sm:$0xff]  }
 0x17e   : > { %5619 = vmatprep.subr.bf16.mxu0 %v9869_v1  ;;  %5908 = vmatprep.subr.bf16.mxu1 %v9869_v1  ;;  %v7921_v4 = vld [vmem:[%s9866_s1 + $0x260] sm:$0xff]  }
 0x17f   : > { %5098 = vmatmul.mubr.bf16.gmra.mrb[152].mxu0 %v7264_v52  ;;  %5387 = vmatmul.mubr.bf16.gmra.mrb[152].mxu1 %v7266_v58 }
 0x180   : > { %5105 = vmatprep.mubr.bf16.mxu0 %v7281_v59  ;;  %5394 = vmatprep.mubr.bf16.mxu1 %v7283_v2 }
 0x181   : > { %5620 = vmatpush1.bf16.msra.mxu0 %v7921_v4  ;;  %5909 = vmatpush1.bf16.msra.mxu1 %v7922_v27 }
 0x182   : > { %v4569_v10 = vpop.f32.mrb[48].mxu0  ;;  %v4858_v15 = vpop.f32.mrb[48].mxu1  ;;  %5621 = vmatprep.subr.bf16.mxu0 %v9869_v1  ;;  %5910 = vmatprep.subr.bf16.mxu1 %v9869_v1 }
 0x183   : > { %v4571_v17 = vpop.f32.mrb[49].mxu0  ;;  %v8626_v19 = vadd.f32 %v4858_v15, %v4569_v10  ;;  %v4860_v20 = vpop.f32.mrb[49].mxu1  ;;  %v762_v10 = vld [vmem:[%s8098_s28 + $0x518] sm:$0xff] }
 0x184   : > { %v4572_v22 = vpop.f32.mrb[50].mxu0  ;;  %v4861_v29 = vpop.f32.mrb[50].mxu1  ;;  %v7312_v17 = vcombine.low %v745_v35, %v753_v38  ;;  %v777_v38 = vld [vmem:[%s8098_s28 + $0x590] sm:$0xff] }
 0x185   : > { %v4574_v30 = vpop.f32.mrb[51].mxu0  ;;  %v8631_v32 = vadd.f32 %v4861_v29, %v4572_v22  ;;  %v4863_v33 = vpop.f32.mrb[51].mxu1 }
 0x187   : > { %5106 = vmatmul.mubr.bf16.gmra.mrb[156].mxu0 %v7280_v18  ;;  %5395 = vmatmul.mubr.bf16.gmra.mrb[156].mxu1 %v7282_v23  ;;  %v7314_v23 = vcombine.low %v746_v41, %v754_v44  ;;  %v778_v44 = vld [vmem:[%s8098_s28 + $0x598] sm:$0xff] }
 0x188   : > { %5113 = vmatprep.mubr.bf16.mxu0 %v7297_v26  ;;  %5402 = vmatprep.mubr.bf16.mxu1 %v7299_v31  ;;  %v7329_v26 = vcombine.high %v761_v5, %v769_v8  ;;  %v7331_v31 = vcombine.high %v762_v10, %v770_v13 }
 0x18a   : > { %v4577_v40 = vpop.f32.mrb[52].mxu0  ;;  %v4866_v45 = vpop.f32.mrb[52].mxu1 }
 0x18b   : > { %v4579_v46 = vpop.f32.mrb[53].mxu0  ;;  %v8638_v49 = vadd.f32 %v4866_v45, %v4577_v40  ;;  %v4868_v50 = vpop.f32.mrb[53].mxu1  ;;  %v785_v40 = vld [vmem:[%s8098_s28 + $0x5d0] sm:$0xff]  ;;  %v786_v45 = vld [vmem:[%s8098_s28 + $0x5d8] sm:$0xff] }
 0x18c   : > { %v4580_v52 = vpop.f32.mrb[54].mxu0  ;;  %v4869_v58 = vpop.f32.mrb[54].mxu1  ;;  %v7328_v50 = vcombine.low %v761_v5, %v769_v8  ;;  %v7347_v4 = vcombine.high %v778_v44, %v786_v45  ;;  %v7923_v5 = vld [vmem:[%s9866_s1 + $0x268] sm:$0xff]   ;;  %v793_v8 = vld [vmem:[%s8098_s28 + $0x610] sm:$0xff] }
 0x18d   : > { %v4582_v59 = vpop.f32.mrb[55].mxu0  ;;  %v8640_v62 = vadd.f32 %v4869_v58, %v4580_v52  ;;  %v4871_v2 = vpop.f32.mrb[55].mxu1  ;;  %v7330_v58 = vcombine.low %v762_v10, %v770_v13  ;;  %v794_v10 = vld [vmem:[%s8098_s28 + $0x618] sm:$0xff]  ;;  %5622 = vmatpush1.bf16.msra.mxu0 %v7923_v5 }
 0x18e   : > { %v7345_v59 = vcombine.high %v777_v38, %v785_v40  ;;  %v802_v13 = vld [vmem:[%s8098_s28 + $0x658] sm:$0xff]  ;;  %5623 = vmatprep.subr.bf16.mxu0 %v9869_v1 }
 0x18f   : > { %5114 = vmatmul.mubr.bf16.gmra.mrb[160].mxu0 %v7296_v48  ;;  %5403 = vmatmul.mubr.bf16.gmra.mrb[160].mxu1 %v7298_v55  ;;  %v7362_v5 = vcombine.low %v794_v10, %v802_v13 }
 0x190   : > { %5121 = vmatprep.mubr.bf16.mxu0 %v7313_v56  ;;  %5410 = vmatprep.mubr.bf16.mxu1 %v7315_v60 }
 0x192   : > { %v4585_v9 = vpop.f32.mrb[56].mxu0  ;;  %v4874_v14 = vpop.f32.mrb[56].mxu1 }
 0x193   : > { %v4587_v15 = vpop.f32.mrb[57].mxu0  ;;  %v8650_v18 = vadd.f32 %v4874_v14, %v4585_v9  ;;  %v4876_v20 = vpop.f32.mrb[57].mxu1 }
 0x194   : > { %v4588_v22 = vpop.f32.mrb[58].mxu0  ;;  %v4877_v29 = vpop.f32.mrb[58].mxu1  ;;  %v801_v15 = vld [vmem:[%s8098_s28 + $0x650] sm:$0xff] }
 0x195   : > { %v4590_v30 = vpop.f32.mrb[59].mxu0  ;;  %v8655_v33 = vadd.f32 %v4877_v29, %v4588_v22  ;;  %v4879_v35 = vpop.f32.mrb[59].mxu1 }
 0x196   : > { %v7361_v35 = vcombine.high %v793_v8, %v801_v15 }
 0x197   : > { %5122 = vmatmul.mubr.bf16.gmra.mrb[164].mxu0 %v7312_v17  ;;  %5411 = vmatmul.mubr.bf16.gmra.mrb[164].mxu1 %v7314_v23  ;;  %v7344_v23 = vcombine.low %v777_v38, %v785_v40 }
 0x198   : > { %5129 = vmatprep.mubr.bf16.mxu0 %v7329_v26  ;;  %5418 = vmatprep.mubr.bf16.mxu1 %v7331_v31  ;;  %v7924_v26 = vld [vmem:[%s9866_s1 + $0x2e8] sm:$0xff]   ;;  %v7346_v31 = vcombine.low %v778_v44, %v786_v45  ;;  %v810_v44 = vld [vmem:[%s8098_s28 + $0x698] sm:$0xff] }
 0x199   : > { %5911 = vmatpush1.bf16.msra.mxu1 %v7924_v26  ;;  %v818_v45 = vld [vmem:[%s8098_s28 + $0x6d8] sm:$0xff] }
 0x19a   : > { %v4593_v41 = vpop.f32.mrb[60].mxu0  ;;  %v4882_v46 = vpop.f32.mrb[60].mxu1  ;;  %5912 = vmatprep.subr.bf16.mxu1 %v9869_v1 }
 0x19b   : > { %v4595_v48 = vpop.f32.mrb[61].mxu0  ;;  %v8662_v52 = vadd.f32 %v4882_v46, %v4593_v41  ;;  %v4884_v55 = vpop.f32.mrb[61].mxu1 }
 0x19c   : > { %v4596_v56 = vpop.f32.mrb[62].mxu0  ;;  %v4885_v60 = vpop.f32.mrb[62].mxu1  ;;  %v7363_v48 = vcombine.high %v794_v10, %v802_v13  ;;  %v817_v55 = vld [vmem:[%s8098_s28 + $0x6d0] sm:$0xff]  ;;  %v826_v10 = vld [vmem:[%s8098_s28 + $0x718] sm:$0xff] }
 0x19d   : > { %v4598_v2 = vpop.f32.mrb[63].mxu0  ;;  %v8664_v9 = vadd.f32 %v4885_v60, %v4596_v56  ;;  %v4887_v14 = vpop.f32.mrb[63].mxu1  ;;  %v7360_v60 = vcombine.low %v793_v8, %v801_v15  ;;  %v7925_v8 = vld [vmem:[%s9866_s1 + $0x270] sm:$0xff]   ;;  %v834_v13 = vld [vmem:[%s8098_s28 + $0x758] sm:$0xff] }
 0x19e   : > { %v825_v15 = vld [vmem:[%s8098_s28 + $0x710] sm:$0xff]  ;;  %5624 = vmatpush1.bf16.msra.mxu0 %v7925_v8 }
 0x19f   : > { %5130 = vmatmul.mubr.bf16.gmra.mrb[168].mxu0 %v7328_v50  ;;  %5419 = vmatmul.mubr.bf16.gmra.mrb[168].mxu1 %v7330_v58  ;;  %v809_v50 = vld [vmem:[%s8098_s28 + $0x690] sm:$0xff] }
 0x1a0   : > { %5137 = vmatprep.mubr.bf16.mxu0 %v7345_v59  ;;  %5426 = vmatprep.mubr.bf16.mxu1 %v7347_v4 }
 0x1a1   : > { %5625 = vmatprep.subr.bf16.mxu0 %v9869_v1 }
 0x1a2   : > { %v4601_v17 = vpop.f32.mrb[64].mxu0  ;;  %v4890_v20 = vpop.f32.mrb[64].mxu1 }
 0x1a3   : > { %v4603_v22 = vpop.f32.mrb[65].mxu0  ;;  %v8677_v27 = vadd.f32 %v4890_v20, %v4601_v17  ;;  %v4892_v29 = vpop.f32.mrb[65].mxu1  ;;  %v7377_v17 = vcombine.high %v809_v50, %v817_v55 }
 0x1a4   : > { %v4604_v30 = vpop.f32.mrb[66].mxu0  ;;  %v4893_v41 = vpop.f32.mrb[66].mxu1 }
 0x1a5   : > { %v4606_v46 = vpop.f32.mrb[67].mxu0  ;;  %v8679_v38 = vadd.f32 %v4893_v41, %v4604_v30  ;;  %v4895_v40 = vpop.f32.mrb[67].mxu1  ;;  %v833_v30 = vld [vmem:[%s8098_s28 + $0x750] sm:$0xff] }
 0x1a6   : > { %v7376_v46 = vcombine.low %v809_v50, %v817_v55  ;;  %v7392_v8 = vcombine.low %v825_v15, %v833_v30 }
 0x1a7   : > { %5138 = vmatmul.mubr.bf16.gmra.mrb[172].mxu0 %v7344_v23  ;;  %5427 = vmatmul.mubr.bf16.gmra.mrb[172].mxu1 %v7346_v31  ;;  %v7379_v23 = vcombine.high %v810_v44, %v818_v45 }
 0x1a8   : > { %5145 = vmatprep.mubr.bf16.mxu0 %v7361_v35  ;;  %5434 = vmatprep.mubr.bf16.mxu1 %v7363_v48  ;;  %v7926_v48 = vld [vmem:[%s9866_s1 + $0x2f0] sm:$0xff]  }
 0x1a9   : > { %5913 = vmatpush1.bf16.msra.mxu1 %v7926_v48  ;;  %v7394_v48 = vcombine.low %v826_v10, %v834_v13 }
 0x1aa   : > { %v4609_v56 = vpop.f32.mrb[68].mxu0  ;;  %v4898_v58 = vpop.f32.mrb[68].mxu1  ;;  %5914 = vmatprep.subr.bf16.mxu1 %v9869_v1 }
 0x1ab   : > { %v4611_v59 = vpop.f32.mrb[69].mxu0  ;;  %v8686_v2 = vadd.f32 %v4898_v58, %v4609_v56  ;;  %v4900_v4 = vpop.f32.mrb[69].mxu1 }
 0x1ac   : > { %v4612_v14 = vpop.f32.mrb[70].mxu0  ;;  %v4901_v20 = vpop.f32.mrb[70].mxu1  ;;  %v7378_v59 = vcombine.low %v810_v44, %v818_v45  ;;  %v842_v44 = vld [vmem:[%s8098_s28 + $0x798] sm:$0xff] }
 0x1ad   : > { %v4614_v22 = vpop.f32.mrb[71].mxu0  ;;  %v8688_v26 = vadd.f32 %v4901_v20, %v4612_v14  ;;  %v4903_v29 = vpop.f32.mrb[71].mxu1  ;;  %v849_v20 = vld [vmem:[%s8098_s28 + $0x7d0] sm:$0xff]  ;;  %v850_v45 = vld [vmem:[%s8098_s28 + $0x7d8] sm:$0xff] }
 0x1af   : > { %5146 = vmatmul.mubr.bf16.gmra.mrb[176].mxu0 %v7360_v60  ;;  %5435 = vmatmul.mubr.bf16.gmra.mrb[176].mxu1 %v7362_v5  ;;  %v7393_v60 = vcombine.high %v825_v15, %v833_v30  ;;  %v7395_v5 = vcombine.high %v826_v10, %v834_v13  ;;  %v7927_v15 = vld [vmem:[%s9866_s1 + $0x278] sm:$0xff]   ;;  %v857_v30 = vld [vmem:[%s8098_s28 + $0x810] sm:$0xff] }
 0x1b0   : > { %5153 = vmatprep.mubr.bf16.mxu0 %v7377_v17  ;;  %5442 = vmatprep.mubr.bf16.mxu1 %v7379_v23  ;;  %v841_v17 = vld [vmem:[%s8098_s28 + $0x790] sm:$0xff]  ;;  %v858_v10 = vld [vmem:[%s8098_s28 + $0x818] sm:$0xff] }
 0x1b1   : > { %v866_v13 = vld [vmem:[%s8098_s28 + $0x858] sm:$0xff]  ;;  %5626 = vmatpush1.bf16.msra.mxu0 %v7927_v15  ;;  %v881_v15 = vld [vmem:[%s8098_s28 + $0x8d0] sm:$0xff] }
 0x1b2   : > { %v4617_v31 = vpop.f32.mrb[72].mxu0  ;;  %v4906_v35 = vpop.f32.mrb[72].mxu1  ;;  %6173 = vmatprep.subr.bf16.mxu0 %v9869_v1 }
 0x1b3   : > { %v4619_v41 = vpop.f32.mrb[73].mxu0  ;;  %v8701_v40 = vadd.f32 %v4906_v35, %v4617_v31  ;;  %v4908_v56 = vpop.f32.mrb[73].mxu1 }
 0x1b4   : > { %v4620_v58 = vpop.f32.mrb[74].mxu0  ;;  %v4909_v4 = vpop.f32.mrb[74].mxu1 }
 0x1b5   : > { %v4622_v14 = vpop.f32.mrb[75].mxu0  ;;  %v8703_v50 = vadd.f32 %v4909_v4, %v4620_v58  ;;  %v4911_v55 = vpop.f32.mrb[75].mxu1 }
 0x1b6   : > { %v865_v14 = vld [vmem:[%s8098_s28 + $0x850] sm:$0xff] }
 0x1b7   : > { %5154 = vmatmul.mubr.bf16.gmra.mrb[180].mxu0 %v7376_v46  ;;  %5443 = vmatmul.mubr.bf16.gmra.mrb[180].mxu1 %v7378_v59  ;;  %v7409_v46 = vcombine.high %v841_v17, %v849_v20  ;;  %v7411_v59 = vcombine.high %v842_v44, %v850_v45 }
 0x1b8   : > { %5161 = vmatprep.mubr.bf16.mxu0 %v7393_v60  ;;  %5450 = vmatprep.mubr.bf16.mxu1 %v7395_v5 }
 0x1ba   : > { %v4625_v22 = vpop.f32.mrb[76].mxu0  ;;  %v4914_v23 = vpop.f32.mrb[76].mxu1 }
 0x1bb   : > { %v4627_v29 = vpop.f32.mrb[77].mxu0  ;;  %v8710_v31 = vadd.f32 %v4914_v23, %v4625_v22  ;;  %v4916_v35 = vpop.f32.mrb[77].mxu1  ;;  %v7408_v23 = vcombine.low %v841_v17, %v849_v20 }
 0x1bc   : > { %v4628_v41 = vpop.f32.mrb[78].mxu0  ;;  %v4917_v56 = vpop.f32.mrb[78].mxu1  ;;  %v7928_v29 = vld [vmem:[%s9866_s1 + $0x2f8] sm:$0xff]  }
 0x1bd   : > { %v4630_v58 = vpop.f32.mrb[79].mxu0  ;;  %v8712_v60 = vadd.f32 %v4917_v56, %v4628_v41  ;;  %v4919_v4 = vpop.f32.mrb[79].mxu1  ;;  %5915 = vmatpush1.bf16.msra.mxu1 %v7928_v29 }
 0x1be   : > { %6462 = vmatprep.subr.bf16.mxu1 %v9869_v1  ;;  %v873_v4 = vld [vmem:[%s8098_s28 + $0x890] sm:$0xff] }
 0x1bf   : > { %5162 = vmatmul.mubr.bf16.gmra.mrb[184].mxu0 %v7392_v8  ;;  %5451 = vmatmul.mubr.bf16.gmra.mrb[184].mxu1 %v7394_v48  ;;  %v7410_v48 = vcombine.low %v842_v44, %v850_v45  ;;  %v874_v44 = vld [vmem:[%s8098_s28 + $0x898] sm:$0xff] }
 0x1c0   : > { %5169 = vmatprep.mubr.bf16.mxu0 %v7409_v46  ;;  %5458 = vmatprep.mubr.bf16.mxu1 %v7411_v59  ;;  %v7425_v46 = vcombine.high %v857_v30, %v865_v14  ;;  %v7427_v59 = vcombine.high %v858_v10, %v866_v13  ;;  %v882_v45 = vld [vmem:[%s8098_s28 + $0x8d8] sm:$0xff] }
 0x1c2   : > { %v4633_v5 = vpop.f32.mrb[80].mxu0  ;;  %v4922_v55 = vpop.f32.mrb[80].mxu1 }
 0x1c3   : > { %v4635_v22 = vpop.f32.mrb[81].mxu0  ;;  %v8725_v8 = vadd.f32 %v4922_v55, %v4633_v5  ;;  %v4924_v35 = vpop.f32.mrb[81].mxu1 }
 0x1c4   : > { %v4636_v41 = vpop.f32.mrb[82].mxu0  ;;  %v4925_v56 = vpop.f32.mrb[82].mxu1  ;;  %v7424_v35 = vcombine.low %v857_v30, %v865_v14  ;;  %v889_v30 = vld [vmem:[%s8098_s28 + $0x910] sm:$0xff] }
 0x1c5   : > { %v4638_v58 = vpop.f32.mrb[83].mxu0  ;;  %v8727_v17 = vadd.f32 %v4925_v56, %v4636_v41  ;;  %v4927_v20 = vpop.f32.mrb[83].mxu1  ;;  %v897_v14 = vld [vmem:[%s8098_s28 + $0x950] sm:$0xff] }
 0x1c7   : > { %9871 = vst [vmem:[#allocation3_spill] sm:$0xff] %v8727_v17  ;;  %5170 = vmatmul.mubr.bf16.gmra.mrb[188].mxu0 %v7408_v23  ;;  %5459 = vmatmul.mubr.bf16.gmra.mrb[188].mxu1 %v7410_v48  ;;  %v7426_v23 = vcombine.low %v858_v10, %v866_v13  ;;  %v7441_v48 = vcombine.high %v873_v4, %v881_v15 }
 0x1c8   : > { %5177 = vmatprep.mubr.bf16.mxu0 %v7425_v46  ;;  %5466 = vmatprep.mubr.bf16.mxu1 %v7427_v59  ;;  %v7443_v59 = vcombine.high %v874_v44, %v882_v45  ;;  %v7440_v10 = vcombine.low %v873_v4, %v881_v15  ;;  %v905_v4 = vld [vmem:[%s8098_s28 + $0x990] sm:$0xff] }
 0x1c9   : > { %v913_v15 = vld [vmem:[%s8098_s28 + $0x9d0] sm:$0xff] }
 0x1ca   : > { %v4641_v5 = vpop.f32.mrb[84].mxu0  ;;  %v4930_v55 = vpop.f32.mrb[84].mxu1 }
 0x1cb   : > { %v4643_v22 = vpop.f32.mrb[85].mxu0  ;;  %v8734_v29 = vadd.f32 %v4930_v55, %v4641_v5  ;;  %v4932_v41 = vpop.f32.mrb[85].mxu1  ;;  %v890_v55 = vld [vmem:[%s8098_s28 + $0x918] sm:$0xff] }
 0x1cc   : > { %v4644_v56 = vpop.f32.mrb[86].mxu0  ;;  %v4933_v46 = vpop.f32.mrb[86].mxu1  ;;  %v898_v22 = vld [vmem:[%s8098_s28 + $0x958] sm:$0xff] }
 0x1cd   : > { %9872 = vst [vmem:[#allocation4_spill] sm:$0xff] %v8734_v29  ;;  %v4646_v58 = vpop.f32.mrb[87].mxu0  ;;  %v8736_v20 = vadd.f32 %v4933_v46, %v4644_v56  ;;  %v4935_v1 = vpop.f32.mrb[87].mxu1  ;;  %v7459_v46 = vcombine.high %v890_v55, %v898_v22 }
 0x1ce   : > { %v7442_v1 = vcombine.low %v874_v44, %v882_v45  ;;  %v7456_v44 = vcombine.low %v889_v30, %v897_v14 }
 0x1cf   : > { %9873 = vst [vmem:[#allocation5_spill] sm:$0xff] %v8736_v20  ;;  %5178 = vmatmul.mubr.bf16.gmra.mrb[192].mxu0 %v7424_v35  ;;  %5467 = vmatmul.mubr.bf16.gmra.mrb[192].mxu1 %v7426_v23  ;;  %v7457_v35 = vcombine.high %v889_v30, %v897_v14  ;;  %v921_v30 = vld [vmem:[%s8098_s28 + $0xa10] sm:$0xff] }
 0x1d0   : > { %5185 = vmatprep.mubr.bf16.mxu0 %v7441_v48  ;;  %5474 = vmatprep.mubr.bf16.mxu1 %v7443_v59  ;;  %v929_v14 = vld [vmem:[%s8098_s28 + $0xa50] sm:$0xff] }
 0x1d2   : > { %v4649_v5 = vpop.f32.mrb[88].mxu0  ;;  %v4938_v41 = vpop.f32.mrb[88].mxu1 }
 0x1d3   : > { %v4651_v29 = vpop.f32.mrb[89].mxu0  ;;  %v8742_v13 = vadd.f32 %v4938_v41, %v4649_v5  ;;  %v4940_v58 = vpop.f32.mrb[89].mxu1  ;;  %v906_v5 = vld [vmem:[%s8098_s28 + $0x998] sm:$0xff] }
 0x1d4   : > { %v4652_v56 = vpop.f32.mrb[90].mxu0  ;;  %v4941_v23 = vpop.f32.mrb[90].mxu1  ;;  %v914_v41 = vld [vmem:[%s8098_s28 + $0x9d8] sm:$0xff] }
 0x1d5   : > { %9874 = vst [vmem:[#allocation6_spill] sm:$0xff] %v8742_v13  ;;  %v4654_v48 = vpop.f32.mrb[91].mxu0  ;;  %v8744_v59 = vadd.f32 %v4941_v23, %v4652_v56  ;;  %v4943_v20 = vpop.f32.mrb[91].mxu1  ;;  %v7475_v23 = vcombine.high %v906_v5, %v914_v41 }
 0x1d6   : > { %v7458_v20 = vcombine.low %v890_v55, %v898_v22  ;;  %v7472_v55 = vcombine.low %v905_v4, %v913_v15 }
 0x1d7   : > { %9875 = vst [vmem:[#allocation7_spill] sm:$0xff] %v8744_v59  ;;  %5186 = vmatmul.mubr.bf16.gmra.mrb[196].mxu0 %v7440_v10  ;;  %5475 = vmatmul.mubr.bf16.gmra.mrb[196].mxu1 %v7442_v1  ;;  %v7473_v10 = vcombine.high %v905_v4, %v913_v15  ;;  %v937_v4 = vld [vmem:[%s8098_s28 + $0xa90] sm:$0xff] }
 0x1d8   : > { %5193 = vmatprep.mubr.bf16.mxu0 %v7457_v35  ;;  %5482 = vmatprep.mubr.bf16.mxu1 %v7459_v46  ;;  %v945_v15 = vld [vmem:[%s8098_s28 + $0xad0] sm:$0xff] }
 0x1da   : > { %v4657_v29 = vpop.f32.mrb[92].mxu0  ;;  %v4946_v58 = vpop.f32.mrb[92].mxu1 }
 0x1db   : > { %v4659_v13 = vpop.f32.mrb[93].mxu0  ;;  %v8750_v45 = vadd.f32 %v4946_v58, %v4657_v29  ;;  %v4948_v48 = vpop.f32.mrb[93].mxu1  ;;  %v922_v29 = vld [vmem:[%s8098_s28 + $0xa18] sm:$0xff] }
 0x1dc   : > { %v4660_v56 = vpop.f32.mrb[94].mxu0  ;;  %v4949_v1 = vpop.f32.mrb[94].mxu1  ;;  %v930_v58 = vld [vmem:[%s8098_s28 + $0xa58] sm:$0xff] }
 0x1dd   : > { %9876 = vst [vmem:[#allocation8_spill] sm:$0xff] %v8750_v45  ;;  %v4662_v35 = vpop.f32.mrb[95].mxu0  ;;  %v8752_v46 = vadd.f32 %v4949_v1, %v4660_v56  ;;  %v4951_v59 = vpop.f32.mrb[95].mxu1  ;;  %v7491_v1 = vcombine.high %v922_v29, %v930_v58 }
 0x1de   : > { %v7474_v59 = vcombine.low %v906_v5, %v914_v41  ;;  %v7488_v5 = vcombine.low %v921_v30, %v929_v14 }
 0x1df   : > { %9877 = vst [vmem:[#allocation9_spill] sm:$0xff] %v8752_v46  ;;  %5194 = vmatmul.mubr.bf16.gmra.mrb[200].mxu0 %v7456_v44  ;;  %5483 = vmatmul.mubr.bf16.gmra.mrb[200].mxu1 %v7458_v20  ;;  %v7489_v44 = vcombine.high %v921_v30, %v929_v14  ;;  %v953_v30 = vld [vmem:[%s8098_s28 + $0xb10] sm:$0xff] }
 0x1e0   : > { %5201 = vmatprep.mubr.bf16.mxu0 %v7473_v10  ;;  %5490 = vmatprep.mubr.bf16.mxu1 %v7475_v23  ;;  %v961_v14 = vld [vmem:[%s8098_s28 + $0xb50] sm:$0xff] }
 0x1e2   : > { %v4665_v13 = vpop.f32.mrb[96].mxu0  ;;  %v4954_v48 = vpop.f32.mrb[96].mxu1 }
 0x1e3   : > { %v4667_v45 = vpop.f32.mrb[97].mxu0  ;;  %v8758_v22 = vadd.f32 %v4954_v48, %v4665_v13  ;;  %v4956_v35 = vpop.f32.mrb[97].mxu1  ;;  %v938_v13 = vld [vmem:[%s8098_s28 + $0xa98] sm:$0xff] }
 0x1e4   : > { %v4668_v56 = vpop.f32.mrb[98].mxu0  ;;  %v4957_v20 = vpop.f32.mrb[98].mxu1  ;;  %v946_v48 = vld [vmem:[%s8098_s28 + $0xad8] sm:$0xff] }
 0x1e5   : > { %9878 = vst [vmem:[#allocation10_spill] sm:$0xff] %v8758_v22  ;;  %v4670_v10 = vpop.f32.mrb[99].mxu0  ;;  %v8760_v23 = vadd.f32 %v4957_v20, %v4668_v56  ;;  %v4959_v46 = vpop.f32.mrb[99].mxu1  ;;  %v7507_v20 = vcombine.high %v938_v13, %v946_v48 }
 0x1e6   : > { %v7490_v46 = vcombine.low %v922_v29, %v930_v58  ;;  %v7504_v29 = vcombine.low %v937_v4, %v945_v15 }
 0x1e7   : > { %9879 = vst [vmem:[#allocation11_spill] sm:$0xff] %v8760_v23  ;;  %5202 = vmatmul.mubr.bf16.gmra.mrb[204].mxu0 %v7472_v55  ;;  %5491 = vmatmul.mubr.bf16.gmra.mrb[204].mxu1 %v7474_v59  ;;  %v7505_v55 = vcombine.high %v937_v4, %v945_v15  ;;  %v969_v4 = vld [vmem:[%s8098_s28 + $0xb90] sm:$0xff] }
 0x1e8   : > { %5209 = vmatprep.mubr.bf16.mxu0 %v7489_v44  ;;  %5498 = vmatprep.mubr.bf16.mxu1 %v7491_v1  ;;  %v977_v15 = vld [vmem:[%s8098_s28 + $0xbd0] sm:$0xff] }
 0x1ea   : > { %v4673_v45 = vpop.f32.mrb[100].mxu0  ;;  %v4962_v35 = vpop.f32.mrb[100].mxu1 }
 0x1eb   : > { %v4675_v22 = vpop.f32.mrb[101].mxu0  ;;  %v8766_v41 = vadd.f32 %v4962_v35, %v4673_v45  ;;  %v4964_v10 = vpop.f32.mrb[101].mxu1  ;;  %v954_v45 = vld [vmem:[%s8098_s28 + $0xb18] sm:$0xff] }
 0x1ec   : > { %v4676_v56 = vpop.f32.mrb[102].mxu0  ;;  %v4965_v59 = vpop.f32.mrb[102].mxu1  ;;  %v962_v35 = vld [vmem:[%s8098_s28 + $0xb58] sm:$0xff] }
 0x1ed   : > { %9880 = vst [vmem:[#allocation12_spill] sm:$0xff] %v8766_v41  ;;  %v4678_v44 = vpop.f32.mrb[103].mxu0  ;;  %v8768_v1 = vadd.f32 %v4965_v59, %v4676_v56  ;;  %v4967_v23 = vpop.f32.mrb[103].mxu1  ;;  %v7523_v59 = vcombine.high %v954_v45, %v962_v35 }
 0x1ee   : > { %v7506_v23 = vcombine.low %v938_v13, %v946_v48  ;;  %v7520_v13 = vcombine.low %v953_v30, %v961_v14 }
 0x1ef   : > { %9881 = vst [vmem:[#allocation13_spill] sm:$0xff] %v8768_v1  ;;  %5210 = vmatmul.mubr.bf16.gmra.mrb[208].mxu0 %v7488_v5  ;;  %5499 = vmatmul.mubr.bf16.gmra.mrb[208].mxu1 %v7490_v46  ;;  %v7521_v5 = vcombine.high %v953_v30, %v961_v14  ;;  %v985_v30 = vld [vmem:[%s8098_s28 + $0xc10] sm:$0xff] }
 0x1f0   : > { %5217 = vmatprep.mubr.bf16.mxu0 %v7505_v55  ;;  %5506 = vmatprep.mubr.bf16.mxu1 %v7507_v20  ;;  %v993_v14 = vld [vmem:[%s8098_s28 + $0xc50] sm:$0xff] }
 0x1f2   : > { %v4681_v22 = vpop.f32.mrb[104].mxu0  ;;  %v4970_v10 = vpop.f32.mrb[104].mxu1 }
 0x1f3   : > { %v4683_v41 = vpop.f32.mrb[105].mxu0  ;;  %v8774_v58 = vadd.f32 %v4970_v10, %v4681_v22  ;;  %v4972_v44 = vpop.f32.mrb[105].mxu1  ;;  %v970_v22 = vld [vmem:[%s8098_s28 + $0xb98] sm:$0xff] }
 0x1f4   : > { %v4684_v56 = vpop.f32.mrb[106].mxu0  ;;  %v4973_v46 = vpop.f32.mrb[106].mxu1  ;;  %v978_v10 = vld [vmem:[%s8098_s28 + $0xbd8] sm:$0xff] }
 0x1f5   : > { %9882 = vst [vmem:[#allocation14_spill] sm:$0xff] %v8774_v58  ;;  %v4686_v55 = vpop.f32.mrb[107].mxu0  ;;  %v8776_v20 = vadd.f32 %v4973_v46, %v4684_v56  ;;  %v4975_v1 = vpop.f32.mrb[107].mxu1  ;;  %v7539_v46 = vcombine.high %v970_v22, %v978_v10 }
 0x1f6   : > { %v7522_v1 = vcombine.low %v954_v45, %v962_v35  ;;  %v7536_v45 = vcombine.low %v969_v4, %v977_v15 }
 0x1f7   : > { %9883 = vst [vmem:[#allocation15_spill] sm:$0xff] %v8776_v20  ;;  %5218 = vmatmul.mubr.bf16.gmra.mrb[212].mxu0 %v7504_v29  ;;  %5507 = vmatmul.mubr.bf16.gmra.mrb[212].mxu1 %v7506_v23  ;;  %v7537_v29 = vcombine.high %v969_v4, %v977_v15  ;;  %v1001_v4 = vld [vmem:[%s8098_s28 + $0xc90] sm:$0xff] }
 0x1f8   : > { %5225 = vmatprep.mubr.bf16.mxu0 %v7521_v5  ;;  %5514 = vmatprep.mubr.bf16.mxu1 %v7523_v59  ;;  %v1009_v15 = vld [vmem:[%s8098_s28 + $0xcd0] sm:$0xff] }
 0x1fa   : > { %v4689_v41 = vpop.f32.mrb[108].mxu0  ;;  %v4978_v44 = vpop.f32.mrb[108].mxu1 }
 0x1fb   : > { %v4691_v58 = vpop.f32.mrb[109].mxu0  ;;  %v8782_v48 = vadd.f32 %v4978_v44, %v4689_v41  ;;  %v4980_v55 = vpop.f32.mrb[109].mxu1  ;;  %v986_v41 = vld [vmem:[%s8098_s28 + $0xc18] sm:$0xff] }
 0x1fc   : > { %v4692_v56 = vpop.f32.mrb[110].mxu0  ;;  %v4981_v23 = vpop.f32.mrb[110].mxu1  ;;  %v994_v44 = vld [vmem:[%s8098_s28 + $0xc58] sm:$0xff] }
 0x1fd   : > { %9884 = vst [vmem:[#allocation16_spill] sm:$0xff] %v8782_v48  ;;  %v4694_v5 = vpop.f32.mrb[111].mxu0  ;;  %v8784_v59 = vadd.f32 %v4981_v23, %v4692_v56  ;;  %v4983_v20 = vpop.f32.mrb[111].mxu1  ;;  %v7555_v23 = vcombine.high %v986_v41, %v994_v44 }
 0x1fe   : > { %v7538_v20 = vcombine.low %v970_v22, %v978_v10  ;;  %v7552_v22 = vcombine.low %v985_v30, %v993_v14 }
 0x1ff   : > { %9885 = vst [vmem:[#allocation17_spill] sm:$0xff] %v8784_v59  ;;  %5226 = vmatmul.mubr.bf16.gmra.mrb[216].mxu0 %v7520_v13  ;;  %5515 = vmatmul.mubr.bf16.gmra.mrb[216].mxu1 %v7522_v1  ;;  %v7553_v13 = vcombine.high %v985_v30, %v993_v14  ;;  %v1017_v30 = vld [vmem:[%s8098_s28 + $0xd10] sm:$0xff] }
 0x200   : > { %5233 = vmatprep.mubr.bf16.mxu0 %v7537_v29  ;;  %5522 = vmatprep.mubr.bf16.mxu1 %v7539_v46  ;;  %v1025_v14 = vld [vmem:[%s8098_s28 + $0xd50] sm:$0xff] }
 0x202   : > { %v4697_v58 = vpop.f32.mrb[112].mxu0  ;;  %v4986_v55 = vpop.f32.mrb[112].mxu1 }
 0x203   : > { %v4699_v48 = vpop.f32.mrb[113].mxu0  ;;  %v8790_v35 = vadd.f32 %v4986_v55, %v4697_v58  ;;  %v4988_v5 = vpop.f32.mrb[113].mxu1  ;;  %v1002_v58 = vld [vmem:[%s8098_s28 + $0xc98] sm:$0xff] }
 0x204   : > { %v4700_v56 = vpop.f32.mrb[114].mxu0  ;;  %v4989_v1 = vpop.f32.mrb[114].mxu1  ;;  %v1010_v55 = vld [vmem:[%s8098_s28 + $0xcd8] sm:$0xff] }
 0x205   : > { %9886 = vst [vmem:[#allocation18_spill] sm:$0xff] %v8790_v35  ;;  %v4702_v29 = vpop.f32.mrb[115].mxu0  ;;  %v8792_v46 = vadd.f32 %v4989_v1, %v4700_v56  ;;  %v4991_v59 = vpop.f32.mrb[115].mxu1  ;;  %v7571_v1 = vcombine.high %v1002_v58, %v1010_v55 }
 0x206   : > { %v7554_v59 = vcombine.low %v986_v41, %v994_v44  ;;  %v7568_v41 = vcombine.low %v1001_v4, %v1009_v15 }
 0x207   : > { %9887 = vst [vmem:[#allocation19_spill] sm:$0xff] %v8792_v46  ;;  %5234 = vmatmul.mubr.bf16.gmra.mrb[220].mxu0 %v7536_v45  ;;  %5523 = vmatmul.mubr.bf16.gmra.mrb[220].mxu1 %v7538_v20  ;;  %v7569_v45 = vcombine.high %v1001_v4, %v1009_v15  ;;  %v1033_v4 = vld [vmem:[%s8098_s28 + $0xd90] sm:$0xff] }
 0x208   : > { %5241 = vmatprep.mubr.bf16.mxu0 %v7553_v13  ;;  %5530 = vmatprep.mubr.bf16.mxu1 %v7555_v23  ;;  %v1041_v15 = vld [vmem:[%s8098_s28 + $0xdd0] sm:$0xff] }
 0x20a   : > { %v4705_v48 = vpop.f32.mrb[116].mxu0  ;;  %v4994_v5 = vpop.f32.mrb[116].mxu1 }
 0x20b   : > { %v4707_v35 = vpop.f32.mrb[117].mxu0  ;;  %v8798_v10 = vadd.f32 %v4994_v5, %v4705_v48  ;;  %v4996_v29 = vpop.f32.mrb[117].mxu1  ;;  %v1018_v48 = vld [vmem:[%s8098_s28 + $0xd18] sm:$0xff] }
 0x20c   : > { %v4708_v56 = vpop.f32.mrb[118].mxu0  ;;  %v4997_v20 = vpop.f32.mrb[118].mxu1  ;;  %v1026_v5 = vld [vmem:[%s8098_s28 + $0xd58] sm:$0xff] }
 0x20d   : > { %9888 = vst [vmem:[#allocation20_spill] sm:$0xff] %v8798_v10  ;;  %v4710_v13 = vpop.f32.mrb[119].mxu0  ;;  %v8800_v23 = vadd.f32 %v4997_v20, %v4708_v56  ;;  %v4999_v46 = vpop.f32.mrb[119].mxu1  ;;  %v7587_v20 = vcombine.high %v1018_v48, %v1026_v5 }
 0x20e   : > { %v7570_v46 = vcombine.low %v1002_v58, %v1010_v55  ;;  %v7584_v58 = vcombine.low %v1017_v30, %v1025_v14 }
 0x20f   : > { %9889 = vst [vmem:[#allocation21_spill] sm:$0xff] %v8800_v23  ;;  %5242 = vmatmul.mubr.bf16.gmra.mrb[224].mxu0 %v7552_v22  ;;  %5531 = vmatmul.mubr.bf16.gmra.mrb[224].mxu1 %v7554_v59  ;;  %v7585_v22 = vcombine.high %v1017_v30, %v1025_v14  ;;  %v1049_v30 = vld [vmem:[%s8098_s28 + $0xe10] sm:$0xff] }
 0x210   : > { %5249 = vmatprep.mubr.bf16.mxu0 %v7569_v45  ;;  %5538 = vmatprep.mubr.bf16.mxu1 %v7571_v1  ;;  %v1057_v14 = vld [vmem:[%s8098_s28 + $0xe50] sm:$0xff] }
 0x212   : > { %v4713_v35 = vpop.f32.mrb[120].mxu0  ;;  %v5002_v29 = vpop.f32.mrb[120].mxu1 }
 0x213   : > { %v4715_v10 = vpop.f32.mrb[121].mxu0  ;;  %v8806_v44 = vadd.f32 %v5002_v29, %v4713_v35  ;;  %v5004_v13 = vpop.f32.mrb[121].mxu1  ;;  %v1034_v35 = vld [vmem:[%s8098_s28 + $0xd98] sm:$0xff] }
 0x214   : > { %v4716_v56 = vpop.f32.mrb[122].mxu0  ;;  %v5005_v59 = vpop.f32.mrb[122].mxu1  ;;  %v1042_v29 = vld [vmem:[%s8098_s28 + $0xdd8] sm:$0xff] }
 0x215   : > { %9890 = vst [vmem:[#allocation22_spill] sm:$0xff] %v8806_v44  ;;  %v4718_v45 = vpop.f32.mrb[123].mxu0  ;;  %v8808_v1 = vadd.f32 %v5005_v59, %v4716_v56  ;;  %v5007_v23 = vpop.f32.mrb[123].mxu1  ;;  %v7603_v59 = vcombine.high %v1034_v35, %v1042_v29 }
 0x216   : > { %v7586_v23 = vcombine.low %v1018_v48, %v1026_v5  ;;  %v7600_v5 = vcombine.low %v1033_v4, %v1041_v15 }
 0x217   : > { %9891 = vst [vmem:[#allocation23_spill] sm:$0xff] %v8808_v1  ;;  %5250 = vmatmul.mubr.bf16.gmra.mrb[228].mxu0 %v7568_v41  ;;  %5539 = vmatmul.mubr.bf16.gmra.mrb[228].mxu1 %v7570_v46  ;;  %v7601_v41 = vcombine.high %v1033_v4, %v1041_v15  ;;  %v1065_v4 = vld [vmem:[%s8098_s28 + $0xe90] sm:$0xff] }
 0x218   : > { %5257 = vmatprep.mubr.bf16.mxu0 %v7585_v22  ;;  %5546 = vmatprep.mubr.bf16.mxu1 %v7587_v20  ;;  %v1073_v15 = vld [vmem:[%s8098_s28 + $0xed0] sm:$0xff] }
 0x21a   : > { %v4721_v10 = vpop.f32.mrb[124].mxu0  ;;  %v5010_v13 = vpop.f32.mrb[124].mxu1 }
 0x21b   : > { %v4723_v44 = vpop.f32.mrb[125].mxu0  ;;  %v8814_v55 = vadd.f32 %v5010_v13, %v4721_v10  ;;  %v5012_v45 = vpop.f32.mrb[125].mxu1  ;;  %v1050_v10 = vld [vmem:[%s8098_s28 + $0xe18] sm:$0xff] }
 0x21c   : > { %v4724_v56 = vpop.f32.mrb[126].mxu0  ;;  %v5013_v46 = vpop.f32.mrb[126].mxu1  ;;  %v1058_v13 = vld [vmem:[%s8098_s28 + $0xe58] sm:$0xff] }
 0x21d   : > { %9892 = vst [vmem:[#allocation24_spill] sm:$0xff] %v8814_v55  ;;  %v4726_v22 = vpop.f32.mrb[127].mxu0  ;;  %v8816_v20 = vadd.f32 %v5013_v46, %v4724_v56  ;;  %v5015_v1 = vpop.f32.mrb[127].mxu1  ;;  %v7602_v46 = vcombine.low %v1034_v35, %v1042_v29  ;;  %v1066_v29 = vld [vmem:[%s8098_s28 + $0xe98] sm:$0xff] }
 0x21e   : > { %v7617_v1 = vcombine.high %v1049_v30, %v1057_v14 }
 0x21f   : > { %9893 = vst [vmem:[#allocation25_spill] sm:$0xff] %v8816_v20  ;;  %5258 = vmatmul.mubr.bf16.gmra.mrb[232].mxu0 %v7584_v58  ;;  %5547 = vmatmul.mubr.bf16.gmra.mrb[232].mxu1 %v7586_v23 }
 0x220   : > { %5265 = vmatprep.mubr.bf16.mxu0 %v7601_v41  ;;  %5554 = vmatprep.mubr.bf16.mxu1 %v7603_v59  ;;  %v7619_v59 = vcombine.high %v1050_v10, %v1058_v13 }
 0x222   : > { %v5051_v44 = vpop.f32.mrb[128].mxu0  ;;  %v5340_v55 = vpop.f32.mrb[128].mxu1 }
 0x223   : > { %v5052_v45 = vadd.f32 %v5051_v44, %v8426_v43  ;;  %v5053_v48 = vpop.f32.mrb[129].mxu0  ;;  %v5342_v22 = vpop.f32.mrb[129].mxu1  ;;  %v1074_v44 = vld [vmem:[%s8098_s28 + $0xed8] sm:$0xff] }
 0x224   : > { %v5054_v56 = vpop.f32.mrb[130].mxu0  ;;  %v5343_v23 = vpop.f32.mrb[130].mxu1 }
 0x225   : > { %v5055_v58 = vadd.f32 %v5054_v56, %v8428_v51  ;;  %v5056_v41 = vpop.f32.mrb[131].mxu0  ;;  %v8824_v20 = vadd.f32 %v5340_v55, %v5052_v45  ;;  %v5345_v17 = vpop.f32.mrb[131].mxu1  ;;  %v7616_v56 = vcombine.low %v1049_v30, %v1057_v14  ;;  %v7618_v45 = vcombine.low %v1050_v10, %v1058_v13  ;;  %v1081_v30 = vld [vmem:[%s8098_s28 + $0xf10] sm:$0xff]  ;;  %v1082_v13 = vld [vmem:[%s8098_s28 + $0xf18] sm:$0xff] }
 0x226   : > { %v1089_v14 = vld [vmem:[%s8098_s28 + $0xf50] sm:$0xff] }
 0x227   : > { %5266 = vmatmul.mubr.bf16.gmra.mrb[236].mxu0 %v7600_v5  ;;  %v8826_v43 = vadd.f32 %v5343_v23, %v5055_v58  ;;  %5555 = vmatmul.mubr.bf16.gmra.mrb[236].mxu1 %v7602_v46  ;;  %v7633_v5 = vcombine.high %v1065_v4, %v1073_v15  ;;  %v7635_v23 = vcombine.high %v1066_v29, %v1074_v44 }
 0x228   : > { %5273 = vmatprep.mubr.bf16.mxu0 %v7617_v1  ;;  %5562 = vmatprep.mubr.bf16.mxu1 %v7619_v59 }
 0x22a   : > { %v5059_v35 = vpop.f32.mrb[132].mxu0  ;;  %v5348_v51 = vpop.f32.mrb[132].mxu1 }
 0x22b   : > { %v5060_v48 = vadd.f32 %v5059_v35, %v8434_v61  ;;  %v5061_v22 = vpop.f32.mrb[133].mxu0  ;;  %v5350_v55 = vpop.f32.mrb[133].mxu1  ;;  %v1090_v35 = vld [vmem:[%s8098_s28 + $0xf58] sm:$0xff] }
 0x22c   : > { %v5062_v17 = vpop.f32.mrb[134].mxu0  ;;  %v5351_v1 = vpop.f32.mrb[134].mxu1 }
 0x22d   : > { %v5063_v46 = vadd.f32 %v5062_v17, %v8436_v6  ;;  %v5064_v58 = vpop.f32.mrb[135].mxu0  ;;  %v8834_v41 = vadd.f32 %v5348_v51, %v5060_v48  ;;  %v5353_v59 = vpop.f32.mrb[135].mxu1  ;;  %v7632_v17 = vcombine.low %v1065_v4, %v1073_v15  ;;  %v1097_v4 = vld [vmem:[%s8098_s28 + $0xf90] sm:$0xff] }
 0x22e   : > { %v7651_v58 = vcombine.high %v1082_v13, %v1090_v35  ;;  %v1105_v15 = vld [vmem:[%s8098_s28 + $0xfd0] sm:$0xff] }
 0x22f   : > { %5274 = vmatmul.mubr.bf16.gmra.mrb[240].mxu0 %v7616_v56  ;;  %v8836_v61 = vadd.f32 %v5351_v1, %v5063_v46  ;;  %5563 = vmatmul.mubr.bf16.gmra.mrb[240].mxu1 %v7618_v45  ;;  %v7634_v56 = vcombine.low %v1066_v29, %v1074_v44  ;;  %v7649_v46 = vcombine.high %v1081_v30, %v1089_v14  ;;  %v1098_v44 = vld [vmem:[%s8098_s28 + $0xf98] sm:$0xff] }
 0x230   : > { %5281 = vmatprep.mubr.bf16.mxu0 %v7633_v5  ;;  %5570 = vmatprep.mubr.bf16.mxu1 %v7635_v23 }
 0x232   : > { %v5067_v10 = vpop.f32.mrb[136].mxu0  ;;  %v5356_v6 = vpop.f32.mrb[136].mxu1 }
 0x233   : > { %v5068_v22 = vadd.f32 %v5067_v10, %v8442_v16  ;;  %v5069_v55 = vpop.f32.mrb[137].mxu0  ;;  %v5358_v48 = vpop.f32.mrb[137].mxu1  ;;  %v1106_v10 = vld [vmem:[%s8098_s28 + $0xfd8] sm:$0xff] }
 0x234   : > { %v5070_v51 = vpop.f32.mrb[138].mxu0  ;;  %v5359_v5 = vpop.f32.mrb[138].mxu1 }
 0x235   : > { %v5071_v45 = vadd.f32 %v5070_v51, %v8444_v24  ;;  %v5072_v1 = vpop.f32.mrb[139].mxu0  ;;  %v8844_v23 = vadd.f32 %v5356_v6, %v5068_v22  ;;  %v5361_v59 = vpop.f32.mrb[139].mxu1  ;;  %v7648_v51 = vcombine.low %v1081_v30, %v1089_v14  ;;  %v603_v30 = vld [vmem:[%s8098_s28 + $0x20] sm:$0xff] }
 0x236   : > { %v7667_v1 = vcombine.high %v1098_v44, %v1106_v10  ;;  %v611_v14 = vld [vmem:[%s8098_s28 + $0x60] sm:$0xff] }
 0x237   : > { %5282 = vmatmul.mubr.bf16.gmra.mrb[244].mxu0 %v7632_v17  ;;  %v8846_v16 = vadd.f32 %v5359_v5, %v5071_v45  ;;  %5571 = vmatmul.mubr.bf16.gmra.mrb[244].mxu1 %v7634_v56  ;;  %v7650_v17 = vcombine.low %v1082_v13, %v1090_v35  ;;  %v7665_v45 = vcombine.high %v1097_v4, %v1105_v15  ;;  %v604_v35 = vld [vmem:[%s8098_s28 + $0x28] sm:$0xff] }
 0x238   : > { %5289 = vmatprep.mubr.bf16.mxu0 %v7649_v46  ;;  %5578 = vmatprep.mubr.bf16.mxu1 %v7651_v58 }
 0x23a   : > { %v5075_v29 = vpop.f32.mrb[140].mxu0  ;;  %v5364_v24 = vpop.f32.mrb[140].mxu1 }
 0x23b   : > { %v5076_v55 = vadd.f32 %v5075_v29, %v8450_v34  ;;  %v5077_v48 = vpop.f32.mrb[141].mxu0  ;;  %v5366_v22 = vpop.f32.mrb[141].mxu1  ;;  %v612_v29 = vld [vmem:[%s8098_s28 + $0x68] sm:$0xff] }
 0x23c   : > { %v5078_v6 = vpop.f32.mrb[142].mxu0  ;;  %v5367_v46 = vpop.f32.mrb[142].mxu1 }
 0x23d   : > { %v5079_v56 = vadd.f32 %v5078_v6, %v8452_v42  ;;  %v5080_v5 = vpop.f32.mrb[143].mxu0  ;;  %v8854_v58 = vadd.f32 %v5364_v24, %v5076_v55  ;;  %v5369_v59 = vpop.f32.mrb[143].mxu1  ;;  %v7664_v6 = vcombine.low %v1097_v4, %v1105_v15  ;;  %v7666_v24 = vcombine.low %v1098_v44, %v1106_v10  ;;  %v619_v15 = vld [vmem:[%s8098_s28 + $0xa0] sm:$0xff] }
 0x23e   : > { %v627_v44 = vld [vmem:[%s8098_s28 + $0xe0] sm:$0xff] }
 0x23f   : > { %5290 = vmatmul.mubr.bf16.gmra.mrb[248].mxu0 %v7648_v51  ;;  %v8856_v34 = vadd.f32 %v5367_v46, %v5079_v56  ;;  %5579 = vmatmul.mubr.bf16.gmra.mrb[248].mxu1 %v7650_v17  ;;  %v7173_v51 = vcombine.high %v603_v30, %v611_v14  ;;  %v7175_v46 = vcombine.high %v604_v35, %v612_v29 }
 0x240   : > { %5297 = vmatprep.mubr.bf16.mxu0 %v7665_v45  ;;  %5586 = vmatprep.mubr.bf16.mxu1 %v7667_v1 }
 0x242   : > { %v5083_v13 = vpop.f32.mrb[144].mxu0  ;;  %v5372_v42 = vpop.f32.mrb[144].mxu1 }
 0x243   : > { %v5084_v48 = vadd.f32 %v5083_v13, %v8458_v54  ;;  %v5085_v22 = vpop.f32.mrb[145].mxu0  ;;  %v5374_v5 = vpop.f32.mrb[145].mxu1 }
 0x244   : > { %v5086_v55 = vpop.f32.mrb[146].mxu0  ;;  %v5375_v45 = vpop.f32.mrb[146].mxu1  ;;  %v7172_v22 = vcombine.low %v603_v30, %v611_v14  ;;  %v620_v5 = vld [vmem:[%s8098_s28 + $0xa8] sm:$0xff]  ;;  %v7189_v30 = vcombine.high %v619_v15, %v627_v44 }
 0x245   : > { %v5087_v17 = vadd.f32 %v5086_v55, %v8460_v63  ;;  %v5088_v56 = vpop.f32.mrb[147].mxu0  ;;  %v8864_v1 = vadd.f32 %v5372_v42, %v5084_v48  ;;  %v5377_v59 = vpop.f32.mrb[147].mxu1  ;;  %v628_v55 = vld [vmem:[%s8098_s28 + $0xe8] sm:$0xff]  ;;  %v7174_v42 = vcombine.low %v604_v35, %v612_v29 }
 0x246   : > { %v7191_v29 = vcombine.high %v620_v5, %v628_v55  ;;  %v8891_v59 = vld [vmem:[%s8098_s28 + $0x160] sm:$0xff] }
 0x247   : > { %5298 = vmatmul.mubr.bf16.gmra.mrb[252].mxu0 %v7664_v6  ;;  %v8866_v54 = vadd.f32 %v5375_v45, %v5087_v17  ;;  %5587 = vmatmul.mubr.bf16.gmra.mrb[252].mxu1 %v7666_v24  ;;  %v7929_v6 = vld [vmem:[%s9866_s1 + $0x300] sm:$0xff]  }
 0x248   : > { %5627 = vmatprep.mubr.bf16.mxu0 %v7173_v51  ;;  %5916 = vmatprep.mubr.bf16.mxu1 %v7175_v46  ;;  %v8888_v46 = vld [vmem:[%s8098_s28 + $0x120] sm:$0xff] }
 0x24a   : > { %v5091_v4 = vpop.f32.mrb[148].mxu0  ;;  %v5380_v63 = vpop.f32.mrb[148].mxu1 }
 0x24b   : > { %v5092_v10 = vadd.f32 %v5091_v4, %v8466_v11  ;;  %v5093_v13 = vpop.f32.mrb[149].mxu0  ;;  %v5382_v56 = vpop.f32.mrb[149].mxu1  ;;  %v7930_v11 = vld [vmem:[%s9866_s1 + $0x380] sm:$0xff]   ;;  %v7932_v4 = vld [vmem:[%s9866_s1 + $0x388] sm:$0xff]  }
 0x24c   : > { %v5094_v48 = vpop.f32.mrb[150].mxu0  ;;  %v5383_v51 = vpop.f32.mrb[150].mxu1  ;;  %v644_v13 = vld [vmem:[%s8098_s28 + $0x168] sm:$0xff] }
 0x24d   : > { %v5095_v24 = vadd.f32 %v5094_v48, %v8474_v21  ;;  %v5096_v17 = vpop.f32.mrb[151].mxu0  ;;  %v8880_v14 = vadd.f32 %v5380_v63, %v5092_v10  ;;  %v5385_v35 = vpop.f32.mrb[151].mxu1  ;;  %v7931_v21 = vld [vmem:[%s9866_s1 + $0x308] sm:$0xff]  }
 0x24e   : > { %v636_v63 = vld [vmem:[%s8098_s28 + $0x128] sm:$0xff]  ;;  %v7190_v17 = vcombine.low %v620_v5, %v628_v55  ;;  %v8917_v55 = vld [vmem:[%s8098_s28 + $0x1a0] sm:$0xff] }
 0x24f   : > { %5628 = vmatmul.mubr.bf16.vlgmr.msra.gmra.mrb[0].mxu0 %v7172_v22  ;;  %v8882_v45 = vadd.f32 %v5383_v51, %v5095_v24  ;;  %5917 = vmatmul.mubr.bf16.vlgmr.msra.gmra.mrb[0].mxu1 %v7174_v42  ;;  %v9895_v22 = vmov 0  }
 0x250   : > { %6174 = vmatpush1.bf16.msra.mxu0 %v7929_v6  ;;  %6463 = vmatpush1.bf16.msra.mxu1 %v7930_v11  ;;  %v7188_v6 = vcombine.low %v619_v15, %v627_v44  ;;  %v7205_v11 = vcombine.high %v8888_v46, %v8891_v59 }
 0x251   : > { %9894 = vst [vmem:[#allocation26_spill] sm:$0xff] %v8882_v45  ;;  %5635 = vmatprep.mubr.bf16.mxu0 %v7189_v30  ;;  %5924 = vmatprep.mubr.bf16.mxu1 %v7191_v29  ;;  %v7207_v45 = vcombine.high %v636_v63, %v644_v13 }
 0x252   : > { %v5099_v10 = vpop.f32.mrb[152].mxu0  ;;  %6175 = vmatprep.subr.bf16.mxu0 %v9895_v22  ;;  %v5388_v48 = vpop.f32.mrb[152].mxu1  ;;  %6464 = vmatprep.subr.bf16.mxu1 %v9895_v22 }
 0x253   : > { %v5100_v56 = vadd.f32 %v5099_v10, %v8488_v36  ;;  %v5101_v42 = vpop.f32.mrb[153].mxu0  ;;  %v5390_v24 = vpop.f32.mrb[153].mxu1  ;;  %v7933_v36 = vld [vmem:[%s9866_s1 + $0x310] sm:$0xff]  }
 0x254   : > { %v5102_v51 = vpop.f32.mrb[154].mxu0  ;;  %6176 = vmatpush1.bf16.msra.mxu0 %v7931_v21  ;;  %v5391_v35 = vpop.f32.mrb[154].mxu1  ;;  %6465 = vmatpush1.bf16.msra.mxu1 %v7932_v4  ;;  %v8920_v21 = vld [vmem:[%s8098_s28 + $0x1e0] sm:$0xff]  ;;  %v7935_v4 = vld [vmem:[%s9866_s1 + $0x318] sm:$0xff]  }
 0x255   : > { %v5103_v30 = vadd.f32 %v5102_v51, %v8494_v47  ;;  %v5104_v29 = vpop.f32.mrb[155].mxu0  ;;  %6177 = vmatprep.subr.bf16.mxu0 %v9895_v22  ;;  %v8908_v15 = vadd.f32 %v5388_v48, %v5100_v56  ;;  %v5393_v44 = vpop.f32.mrb[155].mxu1  ;;  %6466 = vmatprep.subr.bf16.mxu1 %v9895_v22  ;;  %v7934_v47 = vld [vmem:[%s9866_s1 + $0x390] sm:$0xff]   ;;  %v8926_v56 = vld [vmem:[%s8098_s28 + $0x1a8] sm:$0xff]  ;;  %v7204_v51 = vcombine.low %v8888_v46, %v8891_v59  ;;  %v7937_v46 = vld [vmem:[%s9866_s1 + $0x320] sm:$0xff]  }
 0x256   : > { %v8929_v48 = vld [vmem:[%s8098_s28 + $0x1e8] sm:$0xff] }
 0x257   : > { %5636 = vmatmul.mubr.bf16.gmra.mrb[4].mxu0 %v7188_v6  ;;  %v8914_v5 = vadd.f32 %v5391_v35, %v5103_v30  ;;  %5925 = vmatmul.mubr.bf16.gmra.mrb[4].mxu1 %v7190_v17  ;;  %v7206_v30 = vcombine.low %v636_v63, %v644_v13  ;;  %v7221_v35 = vcombine.high %v8917_v55, %v8920_v21 }
 0x258   : > { %5643 = vmatprep.mubr.bf16.mxu0 %v7205_v11  ;;  %5932 = vmatprep.mubr.bf16.mxu1 %v7207_v45  ;;  %v7936_v45 = vld [vmem:[%s9866_s1 + $0x398] sm:$0xff]  }
 0x259   : > { %6178 = vmatpush1.bf16.msra.mxu0 %v7933_v36  ;;  %6467 = vmatpush1.bf16.msra.mxu1 %v7934_v47  ;;  %v8957_v47 = vld [vmem:[%s8098_s28 + $0x220] sm:$0xff] }
 0x25a   : > { %v5107_v10 = vpop.f32.mrb[156].mxu0  ;;  %6179 = vmatprep.subr.bf16.mxu0 %v9895_v22  ;;  %v5396_v6 = vpop.f32.mrb[156].mxu1  ;;  %6468 = vmatprep.subr.bf16.mxu1 %v9895_v22 }
 0x25b   : > { %v5108_v42 = vadd.f32 %v5107_v10, %v8514_v0  ;;  %v5109_v24 = vpop.f32.mrb[157].mxu0  ;;  %v5398_v17 = vpop.f32.mrb[157].mxu1  ;;  %v7223_v0 = vcombine.high %v8926_v56, %v8929_v48  ;;  %v7939_v10 = vld [vmem:[%s9866_s1 + $0x328] sm:$0xff]  }
 0x25c   : > { %v5110_v11 = vpop.f32.mrb[158].mxu0  ;;  %v5399_v36 = vpop.f32.mrb[158].mxu1  ;;  %v7940_v24 = vld [vmem:[%s9866_s1 + $0x3a8] sm:$0xff]  }
 0x25d   : > { %v5111_v29 = vadd.f32 %v5110_v11, %v8520_v12  ;;  %v5112_v44 = vpop.f32.mrb[159].mxu0  ;;  %6180 = vmatpush1.bf16.msra.mxu0 %v7935_v4  ;;  %v8947_v59 = vadd.f32 %v5396_v6, %v5108_v42  ;;  %v5401_v63 = vpop.f32.mrb[159].mxu1  ;;  %6469 = vmatpush1.bf16.msra.mxu1 %v7936_v45  ;;  %v7938_v12 = vld [vmem:[%s9866_s1 + $0x3a0] sm:$0xff]   ;;  %v8966_v42 = vld [vmem:[%s8098_s28 + $0x228] sm:$0xff] }
 0x25e   : > { %6181 = vmatprep.subr.bf16.mxu0 %v9895_v22  ;;  %6470 = vmatprep.subr.bf16.mxu1 %v9895_v22  ;;  %v8960_v4 = vld [vmem:[%s8098_s28 + $0x260] sm:$0xff]  ;;  %v8969_v6 = vld [vmem:[%s8098_s28 + $0x268] sm:$0xff] }
 0x25f   : > { %5644 = vmatmul.mubr.bf16.gmra.mrb[8].mxu0 %v7204_v51  ;;  %v8954_v13 = vadd.f32 %v5399_v36, %v5111_v29  ;;  %5933 = vmatmul.mubr.bf16.gmra.mrb[8].mxu1 %v7206_v30  ;;  %v7220_v30 = vcombine.low %v8917_v55, %v8920_v21  ;;  %v7222_v36 = vcombine.low %v8926_v56, %v8929_v48  ;;  %v7941_v55 = vld [vmem:[%s9866_s1 + $0x330] sm:$0xff]  }
 0x260   : > { %5651 = vmatprep.mubr.bf16.mxu0 %v7221_v35  ;;  %5940 = vmatprep.mubr.bf16.mxu1 %v7223_v0  ;;  %v7237_v44 = vcombine.high %v8957_v47, %v8960_v4  ;;  %v7239_v63 = vcombine.high %v8966_v42, %v8969_v6 }
 0x261   : > { %6182 = vmatpush1.bf16.msra.mxu0 %v7937_v46  ;;  %6471 = vmatpush1.bf16.msra.mxu1 %v7938_v12  ;;  %v8999_v12 = vld [vmem:[%s8098_s28 + $0x2a0] sm:$0xff] }
 0x262   : > { %v5115_v45 = vpop.f32.mrb[160].mxu0  ;;  %6183 = vmatprep.subr.bf16.mxu0 %v9895_v22  ;;  %v5404_v17 = vpop.f32.mrb[160].mxu1  ;;  %6472 = vmatprep.subr.bf16.mxu1 %v9895_v22 }
 0x263   : > { %v5116_v51 = vadd.f32 %v5115_v45, %v8542_v28  ;;  %v5117_v11 = vpop.f32.mrb[161].mxu0  ;;  %v5406_v35 = vpop.f32.mrb[161].mxu1  ;;  %v7943_v45 = vld [vmem:[%s9866_s1 + $0x338] sm:$0xff]  }
 0x264   : > { %v5118_v29 = vpop.f32.mrb[162].mxu0  ;;  %v5407_v46 = vpop.f32.mrb[162].mxu1  ;;  %v7944_v11 = vld [vmem:[%s9866_s1 + $0x3b8] sm:$0xff]  }
 0x265   : > { %v5119_v0 = vadd.f32 %v5118_v29, %v8548_v39  ;;  %v5120_v28 = vpop.f32.mrb[163].mxu0  ;;  %6184 = vmatpush1.bf16.msra.mxu0 %v7939_v10  ;;  %v8989_v21 = vadd.f32 %v5404_v17, %v5116_v51  ;;  %v5409_v56 = vpop.f32.mrb[163].mxu1  ;;  %6473 = vmatpush1.bf16.msra.mxu1 %v7940_v24  ;;  %v7942_v39 = vld [vmem:[%s9866_s1 + $0x3b0] sm:$0xff]   ;;  %v9002_v10 = vld [vmem:[%s8098_s28 + $0x2e0] sm:$0xff]  ;;  %v9008_v51 = vld [vmem:[%s8098_s28 + $0x2a8] sm:$0xff] }
 0x266   : > { %6185 = vmatprep.subr.bf16.mxu0 %v9895_v22  ;;  %6474 = vmatprep.subr.bf16.mxu1 %v9895_v22  ;;  %v9011_v17 = vld [vmem:[%s8098_s28 + $0x2e8] sm:$0xff]  ;;  %v7253_v28 = vcombine.high %v8999_v12, %v9002_v10 }
 0x267   : > { %5652 = vmatmul.mubr.bf16.gmra.mrb[12].mxu0 %v7220_v30  ;;  %v8996_v48 = vadd.f32 %v5407_v46, %v5119_v0  ;;  %5941 = vmatmul.mubr.bf16.gmra.mrb[12].mxu1 %v7222_v36  ;;  %v7236_v36 = vcombine.low %v8957_v47, %v8960_v4  ;;  %v7238_v46 = vcombine.low %v8966_v42, %v8969_v6  ;;  %v7945_v47 = vld [vmem:[%s9866_s1 + $0x340] sm:$0xff]  }
 0x268   : > { %5659 = vmatprep.mubr.bf16.mxu0 %v7237_v44  ;;  %5948 = vmatprep.mubr.bf16.mxu1 %v7239_v63  ;;  %v7255_v56 = vcombine.high %v9008_v51, %v9011_v17 }
 0x269   : > { %6186 = vmatpush1.bf16.msra.mxu0 %v7941_v55  ;;  %6475 = vmatpush1.bf16.msra.mxu1 %v7942_v39  ;;  %v699_v39 = vld [vmem:[%s8098_s28 + $0x320] sm:$0xff] }
 0x26a   : > { %v5123_v24 = vpop.f32.mrb[164].mxu0  ;;  %6187 = vmatprep.subr.bf16.mxu0 %v9895_v22  ;;  %v5412_v35 = vpop.f32.mrb[164].mxu1  ;;  %6476 = vmatprep.subr.bf16.mxu1 %v9895_v22 }
 0x26b   : > { %v5124_v30 = vadd.f32 %v5123_v24, %v8570_v57  ;;  %v5125_v29 = vpop.f32.mrb[165].mxu0  ;;  %v5414_v44 = vpop.f32.mrb[165].mxu1  ;;  %v7947_v24 = vld [vmem:[%s9866_s1 + $0x348] sm:$0xff]  }
 0x26c   : > { %v5126_v0 = vpop.f32.mrb[166].mxu0  ;;  %v5415_v55 = vpop.f32.mrb[166].mxu1  ;;  %v7948_v29 = vld [vmem:[%s9866_s1 + $0x3c8] sm:$0xff]  }
 0x26d   : > { %v5127_v63 = vadd.f32 %v5126_v0, %v8576_v7  ;;  %v5128_v57 = vpop.f32.mrb[167].mxu0  ;;  %6188 = vmatpush1.bf16.msra.mxu0 %v7943_v45  ;;  %v9031_v4 = vadd.f32 %v5412_v35, %v5124_v30  ;;  %v5417_v42 = vpop.f32.mrb[167].mxu1  ;;  %6477 = vmatpush1.bf16.msra.mxu1 %v7944_v11  ;;  %v7946_v7 = vld [vmem:[%s9866_s1 + $0x3c0] sm:$0xff]   ;;  %v700_v30 = vld [vmem:[%s8098_s28 + $0x328] sm:$0xff] }
 0x26e   : > { %6189 = vmatprep.subr.bf16.mxu0 %v9895_v22  ;;  %6478 = vmatprep.subr.bf16.mxu1 %v9895_v22  ;;  %v707_v45 = vld [vmem:[%s8098_s28 + $0x360] sm:$0xff]  ;;  %v708_v35 = vld [vmem:[%s8098_s28 + $0x368] sm:$0xff] }
 0x26f   : > { %5660 = vmatmul.mubr.bf16.gmra.mrb[16].mxu0 %v7236_v36  ;;  %v9038_v6 = vadd.f32 %v5415_v55, %v5127_v63  ;;  %5949 = vmatmul.mubr.bf16.gmra.mrb[16].mxu1 %v7238_v46  ;;  %v7252_v46 = vcombine.low %v8999_v12, %v9002_v10  ;;  %v7254_v55 = vcombine.low %v9008_v51, %v9011_v17  ;;  %v7949_v12 = vld [vmem:[%s9866_s1 + $0x350] sm:$0xff]   ;;  %v715_v17 = vld [vmem:[%s8098_s28 + $0x3a0] sm:$0xff] }
 0x270   : > { %5667 = vmatprep.mubr.bf16.mxu0 %v7253_v28  ;;  %5956 = vmatprep.mubr.bf16.mxu1 %v7255_v56  ;;  %v7269_v57 = vcombine.high %v699_v39, %v707_v45 }
 0x271   : > { %6190 = vmatpush1.bf16.msra.mxu0 %v7945_v47  ;;  %6479 = vmatpush1.bf16.msra.mxu1 %v7946_v7 }
 0x272   : > { %v5131_v11 = vpop.f32.mrb[168].mxu0  ;;  %6191 = vmatprep.subr.bf16.mxu0 %v9895_v22  ;;  %v5420_v44 = vpop.f32.mrb[168].mxu1  ;;  %6480 = vmatprep.subr.bf16.mxu1 %v9895_v22 }
 0x273   : > { %v5132_v36 = vadd.f32 %v5131_v11, %v8596_v25  ;;  %v5133_v0 = vpop.f32.mrb[169].mxu0  ;;  %v5422_v28 = vpop.f32.mrb[169].mxu1  ;;  %v7271_v25 = vcombine.high %v700_v30, %v708_v35 }
 0x274   : > { %v5134_v63 = vpop.f32.mrb[170].mxu0  ;;  %v5423_v47 = vpop.f32.mrb[170].mxu1  ;;  %v7268_v28 = vcombine.low %v699_v39, %v707_v45  ;;  %v7951_v45 = vld [vmem:[%s9866_s1 + $0x358] sm:$0xff]  }
 0x275   : > { %v5135_v56 = vadd.f32 %v5134_v63, %v8601_v37  ;;  %v5136_v42 = vpop.f32.mrb[171].mxu0  ;;  %6192 = vmatpush1.bf16.msra.mxu0 %v7947_v24  ;;  %v9061_v10 = vadd.f32 %v5420_v44, %v5132_v36  ;;  %v5425_v7 = vpop.f32.mrb[171].mxu1  ;;  %6481 = vmatpush1.bf16.msra.mxu1 %v7948_v29  ;;  %v7950_v37 = vld [vmem:[%s9866_s1 + $0x3d0] sm:$0xff]   ;;  %v723_v24 = vld [vmem:[%s8098_s28 + $0x3e0] sm:$0xff]  ;;  %v716_v36 = vld [vmem:[%s8098_s28 + $0x3a8] sm:$0xff] }
 0x276   : > { %6193 = vmatprep.subr.bf16.mxu0 %v9895_v22  ;;  %6482 = vmatprep.subr.bf16.mxu1 %v9895_v22  ;;  %v724_v29 = vld [vmem:[%s8098_s28 + $0x3e8] sm:$0xff] }
 0x277   : > { %5668 = vmatmul.mubr.bf16.gmra.mrb[20].mxu0 %v7252_v46  ;;  %v9068_v51 = vadd.f32 %v5423_v47, %v5135_v56  ;;  %5957 = vmatmul.mubr.bf16.gmra.mrb[20].mxu1 %v7254_v55  ;;  %v7285_v56 = vcombine.high %v715_v17, %v723_v24 }
 0x278   : > { %5675 = vmatprep.mubr.bf16.mxu0 %v7269_v57  ;;  %5964 = vmatprep.mubr.bf16.mxu1 %v7271_v25  ;;  %v7270_v57 = vcombine.low %v700_v30, %v708_v35  ;;  %v731_v30 = vld [vmem:[%s8098_s28 + $0x420] sm:$0xff] }
 0x279   : > { %6194 = vmatpush1.bf16.msra.mxu0 %v7949_v12  ;;  %6483 = vmatpush1.bf16.msra.mxu1 %v7950_v37  ;;  %v7287_v12 = vcombine.high %v716_v36, %v724_v29  ;;  %v739_v35 = vld [vmem:[%s8098_s28 + $0x460] sm:$0xff]  ;;  %v732_v37 = vld [vmem:[%s8098_s28 + $0x428] sm:$0xff] }
 0x27a   : > { %v5139_v11 = vpop.f32.mrb[172].mxu0  ;;  %6195 = vmatprep.subr.bf16.mxu0 %v9895_v22  ;;  %v5428_v0 = vpop.f32.mrb[172].mxu1  ;;  %6484 = vmatprep.subr.bf16.mxu1 %v9895_v22 }
 0x27b   : > { %v5140_v44 = vadd.f32 %v5139_v11, %v8614_v53  ;;  %v5141_v46 = vpop.f32.mrb[173].mxu0  ;;  %v5430_v63 = vpop.f32.mrb[173].mxu1  ;;  %v740_v11 = vld [vmem:[%s8098_s28 + $0x468] sm:$0xff] }
 0x27c   : > { %v5142_v55 = vpop.f32.mrb[174].mxu0  ;;  %v5431_v42 = vpop.f32.mrb[174].mxu1  ;;  %v7952_v63 = vld [vmem:[%s9866_s1 + $0x3d8] sm:$0xff]  }
 0x27d   : > { %v5143_v47 = vadd.f32 %v5142_v55, %v8616_v3  ;;  %v5144_v25 = vpop.f32.mrb[175].mxu0  ;;  %v9078_v7 = vadd.f32 %v5428_v0, %v5140_v44  ;;  %v5433_v53 = vpop.f32.mrb[175].mxu1  ;;  %6196 = vmatpush1.bf16.msra.mxu0 %v7951_v45  ;;  %6485 = vmatpush1.bf16.msra.mxu1 %v7952_v63  ;;  %v748_v45 = vld [vmem:[%s8098_s28 + $0x4a8] sm:$0xff] }
 0x27e   : > { %6197 = vmatprep.subr.bf16.mxu0 %v9895_v22  ;;  %6486 = vmatprep.subr.bf16.mxu1 %v9895_v22 }
 0x27f   : > { %5676 = vmatmul.mubr.bf16.gmra.mrb[24].mxu0 %v7268_v28  ;;  %v9080_v39 = vadd.f32 %v5431_v42, %v5143_v47  ;;  %5965 = vmatmul.mubr.bf16.gmra.mrb[24].mxu1 %v7270_v57  ;;  %v7284_v28 = vcombine.low %v715_v17, %v723_v24  ;;  %v7301_v47 = vcombine.high %v731_v30, %v739_v35 }
 0x280   : > { %5683 = vmatprep.mubr.bf16.mxu0 %v7285_v56  ;;  %5972 = vmatprep.mubr.bf16.mxu1 %v7287_v12  ;;  %v7286_v56 = vcombine.low %v716_v36, %v724_v29  ;;  %v7303_v12 = vcombine.high %v732_v37, %v740_v11  ;;  %v747_v36 = vld [vmem:[%s8098_s28 + $0x4a0] sm:$0xff] }
 0x281   : > { %v755_v29 = vld [vmem:[%s8098_s28 + $0x4e0] sm:$0xff] }
 0x282   : > { %v5147_v3 = vpop.f32.mrb[176].mxu0  ;;  %v5436_v0 = vpop.f32.mrb[176].mxu1 }
 0x283   : > { %v5148_v44 = vadd.f32 %v5147_v3, %v8626_v19  ;;  %v5149_v46 = vpop.f32.mrb[177].mxu0  ;;  %v5438_v55 = vpop.f32.mrb[177].mxu1  ;;  %v756_v3 = vld [vmem:[%s8098_s28 + $0x4e8] sm:$0xff] }
 0x284   : > { %v5150_v57 = vpop.f32.mrb[178].mxu0  ;;  %v5439_v25 = vpop.f32.mrb[178].mxu1 }
 0x285   : > { %v5151_v42 = vadd.f32 %v5150_v57, %v8631_v32  ;;  %v5152_v19 = vpop.f32.mrb[179].mxu0  ;;  %v9095_v17 = vadd.f32 %v5436_v0, %v5148_v44  ;;  %v5441_v24 = vpop.f32.mrb[179].mxu1  ;;  %v7300_v44 = vcombine.low %v731_v30, %v739_v35  ;;  %v7953_v30 = vld [vmem:[%s9866_s1 + $0x360] sm:$0xff]  }
 0x286   : > { %v7319_v19 = vcombine.high %v748_v45, %v756_v3  ;;  %v763_v35 = vld [vmem:[%s8098_s28 + $0x520] sm:$0xff]  ;;  %6198 = vmatpush1.bf16.msra.mxu0 %v7953_v30  ;;  %v780_v30 = vld [vmem:[%s8098_s28 + $0x5a8] sm:$0xff] }
 0x287   : > { %5684 = vmatmul.mubr.bf16.gmra.mrb[28].mxu0 %v7284_v28  ;;  %v9098_v53 = vadd.f32 %v5439_v25, %v5151_v42  ;;  %5973 = vmatmul.mubr.bf16.gmra.mrb[28].mxu1 %v7286_v56  ;;  %v7302_v28 = vcombine.low %v732_v37, %v740_v11  ;;  %v7317_v42 = vcombine.high %v747_v36, %v755_v29  ;;  %v771_v37 = vld [vmem:[%s8098_s28 + $0x560] sm:$0xff]  ;;  %v764_v11 = vld [vmem:[%s8098_s28 + $0x528] sm:$0xff] }
 0x288   : > { %5691 = vmatprep.mubr.bf16.mxu0 %v7301_v47  ;;  %5980 = vmatprep.mubr.bf16.mxu1 %v7303_v12 }
 0x289   : > { %6199 = vmatprep.subr.bf16.mxu0 %v9895_v22 }
 0x28a   : > { %v5155_v32 = vpop.f32.mrb[180].mxu0  ;;  %v5444_v55 = vpop.f32.mrb[180].mxu1 }
 0x28b   : > { %v5156_v46 = vadd.f32 %v5155_v32, %v8638_v49  ;;  %v5157_v63 = vpop.f32.mrb[181].mxu0  ;;  %v5446_v0 = vpop.f32.mrb[181].mxu1  ;;  %v772_v32 = vld [vmem:[%s8098_s28 + $0x568] sm:$0xff] }
 0x28c   : > { %v5158_v57 = vpop.f32.mrb[182].mxu0  ;;  %v5447_v47 = vpop.f32.mrb[182].mxu1  ;;  %v7954_v0 = vld [vmem:[%s9866_s1 + $0x3e0] sm:$0xff]  }
 0x28d   : > { %v5159_v56 = vadd.f32 %v5158_v57, %v8640_v62  ;;  %v5160_v25 = vpop.f32.mrb[183].mxu0  ;;  %v9106_v12 = vadd.f32 %v5444_v55, %v5156_v46  ;;  %v5449_v24 = vpop.f32.mrb[183].mxu1  ;;  %6487 = vmatpush1.bf16.msra.mxu1 %v7954_v0 }
 0x28e   : > { %6488 = vmatprep.subr.bf16.mxu1 %v9895_v22 }
 0x28f   : > { %5692 = vmatmul.mubr.bf16.gmra.mrb[32].mxu0 %v7300_v44  ;;  %v9108_v49 = vadd.f32 %v5447_v47, %v5159_v56  ;;  %5981 = vmatmul.mubr.bf16.gmra.mrb[32].mxu1 %v7302_v28  ;;  %v7316_v44 = vcombine.low %v747_v36, %v755_v29  ;;  %v7333_v56 = vcombine.high %v763_v35, %v771_v37 }
 0x290   : > { %5699 = vmatprep.mubr.bf16.mxu0 %v7317_v42  ;;  %5988 = vmatprep.mubr.bf16.mxu1 %v7319_v19  ;;  %v7318_v42 = vcombine.low %v748_v45, %v756_v3  ;;  %v7335_v19 = vcombine.high %v764_v11, %v772_v32  ;;  %v779_v45 = vld [vmem:[%s8098_s28 + $0x5a0] sm:$0xff] }
 0x291   : > { %v787_v3 = vld [vmem:[%s8098_s28 + $0x5e0] sm:$0xff] }
 0x292   : > { %v5163_v62 = vpop.f32.mrb[184].mxu0  ;;  %v5452_v55 = vpop.f32.mrb[184].mxu1 }
 0x293   : > { %v5164_v46 = vadd.f32 %v5163_v62, %v8650_v18  ;;  %v5165_v63 = vpop.f32.mrb[185].mxu0  ;;  %v5454_v57 = vpop.f32.mrb[185].mxu1  ;;  %v788_v62 = vld [vmem:[%s8098_s28 + $0x5e8] sm:$0xff] }
 0x294   : > { %v5166_v28 = vpop.f32.mrb[186].mxu0  ;;  %v5455_v25 = vpop.f32.mrb[186].mxu1 }
 0x295   : > { %v5167_v47 = vadd.f32 %v5166_v28, %v8655_v33  ;;  %v5168_v18 = vpop.f32.mrb[187].mxu0  ;;  %v9123_v36 = vadd.f32 %v5452_v55, %v5164_v46  ;;  %v5457_v29 = vpop.f32.mrb[187].mxu1  ;;  %v7332_v46 = vcombine.low %v763_v35, %v771_v37  ;;  %v7955_v35 = vld [vmem:[%s9866_s1 + $0x368] sm:$0xff]   ;;  %v795_v37 = vld [vmem:[%s8098_s28 + $0x620] sm:$0xff] }
 0x296   : > { %v7351_v18 = vcombine.high %v780_v30, %v788_v62  ;;  %6200 = vmatpush1.bf16.msra.mxu0 %v7955_v35  ;;  %v812_v35 = vld [vmem:[%s8098_s28 + $0x6a8] sm:$0xff] }
 0x297   : > { %5700 = vmatmul.mubr.bf16.gmra.mrb[36].mxu0 %v7316_v44  ;;  %v9126_v24 = vadd.f32 %v5455_v25, %v5167_v47  ;;  %5989 = vmatmul.mubr.bf16.gmra.mrb[36].mxu1 %v7318_v42  ;;  %v7334_v44 = vcombine.low %v764_v11, %v772_v32  ;;  %v7349_v47 = vcombine.high %v779_v45, %v787_v3  ;;  %v803_v11 = vld [vmem:[%s8098_s28 + $0x660] sm:$0xff]  ;;  %v796_v32 = vld [vmem:[%s8098_s28 + $0x628] sm:$0xff] }
 0x298   : > { %5707 = vmatprep.mubr.bf16.mxu0 %v7333_v56  ;;  %5996 = vmatprep.mubr.bf16.mxu1 %v7335_v19 }
 0x299   : > { %6201 = vmatprep.subr.bf16.mxu0 %v9895_v22 }
 0x29a   : > { %v5171_v33 = vpop.f32.mrb[188].mxu0  ;;  %v5460_v57 = vpop.f32.mrb[188].mxu1 }
 0x29b   : > { %v5172_v63 = vadd.f32 %v5171_v33, %v8662_v52  ;;  %v5173_v0 = vpop.f32.mrb[189].mxu0  ;;  %v5462_v55 = vpop.f32.mrb[189].mxu1  ;;  %v804_v33 = vld [vmem:[%s8098_s28 + $0x668] sm:$0xff] }
 0x29c   : > { %v5174_v28 = vpop.f32.mrb[190].mxu0  ;;  %v5463_v56 = vpop.f32.mrb[190].mxu1 }
 0x29d   : > { %v5175_v42 = vadd.f32 %v5174_v28, %v8664_v9  ;;  %v5176_v25 = vpop.f32.mrb[191].mxu0  ;;  %v9134_v19 = vadd.f32 %v5460_v57, %v5172_v63  ;;  %v5465_v29 = vpop.f32.mrb[191].mxu1 }
 0x29f   : > { %5708 = vmatmul.mubr.bf16.gmra.mrb[40].mxu0 %v7332_v46  ;;  %v9136_v52 = vadd.f32 %v5463_v56, %v5175_v42  ;;  %5997 = vmatmul.mubr.bf16.gmra.mrb[40].mxu1 %v7334_v44  ;;  %v7348_v46 = vcombine.low %v779_v45, %v787_v3  ;;  %v7350_v44 = vcombine.low %v780_v30, %v788_v62  ;;  %v819_v30 = vld [vmem:[%s8098_s28 + $0x6e0] sm:$0xff] }
 0x2a0   : > { %5715 = vmatprep.mubr.bf16.mxu0 %v7349_v47  ;;  %6004 = vmatprep.mubr.bf16.mxu1 %v7351_v18  ;;  %v7365_v47 = vcombine.high %v795_v37, %v803_v11  ;;  %v7367_v18 = vcombine.high %v796_v32, %v804_v33 }
 0x2a2   : > { %v5179_v9 = vpop.f32.mrb[192].mxu0  ;;  %v5468_v57 = vpop.f32.mrb[192].mxu1 }
 0x2a3   : > { %v5180_v63 = vadd.f32 %v5179_v9, %v8677_v27  ;;  %v5181_v0 = vpop.f32.mrb[193].mxu0  ;;  %v5470_v55 = vpop.f32.mrb[193].mxu1  ;;  %v7956_v27 = vld [vmem:[%s9866_s1 + $0x3e8] sm:$0xff]  }
 0x2a4   : > { %v5182_v28 = vpop.f32.mrb[194].mxu0  ;;  %v5471_v56 = vpop.f32.mrb[194].mxu1  ;;  %6489 = vmatpush1.bf16.msra.mxu1 %v7956_v27  ;;  %v820_v9 = vld [vmem:[%s8098_s28 + $0x6e8] sm:$0xff] }
 0x2a5   : > { %v5183_v42 = vadd.f32 %v5182_v28, %v8679_v38  ;;  %v5184_v25 = vpop.f32.mrb[195].mxu0  ;;  %v9151_v45 = vadd.f32 %v5468_v57, %v5180_v63  ;;  %v5473_v3 = vpop.f32.mrb[195].mxu1  ;;  %v811_v38 = vld [vmem:[%s8098_s28 + $0x6a0] sm:$0xff]  ;;  %6490 = vmatprep.subr.bf16.mxu1 %v9895_v22  ;;  %v7364_v57 = vcombine.low %v795_v37, %v803_v11  ;;  %v7957_v37 = vld [vmem:[%s9866_s1 + $0x370] sm:$0xff]  }
 0x2a6   : > { %v827_v11 = vld [vmem:[%s8098_s28 + $0x720] sm:$0xff]  ;;  %6202 = vmatpush1.bf16.msra.mxu0 %v7957_v37  ;;  %v844_v37 = vld [vmem:[%s8098_s28 + $0x7a8] sm:$0xff] }
 0x2a7   : > { %5716 = vmatmul.mubr.bf16.gmra.mrb[44].mxu0 %v7348_v46  ;;  %v9153_v29 = vadd.f32 %v5471_v56, %v5183_v42  ;;  %6005 = vmatmul.mubr.bf16.gmra.mrb[44].mxu1 %v7350_v44  ;;  %v7366_v42 = vcombine.low %v796_v32, %v804_v33  ;;  %v7381_v44 = vcombine.high %v811_v38, %v819_v30  ;;  %v835_v32 = vld [vmem:[%s8098_s28 + $0x760] sm:$0xff]  ;;  %v828_v33 = vld [vmem:[%s8098_s28 + $0x728] sm:$0xff] }
 0x2a8   : > { %5723 = vmatprep.mubr.bf16.mxu0 %v7365_v47  ;;  %6012 = vmatprep.mubr.bf16.mxu1 %v7367_v18  ;;  %v7383_v18 = vcombine.high %v812_v35, %v820_v9 }
 0x2a9   : > { %6203 = vmatprep.subr.bf16.mxu0 %v9895_v22 }
 0x2aa   : > { %v5187_v62 = vpop.f32.mrb[196].mxu0  ;;  %v5476_v55 = vpop.f32.mrb[196].mxu1 }
 0x2ab   : > { %v5188_v0 = vadd.f32 %v5187_v62, %v8686_v2  ;;  %v5189_v63 = vpop.f32.mrb[197].mxu0  ;;  %v5478_v28 = vpop.f32.mrb[197].mxu1  ;;  %v836_v62 = vld [vmem:[%s8098_s28 + $0x768] sm:$0xff] }
 0x2ac   : > { %v5190_v46 = vpop.f32.mrb[198].mxu0  ;;  %v5479_v56 = vpop.f32.mrb[198].mxu1 }
 0x2ad   : > { %v5191_v47 = vadd.f32 %v5190_v46, %v8688_v26  ;;  %v5192_v25 = vpop.f32.mrb[199].mxu0  ;;  %v9162_v27 = vadd.f32 %v5476_v55, %v5188_v0  ;;  %v5481_v3 = vpop.f32.mrb[199].mxu1 }
 0x2af   : > { %5724 = vmatmul.mubr.bf16.gmra.mrb[48].mxu0 %v7364_v57  ;;  %v9164_v2 = vadd.f32 %v5479_v56, %v5191_v47  ;;  %6013 = vmatmul.mubr.bf16.gmra.mrb[48].mxu1 %v7366_v42  ;;  %v7380_v57 = vcombine.low %v811_v38, %v819_v30  ;;  %v7382_v42 = vcombine.low %v812_v35, %v820_v9  ;;  %v851_v35 = vld [vmem:[%s8098_s28 + $0x7e0] sm:$0xff] }
 0x2b0   : > { %5731 = vmatprep.mubr.bf16.mxu0 %v7381_v44  ;;  %6020 = vmatprep.mubr.bf16.mxu1 %v7383_v18  ;;  %v7397_v44 = vcombine.high %v827_v11, %v835_v32  ;;  %v7399_v18 = vcombine.high %v828_v33, %v836_v62 }
 0x2b2   : > { %v5195_v26 = vpop.f32.mrb[200].mxu0  ;;  %v5484_v55 = vpop.f32.mrb[200].mxu1 }
 0x2b3   : > { %v5196_v0 = vadd.f32 %v5195_v26, %v8701_v40  ;;  %v5197_v63 = vpop.f32.mrb[201].mxu0  ;;  %v5486_v28 = vpop.f32.mrb[201].mxu1  ;;  %v7958_v40 = vld [vmem:[%s9866_s1 + $0x3f0] sm:$0xff]   ;;  %v852_v26 = vld [vmem:[%s8098_s28 + $0x7e8] sm:$0xff] }
 0x2b4   : > { %v5198_v46 = vpop.f32.mrb[202].mxu0  ;;  %v5487_v56 = vpop.f32.mrb[202].mxu1  ;;  %6491 = vmatpush1.bf16.msra.mxu1 %v7958_v40 }
 0x2b5   : > { %v5199_v47 = vadd.f32 %v5198_v46, %v8703_v50  ;;  %v5200_v25 = vpop.f32.mrb[203].mxu0  ;;  %v9179_v38 = vadd.f32 %v5484_v55, %v5196_v0  ;;  %v5489_v30 = vpop.f32.mrb[203].mxu1  ;;  %v843_v50 = vld [vmem:[%s8098_s28 + $0x7a0] sm:$0xff]  ;;  %6492 = vmatprep.subr.bf16.mxu1 %v9895_v22  ;;  %v7396_v55 = vcombine.low %v827_v11, %v835_v32  ;;  %v7959_v11 = vld [vmem:[%s9866_s1 + $0x378] sm:$0xff]  }
 0x2b6   : > { %v7415_v25 = vcombine.high %v844_v37, %v852_v26  ;;  %v859_v32 = vld [vmem:[%s8098_s28 + $0x820] sm:$0xff]  ;;  %v868_v30 = vld [vmem:[%s8098_s28 + $0x868] sm:$0xff]  ;;  %6204 = vmatpush1.bf16.msra.mxu0 %v7959_v11 }
 0x2b7   : > { %5732 = vmatmul.mubr.bf16.gmra.mrb[52].mxu0 %v7380_v57  ;;  %v9181_v3 = vadd.f32 %v5487_v56, %v5199_v47  ;;  %6021 = vmatmul.mubr.bf16.gmra.mrb[52].mxu1 %v7382_v42  ;;  %v7398_v47 = vcombine.low %v828_v33, %v836_v62  ;;  %v7413_v42 = vcombine.high %v843_v50, %v851_v35  ;;  %v867_v33 = vld [vmem:[%s8098_s28 + $0x860] sm:$0xff]  ;;  %v860_v62 = vld [vmem:[%s8098_s28 + $0x828] sm:$0xff] }
 0x2b8   : > { %5739 = vmatprep.mubr.bf16.mxu0 %v7397_v44  ;;  %6028 = vmatprep.mubr.bf16.mxu1 %v7399_v18 }
 0x2ba   : > { %v5203_v9 = vpop.f32.mrb[204].mxu0  ;;  %v5492_v28 = vpop.f32.mrb[204].mxu1 }
 0x2bb   : > { %v5204_v63 = vadd.f32 %v5203_v9, %v8710_v31  ;;  %v5205_v0 = vpop.f32.mrb[205].mxu0  ;;  %v5494_v46 = vpop.f32.mrb[205].mxu1 }
 0x2bc   : > { %v5206_v57 = vpop.f32.mrb[206].mxu0  ;;  %v5495_v56 = vpop.f32.mrb[206].mxu1  ;;  %v7412_v0 = vcombine.low %v843_v50, %v851_v35 }
 0x2bd   : > { %v5207_v44 = vadd.f32 %v5206_v57, %v8712_v60  ;;  %v5208_v22 = vpop.f32.mrb[207].mxu0  ;;  %v9190_v18 = vadd.f32 %v5492_v28, %v5204_v63  ;;  %v5497_v40 = vpop.f32.mrb[207].mxu1  ;;  %v7414_v57 = vcombine.low %v844_v37, %v852_v26  ;;  %v875_v37 = vld [vmem:[%s8098_s28 + $0x8a0] sm:$0xff] }
 0x2be   : > { %v883_v26 = vld [vmem:[%s8098_s28 + $0x8e0] sm:$0xff] }
 0x2bf   : > { %5740 = vmatmul.mubr.bf16.gmra.mrb[56].mxu0 %v7396_v55  ;;  %v9192_v31 = vadd.f32 %v5495_v56, %v5207_v44  ;;  %6029 = vmatmul.mubr.bf16.gmra.mrb[56].mxu1 %v7398_v47  ;;  %v7429_v47 = vcombine.high %v859_v32, %v867_v33 }
 0x2c0   : > { %5747 = vmatprep.mubr.bf16.mxu0 %v7413_v42  ;;  %6036 = vmatprep.mubr.bf16.mxu1 %v7415_v25  ;;  %v9897_v42 = vld [vmem:[#allocation3_spill] sm:$0xff]  ;;  %v7431_v25 = vcombine.high %v860_v62, %v868_v30 }
 0x2c1   : > { %9896 = vst [vmem:[#allocation27_spill] sm:$0xff] %v9192_v31  ;;  %v7428_v31 = vcombine.low %v859_v32, %v867_v33  ;;  %v891_v32 = vld [vmem:[%s8098_s28 + $0x920] sm:$0xff] }
 0x2c2   : > { %v5211_v60 = vpop.f32.mrb[208].mxu0  ;;  %v5500_v63 = vpop.f32.mrb[208].mxu1  ;;  %v899_v33 = vld [vmem:[%s8098_s28 + $0x960] sm:$0xff] }
 0x2c3   : > { %v5212_v9 = vadd.f32 %v5211_v60, %v8725_v8  ;;  %v5213_v28 = vpop.f32.mrb[209].mxu0  ;;  %v5502_v55 = vpop.f32.mrb[209].mxu1  ;;  %v7960_v8 = vld [vmem:[%s9866_s1 + $0x3f8] sm:$0xff]   ;;  %v876_v60 = vld [vmem:[%s8098_s28 + $0x8a8] sm:$0xff] }
 0x2c4   : > { %v5214_v46 = vpop.f32.mrb[210].mxu0  ;;  %v5503_v56 = vpop.f32.mrb[210].mxu1  ;;  %6493 = vmatpush1.bf16.msra.mxu1 %v7960_v8  ;;  %v884_v28 = vld [vmem:[%s8098_s28 + $0x8e8] sm:$0xff] }
 0x2c5   : > { %v5215_v44 = vadd.f32 %v5214_v46, %v9897_v42  ;;  %v5216_v22 = vpop.f32.mrb[211].mxu0  ;;  %v9206_v40 = vadd.f32 %v5500_v63, %v5212_v9  ;;  %v5505_v50 = vpop.f32.mrb[211].mxu1  ;;  %v9899_v55 = vld [vmem:[#allocation4_spill] sm:$0xff]  ;;  %v7447_v8 = vcombine.high %v876_v60, %v884_v28 }
 0x2c7   : > { %5748 = vmatmul.mubr.bf16.gmra.mrb[60].mxu0 %v7412_v0  ;;  %v9208_v35 = vadd.f32 %v5503_v56, %v5215_v44  ;;  %6037 = vmatmul.mubr.bf16.gmra.mrb[60].mxu1 %v7414_v57  ;;  %v7430_v0 = vcombine.low %v860_v62, %v868_v30  ;;  %v7445_v44 = vcombine.high %v875_v37, %v883_v26  ;;  %v9900_v57 = vld [vmem:[#allocation5_spill] sm:$0xff]  ;;  %v892_v30 = vld [vmem:[%s8098_s28 + $0x928] sm:$0xff] }
 0x2c8   : > { %5755 = vmatprep.mubr.bf16.mxu0 %v7429_v47  ;;  %6044 = vmatprep.mubr.bf16.mxu1 %v7431_v25 }
 0x2c9   : > { %9898 = vst [vmem:[#allocation3_spill] sm:$0xff] %v9208_v35 }
 0x2ca   : > { %v5219_v11 = vpop.f32.mrb[212].mxu0  ;;  %v5508_v42 = vpop.f32.mrb[212].mxu1 }
 0x2cb   : > { %v5220_v46 = vadd.f32 %v5219_v11, %v9899_v55  ;;  %v5221_v22 = vpop.f32.mrb[213].mxu0  ;;  %v5510_v9 = vpop.f32.mrb[213].mxu1  ;;  %v900_v55 = vld [vmem:[%s8098_s28 + $0x968] sm:$0xff] }
 0x2cc   : > { %v5222_v63 = vpop.f32.mrb[214].mxu0  ;;  %v5511_v56 = vpop.f32.mrb[214].mxu1  ;;  %v9903_v22 = vld [vmem:[#allocation6_spill] sm:$0xff] }
 0x2cd   : > { %v5223_v47 = vadd.f32 %v5222_v63, %v9900_v57  ;;  %v5224_v25 = vpop.f32.mrb[215].mxu0  ;;  %v9216_v50 = vadd.f32 %v5508_v42, %v5220_v46  ;;  %v5513_v35 = vpop.f32.mrb[215].mxu1  ;;  %v7461_v42 = vcombine.high %v891_v32, %v899_v33 }
 0x2ce   : > { %v7444_v25 = vcombine.low %v875_v37, %v883_v26  ;;  %v907_v37 = vld [vmem:[%s8098_s28 + $0x9a0] sm:$0xff] }
 0x2cf   : > { %9901 = vst [vmem:[#allocation4_spill] sm:$0xff] %v9216_v50  ;;  %5756 = vmatmul.mubr.bf16.gmra.mrb[64].mxu0 %v7428_v31  ;;  %v9218_v11 = vadd.f32 %v5511_v56, %v5223_v47  ;;  %6045 = vmatmul.mubr.bf16.gmra.mrb[64].mxu1 %v7430_v0  ;;  %v7446_v31 = vcombine.low %v876_v60, %v884_v28  ;;  %v9904_v0 = vld [vmem:[#allocation7_spill] sm:$0xff]  ;;  %v908_v28 = vld [vmem:[%s8098_s28 + $0x9a8] sm:$0xff] }
 0x2d0   : > { %5763 = vmatprep.mubr.bf16.mxu0 %v7445_v44  ;;  %6052 = vmatprep.mubr.bf16.mxu1 %v7447_v8  ;;  %v7463_v8 = vcombine.high %v892_v30, %v900_v55  ;;  %v915_v26 = vld [vmem:[%s8098_s28 + $0x9e0] sm:$0xff] }
 0x2d1   : > { %9902 = vst [vmem:[#allocation5_spill] sm:$0xff] %v9218_v11 }
 0x2d2   : > { %v5227_v62 = vpop.f32.mrb[216].mxu0  ;;  %v5516_v63 = vpop.f32.mrb[216].mxu1 }
 0x2d3   : > { %v5228_v9 = vadd.f32 %v5227_v62, %v9903_v22  ;;  %v5229_v57 = vpop.f32.mrb[217].mxu0  ;;  %v5518_v46 = vpop.f32.mrb[217].mxu1  ;;  %v916_v22 = vld [vmem:[%s8098_s28 + $0x9e8] sm:$0xff] }
 0x2d4   : > { %v5230_v35 = vpop.f32.mrb[218].mxu0  ;;  %v5519_v47 = vpop.f32.mrb[218].mxu1  ;;  %v9907_v57 = vld [vmem:[#allocation8_spill] sm:$0xff] }
 0x2d5   : > { %v5231_v44 = vadd.f32 %v5230_v35, %v9904_v0  ;;  %v5232_v56 = vpop.f32.mrb[219].mxu0  ;;  %v9226_v11 = vadd.f32 %v5516_v63, %v5228_v9  ;;  %v5521_v50 = vpop.f32.mrb[219].mxu1  ;;  %v7462_v63 = vcombine.low %v892_v30, %v900_v55  ;;  %v924_v55 = vld [vmem:[%s8098_s28 + $0xa28] sm:$0xff] }
 0x2d6   : > { %v7460_v56 = vcombine.low %v891_v32, %v899_v33  ;;  %v923_v32 = vld [vmem:[%s8098_s28 + $0xa20] sm:$0xff] }
 0x2d7   : > { %9905 = vst [vmem:[#allocation6_spill] sm:$0xff] %v9226_v11  ;;  %5764 = vmatmul.mubr.bf16.gmra.mrb[68].mxu0 %v7444_v25  ;;  %v9228_v62 = vadd.f32 %v5519_v47, %v5231_v44  ;;  %6053 = vmatmul.mubr.bf16.gmra.mrb[68].mxu1 %v7446_v31  ;;  %v7477_v25 = vcombine.high %v907_v37, %v915_v26  ;;  %v9908_v31 = vld [vmem:[#allocation9_spill] sm:$0xff]  ;;  %v931_v33 = vld [vmem:[%s8098_s28 + $0xa60] sm:$0xff] }
 0x2d8   : > { %5771 = vmatprep.mubr.bf16.mxu0 %v7461_v42  ;;  %6060 = vmatprep.mubr.bf16.mxu1 %v7463_v8  ;;  %v7479_v8 = vcombine.high %v908_v28, %v916_v22 }
 0x2d9   : > { %9906 = vst [vmem:[#allocation7_spill] sm:$0xff] %v9228_v62 }
 0x2da   : > { %v5235_v60 = vpop.f32.mrb[220].mxu0  ;;  %v5524_v35 = vpop.f32.mrb[220].mxu1 }
 0x2db   : > { %v5236_v46 = vadd.f32 %v5235_v60, %v9907_v57  ;;  %v5237_v0 = vpop.f32.mrb[221].mxu0  ;;  %v5526_v9 = vpop.f32.mrb[221].mxu1  ;;  %v932_v57 = vld [vmem:[%s8098_s28 + $0xa68] sm:$0xff] }
 0x2dc   : > { %v5238_v50 = vpop.f32.mrb[222].mxu0  ;;  %v5527_v44 = vpop.f32.mrb[222].mxu1  ;;  %v9911_v0 = vld [vmem:[#allocation10_spill] sm:$0xff] }
 0x2dd   : > { %v5239_v42 = vadd.f32 %v5238_v50, %v9908_v31  ;;  %v5240_v47 = vpop.f32.mrb[223].mxu0  ;;  %v9236_v62 = vadd.f32 %v5524_v35, %v5236_v46  ;;  %v5529_v11 = vpop.f32.mrb[223].mxu1  ;;  %v7478_v35 = vcombine.low %v908_v28, %v916_v22  ;;  %v940_v22 = vld [vmem:[%s8098_s28 + $0xaa8] sm:$0xff] }
 0x2de   : > { %v7476_v47 = vcombine.low %v907_v37, %v915_v26  ;;  %v939_v37 = vld [vmem:[%s8098_s28 + $0xaa0] sm:$0xff] }
 0x2df   : > { %9909 = vst [vmem:[#allocation8_spill] sm:$0xff] %v9236_v62  ;;  %5772 = vmatmul.mubr.bf16.gmra.mrb[72].mxu0 %v7460_v56  ;;  %v9238_v60 = vadd.f32 %v5527_v44, %v5239_v42  ;;  %6061 = vmatmul.mubr.bf16.gmra.mrb[72].mxu1 %v7462_v63  ;;  %v7493_v56 = vcombine.high %v923_v32, %v931_v33  ;;  %v9912_v63 = vld [vmem:[#allocation11_spill] sm:$0xff] }
 0x2e0   : > { %5779 = vmatprep.mubr.bf16.mxu0 %v7477_v25  ;;  %6068 = vmatprep.mubr.bf16.mxu1 %v7479_v8  ;;  %v7495_v8 = vcombine.high %v924_v55, %v932_v57  ;;  %v947_v26 = vld [vmem:[%s8098_s28 + $0xae0] sm:$0xff] }
 0x2e1   : > { %9910 = vst [vmem:[#allocation9_spill] sm:$0xff] %v9238_v60 }
 0x2e2   : > { %v5243_v30 = vpop.f32.mrb[224].mxu0  ;;  %v5532_v50 = vpop.f32.mrb[224].mxu1 }
 0x2e3   : > { %v5244_v9 = vadd.f32 %v5243_v30, %v9911_v0  ;;  %v5245_v31 = vpop.f32.mrb[225].mxu0  ;;  %v5534_v46 = vpop.f32.mrb[225].mxu1  ;;  %v948_v0 = vld [vmem:[%s8098_s28 + $0xae8] sm:$0xff] }
 0x2e4   : > { %v5246_v11 = vpop.f32.mrb[226].mxu0  ;;  %v5535_v42 = vpop.f32.mrb[226].mxu1  ;;  %v9915_v31 = vld [vmem:[#allocation12_spill] sm:$0xff] }
 0x2e5   : > { %v5247_v25 = vadd.f32 %v5246_v11, %v9912_v63  ;;  %v5248_v44 = vpop.f32.mrb[227].mxu0  ;;  %v9246_v60 = vadd.f32 %v5532_v50, %v5244_v9  ;;  %v5537_v62 = vpop.f32.mrb[227].mxu1  ;;  %v7494_v50 = vcombine.low %v924_v55, %v932_v57  ;;  %v956_v57 = vld [vmem:[%s8098_s28 + $0xb28] sm:$0xff] }
 0x2e6   : > { %v7492_v44 = vcombine.low %v923_v32, %v931_v33  ;;  %v955_v32 = vld [vmem:[%s8098_s28 + $0xb20] sm:$0xff] }
 0x2e7   : > { %9913 = vst [vmem:[#allocation10_spill] sm:$0xff] %v9246_v60  ;;  %5780 = vmatmul.mubr.bf16.gmra.mrb[76].mxu0 %v7476_v47  ;;  %v9248_v30 = vadd.f32 %v5535_v42, %v5247_v25  ;;  %6069 = vmatmul.mubr.bf16.gmra.mrb[76].mxu1 %v7478_v35  ;;  %v7509_v47 = vcombine.high %v939_v37, %v947_v26  ;;  %v9916_v35 = vld [vmem:[#allocation13_spill] sm:$0xff]  ;;  %v963_v33 = vld [vmem:[%s8098_s28 + $0xb60] sm:$0xff] }
 0x2e8   : > { %5787 = vmatprep.mubr.bf16.mxu0 %v7493_v56  ;;  %6076 = vmatprep.mubr.bf16.mxu1 %v7495_v8  ;;  %v7511_v8 = vcombine.high %v940_v22, %v948_v0 }
 0x2e9   : > { %9914 = vst [vmem:[#allocation11_spill] sm:$0xff] %v9248_v30 }
 0x2ea   : > { %v5251_v28 = vpop.f32.mrb[228].mxu0  ;;  %v5540_v11 = vpop.f32.mrb[228].mxu1 }
 0x2eb   : > { %v5252_v46 = vadd.f32 %v5251_v28, %v9915_v31  ;;  %v5253_v63 = vpop.f32.mrb[229].mxu0  ;;  %v5542_v9 = vpop.f32.mrb[229].mxu1  ;;  %v964_v31 = vld [vmem:[%s8098_s28 + $0xb68] sm:$0xff] }
 0x2ec   : > { %v5254_v62 = vpop.f32.mrb[230].mxu0  ;;  %v5543_v25 = vpop.f32.mrb[230].mxu1  ;;  %v9919_v63 = vld [vmem:[#allocation14_spill] sm:$0xff] }
 0x2ed   : > { %v5255_v56 = vadd.f32 %v5254_v62, %v9916_v35  ;;  %v5256_v42 = vpop.f32.mrb[231].mxu0  ;;  %v9256_v30 = vadd.f32 %v5540_v11, %v5252_v46  ;;  %v5545_v60 = vpop.f32.mrb[231].mxu1  ;;  %v7510_v11 = vcombine.low %v940_v22, %v948_v0  ;;  %v972_v0 = vld [vmem:[%s8098_s28 + $0xba8] sm:$0xff] }
 0x2ee   : > { %v7508_v42 = vcombine.low %v939_v37, %v947_v26  ;;  %v971_v37 = vld [vmem:[%s8098_s28 + $0xba0] sm:$0xff] }
 0x2ef   : > { %9917 = vst [vmem:[#allocation12_spill] sm:$0xff] %v9256_v30  ;;  %5788 = vmatmul.mubr.bf16.gmra.mrb[80].mxu0 %v7492_v44  ;;  %v9258_v28 = vadd.f32 %v5543_v25, %v5255_v56  ;;  %6077 = vmatmul.mubr.bf16.gmra.mrb[80].mxu1 %v7494_v50  ;;  %v7525_v44 = vcombine.high %v955_v32, %v963_v33  ;;  %v9920_v50 = vld [vmem:[#allocation15_spill] sm:$0xff] }
 0x2f0   : > { %5795 = vmatprep.mubr.bf16.mxu0 %v7509_v47  ;;  %6084 = vmatprep.mubr.bf16.mxu1 %v7511_v8  ;;  %v7527_v8 = vcombine.high %v956_v57, %v964_v31  ;;  %v979_v26 = vld [vmem:[%s8098_s28 + $0xbe0] sm:$0xff] }
 0x2f1   : > { %9918 = vst [vmem:[#allocation13_spill] sm:$0xff] %v9258_v28 }
 0x2f2   : > { %v5259_v55 = vpop.f32.mrb[232].mxu0  ;;  %v5548_v62 = vpop.f32.mrb[232].mxu1 }
 0x2f3   : > { %v5260_v9 = vadd.f32 %v5259_v55, %v9919_v63  ;;  %v5261_v35 = vpop.f32.mrb[233].mxu0  ;;  %v5550_v46 = vpop.f32.mrb[233].mxu1  ;;  %v980_v63 = vld [vmem:[%s8098_s28 + $0xbe8] sm:$0xff] }
 0x2f4   : > { %v5262_v60 = vpop.f32.mrb[234].mxu0  ;;  %v5551_v56 = vpop.f32.mrb[234].mxu1  ;;  %v9923_v35 = vld [vmem:[#allocation16_spill] sm:$0xff] }
 0x2f5   : > { %v5263_v47 = vadd.f32 %v5262_v60, %v9920_v50  ;;  %v5264_v25 = vpop.f32.mrb[235].mxu0  ;;  %v9266_v28 = vadd.f32 %v5548_v62, %v5260_v9  ;;  %v5553_v30 = vpop.f32.mrb[235].mxu1  ;;  %v7526_v62 = vcombine.low %v956_v57, %v964_v31  ;;  %v988_v31 = vld [vmem:[%s8098_s28 + $0xc28] sm:$0xff] }
 0x2f6   : > { %v7524_v25 = vcombine.low %v955_v32, %v963_v33  ;;  %v987_v32 = vld [vmem:[%s8098_s28 + $0xc20] sm:$0xff] }
 0x2f7   : > { %9921 = vst [vmem:[#allocation14_spill] sm:$0xff] %v9266_v28  ;;  %5796 = vmatmul.mubr.bf16.gmra.mrb[84].mxu0 %v7508_v42  ;;  %v9268_v55 = vadd.f32 %v5551_v56, %v5263_v47  ;;  %6085 = vmatmul.mubr.bf16.gmra.mrb[84].mxu1 %v7510_v11  ;;  %v7541_v42 = vcombine.high %v971_v37, %v979_v26  ;;  %v9924_v11 = vld [vmem:[#allocation17_spill] sm:$0xff]  ;;  %v995_v33 = vld [vmem:[%s8098_s28 + $0xc60] sm:$0xff] }
 0x2f8   : > { %5803 = vmatprep.mubr.bf16.mxu0 %v7525_v44  ;;  %6092 = vmatprep.mubr.bf16.mxu1 %v7527_v8  ;;  %v7543_v8 = vcombine.high %v972_v0, %v980_v63 }
 0x2f9   : > { %9922 = vst [vmem:[#allocation15_spill] sm:$0xff] %v9268_v55 }
 0x2fa   : > { %v5267_v22 = vpop.f32.mrb[236].mxu0  ;;  %v5556_v60 = vpop.f32.mrb[236].mxu1 }
 0x2fb   : > { %v5268_v46 = vadd.f32 %v5267_v22, %v9923_v35  ;;  %v5269_v50 = vpop.f32.mrb[237].mxu0  ;;  %v5558_v9 = vpop.f32.mrb[237].mxu1  ;;  %v996_v35 = vld [vmem:[%s8098_s28 + $0xc68] sm:$0xff] }
 0x2fc   : > { %v5270_v30 = vpop.f32.mrb[238].mxu0  ;;  %v5559_v47 = vpop.f32.mrb[238].mxu1  ;;  %v9927_v50 = vld [vmem:[#allocation18_spill] sm:$0xff] }
 0x2fd   : > { %v5271_v44 = vadd.f32 %v5270_v30, %v9924_v11  ;;  %v5272_v56 = vpop.f32.mrb[239].mxu0  ;;  %v9276_v55 = vadd.f32 %v5556_v60, %v5268_v46  ;;  %v5561_v28 = vpop.f32.mrb[239].mxu1  ;;  %v7542_v60 = vcombine.low %v972_v0, %v980_v63  ;;  %v1004_v63 = vld [vmem:[%s8098_s28 + $0xca8] sm:$0xff] }
 0x2fe   : > { %v7540_v56 = vcombine.low %v971_v37, %v979_v26  ;;  %v1003_v37 = vld [vmem:[%s8098_s28 + $0xca0] sm:$0xff] }
 0x2ff   : > { %9925 = vst [vmem:[#allocation16_spill] sm:$0xff] %v9276_v55  ;;  %5804 = vmatmul.mubr.bf16.gmra.mrb[88].mxu0 %v7524_v25  ;;  %v9278_v22 = vadd.f32 %v5559_v47, %v5271_v44  ;;  %6093 = vmatmul.mubr.bf16.gmra.mrb[88].mxu1 %v7526_v62  ;;  %v7557_v25 = vcombine.high %v987_v32, %v995_v33  ;;  %v9928_v62 = vld [vmem:[#allocation19_spill] sm:$0xff] }
 0x300   : > { %5811 = vmatprep.mubr.bf16.mxu0 %v7541_v42  ;;  %6100 = vmatprep.mubr.bf16.mxu1 %v7543_v8  ;;  %v7559_v8 = vcombine.high %v988_v31, %v996_v35  ;;  %v1011_v26 = vld [vmem:[%s8098_s28 + $0xce0] sm:$0xff] }
 0x301   : > { %9926 = vst [vmem:[#allocation17_spill] sm:$0xff] %v9278_v22 }
 0x302   : > { %v5275_v57 = vpop.f32.mrb[240].mxu0  ;;  %v5564_v30 = vpop.f32.mrb[240].mxu1 }
 0x303   : > { %v5276_v9 = vadd.f32 %v5275_v57, %v9927_v50  ;;  %v5277_v11 = vpop.f32.mrb[241].mxu0  ;;  %v5566_v46 = vpop.f32.mrb[241].mxu1  ;;  %v1012_v50 = vld [vmem:[%s8098_s28 + $0xce8] sm:$0xff] }
 0x304   : > { %v5278_v28 = vpop.f32.mrb[242].mxu0  ;;  %v5567_v44 = vpop.f32.mrb[242].mxu1  ;;  %v9931_v11 = vld [vmem:[#allocation20_spill] sm:$0xff] }
 0x305   : > { %v5279_v42 = vadd.f32 %v5278_v28, %v9928_v62  ;;  %v5280_v47 = vpop.f32.mrb[243].mxu0  ;;  %v9286_v22 = vadd.f32 %v5564_v30, %v5276_v9  ;;  %v5569_v55 = vpop.f32.mrb[243].mxu1  ;;  %v7558_v30 = vcombine.low %v988_v31, %v996_v35  ;;  %v1020_v35 = vld [vmem:[%s8098_s28 + $0xd28] sm:$0xff] }
 0x306   : > { %v7556_v47 = vcombine.low %v987_v32, %v995_v33  ;;  %v1019_v32 = vld [vmem:[%s8098_s28 + $0xd20] sm:$0xff] }
 0x307   : > { %9929 = vst [vmem:[#allocation18_spill] sm:$0xff] %v9286_v22  ;;  %5812 = vmatmul.mubr.bf16.gmra.mrb[92].mxu0 %v7540_v56  ;;  %v9288_v57 = vadd.f32 %v5567_v44, %v5279_v42  ;;  %6101 = vmatmul.mubr.bf16.gmra.mrb[92].mxu1 %v7542_v60  ;;  %v7573_v56 = vcombine.high %v1003_v37, %v1011_v26  ;;  %v9932_v60 = vld [vmem:[#allocation21_spill] sm:$0xff]  ;;  %v1027_v33 = vld [vmem:[%s8098_s28 + $0xd60] sm:$0xff] }
 0x308   : > { %5819 = vmatprep.mubr.bf16.mxu0 %v7557_v25  ;;  %6108 = vmatprep.mubr.bf16.mxu1 %v7559_v8  ;;  %v7575_v8 = vcombine.high %v1004_v63, %v1012_v50 }
 0x309   : > { %9930 = vst [vmem:[#allocation19_spill] sm:$0xff] %v9288_v57 }
 0x30a   : > { %v5283_v0 = vpop.f32.mrb[244].mxu0  ;;  %v5572_v28 = vpop.f32.mrb[244].mxu1 }
 0x30b   : > { %v5284_v46 = vadd.f32 %v5283_v0, %v9931_v11  ;;  %v5285_v62 = vpop.f32.mrb[245].mxu0  ;;  %v5574_v9 = vpop.f32.mrb[245].mxu1  ;;  %v1028_v11 = vld [vmem:[%s8098_s28 + $0xd68] sm:$0xff] }
 0x30c   : > { %v5286_v55 = vpop.f32.mrb[246].mxu0  ;;  %v5575_v42 = vpop.f32.mrb[246].mxu1  ;;  %v9935_v62 = vld [vmem:[#allocation22_spill] sm:$0xff] }
 0x30d   : > { %v5287_v25 = vadd.f32 %v5286_v55, %v9932_v60  ;;  %v5288_v44 = vpop.f32.mrb[247].mxu0  ;;  %v9296_v57 = vadd.f32 %v5572_v28, %v5284_v46  ;;  %v5577_v22 = vpop.f32.mrb[247].mxu1  ;;  %v7574_v28 = vcombine.low %v1004_v63, %v1012_v50  ;;  %v1036_v50 = vld [vmem:[%s8098_s28 + $0xda8] sm:$0xff] }
 0x30e   : > { %v7572_v44 = vcombine.low %v1003_v37, %v1011_v26  ;;  %v1035_v37 = vld [vmem:[%s8098_s28 + $0xda0] sm:$0xff] }
 0x30f   : > { %9933 = vst [vmem:[#allocation20_spill] sm:$0xff] %v9296_v57  ;;  %5820 = vmatmul.mubr.bf16.gmra.mrb[96].mxu0 %v7556_v47  ;;  %v9298_v0 = vadd.f32 %v5575_v42, %v5287_v25  ;;  %6109 = vmatmul.mubr.bf16.gmra.mrb[96].mxu1 %v7558_v30  ;;  %v7589_v47 = vcombine.high %v1019_v32, %v1027_v33  ;;  %v9936_v30 = vld [vmem:[#allocation23_spill] sm:$0xff] }
 0x310   : > { %5827 = vmatprep.mubr.bf16.mxu0 %v7573_v56  ;;  %6116 = vmatprep.mubr.bf16.mxu1 %v7575_v8  ;;  %v7591_v8 = vcombine.high %v1020_v35, %v1028_v11  ;;  %v1043_v26 = vld [vmem:[%s8098_s28 + $0xde0] sm:$0xff] }
 0x311   : > { %9934 = vst [vmem:[#allocation21_spill] sm:$0xff] %v9298_v0 }
 0x312   : > { %v5291_v31 = vpop.f32.mrb[248].mxu0  ;;  %v5580_v55 = vpop.f32.mrb[248].mxu1 }
 0x313   : > { %v5292_v9 = vadd.f32 %v5291_v31, %v9935_v62  ;;  %v5293_v60 = vpop.f32.mrb[249].mxu0  ;;  %v5582_v46 = vpop.f32.mrb[249].mxu1  ;;  %v1044_v62 = vld [vmem:[%s8098_s28 + $0xde8] sm:$0xff] }
 0x314   : > { %v5294_v22 = vpop.f32.mrb[250].mxu0  ;;  %v5583_v25 = vpop.f32.mrb[250].mxu1  ;;  %v9939_v60 = vld [vmem:[#allocation24_spill] sm:$0xff] }
 0x315   : > { %v5295_v56 = vadd.f32 %v5294_v22, %v9936_v30  ;;  %v5296_v42 = vpop.f32.mrb[251].mxu0  ;;  %v9306_v0 = vadd.f32 %v5580_v55, %v5292_v9  ;;  %v5585_v57 = vpop.f32.mrb[251].mxu1  ;;  %v7590_v55 = vcombine.low %v1020_v35, %v1028_v11  ;;  %v1052_v11 = vld [vmem:[%s8098_s28 + $0xe28] sm:$0xff] }
 0x316   : > { %v7588_v42 = vcombine.low %v1019_v32, %v1027_v33  ;;  %v1051_v32 = vld [vmem:[%s8098_s28 + $0xe20] sm:$0xff] }
 0x317   : > { %9937 = vst [vmem:[#allocation22_spill] sm:$0xff] %v9306_v0  ;;  %5828 = vmatmul.mubr.bf16.gmra.mrb[100].mxu0 %v7572_v44  ;;  %v9308_v31 = vadd.f32 %v5583_v25, %v5295_v56  ;;  %6117 = vmatmul.mubr.bf16.gmra.mrb[100].mxu1 %v7574_v28  ;;  %v7605_v44 = vcombine.high %v1035_v37, %v1043_v26  ;;  %v9940_v28 = vld [vmem:[#allocation25_spill] sm:$0xff]  ;;  %v1059_v33 = vld [vmem:[%s8098_s28 + $0xe60] sm:$0xff] }
 0x318   : > { %5835 = vmatprep.mubr.bf16.mxu0 %v7589_v47  ;;  %6124 = vmatprep.mubr.bf16.mxu1 %v7591_v8  ;;  %v7607_v8 = vcombine.high %v1036_v50, %v1044_v62 }
 0x319   : > { %9938 = vst [vmem:[#allocation23_spill] sm:$0xff] %v9308_v31 }
 0x31a   : > { %v5299_v63 = vpop.f32.mrb[252].mxu0  ;;  %v5588_v22 = vpop.f32.mrb[252].mxu1 }
 0x31b   : > { %v5300_v46 = vadd.f32 %v5299_v63, %v9939_v60  ;;  %v5301_v30 = vpop.f32.mrb[253].mxu0  ;;  %v5590_v9 = vpop.f32.mrb[253].mxu1  ;;  %v1060_v60 = vld [vmem:[%s8098_s28 + $0xe68] sm:$0xff] }
 0x31c   : > { %v5302_v57 = vpop.f32.mrb[254].mxu0  ;;  %v5591_v56 = vpop.f32.mrb[254].mxu1 }
 0x31d   : > { %v5303_v47 = vadd.f32 %v5302_v57, %v9940_v28  ;;  %v5304_v25 = vpop.f32.mrb[255].mxu0  ;;  %v9316_v31 = vadd.f32 %v5588_v22, %v5300_v46  ;;  %v5593_v0 = vpop.f32.mrb[255].mxu1  ;;  %v7604_v28 = vcombine.low %v1035_v37, %v1043_v26  ;;  %v7606_v22 = vcombine.low %v1036_v50, %v1044_v62  ;;  %v1067_v37 = vld [vmem:[%s8098_s28 + $0xea0] sm:$0xff]  ;;  %v1068_v62 = vld [vmem:[%s8098_s28 + $0xea8] sm:$0xff] }
 0x31e   : > { %v7623_v25 = vcombine.high %v1052_v11, %v1060_v60  ;;  %v1075_v26 = vld [vmem:[%s8098_s28 + $0xee0] sm:$0xff] }
 0x31f   : > { %5836 = vmatmul.mubr.bf16.gmra.mrb[104].mxu0 %v7588_v42  ;;  %v9318_v63 = vadd.f32 %v5591_v56, %v5303_v47  ;;  %6125 = vmatmul.mubr.bf16.gmra.mrb[104].mxu1 %v7590_v55  ;;  %v7621_v42 = vcombine.high %v1051_v32, %v1059_v33 }
 0x320   : > { %5843 = vmatprep.mubr.bf16.mxu0 %v7605_v44  ;;  %6132 = vmatprep.mubr.bf16.mxu1 %v7607_v8 }
 0x322   : > { %v5629_v35 = vpop.f32.mrb[0].mxu0  ;;  %v5918_v9 = vpop.f32.mrb[0].mxu1 }
 0x323   : > { %v5630_v30 = vadd.f32 %v5629_v35, %v8824_v20  ;;  %v5631_v57 = vpop.f32.mrb[1].mxu0  ;;  %v5920_v46 = vpop.f32.mrb[1].mxu1  ;;  %v1076_v35 = vld [vmem:[%s8098_s28 + $0xee8] sm:$0xff] }
 0x324   : > { %v5632_v0 = vpop.f32.mrb[2].mxu0  ;;  %v5921_v47 = vpop.f32.mrb[2].mxu1 }
 0x325   : > { %v9325_v55 = vadd.f32 %v5918_v9, %v5630_v30  ;;  %v5633_v44 = vadd.f32 %v5632_v0, %v8826_v43  ;;  %v5634_v56 = vpop.f32.mrb[3].mxu0  ;;  %v5923_v8 = vpop.f32.mrb[3].mxu1  ;;  %v7620_v43 = vcombine.low %v1051_v32, %v1059_v33  ;;  %v1083_v32 = vld [vmem:[%s8098_s28 + $0xf20] sm:$0xff] }
 0x326   : > { %v1091_v33 = vld [vmem:[%s8098_s28 + $0xf60] sm:$0xff] }
 0x327   : > { %v9328_v20 = vadd.f32 %v5921_v47, %v5633_v44  ;;  %5844 = vmatmul.mubr.bf16.gmra.mrb[108].mxu0 %v7604_v28  ;;  %6133 = vmatmul.mubr.bf16.gmra.mrb[108].mxu1 %v7606_v22  ;;  %v7622_v44 = vcombine.low %v1052_v11, %v1060_v60  ;;  %v7637_v28 = vcombine.high %v1067_v37, %v1075_v26  ;;  %v1084_v60 = vld [vmem:[%s8098_s28 + $0xf28] sm:$0xff] }
 0x328   : > { %5851 = vmatprep.mubr.bf16.mxu0 %v7621_v42  ;;  %6140 = vmatprep.mubr.bf16.mxu1 %v7623_v25  ;;  %v7639_v25 = vcombine.high %v1068_v62, %v1076_v35 }
 0x32a   : > { %v5637_v50 = vpop.f32.mrb[4].mxu0  ;;  %v5926_v9 = vpop.f32.mrb[4].mxu1 }
 0x32b   : > { %v5638_v30 = vadd.f32 %v5637_v50, %v8834_v41  ;;  %v5639_v57 = vpop.f32.mrb[5].mxu0  ;;  %v5928_v46 = vpop.f32.mrb[5].mxu1  ;;  %v1092_v50 = vld [vmem:[%s8098_s28 + $0xf68] sm:$0xff] }
 0x32c   : > { %v5640_v0 = vpop.f32.mrb[6].mxu0  ;;  %v5929_v47 = vpop.f32.mrb[6].mxu1 }
 0x32d   : > { %v9335_v22 = vadd.f32 %v5926_v9, %v5638_v30  ;;  %v5641_v42 = vadd.f32 %v5640_v0, %v8836_v61  ;;  %v5642_v56 = vpop.f32.mrb[7].mxu0  ;;  %v5931_v8 = vpop.f32.mrb[7].mxu1  ;;  %v7636_v61 = vcombine.low %v1067_v37, %v1075_v26  ;;  %v1099_v37 = vld [vmem:[%s8098_s28 + $0xfa0] sm:$0xff] }
 0x32e   : > { %v1107_v26 = vld [vmem:[%s8098_s28 + $0xfe0] sm:$0xff] }
 0x32f   : > { %v9338_v41 = vadd.f32 %v5929_v47, %v5641_v42  ;;  %5852 = vmatmul.mubr.bf16.gmra.mrb[112].mxu0 %v7620_v43  ;;  %6141 = vmatmul.mubr.bf16.gmra.mrb[112].mxu1 %v7622_v44  ;;  %v7638_v42 = vcombine.low %v1068_v62, %v1076_v35  ;;  %v7653_v43 = vcombine.high %v1083_v32, %v1091_v33  ;;  %v1100_v35 = vld [vmem:[%s8098_s28 + $0xfa8] sm:$0xff] }
 0x330   : > { %5859 = vmatprep.mubr.bf16.mxu0 %v7637_v28  ;;  %6148 = vmatprep.mubr.bf16.mxu1 %v7639_v25  ;;  %v7655_v25 = vcombine.high %v1084_v60, %v1092_v50 }
 0x332   : > { %v5645_v11 = vpop.f32.mrb[8].mxu0  ;;  %v5934_v9 = vpop.f32.mrb[8].mxu1 }
 0x333   : > { %v5646_v30 = vadd.f32 %v5645_v11, %v8844_v23  ;;  %v5647_v57 = vpop.f32.mrb[9].mxu0  ;;  %v5936_v46 = vpop.f32.mrb[9].mxu1  ;;  %v1108_v11 = vld [vmem:[%s8098_s28 + $0xfe8] sm:$0xff] }
 0x334   : > { %v5648_v0 = vpop.f32.mrb[10].mxu0  ;;  %v5937_v47 = vpop.f32.mrb[10].mxu1 }
 0x335   : > { %v9345_v44 = vadd.f32 %v5934_v9, %v5646_v30  ;;  %v5649_v28 = vadd.f32 %v5648_v0, %v8846_v16  ;;  %v5650_v56 = vpop.f32.mrb[11].mxu0  ;;  %v5939_v8 = vpop.f32.mrb[11].mxu1  ;;  %v7652_v16 = vcombine.low %v1083_v32, %v1091_v33  ;;  %v605_v32 = vld [vmem:[%s8098_s28 + $0x30] sm:$0xff] }
 0x336   : > { %v613_v33 = vld [vmem:[%s8098_s28 + $0x70] sm:$0xff] }
 0x337   : > { %v9348_v23 = vadd.f32 %v5937_v47, %v5649_v28  ;;  %5860 = vmatmul.mubr.bf16.gmra.mrb[116].mxu0 %v7636_v61  ;;  %6149 = vmatmul.mubr.bf16.gmra.mrb[116].mxu1 %v7638_v42  ;;  %v7654_v28 = vcombine.low %v1084_v60, %v1092_v50  ;;  %v7669_v61 = vcombine.high %v1099_v37, %v1107_v26  ;;  %v606_v50 = vld [vmem:[%s8098_s28 + $0x38] sm:$0xff] }
 0x338   : > { %5867 = vmatprep.mubr.bf16.mxu0 %v7653_v43  ;;  %6156 = vmatprep.mubr.bf16.mxu1 %v7655_v25  ;;  %v7671_v25 = vcombine.high %v1100_v35, %v1108_v11 }
 0x33a   : > { %v5653_v62 = vpop.f32.mrb[12].mxu0  ;;  %v5942_v9 = vpop.f32.mrb[12].mxu1 }
 0x33b   : > { %v5654_v30 = vadd.f32 %v5653_v62, %v8854_v58  ;;  %v5655_v57 = vpop.f32.mrb[13].mxu0  ;;  %v5944_v46 = vpop.f32.mrb[13].mxu1  ;;  %v614_v62 = vld [vmem:[%s8098_s28 + $0x78] sm:$0xff] }
 0x33c   : > { %v5656_v0 = vpop.f32.mrb[14].mxu0  ;;  %v5945_v47 = vpop.f32.mrb[14].mxu1 }
 0x33d   : > { %v9355_v42 = vadd.f32 %v5942_v9, %v5654_v30  ;;  %v5657_v43 = vadd.f32 %v5656_v0, %v8856_v34  ;;  %v5658_v56 = vpop.f32.mrb[15].mxu0  ;;  %v5947_v8 = vpop.f32.mrb[15].mxu1  ;;  %v7668_v34 = vcombine.low %v1099_v37, %v1107_v26  ;;  %v621_v37 = vld [vmem:[%s8098_s28 + $0xb0] sm:$0xff] }
 0x33e   : > { %v629_v26 = vld [vmem:[%s8098_s28 + $0xf0] sm:$0xff] }
 0x33f   : > { %v9358_v58 = vadd.f32 %v5945_v47, %v5657_v43  ;;  %5868 = vmatmul.mubr.bf16.gmra.mrb[120].mxu0 %v7652_v16  ;;  %6157 = vmatmul.mubr.bf16.gmra.mrb[120].mxu1 %v7654_v28  ;;  %v7670_v43 = vcombine.low %v1100_v35, %v1108_v11  ;;  %v7177_v16 = vcombine.high %v605_v32, %v613_v33  ;;  %v622_v11 = vld [vmem:[%s8098_s28 + $0xb8] sm:$0xff] }
 0x340   : > { %5875 = vmatprep.mubr.bf16.mxu0 %v7669_v61  ;;  %6164 = vmatprep.mubr.bf16.mxu1 %v7671_v25  ;;  %v7179_v25 = vcombine.high %v606_v50, %v614_v62 }
 0x342   : > { %v5661_v60 = vpop.f32.mrb[16].mxu0  ;;  %v5950_v9 = vpop.f32.mrb[16].mxu1 }
 0x343   : > { %v5662_v30 = vadd.f32 %v5661_v60, %v8864_v1  ;;  %v5663_v57 = vpop.f32.mrb[17].mxu0  ;;  %v5952_v46 = vpop.f32.mrb[17].mxu1  ;;  %v630_v60 = vld [vmem:[%s8098_s28 + $0xf8] sm:$0xff] }
 0x344   : > { %v5664_v0 = vpop.f32.mrb[18].mxu0  ;;  %v5953_v47 = vpop.f32.mrb[18].mxu1 }
 0x345   : > { %v9365_v28 = vadd.f32 %v5950_v9, %v5662_v30  ;;  %v5665_v61 = vadd.f32 %v5664_v0, %v8866_v54  ;;  %v5666_v56 = vpop.f32.mrb[19].mxu0  ;;  %v5955_v8 = vpop.f32.mrb[19].mxu1  ;;  %v7176_v54 = vcombine.low %v605_v32, %v613_v33  ;;  %v637_v32 = vld [vmem:[%s8098_s28 + $0x130] sm:$0xff] }
 0x346   : > { %v7195_v8 = vcombine.high %v622_v11, %v630_v60  ;;  %v645_v33 = vld [vmem:[%s8098_s28 + $0x170] sm:$0xff] }
 0x347   : > { %v9368_v1 = vadd.f32 %v5953_v47, %v5665_v61  ;;  %5876 = vmatmul.mubr.bf16.gmra.mrb[124].mxu0 %v7668_v34  ;;  %6165 = vmatmul.mubr.bf16.gmra.mrb[124].mxu1 %v7670_v43  ;;  %v7178_v61 = vcombine.low %v606_v50, %v614_v62  ;;  %v7193_v34 = vcombine.high %v621_v37, %v629_v26  ;;  %v638_v62 = vld [vmem:[%s8098_s28 + $0x138] sm:$0xff] }
 0x348   : > { %6205 = vmatprep.mubr.bf16.mxu0 %v7177_v16  ;;  %6494 = vmatprep.mubr.bf16.mxu1 %v7179_v25  ;;  %v9942_v16 = vld [vmem:[#allocation26_spill] sm:$0xff] }
 0x349   : > { %9941 = vst [vmem:[#allocation24_spill] sm:$0xff] %v9368_v1 }
 0x34a   : > { %v5669_v35 = vpop.f32.mrb[20].mxu0  ;;  %v5958_v9 = vpop.f32.mrb[20].mxu1 }
 0x34b   : > { %v5670_v30 = vadd.f32 %v5669_v35, %v8880_v14  ;;  %v5671_v57 = vpop.f32.mrb[21].mxu0  ;;  %v5960_v46 = vpop.f32.mrb[21].mxu1  ;;  %v646_v35 = vld [vmem:[%s8098_s28 + $0x178] sm:$0xff] }
 0x34c   : > { %v5672_v0 = vpop.f32.mrb[22].mxu0  ;;  %v5961_v56 = vpop.f32.mrb[22].mxu1  ;;  %v7192_v46 = vcombine.low %v621_v37, %v629_v26  ;;  %v653_v37 = vld [vmem:[%s8098_s28 + $0x1b0] sm:$0xff] }
 0x34d   : > { %v9375_v43 = vadd.f32 %v5958_v9, %v5670_v30  ;;  %v5673_v47 = vadd.f32 %v5672_v0, %v9942_v16  ;;  %v5674_v25 = vpop.f32.mrb[23].mxu0  ;;  %v5963_v1 = vpop.f32.mrb[23].mxu1  ;;  %v7194_v16 = vcombine.low %v622_v11, %v630_v60  ;;  %v661_v26 = vld [vmem:[%s8098_s28 + $0x1f0] sm:$0xff]  ;;  %v654_v60 = vld [vmem:[%s8098_s28 + $0x1b8] sm:$0xff] }
 0x34e   : > { %v7211_v25 = vcombine.high %v638_v62, %v646_v35 }
 0x34f   : > { %v9378_v14 = vadd.f32 %v5961_v56, %v5673_v47  ;;  %6206 = vmatmul.mubr.bf16.vlgmr.msra.gmra.mrb[128].mxu0 %v7176_v54  ;;  %6495 = vmatmul.mubr.bf16.vlgmr.msra.gmra.mrb[128].mxu1 %v7178_v61  ;;  %v7209_v54 = vcombine.high %v637_v32, %v645_v33 }
 0x350   : > { %6213 = vmatprep.mubr.bf16.mxu0 %v7193_v34  ;;  %6502 = vmatprep.mubr.bf16.mxu1 %v7195_v8 }
 0x352   : > { %v5677_v50 = vpop.f32.mrb[24].mxu0  ;;  %v5966_v9 = vpop.f32.mrb[24].mxu1 }
 0x353   : > { %v5678_v30 = vadd.f32 %v5677_v50, %v8908_v15  ;;  %v5679_v57 = vpop.f32.mrb[25].mxu0  ;;  %v5968_v0 = vpop.f32.mrb[25].mxu1  ;;  %v662_v50 = vld [vmem:[%s8098_s28 + $0x1f8] sm:$0xff] }
 0x354   : > { %v5680_v1 = vpop.f32.mrb[26].mxu0  ;;  %v5969_v47 = vpop.f32.mrb[26].mxu1 }
 0x355   : > { %v9385_v61 = vadd.f32 %v5966_v9, %v5678_v30  ;;  %v5681_v34 = vadd.f32 %v5680_v1, %v8914_v5  ;;  %v5682_v56 = vpop.f32.mrb[27].mxu0  ;;  %v5971_v8 = vpop.f32.mrb[27].mxu1  ;;  %v7208_v5 = vcombine.low %v637_v32, %v645_v33  ;;  %v669_v32 = vld [vmem:[%s8098_s28 + $0x230] sm:$0xff] }
 0x356   : > { %v677_v33 = vld [vmem:[%s8098_s28 + $0x270] sm:$0xff] }
 0x357   : > { %v9388_v15 = vadd.f32 %v5969_v47, %v5681_v34  ;;  %6214 = vmatmul.mubr.bf16.gmra.mrb[132].mxu0 %v7192_v46  ;;  %6503 = vmatmul.mubr.bf16.gmra.mrb[132].mxu1 %v7194_v16  ;;  %v7210_v34 = vcombine.low %v638_v62, %v646_v35  ;;  %v7225_v46 = vcombine.high %v653_v37, %v661_v26  ;;  %v670_v35 = vld [vmem:[%s8098_s28 + $0x238] sm:$0xff] }
 0x358   : > { %6221 = vmatprep.mubr.bf16.mxu0 %v7209_v54  ;;  %6510 = vmatprep.mubr.bf16.mxu1 %v7211_v25  ;;  %v7227_v25 = vcombine.high %v654_v60, %v662_v50 }
 0x35a   : > { %v5685_v11 = vpop.f32.mrb[28].mxu0  ;;  %v5974_v9 = vpop.f32.mrb[28].mxu1 }
 0x35b   : > { %v5686_v30 = vadd.f32 %v5685_v11, %v8947_v59  ;;  %v5687_v57 = vpop.f32.mrb[29].mxu0  ;;  %v5976_v0 = vpop.f32.mrb[29].mxu1  ;;  %v678_v11 = vld [vmem:[%s8098_s28 + $0x278] sm:$0xff] }
 0x35c   : > { %v5688_v1 = vpop.f32.mrb[30].mxu0  ;;  %v5977_v47 = vpop.f32.mrb[30].mxu1 }
 0x35d   : > { %v9395_v16 = vadd.f32 %v5974_v9, %v5686_v30  ;;  %v5689_v54 = vadd.f32 %v5688_v1, %v8954_v13  ;;  %v5690_v56 = vpop.f32.mrb[31].mxu0  ;;  %v5979_v8 = vpop.f32.mrb[31].mxu1  ;;  %v7224_v13 = vcombine.low %v653_v37, %v661_v26  ;;  %v685_v37 = vld [vmem:[%s8098_s28 + $0x2b0] sm:$0xff] }
 0x35e   : > { %v693_v26 = vld [vmem:[%s8098_s28 + $0x2f0] sm:$0xff] }
 0x35f   : > { %v9398_v59 = vadd.f32 %v5977_v47, %v5689_v54  ;;  %6222 = vmatmul.mubr.bf16.gmra.mrb[136].mxu0 %v7208_v5  ;;  %6511 = vmatmul.mubr.bf16.gmra.mrb[136].mxu1 %v7210_v34  ;;  %v7226_v54 = vcombine.low %v654_v60, %v662_v50  ;;  %v7241_v5 = vcombine.high %v669_v32, %v677_v33  ;;  %v686_v50 = vld [vmem:[%s8098_s28 + $0x2b8] sm:$0xff] }
 0x360   : > { %6229 = vmatprep.mubr.bf16.mxu0 %v7225_v46  ;;  %6518 = vmatprep.mubr.bf16.mxu1 %v7227_v25  ;;  %v7243_v25 = vcombine.high %v670_v35, %v678_v11 }
 0x362   : > { %v5693_v62 = vpop.f32.mrb[32].mxu0  ;;  %v5982_v9 = vpop.f32.mrb[32].mxu1 }
 0x363   : > { %v5694_v30 = vadd.f32 %v5693_v62, %v8989_v21  ;;  %v5695_v57 = vpop.f32.mrb[33].mxu0  ;;  %v5984_v0 = vpop.f32.mrb[33].mxu1  ;;  %v694_v62 = vld [vmem:[%s8098_s28 + $0x2f8] sm:$0xff] }
 0x364   : > { %v5696_v1 = vpop.f32.mrb[34].mxu0  ;;  %v5985_v47 = vpop.f32.mrb[34].mxu1 }
 0x365   : > { %v9405_v34 = vadd.f32 %v5982_v9, %v5694_v30  ;;  %v5697_v46 = vadd.f32 %v5696_v1, %v8996_v48  ;;  %v5698_v56 = vpop.f32.mrb[35].mxu0  ;;  %v5987_v8 = vpop.f32.mrb[35].mxu1  ;;  %v7240_v48 = vcombine.low %v669_v32, %v677_v33  ;;  %v701_v32 = vld [vmem:[%s8098_s28 + $0x330] sm:$0xff] }
 0x366   : > { %v709_v33 = vld [vmem:[%s8098_s28 + $0x370] sm:$0xff] }
 0x367   : > { %v9408_v21 = vadd.f32 %v5985_v47, %v5697_v46  ;;  %6230 = vmatmul.mubr.bf16.gmra.mrb[140].mxu0 %v7224_v13  ;;  %6519 = vmatmul.mubr.bf16.gmra.mrb[140].mxu1 %v7226_v54  ;;  %v7242_v46 = vcombine.low %v670_v35, %v678_v11  ;;  %v7257_v13 = vcombine.high %v685_v37, %v693_v26  ;;  %v702_v11 = vld [vmem:[%s8098_s28 + $0x338] sm:$0xff] }
 0x368   : > { %6237 = vmatprep.mubr.bf16.mxu0 %v7241_v5  ;;  %6526 = vmatprep.mubr.bf16.mxu1 %v7243_v25  ;;  %v7259_v25 = vcombine.high %v686_v50, %v694_v62 }
 0x36a   : > { %v5701_v60 = vpop.f32.mrb[36].mxu0  ;;  %v5990_v9 = vpop.f32.mrb[36].mxu1 }
 0x36b   : > { %v5702_v30 = vadd.f32 %v5701_v60, %v9031_v4  ;;  %v5703_v57 = vpop.f32.mrb[37].mxu0  ;;  %v5992_v0 = vpop.f32.mrb[37].mxu1  ;;  %v710_v60 = vld [vmem:[%s8098_s28 + $0x378] sm:$0xff] }
 0x36c   : > { %v5704_v1 = vpop.f32.mrb[38].mxu0  ;;  %v5993_v47 = vpop.f32.mrb[38].mxu1 }
 0x36d   : > { %v9415_v54 = vadd.f32 %v5990_v9, %v5702_v30  ;;  %v5705_v5 = vadd.f32 %v5704_v1, %v9038_v6  ;;  %v5706_v56 = vpop.f32.mrb[39].mxu0  ;;  %v5995_v8 = vpop.f32.mrb[39].mxu1  ;;  %v7256_v6 = vcombine.low %v685_v37, %v693_v26  ;;  %v717_v37 = vld [vmem:[%s8098_s28 + $0x3b0] sm:$0xff] }
 0x36e   : > { %v725_v26 = vld [vmem:[%s8098_s28 + $0x3f0] sm:$0xff] }
 0x36f   : > { %v9418_v4 = vadd.f32 %v5993_v47, %v5705_v5  ;;  %6238 = vmatmul.mubr.bf16.gmra.mrb[144].mxu0 %v7240_v48  ;;  %6527 = vmatmul.mubr.bf16.gmra.mrb[144].mxu1 %v7242_v46  ;;  %v7258_v5 = vcombine.low %v686_v50, %v694_v62  ;;  %v7273_v48 = vcombine.high %v701_v32, %v709_v33  ;;  %v718_v62 = vld [vmem:[%s8098_s28 + $0x3b8] sm:$0xff] }
 0x370   : > { %6245 = vmatprep.mubr.bf16.mxu0 %v7257_v13  ;;  %6534 = vmatprep.mubr.bf16.mxu1 %v7259_v25  ;;  %v7275_v25 = vcombine.high %v702_v11, %v710_v60 }
 0x372   : > { %v5709_v35 = vpop.f32.mrb[40].mxu0  ;;  %v5998_v9 = vpop.f32.mrb[40].mxu1 }
 0x373   : > { %v5710_v30 = vadd.f32 %v5709_v35, %v9061_v10  ;;  %v5711_v57 = vpop.f32.mrb[41].mxu0  ;;  %v6000_v0 = vpop.f32.mrb[41].mxu1  ;;  %v726_v35 = vld [vmem:[%s8098_s28 + $0x3f8] sm:$0xff] }
 0x374   : > { %v5712_v1 = vpop.f32.mrb[42].mxu0  ;;  %v6001_v47 = vpop.f32.mrb[42].mxu1 }
 0x375   : > { %v9425_v46 = vadd.f32 %v5998_v9, %v5710_v30  ;;  %v5713_v13 = vadd.f32 %v5712_v1, %v9068_v51  ;;  %v5714_v56 = vpop.f32.mrb[43].mxu0  ;;  %v6003_v8 = vpop.f32.mrb[43].mxu1  ;;  %v7272_v51 = vcombine.low %v701_v32, %v709_v33  ;;  %v733_v32 = vld [vmem:[%s8098_s28 + $0x430] sm:$0xff] }
 0x376   : > { %v741_v33 = vld [vmem:[%s8098_s28 + $0x470] sm:$0xff] }
 0x377   : > { %v9428_v10 = vadd.f32 %v6001_v47, %v5713_v13  ;;  %6246 = vmatmul.mubr.bf16.gmra.mrb[148].mxu0 %v7256_v6  ;;  %6535 = vmatmul.mubr.bf16.gmra.mrb[148].mxu1 %v7258_v5  ;;  %v7274_v13 = vcombine.low %v702_v11, %v710_v60  ;;  %v7289_v6 = vcombine.high %v717_v37, %v725_v26  ;;  %v734_v60 = vld [vmem:[%s8098_s28 + $0x438] sm:$0xff] }
 0x378   : > { %6253 = vmatprep.mubr.bf16.mxu0 %v7273_v48  ;;  %6542 = vmatprep.mubr.bf16.mxu1 %v7275_v25  ;;  %v7291_v25 = vcombine.high %v718_v62, %v726_v35 }
 0x37a   : > { %v5717_v50 = vpop.f32.mrb[44].mxu0  ;;  %v6006_v9 = vpop.f32.mrb[44].mxu1 }
 0x37b   : > { %v5718_v30 = vadd.f32 %v5717_v50, %v9078_v7  ;;  %v5719_v57 = vpop.f32.mrb[45].mxu0  ;;  %v6008_v0 = vpop.f32.mrb[45].mxu1  ;;  %v742_v50 = vld [vmem:[%s8098_s28 + $0x478] sm:$0xff] }
 0x37c   : > { %v5720_v1 = vpop.f32.mrb[46].mxu0  ;;  %v6009_v47 = vpop.f32.mrb[46].mxu1 }
 0x37d   : > { %v9435_v5 = vadd.f32 %v6006_v9, %v5718_v30  ;;  %v5721_v48 = vadd.f32 %v5720_v1, %v9080_v39  ;;  %v5722_v56 = vpop.f32.mrb[47].mxu0  ;;  %v6011_v8 = vpop.f32.mrb[47].mxu1  ;;  %v7288_v39 = vcombine.low %v717_v37, %v725_v26  ;;  %v749_v37 = vld [vmem:[%s8098_s28 + $0x4b0] sm:$0xff] }
 0x37e   : > { %v757_v26 = vld [vmem:[%s8098_s28 + $0x4f0] sm:$0xff] }
 0x37f   : > { %v9438_v7 = vadd.f32 %v6009_v47, %v5721_v48  ;;  %6254 = vmatmul.mubr.bf16.gmra.mrb[152].mxu0 %v7272_v51  ;;  %6543 = vmatmul.mubr.bf16.gmra.mrb[152].mxu1 %v7274_v13  ;;  %v7290_v48 = vcombine.low %v718_v62, %v726_v35  ;;  %v7305_v51 = vcombine.high %v733_v32, %v741_v33  ;;  %v750_v35 = vld [vmem:[%s8098_s28 + $0x4b8] sm:$0xff] }
 0x380   : > { %6261 = vmatprep.mubr.bf16.mxu0 %v7289_v6  ;;  %6550 = vmatprep.mubr.bf16.mxu1 %v7291_v25  ;;  %v7307_v25 = vcombine.high %v734_v60, %v742_v50 }
 0x382   : > { %v5725_v11 = vpop.f32.mrb[48].mxu0  ;;  %v6014_v9 = vpop.f32.mrb[48].mxu1 }
 0x383   : > { %v5726_v30 = vadd.f32 %v5725_v11, %v9095_v17  ;;  %v5727_v57 = vpop.f32.mrb[49].mxu0  ;;  %v6016_v0 = vpop.f32.mrb[49].mxu1  ;;  %v758_v11 = vld [vmem:[%s8098_s28 + $0x4f8] sm:$0xff] }
 0x384   : > { %v5728_v1 = vpop.f32.mrb[50].mxu0  ;;  %v6017_v47 = vpop.f32.mrb[50].mxu1 }
 0x385   : > { %v9445_v13 = vadd.f32 %v6014_v9, %v5726_v30  ;;  %v5729_v6 = vadd.f32 %v5728_v1, %v9098_v53  ;;  %v5730_v56 = vpop.f32.mrb[51].mxu0  ;;  %v6019_v8 = vpop.f32.mrb[51].mxu1  ;;  %v7304_v53 = vcombine.low %v733_v32, %v741_v33  ;;  %v765_v32 = vld [vmem:[%s8098_s28 + $0x530] sm:$0xff] }
 0x386   : > { %v773_v33 = vld [vmem:[%s8098_s28 + $0x570] sm:$0xff] }
 0x387   : > { %v9448_v17 = vadd.f32 %v6017_v47, %v5729_v6  ;;  %6262 = vmatmul.mubr.bf16.gmra.mrb[156].mxu0 %v7288_v39  ;;  %6551 = vmatmul.mubr.bf16.gmra.mrb[156].mxu1 %v7290_v48  ;;  %v7306_v6 = vcombine.low %v734_v60, %v742_v50  ;;  %v7321_v39 = vcombine.high %v749_v37, %v757_v26  ;;  %v766_v50 = vld [vmem:[%s8098_s28 + $0x538] sm:$0xff] }
 0x388   : > { %6269 = vmatprep.mubr.bf16.mxu0 %v7305_v51  ;;  %6558 = vmatprep.mubr.bf16.mxu1 %v7307_v25  ;;  %v7323_v25 = vcombine.high %v750_v35, %v758_v11 }
 0x38a   : > { %v5733_v62 = vpop.f32.mrb[52].mxu0  ;;  %v6022_v9 = vpop.f32.mrb[52].mxu1 }
 0x38b   : > { %v5734_v30 = vadd.f32 %v5733_v62, %v9106_v12  ;;  %v5735_v57 = vpop.f32.mrb[53].mxu0  ;;  %v6024_v0 = vpop.f32.mrb[53].mxu1  ;;  %v774_v62 = vld [vmem:[%s8098_s28 + $0x578] sm:$0xff] }
 0x38c   : > { %v5736_v1 = vpop.f32.mrb[54].mxu0  ;;  %v6025_v47 = vpop.f32.mrb[54].mxu1 }
 0x38d   : > { %v9455_v48 = vadd.f32 %v6022_v9, %v5734_v30  ;;  %v5737_v51 = vadd.f32 %v5736_v1, %v9108_v49  ;;  %v5738_v56 = vpop.f32.mrb[55].mxu0  ;;  %v6027_v8 = vpop.f32.mrb[55].mxu1  ;;  %v7320_v49 = vcombine.low %v749_v37, %v757_v26  ;;  %v781_v37 = vld [vmem:[%s8098_s28 + $0x5b0] sm:$0xff] }
 0x38e   : > { %v789_v26 = vld [vmem:[%s8098_s28 + $0x5f0] sm:$0xff] }
 0x38f   : > { %v9458_v12 = vadd.f32 %v6025_v47, %v5737_v51  ;;  %6270 = vmatmul.mubr.bf16.gmra.mrb[160].mxu0 %v7304_v53  ;;  %6559 = vmatmul.mubr.bf16.gmra.mrb[160].mxu1 %v7306_v6  ;;  %v7322_v51 = vcombine.low %v750_v35, %v758_v11  ;;  %v7337_v53 = vcombine.high %v765_v32, %v773_v33  ;;  %v782_v11 = vld [vmem:[%s8098_s28 + $0x5b8] sm:$0xff] }
 0x390   : > { %6277 = vmatprep.mubr.bf16.mxu0 %v7321_v39  ;;  %6566 = vmatprep.mubr.bf16.mxu1 %v7323_v25  ;;  %v7339_v25 = vcombine.high %v766_v50, %v774_v62 }
 0x392   : > { %v5741_v60 = vpop.f32.mrb[56].mxu0  ;;  %v6030_v9 = vpop.f32.mrb[56].mxu1 }
 0x393   : > { %v5742_v30 = vadd.f32 %v5741_v60, %v9123_v36  ;;  %v5743_v57 = vpop.f32.mrb[57].mxu0  ;;  %v6032_v0 = vpop.f32.mrb[57].mxu1  ;;  %v790_v60 = vld [vmem:[%s8098_s28 + $0x5f8] sm:$0xff] }
 0x394   : > { %v5744_v1 = vpop.f32.mrb[58].mxu0  ;;  %v6033_v47 = vpop.f32.mrb[58].mxu1 }
 0x395   : > { %v9465_v6 = vadd.f32 %v6030_v9, %v5742_v30  ;;  %v5745_v39 = vadd.f32 %v5744_v1, %v9126_v24  ;;  %v5746_v56 = vpop.f32.mrb[59].mxu0  ;;  %v6035_v8 = vpop.f32.mrb[59].mxu1  ;;  %v7336_v24 = vcombine.low %v765_v32, %v773_v33  ;;  %v797_v32 = vld [vmem:[%s8098_s28 + $0x630] sm:$0xff] }
 0x396   : > { %v805_v33 = vld [vmem:[%s8098_s28 + $0x670] sm:$0xff] }
 0x397   : > { %v9468_v36 = vadd.f32 %v6033_v47, %v5745_v39  ;;  %6278 = vmatmul.mubr.bf16.gmra.mrb[164].mxu0 %v7320_v49  ;;  %6567 = vmatmul.mubr.bf16.gmra.mrb[164].mxu1 %v7322_v51  ;;  %v7338_v39 = vcombine.low %v766_v50, %v774_v62  ;;  %v7353_v49 = vcombine.high %v781_v37, %v789_v26  ;;  %v798_v62 = vld [vmem:[%s8098_s28 + $0x638] sm:$0xff] }
 0x398   : > { %6285 = vmatprep.mubr.bf16.mxu0 %v7337_v53  ;;  %6574 = vmatprep.mubr.bf16.mxu1 %v7339_v25  ;;  %v7355_v25 = vcombine.high %v782_v11, %v790_v60 }
 0x39a   : > { %v5749_v35 = vpop.f32.mrb[60].mxu0  ;;  %v6038_v9 = vpop.f32.mrb[60].mxu1 }
 0x39b   : > { %v5750_v30 = vadd.f32 %v5749_v35, %v9134_v19  ;;  %v5751_v57 = vpop.f32.mrb[61].mxu0  ;;  %v6040_v0 = vpop.f32.mrb[61].mxu1  ;;  %v806_v35 = vld [vmem:[%s8098_s28 + $0x678] sm:$0xff] }
 0x39c   : > { %v5752_v1 = vpop.f32.mrb[62].mxu0  ;;  %v6041_v47 = vpop.f32.mrb[62].mxu1 }
 0x39d   : > { %v9475_v51 = vadd.f32 %v6038_v9, %v5750_v30  ;;  %v5753_v53 = vadd.f32 %v5752_v1, %v9136_v52  ;;  %v5754_v56 = vpop.f32.mrb[63].mxu0  ;;  %v6043_v8 = vpop.f32.mrb[63].mxu1  ;;  %v7352_v52 = vcombine.low %v781_v37, %v789_v26  ;;  %v813_v37 = vld [vmem:[%s8098_s28 + $0x6b0] sm:$0xff] }
 0x39e   : > { %v821_v26 = vld [vmem:[%s8098_s28 + $0x6f0] sm:$0xff] }
 0x39f   : > { %v9478_v19 = vadd.f32 %v6041_v47, %v5753_v53  ;;  %6286 = vmatmul.mubr.bf16.gmra.mrb[168].mxu0 %v7336_v24  ;;  %6575 = vmatmul.mubr.bf16.gmra.mrb[168].mxu1 %v7338_v39  ;;  %v7354_v53 = vcombine.low %v782_v11, %v790_v60  ;;  %v7369_v24 = vcombine.high %v797_v32, %v805_v33  ;;  %v814_v60 = vld [vmem:[%s8098_s28 + $0x6b8] sm:$0xff] }
 0x3a0   : > { %6293 = vmatprep.mubr.bf16.mxu0 %v7353_v49  ;;  %6582 = vmatprep.mubr.bf16.mxu1 %v7355_v25  ;;  %v7371_v25 = vcombine.high %v798_v62, %v806_v35 }
 0x3a2   : > { %v5757_v50 = vpop.f32.mrb[64].mxu0  ;;  %v6046_v9 = vpop.f32.mrb[64].mxu1 }
 0x3a3   : > { %v5758_v30 = vadd.f32 %v5757_v50, %v9151_v45  ;;  %v5759_v57 = vpop.f32.mrb[65].mxu0  ;;  %v6048_v0 = vpop.f32.mrb[65].mxu1  ;;  %v822_v50 = vld [vmem:[%s8098_s28 + $0x6f8] sm:$0xff] }
 0x3a4   : > { %v5760_v1 = vpop.f32.mrb[66].mxu0  ;;  %v6049_v47 = vpop.f32.mrb[66].mxu1 }
 0x3a5   : > { %v9485_v39 = vadd.f32 %v6046_v9, %v5758_v30  ;;  %v5761_v49 = vadd.f32 %v5760_v1, %v9153_v29  ;;  %v5762_v56 = vpop.f32.mrb[67].mxu0  ;;  %v6051_v8 = vpop.f32.mrb[67].mxu1  ;;  %v7368_v29 = vcombine.low %v797_v32, %v805_v33  ;;  %v829_v32 = vld [vmem:[%s8098_s28 + $0x730] sm:$0xff] }
 0x3a6   : > { %v837_v33 = vld [vmem:[%s8098_s28 + $0x770] sm:$0xff] }
 0x3a7   : > { %v9488_v45 = vadd.f32 %v6049_v47, %v5761_v49  ;;  %6294 = vmatmul.mubr.bf16.gmra.mrb[172].mxu0 %v7352_v52  ;;  %6583 = vmatmul.mubr.bf16.gmra.mrb[172].mxu1 %v7354_v53  ;;  %v7370_v49 = vcombine.low %v798_v62, %v806_v35  ;;  %v7385_v52 = vcombine.high %v813_v37, %v821_v26  ;;  %v830_v35 = vld [vmem:[%s8098_s28 + $0x738] sm:$0xff] }
 0x3a8   : > { %6301 = vmatprep.mubr.bf16.mxu0 %v7369_v24  ;;  %6590 = vmatprep.mubr.bf16.mxu1 %v7371_v25  ;;  %v7387_v25 = vcombine.high %v814_v60, %v822_v50 }
 0x3aa   : > { %v5765_v11 = vpop.f32.mrb[68].mxu0  ;;  %v6054_v9 = vpop.f32.mrb[68].mxu1 }
 0x3ab   : > { %v5766_v30 = vadd.f32 %v5765_v11, %v9162_v27  ;;  %v5767_v57 = vpop.f32.mrb[69].mxu0  ;;  %v6056_v0 = vpop.f32.mrb[69].mxu1  ;;  %v838_v11 = vld [vmem:[%s8098_s28 + $0x778] sm:$0xff] }
 0x3ac   : > { %v5768_v1 = vpop.f32.mrb[70].mxu0  ;;  %v6057_v47 = vpop.f32.mrb[70].mxu1 }
 0x3ad   : > { %v9495_v53 = vadd.f32 %v6054_v9, %v5766_v30  ;;  %v5769_v24 = vadd.f32 %v5768_v1, %v9164_v2  ;;  %v5770_v56 = vpop.f32.mrb[71].mxu0  ;;  %v6059_v8 = vpop.f32.mrb[71].mxu1  ;;  %v7384_v2 = vcombine.low %v813_v37, %v821_v26  ;;  %v845_v37 = vld [vmem:[%s8098_s28 + $0x7b0] sm:$0xff] }
 0x3ae   : > { %v853_v26 = vld [vmem:[%s8098_s28 + $0x7f0] sm:$0xff] }
 0x3af   : > { %v9498_v27 = vadd.f32 %v6057_v47, %v5769_v24  ;;  %6302 = vmatmul.mubr.bf16.gmra.mrb[176].mxu0 %v7368_v29  ;;  %6591 = vmatmul.mubr.bf16.gmra.mrb[176].mxu1 %v7370_v49  ;;  %v7386_v24 = vcombine.low %v814_v60, %v822_v50  ;;  %v7401_v29 = vcombine.high %v829_v32, %v837_v33  ;;  %v846_v50 = vld [vmem:[%s8098_s28 + $0x7b8] sm:$0xff] }
 0x3b0   : > { %6309 = vmatprep.mubr.bf16.mxu0 %v7385_v52  ;;  %6598 = vmatprep.mubr.bf16.mxu1 %v7387_v25  ;;  %v7403_v25 = vcombine.high %v830_v35, %v838_v11 }
 0x3b2   : > { %v5773_v62 = vpop.f32.mrb[72].mxu0  ;;  %v6062_v9 = vpop.f32.mrb[72].mxu1 }
 0x3b3   : > { %v5774_v30 = vadd.f32 %v5773_v62, %v9179_v38  ;;  %v5775_v57 = vpop.f32.mrb[73].mxu0  ;;  %v6064_v0 = vpop.f32.mrb[73].mxu1  ;;  %v854_v62 = vld [vmem:[%s8098_s28 + $0x7f8] sm:$0xff] }
 0x3b4   : > { %v5776_v1 = vpop.f32.mrb[74].mxu0  ;;  %v6065_v47 = vpop.f32.mrb[74].mxu1 }
 0x3b5   : > { %v9505_v49 = vadd.f32 %v6062_v9, %v5774_v30  ;;  %v5777_v52 = vadd.f32 %v5776_v1, %v9181_v3  ;;  %v5778_v56 = vpop.f32.mrb[75].mxu0  ;;  %v6067_v8 = vpop.f32.mrb[75].mxu1  ;;  %v7400_v3 = vcombine.low %v829_v32, %v837_v33  ;;  %v861_v32 = vld [vmem:[%s8098_s28 + $0x830] sm:$0xff] }
 0x3b6   : > { %v7419_v8 = vcombine.high %v846_v50, %v854_v62  ;;  %v869_v33 = vld [vmem:[%s8098_s28 + $0x870] sm:$0xff] }
 0x3b7   : > { %v9508_v38 = vadd.f32 %v6065_v47, %v5777_v52  ;;  %6310 = vmatmul.mubr.bf16.gmra.mrb[180].mxu0 %v7384_v2  ;;  %6599 = vmatmul.mubr.bf16.gmra.mrb[180].mxu1 %v7386_v24  ;;  %v7402_v52 = vcombine.low %v830_v35, %v838_v11  ;;  %v7417_v2 = vcombine.high %v845_v37, %v853_v26  ;;  %v862_v11 = vld [vmem:[%s8098_s28 + $0x838] sm:$0xff] }
 0x3b8   : > { %6317 = vmatprep.mubr.bf16.mxu0 %v7401_v29  ;;  %6606 = vmatprep.mubr.bf16.mxu1 %v7403_v25  ;;  %v9944_v29 = vld [vmem:[#allocation27_spill] sm:$0xff] }
 0x3b9   : > { %9943 = vst [vmem:[#allocation25_spill] sm:$0xff] %v9508_v38 }
 0x3ba   : > { %v5781_v60 = vpop.f32.mrb[76].mxu0  ;;  %v6070_v9 = vpop.f32.mrb[76].mxu1 }
 0x3bb   : > { %v5782_v30 = vadd.f32 %v5781_v60, %v9190_v18  ;;  %v5783_v57 = vpop.f32.mrb[77].mxu0  ;;  %v6072_v0 = vpop.f32.mrb[77].mxu1  ;;  %v870_v60 = vld [vmem:[%s8098_s28 + $0x878] sm:$0xff] }
 0x3bc   : > { %v5784_v1 = vpop.f32.mrb[78].mxu0  ;;  %v6073_v56 = vpop.f32.mrb[78].mxu1  ;;  %v7416_v0 = vcombine.low %v845_v37, %v853_v26  ;;  %v877_v37 = vld [vmem:[%s8098_s28 + $0x8b0] sm:$0xff] }
 0x3bd   : > { %v9515_v24 = vadd.f32 %v6070_v9, %v5782_v30  ;;  %v5785_v47 = vadd.f32 %v5784_v1, %v9944_v29  ;;  %v5786_v25 = vpop.f32.mrb[79].mxu0  ;;  %v6075_v38 = vpop.f32.mrb[79].mxu1  ;;  %v7418_v29 = vcombine.low %v846_v50, %v854_v62  ;;  %v885_v26 = vld [vmem:[%s8098_s28 + $0x8f0] sm:$0xff]  ;;  %v878_v62 = vld [vmem:[%s8098_s28 + $0x8b8] sm:$0xff] }
 0x3bf   : > { %v9518_v18 = vadd.f32 %v6073_v56, %v5785_v47  ;;  %6318 = vmatmul.mubr.bf16.gmra.mrb[184].mxu0 %v7400_v3  ;;  %6607 = vmatmul.mubr.bf16.gmra.mrb[184].mxu1 %v7402_v52  ;;  %v7433_v3 = vcombine.high %v861_v32, %v869_v33 }
 0x3c0   : > { %6325 = vmatprep.mubr.bf16.mxu0 %v7417_v2  ;;  %6614 = vmatprep.mubr.bf16.mxu1 %v7419_v8  ;;  %v9947_v2 = vld [vmem:[#allocation3_spill] sm:$0xff]  ;;  %v7435_v8 = vcombine.high %v862_v11, %v870_v60 }
 0x3c1   : > { %9945 = vst [vmem:[#allocation26_spill] sm:$0xff] %v9518_v18 }
 0x3c2   : > { %v5789_v35 = vpop.f32.mrb[80].mxu0  ;;  %v6078_v9 = vpop.f32.mrb[80].mxu1 }
 0x3c3   : > { %v5790_v30 = vadd.f32 %v5789_v35, %v9206_v40  ;;  %v5791_v57 = vpop.f32.mrb[81].mxu0  ;;  %v6080_v1 = vpop.f32.mrb[81].mxu1  ;;  %v886_v35 = vld [vmem:[%s8098_s28 + $0x8f8] sm:$0xff] }
 0x3c4   : > { %v5792_v38 = vpop.f32.mrb[82].mxu0  ;;  %v6081_v56 = vpop.f32.mrb[82].mxu1  ;;  %v9949_v57 = vld [vmem:[#allocation4_spill] sm:$0xff] }
 0x3c5   : > { %v9525_v52 = vadd.f32 %v6078_v9, %v5790_v30  ;;  %v5793_v47 = vadd.f32 %v5792_v38, %v9947_v2  ;;  %v5794_v25 = vpop.f32.mrb[83].mxu0  ;;  %v6083_v18 = vpop.f32.mrb[83].mxu1  ;;  %v7432_v38 = vcombine.low %v861_v32, %v869_v33  ;;  %v893_v32 = vld [vmem:[%s8098_s28 + $0x930] sm:$0xff] }
 0x3c6   : > { %v901_v33 = vld [vmem:[%s8098_s28 + $0x970] sm:$0xff] }
 0x3c7   : > { %9946 = vst [vmem:[#allocation27_spill] sm:$0xff] %v9525_v52  ;;  %v9528_v40 = vadd.f32 %v6081_v56, %v5793_v47  ;;  %6326 = vmatmul.mubr.bf16.gmra.mrb[188].mxu0 %v7416_v0  ;;  %6615 = vmatmul.mubr.bf16.gmra.mrb[188].mxu1 %v7418_v29  ;;  %v7434_v47 = vcombine.low %v862_v11, %v870_v60  ;;  %v894_v60 = vld [vmem:[%s8098_s28 + $0x938] sm:$0xff] }
 0x3c8   : > { %6333 = vmatprep.mubr.bf16.mxu0 %v7433_v3  ;;  %6622 = vmatprep.mubr.bf16.mxu1 %v7435_v8  ;;  %v7449_v0 = vcombine.high %v877_v37, %v885_v26  ;;  %v9951_v3 = vld [vmem:[#allocation5_spill] sm:$0xff] }
 0x3c9   : > { %9948 = vst [vmem:[#allocation3_spill] sm:$0xff] %v9528_v40  ;;  %v7451_v40 = vcombine.high %v878_v62, %v886_v35 }
 0x3ca   : > { %v5797_v50 = vpop.f32.mrb[84].mxu0  ;;  %v6086_v9 = vpop.f32.mrb[84].mxu1 }
 0x3cb   : > { %v5798_v30 = vadd.f32 %v5797_v50, %v9949_v57  ;;  %v5799_v1 = vpop.f32.mrb[85].mxu0  ;;  %v6088_v2 = vpop.f32.mrb[85].mxu1  ;;  %v902_v57 = vld [vmem:[%s8098_s28 + $0x978] sm:$0xff] }
 0x3cc   : > { %v5800_v18 = vpop.f32.mrb[86].mxu0  ;;  %v6089_v25 = vpop.f32.mrb[86].mxu1  ;;  %v9953_v1 = vld [vmem:[#allocation6_spill] sm:$0xff] }
 0x3cd   : > { %v9535_v29 = vadd.f32 %v6086_v9, %v5798_v30  ;;  %v5801_v56 = vadd.f32 %v5800_v18, %v9951_v3  ;;  %v5802_v8 = vpop.f32.mrb[87].mxu0  ;;  %v6091_v52 = vpop.f32.mrb[87].mxu1  ;;  %v7448_v18 = vcombine.low %v877_v37, %v885_v26  ;;  %v909_v37 = vld [vmem:[%s8098_s28 + $0x9b0] sm:$0xff] }
 0x3ce   : > { %v917_v26 = vld [vmem:[%s8098_s28 + $0x9f0] sm:$0xff] }
 0x3cf   : > { %9950 = vst [vmem:[#allocation4_spill] sm:$0xff] %v9535_v29  ;;  %v9538_v50 = vadd.f32 %v6089_v25, %v5801_v56  ;;  %6334 = vmatmul.mubr.bf16.gmra.mrb[192].mxu0 %v7432_v38  ;;  %6623 = vmatmul.mubr.bf16.gmra.mrb[192].mxu1 %v7434_v47  ;;  %v7450_v56 = vcombine.low %v878_v62, %v886_v35  ;;  %v910_v35 = vld [vmem:[%s8098_s28 + $0x9b8] sm:$0xff] }
 0x3d0   : > { %6341 = vmatprep.mubr.bf16.mxu0 %v7449_v0  ;;  %6630 = vmatprep.mubr.bf16.mxu1 %v7451_v40  ;;  %v7465_v38 = vcombine.high %v893_v32, %v901_v33  ;;  %v9955_v40 = vld [vmem:[#allocation7_spill] sm:$0xff] }
 0x3d1   : > { %9952 = vst [vmem:[#allocation5_spill] sm:$0xff] %v9538_v50  ;;  %v7467_v50 = vcombine.high %v894_v60, %v902_v57 }
 0x3d2   : > { %v5805_v11 = vpop.f32.mrb[88].mxu0  ;;  %v6094_v9 = vpop.f32.mrb[88].mxu1 }
 0x3d3   : > { %v5806_v30 = vadd.f32 %v5805_v11, %v9953_v1  ;;  %v5807_v2 = vpop.f32.mrb[89].mxu0  ;;  %v6096_v3 = vpop.f32.mrb[89].mxu1  ;;  %v918_v1 = vld [vmem:[%s8098_s28 + $0x9f8] sm:$0xff] }
 0x3d4   : > { %v5808_v52 = vpop.f32.mrb[90].mxu0  ;;  %v6097_v25 = vpop.f32.mrb[90].mxu1  ;;  %v9957_v2 = vld [vmem:[#allocation8_spill] sm:$0xff] }
 0x3d5   : > { %v9545_v47 = vadd.f32 %v6094_v9, %v5806_v30  ;;  %v5809_v0 = vadd.f32 %v5808_v52, %v9955_v40  ;;  %v5810_v8 = vpop.f32.mrb[91].mxu0  ;;  %v6099_v29 = vpop.f32.mrb[91].mxu1  ;;  %v7464_v52 = vcombine.low %v893_v32, %v901_v33  ;;  %v925_v32 = vld [vmem:[%s8098_s28 + $0xa30] sm:$0xff] }
 0x3d6   : > { %v933_v33 = vld [vmem:[%s8098_s28 + $0xa70] sm:$0xff] }
 0x3d7   : > { %9954 = vst [vmem:[#allocation6_spill] sm:$0xff] %v9545_v47  ;;  %v9548_v11 = vadd.f32 %v6097_v25, %v5809_v0  ;;  %6342 = vmatmul.mubr.bf16.gmra.mrb[196].mxu0 %v7448_v18  ;;  %6631 = vmatmul.mubr.bf16.gmra.mrb[196].mxu1 %v7450_v56  ;;  %v7466_v0 = vcombine.low %v894_v60, %v902_v57  ;;  %v926_v57 = vld [vmem:[%s8098_s28 + $0xa38] sm:$0xff] }
 0x3d8   : > { %6349 = vmatprep.mubr.bf16.mxu0 %v7465_v38  ;;  %6638 = vmatprep.mubr.bf16.mxu1 %v7467_v50  ;;  %v7481_v18 = vcombine.high %v909_v37, %v917_v26  ;;  %v9959_v50 = vld [vmem:[#allocation9_spill] sm:$0xff] }
 0x3d9   : > { %9956 = vst [vmem:[#allocation7_spill] sm:$0xff] %v9548_v11  ;;  %v7483_v11 = vcombine.high %v910_v35, %v918_v1 }
 0x3da   : > { %v5813_v62 = vpop.f32.mrb[92].mxu0  ;;  %v6102_v9 = vpop.f32.mrb[92].mxu1 }
 0x3db   : > { %v5814_v30 = vadd.f32 %v5813_v62, %v9957_v2  ;;  %v5815_v3 = vpop.f32.mrb[93].mxu0  ;;  %v6104_v40 = vpop.f32.mrb[93].mxu1  ;;  %v934_v2 = vld [vmem:[%s8098_s28 + $0xa78] sm:$0xff] }
 0x3dc   : > { %v5816_v29 = vpop.f32.mrb[94].mxu0  ;;  %v6105_v25 = vpop.f32.mrb[94].mxu1  ;;  %v9961_v3 = vld [vmem:[#allocation10_spill] sm:$0xff] }
 0x3dd   : > { %v9555_v56 = vadd.f32 %v6102_v9, %v5814_v30  ;;  %v5817_v38 = vadd.f32 %v5816_v29, %v9959_v50  ;;  %v5818_v8 = vpop.f32.mrb[95].mxu0  ;;  %v6107_v47 = vpop.f32.mrb[95].mxu1  ;;  %v7480_v29 = vcombine.low %v909_v37, %v917_v26  ;;  %v941_v37 = vld [vmem:[%s8098_s28 + $0xab0] sm:$0xff] }
 0x3de   : > { %v949_v26 = vld [vmem:[%s8098_s28 + $0xaf0] sm:$0xff] }
 0x3df   : > { %9958 = vst [vmem:[#allocation8_spill] sm:$0xff] %v9555_v56  ;;  %v9558_v62 = vadd.f32 %v6105_v25, %v5817_v38  ;;  %6350 = vmatmul.mubr.bf16.gmra.mrb[200].mxu0 %v7464_v52  ;;  %6639 = vmatmul.mubr.bf16.gmra.mrb[200].mxu1 %v7466_v0  ;;  %v7482_v38 = vcombine.low %v910_v35, %v918_v1  ;;  %v942_v1 = vld [vmem:[%s8098_s28 + $0xab8] sm:$0xff] }
 0x3e0   : > { %6357 = vmatprep.mubr.bf16.mxu0 %v7481_v18  ;;  %6646 = vmatprep.mubr.bf16.mxu1 %v7483_v11  ;;  %v7497_v52 = vcombine.high %v925_v32, %v933_v33  ;;  %v9963_v11 = vld [vmem:[#allocation11_spill] sm:$0xff] }
 0x3e1   : > { %9960 = vst [vmem:[#allocation9_spill] sm:$0xff] %v9558_v62  ;;  %v7499_v62 = vcombine.high %v926_v57, %v934_v2 }
 0x3e2   : > { %v5821_v60 = vpop.f32.mrb[96].mxu0  ;;  %v6110_v9 = vpop.f32.mrb[96].mxu1 }
 0x3e3   : > { %v5822_v30 = vadd.f32 %v5821_v60, %v9961_v3  ;;  %v5823_v40 = vpop.f32.mrb[97].mxu0  ;;  %v6112_v50 = vpop.f32.mrb[97].mxu1  ;;  %v950_v3 = vld [vmem:[%s8098_s28 + $0xaf8] sm:$0xff] }
 0x3e4   : > { %v5824_v47 = vpop.f32.mrb[98].mxu0  ;;  %v6113_v25 = vpop.f32.mrb[98].mxu1  ;;  %v9965_v40 = vld [vmem:[#allocation12_spill] sm:$0xff] }
 0x3e5   : > { %v9565_v0 = vadd.f32 %v6110_v9, %v5822_v30  ;;  %v5825_v18 = vadd.f32 %v5824_v47, %v9963_v11  ;;  %v5826_v8 = vpop.f32.mrb[99].mxu0  ;;  %v6115_v56 = vpop.f32.mrb[99].mxu1  ;;  %v7496_v47 = vcombine.low %v925_v32, %v933_v33  ;;  %v957_v32 = vld [vmem:[%s8098_s28 + $0xb30] sm:$0xff] }
 0x3e6   : > { %v965_v33 = vld [vmem:[%s8098_s28 + $0xb70] sm:$0xff] }
 0x3e7   : > { %9962 = vst [vmem:[#allocation10_spill] sm:$0xff] %v9565_v0  ;;  %v9568_v60 = vadd.f32 %v6113_v25, %v5825_v18  ;;  %6358 = vmatmul.mubr.bf16.gmra.mrb[204].mxu0 %v7480_v29  ;;  %6647 = vmatmul.mubr.bf16.gmra.mrb[204].mxu1 %v7482_v38  ;;  %v7498_v18 = vcombine.low %v926_v57, %v934_v2  ;;  %v958_v2 = vld [vmem:[%s8098_s28 + $0xb38] sm:$0xff] }
 0x3e8   : > { %6365 = vmatprep.mubr.bf16.mxu0 %v7497_v52  ;;  %6654 = vmatprep.mubr.bf16.mxu1 %v7499_v62  ;;  %v7513_v29 = vcombine.high %v941_v37, %v949_v26  ;;  %v9967_v62 = vld [vmem:[#allocation13_spill] sm:$0xff] }
 0x3e9   : > { %9964 = vst [vmem:[#allocation11_spill] sm:$0xff] %v9568_v60  ;;  %v7515_v60 = vcombine.high %v942_v1, %v950_v3 }
 0x3ea   : > { %v5829_v35 = vpop.f32.mrb[100].mxu0  ;;  %v6118_v9 = vpop.f32.mrb[100].mxu1 }
 0x3eb   : > { %v5830_v30 = vadd.f32 %v5829_v35, %v9965_v40  ;;  %v5831_v50 = vpop.f32.mrb[101].mxu0  ;;  %v6120_v11 = vpop.f32.mrb[101].mxu1  ;;  %v966_v40 = vld [vmem:[%s8098_s28 + $0xb78] sm:$0xff] }
 0x3ec   : > { %v5832_v56 = vpop.f32.mrb[102].mxu0  ;;  %v6121_v25 = vpop.f32.mrb[102].mxu1  ;;  %v9969_v50 = vld [vmem:[#allocation14_spill] sm:$0xff] }
 0x3ed   : > { %v9575_v38 = vadd.f32 %v6118_v9, %v5830_v30  ;;  %v5833_v52 = vadd.f32 %v5832_v56, %v9967_v62  ;;  %v5834_v8 = vpop.f32.mrb[103].mxu0  ;;  %v6123_v0 = vpop.f32.mrb[103].mxu1  ;;  %v7512_v56 = vcombine.low %v941_v37, %v949_v26  ;;  %v973_v37 = vld [vmem:[%s8098_s28 + $0xbb0] sm:$0xff] }
 0x3ee   : > { %v981_v26 = vld [vmem:[%s8098_s28 + $0xbf0] sm:$0xff] }
 0x3ef   : > { %9966 = vst [vmem:[#allocation12_spill] sm:$0xff] %v9575_v38  ;;  %v9578_v35 = vadd.f32 %v6121_v25, %v5833_v52  ;;  %6366 = vmatmul.mubr.bf16.gmra.mrb[208].mxu0 %v7496_v47  ;;  %6655 = vmatmul.mubr.bf16.gmra.mrb[208].mxu1 %v7498_v18  ;;  %v7514_v52 = vcombine.low %v942_v1, %v950_v3  ;;  %v974_v3 = vld [vmem:[%s8098_s28 + $0xbb8] sm:$0xff] }
 0x3f0   : > { %6373 = vmatprep.mubr.bf16.mxu0 %v7513_v29  ;;  %6662 = vmatprep.mubr.bf16.mxu1 %v7515_v60  ;;  %v7529_v47 = vcombine.high %v957_v32, %v965_v33  ;;  %v9971_v60 = vld [vmem:[#allocation15_spill] sm:$0xff] }
 0x3f1   : > { %9968 = vst [vmem:[#allocation13_spill] sm:$0xff] %v9578_v35  ;;  %v7531_v35 = vcombine.high %v958_v2, %v966_v40 }
 0x3f2   : > { %v5837_v57 = vpop.f32.mrb[104].mxu0  ;;  %v6126_v9 = vpop.f32.mrb[104].mxu1 }
 0x3f3   : > { %v5838_v30 = vadd.f32 %v5837_v57, %v9969_v50  ;;  %v5839_v11 = vpop.f32.mrb[105].mxu0  ;;  %v6128_v62 = vpop.f32.mrb[105].mxu1  ;;  %v982_v50 = vld [vmem:[%s8098_s28 + $0xbf8] sm:$0xff] }
 0x3f4   : > { %v5840_v0 = vpop.f32.mrb[106].mxu0  ;;  %v6129_v25 = vpop.f32.mrb[106].mxu1  ;;  %v9973_v11 = vld [vmem:[#allocation16_spill] sm:$0xff] }
 0x3f5   : > { %v9585_v18 = vadd.f32 %v6126_v9, %v5838_v30  ;;  %v5841_v29 = vadd.f32 %v5840_v0, %v9971_v60  ;;  %v5842_v8 = vpop.f32.mrb[107].mxu0  ;;  %v6131_v38 = vpop.f32.mrb[107].mxu1  ;;  %v7528_v0 = vcombine.low %v957_v32, %v965_v33  ;;  %v989_v32 = vld [vmem:[%s8098_s28 + $0xc30] sm:$0xff] }
 0x3f6   : > { %v997_v33 = vld [vmem:[%s8098_s28 + $0xc70] sm:$0xff] }
 0x3f7   : > { %9970 = vst [vmem:[#allocation14_spill] sm:$0xff] %v9585_v18  ;;  %v9588_v57 = vadd.f32 %v6129_v25, %v5841_v29  ;;  %6374 = vmatmul.mubr.bf16.gmra.mrb[212].mxu0 %v7512_v56  ;;  %6663 = vmatmul.mubr.bf16.gmra.mrb[212].mxu1 %v7514_v52  ;;  %v7530_v29 = vcombine.low %v958_v2, %v966_v40  ;;  %v990_v40 = vld [vmem:[%s8098_s28 + $0xc38] sm:$0xff] }
 0x3f8   : > { %6381 = vmatprep.mubr.bf16.mxu0 %v7529_v47  ;;  %6670 = vmatprep.mubr.bf16.mxu1 %v7531_v35  ;;  %v7545_v56 = vcombine.high %v973_v37, %v981_v26  ;;  %v9975_v35 = vld [vmem:[#allocation17_spill] sm:$0xff] }
 0x3f9   : > { %9972 = vst [vmem:[#allocation15_spill] sm:$0xff] %v9588_v57  ;;  %v7547_v57 = vcombine.high %v974_v3, %v982_v50 }
 0x3fa   : > { %v5845_v1 = vpop.f32.mrb[108].mxu0  ;;  %v6134_v9 = vpop.f32.mrb[108].mxu1 }
 0x3fb   : > { %v5846_v30 = vadd.f32 %v5845_v1, %v9973_v11  ;;  %v5847_v62 = vpop.f32.mrb[109].mxu0  ;;  %v6136_v60 = vpop.f32.mrb[109].mxu1  ;;  %v998_v11 = vld [vmem:[%s8098_s28 + $0xc78] sm:$0xff] }
 0x3fc   : > { %v5848_v38 = vpop.f32.mrb[110].mxu0  ;;  %v6137_v25 = vpop.f32.mrb[110].mxu1  ;;  %v9977_v62 = vld [vmem:[#allocation18_spill] sm:$0xff] }
 0x3fd   : > { %v9595_v52 = vadd.f32 %v6134_v9, %v5846_v30  ;;  %v5849_v47 = vadd.f32 %v5848_v38, %v9975_v35  ;;  %v5850_v8 = vpop.f32.mrb[111].mxu0  ;;  %v6139_v18 = vpop.f32.mrb[111].mxu1  ;;  %v7544_v38 = vcombine.low %v973_v37, %v981_v26  ;;  %v1005_v37 = vld [vmem:[%s8098_s28 + $0xcb0] sm:$0xff] }
 0x3fe   : > { %v1013_v26 = vld [vmem:[%s8098_s28 + $0xcf0] sm:$0xff] }
 0x3ff   : > { %9974 = vst [vmem:[#allocation16_spill] sm:$0xff] %v9595_v52  ;;  %v9598_v1 = vadd.f32 %v6137_v25, %v5849_v47  ;;  %6382 = vmatmul.mubr.bf16.gmra.mrb[216].mxu0 %v7528_v0  ;;  %6671 = vmatmul.mubr.bf16.gmra.mrb[216].mxu1 %v7530_v29  ;;  %v7546_v47 = vcombine.low %v974_v3, %v982_v50  ;;  %v1006_v50 = vld [vmem:[%s8098_s28 + $0xcb8] sm:$0xff] }
 0x400   : > { %6389 = vmatprep.mubr.bf16.mxu0 %v7545_v56  ;;  %6678 = vmatprep.mubr.bf16.mxu1 %v7547_v57  ;;  %v7561_v0 = vcombine.high %v989_v32, %v997_v33  ;;  %v9979_v57 = vld [vmem:[#allocation19_spill] sm:$0xff] }
 0x401   : > { %9976 = vst [vmem:[#allocation17_spill] sm:$0xff] %v9598_v1  ;;  %v7563_v1 = vcombine.high %v990_v40, %v998_v11 }
 0x402   : > { %v5853_v2 = vpop.f32.mrb[112].mxu0  ;;  %v6142_v9 = vpop.f32.mrb[112].mxu1 }
 0x403   : > { %v5854_v30 = vadd.f32 %v5853_v2, %v9977_v62  ;;  %v5855_v60 = vpop.f32.mrb[113].mxu0  ;;  %v6144_v35 = vpop.f32.mrb[113].mxu1  ;;  %v1014_v62 = vld [vmem:[%s8098_s28 + $0xcf8] sm:$0xff] }
 0x404   : > { %v5856_v18 = vpop.f32.mrb[114].mxu0  ;;  %v6145_v25 = vpop.f32.mrb[114].mxu1  ;;  %v9981_v60 = vld [vmem:[#allocation20_spill] sm:$0xff] }
 0x405   : > { %v9605_v29 = vadd.f32 %v6142_v9, %v5854_v30  ;;  %v5857_v56 = vadd.f32 %v5856_v18, %v9979_v57  ;;  %v5858_v8 = vpop.f32.mrb[115].mxu0  ;;  %v6147_v52 = vpop.f32.mrb[115].mxu1  ;;  %v7560_v18 = vcombine.low %v989_v32, %v997_v33  ;;  %v1021_v32 = vld [vmem:[%s8098_s28 + $0xd30] sm:$0xff] }
 0x406   : > { %v1029_v33 = vld [vmem:[%s8098_s28 + $0xd70] sm:$0xff] }
 0x407   : > { %9978 = vst [vmem:[#allocation18_spill] sm:$0xff] %v9605_v29  ;;  %v9608_v2 = vadd.f32 %v6145_v25, %v5857_v56  ;;  %6390 = vmatmul.mubr.bf16.gmra.mrb[220].mxu0 %v7544_v38  ;;  %6679 = vmatmul.mubr.bf16.gmra.mrb[220].mxu1 %v7546_v47  ;;  %v7562_v56 = vcombine.low %v990_v40, %v998_v11  ;;  %v1022_v11 = vld [vmem:[%s8098_s28 + $0xd38] sm:$0xff] }
 0x408   : > { %6397 = vmatprep.mubr.bf16.mxu0 %v7561_v0  ;;  %6686 = vmatprep.mubr.bf16.mxu1 %v7563_v1  ;;  %v7577_v38 = vcombine.high %v1005_v37, %v1013_v26  ;;  %v9983_v1 = vld [vmem:[#allocation21_spill] sm:$0xff] }
 0x409   : > { %9980 = vst [vmem:[#allocation19_spill] sm:$0xff] %v9608_v2  ;;  %v7579_v2 = vcombine.high %v1006_v50, %v1014_v62 }
 0x40a   : > { %v5861_v3 = vpop.f32.mrb[116].mxu0  ;;  %v6150_v9 = vpop.f32.mrb[116].mxu1 }
 0x40b   : > { %v5862_v30 = vadd.f32 %v5861_v3, %v9981_v60  ;;  %v5863_v35 = vpop.f32.mrb[117].mxu0  ;;  %v6152_v57 = vpop.f32.mrb[117].mxu1  ;;  %v1030_v60 = vld [vmem:[%s8098_s28 + $0xd78] sm:$0xff] }
 0x40c   : > { %v5864_v52 = vpop.f32.mrb[118].mxu0  ;;  %v6153_v25 = vpop.f32.mrb[118].mxu1  ;;  %v9985_v35 = vld [vmem:[#allocation22_spill] sm:$0xff] }
 0x40d   : > { %v9615_v47 = vadd.f32 %v6150_v9, %v5862_v30  ;;  %v5865_v0 = vadd.f32 %v5864_v52, %v9983_v1  ;;  %v5866_v8 = vpop.f32.mrb[119].mxu0  ;;  %v6155_v29 = vpop.f32.mrb[119].mxu1  ;;  %v7576_v52 = vcombine.low %v1005_v37, %v1013_v26  ;;  %v1037_v37 = vld [vmem:[%s8098_s28 + $0xdb0] sm:$0xff] }
 0x40e   : > { %v1045_v26 = vld [vmem:[%s8098_s28 + $0xdf0] sm:$0xff] }
 0x40f   : > { %9982 = vst [vmem:[#allocation20_spill] sm:$0xff] %v9615_v47  ;;  %v9618_v3 = vadd.f32 %v6153_v25, %v5865_v0  ;;  %6398 = vmatmul.mubr.bf16.gmra.mrb[224].mxu0 %v7560_v18  ;;  %6687 = vmatmul.mubr.bf16.gmra.mrb[224].mxu1 %v7562_v56  ;;  %v7578_v0 = vcombine.low %v1006_v50, %v1014_v62  ;;  %v1038_v62 = vld [vmem:[%s8098_s28 + $0xdb8] sm:$0xff] }
 0x410   : > { %6405 = vmatprep.mubr.bf16.mxu0 %v7577_v38  ;;  %6694 = vmatprep.mubr.bf16.mxu1 %v7579_v2  ;;  %v7593_v18 = vcombine.high %v1021_v32, %v1029_v33  ;;  %v9986_v2 = vld [vmem:[#allocation23_spill] sm:$0xff] }
 0x411   : > { %9984 = vst [vmem:[#allocation21_spill] sm:$0xff] %v9618_v3  ;;  %v7595_v3 = vcombine.high %v1022_v11, %v1030_v60 }
 0x412   : > { %v5869_v40 = vpop.f32.mrb[120].mxu0  ;;  %v6158_v9 = vpop.f32.mrb[120].mxu1 }
 0x413   : > { %v5870_v30 = vadd.f32 %v5869_v40, %v9985_v35  ;;  %v5871_v57 = vpop.f32.mrb[121].mxu0  ;;  %v6160_v1 = vpop.f32.mrb[121].mxu1  ;;  %v1046_v35 = vld [vmem:[%s8098_s28 + $0xdf8] sm:$0xff] }
 0x414   : > { %v5872_v29 = vpop.f32.mrb[122].mxu0  ;;  %v6161_v25 = vpop.f32.mrb[122].mxu1  ;;  %v7592_v1 = vcombine.low %v1021_v32, %v1029_v33  ;;  %v1053_v32 = vld [vmem:[%s8098_s28 + $0xe30] sm:$0xff] }
 0x415   : > { %v9625_v56 = vadd.f32 %v6158_v9, %v5870_v30  ;;  %v5873_v38 = vadd.f32 %v5872_v29, %v9986_v2  ;;  %v5874_v8 = vpop.f32.mrb[123].mxu0  ;;  %v6163_v47 = vpop.f32.mrb[123].mxu1  ;;  %v7594_v2 = vcombine.low %v1022_v11, %v1030_v60  ;;  %v1061_v33 = vld [vmem:[%s8098_s28 + $0xe70] sm:$0xff]  ;;  %v1054_v60 = vld [vmem:[%s8098_s28 + $0xe38] sm:$0xff] }
 0x417   : > { %v9628_v40 = vadd.f32 %v6161_v25, %v5873_v38  ;;  %6406 = vmatmul.mubr.bf16.gmra.mrb[228].mxu0 %v7576_v52  ;;  %6695 = vmatmul.mubr.bf16.gmra.mrb[228].mxu1 %v7578_v0  ;;  %v7609_v52 = vcombine.high %v1037_v37, %v1045_v26  ;;  %v7611_v25 = vcombine.high %v1038_v62, %v1046_v35 }
 0x418   : > { %6413 = vmatprep.mubr.bf16.mxu0 %v7593_v18  ;;  %6702 = vmatprep.mubr.bf16.mxu1 %v7595_v3 }
 0x41a   : > { %v5877_v50 = vpop.f32.mrb[124].mxu0  ;;  %v6166_v9 = vpop.f32.mrb[124].mxu1 }
 0x41b   : > { %v5878_v30 = vadd.f32 %v5877_v50, %v9316_v31  ;;  %v5879_v57 = vpop.f32.mrb[125].mxu0  ;;  %v6168_v29 = vpop.f32.mrb[125].mxu1  ;;  %v1062_v50 = vld [vmem:[%s8098_s28 + $0xe78] sm:$0xff] }
 0x41c   : > { %v5880_v47 = vpop.f32.mrb[126].mxu0  ;;  %v6169_v18 = vpop.f32.mrb[126].mxu1  ;;  %v7608_v57 = vcombine.low %v1037_v37, %v1045_v26  ;;  %v9649_v29 = vld [vmem:[%s9867_s2] ss:$0 sm:$0xff] }
 0x41d   : > { %v9635_v0 = vadd.f32 %v6166_v9, %v5878_v30  ;;  %v5881_v3 = vadd.f32 %v5880_v47, %v9318_v63  ;;  %v5882_v38 = vpop.f32.mrb[127].mxu0  ;;  %v6171_v31 = vpop.f32.mrb[127].mxu1 }
 0x41e   : > { %v1077_v31 = vld [vmem:[%s8098_s28 + $0xef0] sm:$0xff] }
 0x41f   : > { %v9638_v8 = vadd.f32 %v6169_v18, %v5881_v3  ;;  %6414 = vmatmul.mubr.bf16.gmra.mrb[232].mxu0 %v7592_v1  ;;  %6703 = vmatmul.mubr.bf16.gmra.mrb[232].mxu1 %v7594_v2  ;;  %v7610_v2 = vcombine.low %v1038_v62, %v1046_v35  ;;  %v1069_v35 = vld [vmem:[%s8098_s28 + $0xeb0] sm:$0xff] }
 0x420   : > { %6421 = vmatprep.mubr.bf16.mxu0 %v7609_v52  ;;  %6710 = vmatprep.mubr.bf16.mxu1 %v7611_v25  ;;  %v7625_v52 = vcombine.high %v1053_v32, %v1061_v33  ;;  %v7627_v25 = vcombine.high %v1054_v60, %v1062_v50 }
 0x422   : > { %v6207_v11 = vpop.f32.mrb[128].mxu0  ;;  %v6496_v63 = vpop.f32.mrb[128].mxu1 }
 0x423   : > { %v6208_v30 = vadd.f32 %v6207_v11, %v9325_v55  ;;  %v6209_v9 = vpop.f32.mrb[129].mxu0  ;;  %v6498_v1 = vpop.f32.mrb[129].mxu1 }
 0x424   : > { %v6210_v47 = vpop.f32.mrb[130].mxu0  ;;  %v6499_v38 = vpop.f32.mrb[130].mxu1 }
 0x425   : > { %v6497_v3 = vadd.f32 %v6496_v63, %v6208_v30  ;;  %v6211_v18 = vadd.f32 %v6210_v47, %v9328_v20  ;;  %v6212_v55 = vpop.f32.mrb[131].mxu0  ;;  %v6501_v37 = vpop.f32.mrb[131].mxu1  ;;  %v1070_v30 = vld [vmem:[%s8098_s28 + $0xeb8] sm:$0xff] }
 0x426   : > { %v1078_v63 = vld [vmem:[%s8098_s28 + $0xef8] sm:$0xff]  ;;  %v7624_v55 = vcombine.low %v1053_v32, %v1061_v33 }
 0x427   : > { %v6953_v26 = vadd.f32 %v9649_v29, %v6497_v3  ;;  %v6500_v62 = vadd.f32 %v6499_v38, %v6211_v18  ;;  %6422 = vmatmul.mubr.bf16.gmra.mrb[236].mxu0 %v7608_v57  ;;  %6711 = vmatmul.mubr.bf16.gmra.mrb[236].mxu1 %v7610_v2  ;;  %v7626_v2 = vcombine.low %v1054_v60, %v1062_v50  ;;  %v1085_v60 = vld [vmem:[%s8098_s28 + $0xf30] sm:$0xff] }
 0x428   : > { %6429 = vmatprep.mubr.bf16.mxu0 %v7625_v52  ;;  %6718 = vmatprep.mubr.bf16.mxu1 %v7627_v25  ;;  %v7641_v52 = vcombine.high %v1069_v35, %v1077_v31  ;;  %v1093_v50 = vld [vmem:[%s8098_s28 + $0xf70] sm:$0xff] }
 0x429   : > { %7017 = vst [vmem:[%s9655_s11] sm:$0xff] %v6953_v26  ;;  %v6954_v20 = vadd.f32 %v9649_v29, %v6500_v62  ;;  %v7643_v26 = vcombine.high %v1070_v30, %v1078_v63 }
 0x42a   : > { %v6215_v11 = vpop.f32.mrb[132].mxu0  ;;  %v6504_v1 = vpop.f32.mrb[132].mxu1 }
 0x42b   : > { %7018 = vst [vmem:[%s9655_s11 + $0x8] sm:$0xff] %v6954_v20  ;;  %v6216_v9 = vadd.f32 %v6215_v11, %v9335_v22  ;;  %v6217_v47 = vpop.f32.mrb[133].mxu0  ;;  %v6506_v3 = vpop.f32.mrb[133].mxu1  ;;  %v1086_v20 = vld [vmem:[%s8098_s28 + $0xf38] sm:$0xff] }
 0x42c   : > { %v6218_v57 = vpop.f32.mrb[134].mxu0  ;;  %v6507_v25 = vpop.f32.mrb[134].mxu1  ;;  %v1094_v11 = vld [vmem:[%s8098_s28 + $0xf78] sm:$0xff]  ;;  %v7640_v3 = vcombine.low %v1069_v35, %v1077_v31 }
 0x42d   : > { %v6505_v18 = vadd.f32 %v6504_v1, %v6216_v9  ;;  %v6219_v38 = vadd.f32 %v6218_v57, %v9338_v41  ;;  %v6220_v37 = vpop.f32.mrb[135].mxu0  ;;  %v6509_v22 = vpop.f32.mrb[135].mxu1 }
 0x42f   : > { %v6955_v62 = vadd.f32 %v9649_v29, %v6505_v18  ;;  %v6508_v32 = vadd.f32 %v6507_v25, %v6219_v38  ;;  %6430 = vmatmul.mubr.bf16.gmra.mrb[240].mxu0 %v7624_v55  ;;  %6719 = vmatmul.mubr.bf16.gmra.mrb[240].mxu1 %v7626_v2  ;;  %v7642_v2 = vcombine.low %v1070_v30, %v1078_v63  ;;  %v1101_v30 = vld [vmem:[%s8098_s28 + $0xfb0] sm:$0xff] }
 0x430   : > { %6437 = vmatprep.mubr.bf16.mxu0 %v7641_v52  ;;  %6726 = vmatprep.mubr.bf16.mxu1 %v7643_v26  ;;  %v7657_v52 = vcombine.high %v1085_v60, %v1093_v50  ;;  %v7659_v26 = vcombine.high %v1086_v20, %v1094_v11  ;;  %v1109_v63 = vld [vmem:[%s8098_s28 + $0xff0] sm:$0xff] }
 0x431   : > { %7019 = vst [vmem:[%s9655_s11 + $0x10] sm:$0xff] %v6955_v62  ;;  %v6956_v33 = vadd.f32 %v9649_v29, %v6508_v32  ;;  %v1102_v62 = vld [vmem:[%s8098_s28 + $0xfb8] sm:$0xff] }
 0x432   : > { %v6223_v41 = vpop.f32.mrb[136].mxu0  ;;  %v6512_v1 = vpop.f32.mrb[136].mxu1  ;;  %v1110_v32 = vld [vmem:[%s8098_s28 + $0xff8] sm:$0xff] }
 0x433   : > { %7020 = vst [vmem:[%s9655_s11 + $0x18] sm:$0xff] %v6956_v33  ;;  %v6224_v9 = vadd.f32 %v6223_v41, %v9345_v44  ;;  %v6225_v47 = vpop.f32.mrb[137].mxu0  ;;  %v6514_v57 = vpop.f32.mrb[137].mxu1 }
 0x434   : > { %v6226_v55 = vpop.f32.mrb[138].mxu0  ;;  %v6515_v25 = vpop.f32.mrb[138].mxu1  ;;  %v7658_v57 = vcombine.low %v1086_v20, %v1094_v11  ;;  %v7672_v11 = vcombine.low %v1101_v30, %v1109_v63 }
 0x435   : > { %v6513_v18 = vadd.f32 %v6512_v1, %v6224_v9  ;;  %v6227_v38 = vadd.f32 %v6226_v55, %v9348_v23  ;;  %v6228_v37 = vpop.f32.mrb[139].mxu0  ;;  %v6517_v44 = vpop.f32.mrb[139].mxu1  ;;  %v7656_v1 = vcombine.low %v1085_v60, %v1093_v50  ;;  %v7673_v55 = vcombine.high %v1101_v30, %v1109_v63 }
 0x437   : > { %v6957_v22 = vadd.f32 %v9649_v29, %v6513_v18  ;;  %v6516_v35 = vadd.f32 %v6515_v25, %v6227_v38  ;;  %6438 = vmatmul.mubr.bf16.gmra.mrb[244].mxu0 %v7640_v3  ;;  %6727 = vmatmul.mubr.bf16.gmra.mrb[244].mxu1 %v7642_v2  ;;  %v7675_v25 = vcombine.high %v1102_v62, %v1110_v32 }
 0x438   : > { %6445 = vmatprep.mubr.bf16.mxu0 %v7657_v52  ;;  %6734 = vmatprep.mubr.bf16.mxu1 %v7659_v26 }
 0x439   : > { %7021 = vst [vmem:[%s9655_s11 + $0x20] sm:$0xff] %v6957_v22  ;;  %v6958_v31 = vadd.f32 %v9649_v29, %v6516_v35 }
 0x43a   : > { %v6231_v23 = vpop.f32.mrb[140].mxu0  ;;  %v6520_v41 = vpop.f32.mrb[140].mxu1 }
 0x43b   : > { %7022 = vst [vmem:[%s9655_s11 + $0x28] sm:$0xff] %v6958_v31  ;;  %v6232_v33 = vadd.f32 %v6231_v23, %v9355_v42  ;;  %v6233_v9 = vpop.f32.mrb[141].mxu0  ;;  %v6522_v47 = vpop.f32.mrb[141].mxu1  ;;  %v7674_v31 = vcombine.low %v1102_v62, %v1110_v32 }
 0x43c   : > { %v6234_v3 = vpop.f32.mrb[142].mxu0  ;;  %v6523_v18 = vpop.f32.mrb[142].mxu1 }
 0x43d   : > { %v6521_v2 = vadd.f32 %v6520_v41, %v6232_v33  ;;  %v6235_v52 = vadd.f32 %v6234_v3, %v9358_v58  ;;  %v6236_v38 = vpop.f32.mrb[143].mxu0  ;;  %v6525_v37 = vpop.f32.mrb[143].mxu1  ;;  %v9987_v33 = vld [vmem:[#allocation24_spill] sm:$0xff] }
 0x43f   : > { %v6959_v26 = vadd.f32 %v9649_v29, %v6521_v2  ;;  %v6524_v44 = vadd.f32 %v6523_v18, %v6235_v52  ;;  %6446 = vmatmul.mubr.bf16.gmra.mrb[248].mxu0 %v7656_v1  ;;  %6735 = vmatmul.mubr.bf16.gmra.mrb[248].mxu1 %v7658_v57 }
 0x440   : > { %6453 = vmatprep.mubr.bf16.mxu0 %v7673_v55  ;;  %6742 = vmatprep.mubr.bf16.mxu1 %v7675_v25 }
 0x441   : > { %7023 = vst [vmem:[%s9655_s11 + $0x30] sm:$0xff] %v6959_v26  ;;  %v6960_v42 = vadd.f32 %v9649_v29, %v6524_v44 }
 0x442   : > { %v6239_v60 = vpop.f32.mrb[144].mxu0  ;;  %v6528_v58 = vpop.f32.mrb[144].mxu1 }
 0x443   : > { %7024 = vst [vmem:[%s9655_s11 + $0x38] sm:$0xff] %v6960_v42  ;;  %v6240_v50 = vadd.f32 %v6239_v60, %v9365_v28  ;;  %v6241_v20 = vpop.f32.mrb[145].mxu0  ;;  %v6530_v22 = vpop.f32.mrb[145].mxu1 }
 0x444   : > { %v6242_v35 = vpop.f32.mrb[146].mxu0  ;;  %v6531_v9 = vpop.f32.mrb[146].mxu1 }
 0x445   : > { %v6529_v23 = vadd.f32 %v6528_v58, %v6240_v50  ;;  %v6243_v41 = vadd.f32 %v6242_v35, %v9987_v33  ;;  %v6244_v1 = vpop.f32.mrb[147].mxu0  ;;  %v6533_v47 = vpop.f32.mrb[147].mxu1 }
 0x447   : > { %v6961_v3 = vadd.f32 %v9649_v29, %v6529_v23  ;;  %v6532_v57 = vadd.f32 %v6531_v9, %v6243_v41  ;;  %6454 = vmatmul.mubr.bf16.gmra.mrb[252].mxu0 %v7672_v11  ;;  %6743 = vmatmul.mubr.bf16.gmra.mrb[252].mxu1 %v7674_v31 }
 0x449   : > { %7025 = vst [vmem:[%s9655_s11 + $0x40] sm:$0xff] %v6961_v3  ;;  %v6962_v28 = vadd.f32 %v9649_v29, %v6532_v57 }
 0x44a   : > { %v6247_v30 = vpop.f32.mrb[148].mxu0  ;;  %v6536_v62 = vpop.f32.mrb[148].mxu1 }
 0x44b   : > { %7026 = vst [vmem:[%s9655_s11 + $0x48] sm:$0xff] %v6962_v28  ;;  %v6248_v63 = vadd.f32 %v6247_v30, %v9375_v43  ;;  %v6249_v32 = vpop.f32.mrb[149].mxu0  ;;  %v6538_v55 = vpop.f32.mrb[149].mxu1 }
 0x44c   : > { %v6250_v2 = vpop.f32.mrb[150].mxu0  ;;  %v6539_v38 = vpop.f32.mrb[150].mxu1 }
 0x44d   : > { %v6537_v52 = vadd.f32 %v6536_v62, %v6248_v63  ;;  %v6251_v18 = vadd.f32 %v6250_v2, %v9378_v14  ;;  %v6252_v25 = vpop.f32.mrb[151].mxu0  ;;  %v6541_v37 = vpop.f32.mrb[151].mxu1 }
 0x44f   : > { %v6963_v26 = vadd.f32 %v9649_v29, %v6537_v52  ;;  %v6540_v44 = vadd.f32 %v6539_v38, %v6251_v18 }
 0x451   : > { %7027 = vst [vmem:[%s9655_s11 + $0x50] sm:$0xff] %v6963_v26  ;;  %v6964_v42 = vadd.f32 %v9649_v29, %v6540_v44 }
 0x452   : > { %v6255_v60 = vpop.f32.mrb[152].mxu0  ;;  %v6544_v50 = vpop.f32.mrb[152].mxu1 }
 0x453   : > { %7028 = vst [vmem:[%s9655_s11 + $0x58] sm:$0xff] %v6964_v42  ;;  %v6256_v43 = vadd.f32 %v6255_v60, %v9385_v61  ;;  %v6257_v58 = vpop.f32.mrb[153].mxu0  ;;  %v6546_v20 = vpop.f32.mrb[153].mxu1 }
 0x454   : > { %v6258_v11 = vpop.f32.mrb[154].mxu0  ;;  %v6547_v35 = vpop.f32.mrb[154].mxu1 }
 0x455   : > { %v6545_v14 = vadd.f32 %v6544_v50, %v6256_v43  ;;  %v6259_v22 = vadd.f32 %v6258_v11, %v9388_v15  ;;  %v6260_v31 = vpop.f32.mrb[155].mxu0  ;;  %v6549_v23 = vpop.f32.mrb[155].mxu1 }
 0x457   : > { %v6965_v33 = vadd.f32 %v9649_v29, %v6545_v14  ;;  %v6548_v41 = vadd.f32 %v6547_v35, %v6259_v22 }
 0x459   : > { %7029 = vst [vmem:[%s9655_s11 + $0x60] sm:$0xff] %v6965_v33  ;;  %v6966_v9 = vadd.f32 %v9649_v29, %v6548_v41 }
 0x45a   : > { %v6263_v1 = vpop.f32.mrb[156].mxu0  ;;  %v6552_v47 = vpop.f32.mrb[156].mxu1 }
 0x45b   : > { %7030 = vst [vmem:[%s9655_s11 + $0x68] sm:$0xff] %v6966_v9  ;;  %v6264_v61 = vadd.f32 %v6263_v1, %v9395_v16  ;;  %v6265_v3 = vpop.f32.mrb[157].mxu0  ;;  %v6554_v57 = vpop.f32.mrb[157].mxu1 }
 0x45c   : > { %v6266_v28 = vpop.f32.mrb[158].mxu0  ;;  %v6555_v63 = vpop.f32.mrb[158].mxu1 }
 0x45d   : > { %v6553_v15 = vadd.f32 %v6552_v47, %v6264_v61  ;;  %v6267_v30 = vadd.f32 %v6266_v28, %v9398_v59  ;;  %v6268_v62 = vpop.f32.mrb[159].mxu0  ;;  %v6557_v32 = vpop.f32.mrb[159].mxu1 }
 0x45f   : > { %v6967_v55 = vadd.f32 %v9649_v29, %v6553_v15  ;;  %v6556_v2 = vadd.f32 %v6555_v63, %v6267_v30 }
 0x461   : > { %7031 = vst [vmem:[%s9655_s11 + $0x70] sm:$0xff] %v6967_v55  ;;  %v6968_v52 = vadd.f32 %v9649_v29, %v6556_v2 }
 0x462   : > { %v6271_v18 = vpop.f32.mrb[160].mxu0  ;;  %v6560_v38 = vpop.f32.mrb[160].mxu1 }
 0x463   : > { %7032 = vst [vmem:[%s9655_s11 + $0x78] sm:$0xff] %v6968_v52  ;;  %v6272_v16 = vadd.f32 %v6271_v18, %v9405_v34  ;;  %v6273_v25 = vpop.f32.mrb[161].mxu0  ;;  %v6562_v37 = vpop.f32.mrb[161].mxu1 }
 0x464   : > { %v6274_v26 = vpop.f32.mrb[162].mxu0  ;;  %v6563_v42 = vpop.f32.mrb[162].mxu1 }
 0x465   : > { %v6561_v59 = vadd.f32 %v6560_v38, %v6272_v16  ;;  %v6275_v44 = vadd.f32 %v6274_v26, %v9408_v21  ;;  %v6276_v60 = vpop.f32.mrb[163].mxu0  ;;  %v6565_v43 = vpop.f32.mrb[163].mxu1 }
 0x467   : > { %v6969_v50 = vadd.f32 %v9649_v29, %v6561_v59  ;;  %v6564_v58 = vadd.f32 %v6563_v42, %v6275_v44 }
 0x469   : > { %7033 = vst [vmem:[%s9655_s11 + $0x80] sm:$0xff] %v6969_v50  ;;  %v6970_v20 = vadd.f32 %v9649_v29, %v6564_v58 }
 0x46a   : > { %v6279_v11 = vpop.f32.mrb[164].mxu0  ;;  %v6568_v14 = vpop.f32.mrb[164].mxu1 }
 0x46b   : > { %7034 = vst [vmem:[%s9655_s11 + $0x88] sm:$0xff] %v6970_v20  ;;  %v6280_v34 = vadd.f32 %v6279_v11, %v9415_v54  ;;  %v6281_v22 = vpop.f32.mrb[165].mxu0  ;;  %v6570_v35 = vpop.f32.mrb[165].mxu1 }
 0x46c   : > { %v6282_v31 = vpop.f32.mrb[166].mxu0  ;;  %v6571_v33 = vpop.f32.mrb[166].mxu1 }
 0x46d   : > { %v6569_v21 = vadd.f32 %v6568_v14, %v6280_v34  ;;  %v6283_v23 = vadd.f32 %v6282_v31, %v9418_v4  ;;  %v6284_v41 = vpop.f32.mrb[167].mxu0  ;;  %v6573_v9 = vpop.f32.mrb[167].mxu1 }
 0x46f   : > { %v6971_v1 = vadd.f32 %v9649_v29, %v6569_v21  ;;  %v6572_v61 = vadd.f32 %v6571_v33, %v6283_v23 }
 0x471   : > { %7035 = vst [vmem:[%s9655_s11 + $0x90] sm:$0xff] %v6971_v1  ;;  %v6972_v47 = vadd.f32 %v9649_v29, %v6572_v61 }
 0x472   : > { %v6287_v3 = vpop.f32.mrb[168].mxu0  ;;  %v6576_v57 = vpop.f32.mrb[168].mxu1 }
 0x473   : > { %7036 = vst [vmem:[%s9655_s11 + $0x98] sm:$0xff] %v6972_v47  ;;  %v6288_v54 = vadd.f32 %v6287_v3, %v9425_v46  ;;  %v6289_v28 = vpop.f32.mrb[169].mxu0  ;;  %v6578_v15 = vpop.f32.mrb[169].mxu1 }
 0x474   : > { %v6290_v30 = vpop.f32.mrb[170].mxu0  ;;  %v6579_v62 = vpop.f32.mrb[170].mxu1 }
 0x475   : > { %v6577_v4 = vadd.f32 %v6576_v57, %v6288_v54  ;;  %v6291_v63 = vadd.f32 %v6290_v30, %v9428_v10  ;;  %v6292_v32 = vpop.f32.mrb[171].mxu0  ;;  %v6581_v55 = vpop.f32.mrb[171].mxu1 }
 0x477   : > { %v6973_v2 = vadd.f32 %v9649_v29, %v6577_v4  ;;  %v6580_v52 = vadd.f32 %v6579_v62, %v6291_v63 }
 0x479   : > { %7037 = vst [vmem:[%s9655_s11 + $0xa0] sm:$0xff] %v6973_v2  ;;  %v6974_v18 = vadd.f32 %v9649_v29, %v6580_v52 }
 0x47a   : > { %v6295_v16 = vpop.f32.mrb[172].mxu0  ;;  %v6584_v38 = vpop.f32.mrb[172].mxu1 }
 0x47b   : > { %7038 = vst [vmem:[%s9655_s11 + $0xa8] sm:$0xff] %v6974_v18  ;;  %v6296_v46 = vadd.f32 %v6295_v16, %v9435_v5  ;;  %v6297_v25 = vpop.f32.mrb[173].mxu0  ;;  %v6586_v37 = vpop.f32.mrb[173].mxu1 }
 0x47c   : > { %v6298_v26 = vpop.f32.mrb[174].mxu0  ;;  %v6587_v44 = vpop.f32.mrb[174].mxu1 }
 0x47d   : > { %v6585_v10 = vadd.f32 %v6584_v38, %v6296_v46  ;;  %v6299_v59 = vadd.f32 %v6298_v26, %v9438_v7  ;;  %v6300_v42 = vpop.f32.mrb[175].mxu0  ;;  %v6589_v60 = vpop.f32.mrb[175].mxu1 }
 0x47f   : > { %v6975_v43 = vadd.f32 %v9649_v29, %v6585_v10  ;;  %v6588_v50 = vadd.f32 %v6587_v44, %v6299_v59 }
 0x481   : > { %7039 = vst [vmem:[%s9655_s11 + $0xb0] sm:$0xff] %v6975_v43  ;;  %v6976_v58 = vadd.f32 %v9649_v29, %v6588_v50 }
 0x482   : > { %v6303_v20 = vpop.f32.mrb[176].mxu0  ;;  %v6592_v11 = vpop.f32.mrb[176].mxu1 }
 0x483   : > { %7040 = vst [vmem:[%s9655_s11 + $0xb8] sm:$0xff] %v6976_v58  ;;  %v6304_v5 = vadd.f32 %v6303_v20, %v9445_v13  ;;  %v6305_v34 = vpop.f32.mrb[177].mxu0  ;;  %v6594_v14 = vpop.f32.mrb[177].mxu1 }
 0x484   : > { %v6306_v22 = vpop.f32.mrb[178].mxu0  ;;  %v6595_v31 = vpop.f32.mrb[178].mxu1 }
 0x485   : > { %v6593_v7 = vadd.f32 %v6592_v11, %v6304_v5  ;;  %v6307_v35 = vadd.f32 %v6306_v22, %v9448_v17  ;;  %v6308_v21 = vpop.f32.mrb[179].mxu0  ;;  %v6597_v23 = vpop.f32.mrb[179].mxu1 }
 0x487   : > { %v6977_v33 = vadd.f32 %v9649_v29, %v6593_v7  ;;  %v6596_v41 = vadd.f32 %v6595_v31, %v6307_v35 }
 0x489   : > { %7041 = vst [vmem:[%s9655_s11 + $0xc0] sm:$0xff] %v6977_v33  ;;  %v6978_v9 = vadd.f32 %v9649_v29, %v6596_v41 }
 0x48a   : > { %v6311_v1 = vpop.f32.mrb[180].mxu0  ;;  %v6600_v61 = vpop.f32.mrb[180].mxu1 }
 0x48b   : > { %7042 = vst [vmem:[%s9655_s11 + $0xc8] sm:$0xff] %v6978_v9  ;;  %v6312_v13 = vadd.f32 %v6311_v1, %v9455_v48  ;;  %v6313_v47 = vpop.f32.mrb[181].mxu0  ;;  %v6602_v3 = vpop.f32.mrb[181].mxu1 }
 0x48c   : > { %v6314_v54 = vpop.f32.mrb[182].mxu0  ;;  %v6603_v28 = vpop.f32.mrb[182].mxu1 }
 0x48d   : > { %v6601_v17 = vadd.f32 %v6600_v61, %v6312_v13  ;;  %v6315_v57 = vadd.f32 %v6314_v54, %v9458_v12  ;;  %v6316_v15 = vpop.f32.mrb[183].mxu0  ;;  %v6605_v30 = vpop.f32.mrb[183].mxu1 }
 0x48f   : > { %v6979_v4 = vadd.f32 %v9649_v29, %v6601_v17  ;;  %v6604_v63 = vadd.f32 %v6603_v28, %v6315_v57 }
 0x491   : > { %7043 = vst [vmem:[%s9655_s11 + $0xd0] sm:$0xff] %v6979_v4  ;;  %v6980_v62 = vadd.f32 %v9649_v29, %v6604_v63 }
 0x492   : > { %v6319_v32 = vpop.f32.mrb[184].mxu0  ;;  %v6608_v55 = vpop.f32.mrb[184].mxu1 }
 0x493   : > { %7044 = vst [vmem:[%s9655_s11 + $0xd8] sm:$0xff] %v6980_v62  ;;  %v6320_v48 = vadd.f32 %v6319_v32, %v9465_v6  ;;  %v6321_v2 = vpop.f32.mrb[185].mxu0  ;;  %v6610_v52 = vpop.f32.mrb[185].mxu1 }
 0x494   : > { %v6322_v18 = vpop.f32.mrb[186].mxu0  ;;  %v6611_v46 = vpop.f32.mrb[186].mxu1 }
 0x495   : > { %v6609_v12 = vadd.f32 %v6608_v55, %v6320_v48  ;;  %v6323_v16 = vadd.f32 %v6322_v18, %v9468_v36  ;;  %v6324_v38 = vpop.f32.mrb[187].mxu0  ;;  %v6613_v25 = vpop.f32.mrb[187].mxu1 }
 0x497   : > { %v6981_v37 = vadd.f32 %v9649_v29, %v6609_v12  ;;  %v6612_v26 = vadd.f32 %v6611_v46, %v6323_v16  ;;  %v9988_v12 = vld [vmem:[#allocation25_spill] sm:$0xff] }
 0x499   : > { %7045 = vst [vmem:[%s9655_s11 + $0xe0] sm:$0xff] %v6981_v37  ;;  %v6982_v10 = vadd.f32 %v9649_v29, %v6612_v26 }
 0x49a   : > { %v6327_v59 = vpop.f32.mrb[188].mxu0  ;;  %v6616_v44 = vpop.f32.mrb[188].mxu1 }
 0x49b   : > { %7046 = vst [vmem:[%s9655_s11 + $0xe8] sm:$0xff] %v6982_v10  ;;  %v6328_v6 = vadd.f32 %v6327_v59, %v9475_v51  ;;  %v6329_v42 = vpop.f32.mrb[189].mxu0  ;;  %v6618_v60 = vpop.f32.mrb[189].mxu1 }
 0x49c   : > { %v6330_v43 = vpop.f32.mrb[190].mxu0  ;;  %v6619_v58 = vpop.f32.mrb[190].mxu1 }
 0x49d   : > { %v6617_v36 = vadd.f32 %v6616_v44, %v6328_v6  ;;  %v6331_v50 = vadd.f32 %v6330_v43, %v9478_v19  ;;  %v6332_v20 = vpop.f32.mrb[191].mxu0  ;;  %v6621_v5 = vpop.f32.mrb[191].mxu1 }
 0x49f   : > { %v6983_v11 = vadd.f32 %v9649_v29, %v6617_v36  ;;  %v6620_v34 = vadd.f32 %v6619_v58, %v6331_v50  ;;  %v9989_v36 = vld [vmem:[#allocation26_spill] sm:$0xff] }
 0x4a1   : > { %7047 = vst [vmem:[%s9655_s11 + $0xf0] sm:$0xff] %v6983_v11  ;;  %v6984_v14 = vadd.f32 %v9649_v29, %v6620_v34 }
 0x4a2   : > { %v6335_v22 = vpop.f32.mrb[192].mxu0  ;;  %v6624_v7 = vpop.f32.mrb[192].mxu1 }
 0x4a3   : > { %7048 = vst [vmem:[%s9655_s11 + $0xf8] sm:$0xff] %v6984_v14  ;;  %v6336_v51 = vadd.f32 %v6335_v22, %v9485_v39  ;;  %v6337_v35 = vpop.f32.mrb[193].mxu0  ;;  %v6626_v31 = vpop.f32.mrb[193].mxu1 }
 0x4a4   : > { %v6338_v21 = vpop.f32.mrb[194].mxu0  ;;  %v6627_v33 = vpop.f32.mrb[194].mxu1 }
 0x4a5   : > { %v6625_v19 = vadd.f32 %v6624_v7, %v6336_v51  ;;  %v6339_v23 = vadd.f32 %v6338_v21, %v9488_v45  ;;  %v6340_v41 = vpop.f32.mrb[195].mxu0  ;;  %v6629_v9 = vpop.f32.mrb[195].mxu1 }
 0x4a7   : > { %v6985_v1 = vadd.f32 %v9649_v29, %v6625_v19  ;;  %v6628_v13 = vadd.f32 %v6627_v33, %v6339_v23  ;;  %v9991_v23 = vld [vmem:[#allocation3_spill] sm:$0xff] }
 0x4a9   : > { %7049 = vst [vmem:[%s9655_s11 + $0x100] sm:$0xff] %v6985_v1  ;;  %v6986_v61 = vadd.f32 %v9649_v29, %v6628_v13 }
 0x4aa   : > { %v6343_v47 = vpop.f32.mrb[196].mxu0  ;;  %v6632_v3 = vpop.f32.mrb[196].mxu1 }
 0x4ab   : > { %7050 = vst [vmem:[%s9655_s11 + $0x108] sm:$0xff] %v6986_v61  ;;  %v6344_v39 = vadd.f32 %v6343_v47, %v9495_v53  ;;  %v6345_v54 = vpop.f32.mrb[197].mxu0  ;;  %v6634_v17 = vpop.f32.mrb[197].mxu1 }
 0x4ac   : > { %v6346_v57 = vpop.f32.mrb[198].mxu0  ;;  %v6635_v15 = vpop.f32.mrb[198].mxu1 }
 0x4ad   : > { %v6633_v45 = vadd.f32 %v6632_v3, %v6344_v39  ;;  %v6347_v28 = vadd.f32 %v6346_v57, %v9498_v27  ;;  %v6348_v30 = vpop.f32.mrb[199].mxu0  ;;  %v6637_v4 = vpop.f32.mrb[199].mxu1  ;;  %v9992_v3 = vld [vmem:[#allocation4_spill] sm:$0xff] }
 0x4ae   : > { %v9993_v30 = vld [vmem:[#allocation5_spill] sm:$0xff] }
 0x4af   : > { %v6987_v63 = vadd.f32 %v9649_v29, %v6633_v45  ;;  %v6636_v62 = vadd.f32 %v6635_v15, %v6347_v28 }
 0x4b1   : > { %7051 = vst [vmem:[%s9655_s11 + $0x110] sm:$0xff] %v6987_v63  ;;  %v6988_v32 = vadd.f32 %v9649_v29, %v6636_v62 }
 0x4b2   : > { %v6351_v48 = vpop.f32.mrb[200].mxu0  ;;  %v6640_v55 = vpop.f32.mrb[200].mxu1 }
 0x4b3   : > { %7052 = vst [vmem:[%s9655_s11 + $0x118] sm:$0xff] %v6988_v32  ;;  %v6352_v53 = vadd.f32 %v6351_v48, %v9505_v49  ;;  %v6353_v2 = vpop.f32.mrb[201].mxu0  ;;  %v6642_v52 = vpop.f32.mrb[201].mxu1 }
 0x4b4   : > { %v6354_v18 = vpop.f32.mrb[202].mxu0  ;;  %v6643_v46 = vpop.f32.mrb[202].mxu1  ;;  %v9994_v52 = vld [vmem:[#allocation6_spill] sm:$0xff] }
 0x4b5   : > { %v6641_v27 = vadd.f32 %v6640_v55, %v6352_v53  ;;  %v6355_v16 = vadd.f32 %v6354_v18, %v9988_v12  ;;  %v6356_v38 = vpop.f32.mrb[203].mxu0  ;;  %v6645_v25 = vpop.f32.mrb[203].mxu1 }
 0x4b6   : > { %v9995_v25 = vld [vmem:[#allocation7_spill] sm:$0xff] }
 0x4b7   : > { %v6989_v37 = vadd.f32 %v9649_v29, %v6641_v27  ;;  %v6644_v26 = vadd.f32 %v6643_v46, %v6355_v16 }
 0x4b9   : > { %7053 = vst [vmem:[%s9655_s11 + $0x120] sm:$0xff] %v6989_v37  ;;  %v6990_v10 = vadd.f32 %v9649_v29, %v6644_v26 }
 0x4ba   : > { %v6359_v59 = vpop.f32.mrb[204].mxu0  ;;  %v6648_v6 = vpop.f32.mrb[204].mxu1 }
 0x4bb   : > { %7054 = vst [vmem:[%s9655_s11 + $0x128] sm:$0xff] %v6990_v10  ;;  %v6360_v49 = vadd.f32 %v6359_v59, %v9515_v24  ;;  %v6361_v44 = vpop.f32.mrb[205].mxu0  ;;  %v6650_v42 = vpop.f32.mrb[205].mxu1  ;;  %v9990_v24 = vld [vmem:[#allocation27_spill] sm:$0xff] }
 0x4bc   : > { %v6362_v60 = vpop.f32.mrb[206].mxu0  ;;  %v6651_v58 = vpop.f32.mrb[206].mxu1 }
 0x4bd   : > { %v6649_v43 = vadd.f32 %v6648_v6, %v6360_v49  ;;  %v6363_v50 = vadd.f32 %v6362_v60, %v9989_v36  ;;  %v6364_v20 = vpop.f32.mrb[207].mxu0  ;;  %v6653_v5 = vpop.f32.mrb[207].mxu1  ;;  %v9996_v60 = vld [vmem:[#allocation8_spill] sm:$0xff] }
 0x4bf   : > { %v6991_v11 = vadd.f32 %v9649_v29, %v6649_v43  ;;  %v6652_v34 = vadd.f32 %v6651_v58, %v6363_v50 }
 0x4c1   : > { %7055 = vst [vmem:[%s9655_s11 + $0x130] sm:$0xff] %v6991_v11  ;;  %v6992_v14 = vadd.f32 %v9649_v29, %v6652_v34  ;;  %v9997_v11 = vld [vmem:[#allocation9_spill] sm:$0xff] }
 0x4c2   : > { %v6367_v22 = vpop.f32.mrb[208].mxu0  ;;  %v6656_v7 = vpop.f32.mrb[208].mxu1 }
 0x4c3   : > { %7056 = vst [vmem:[%s9655_s11 + $0x138] sm:$0xff] %v6992_v14  ;;  %v6368_v51 = vadd.f32 %v6367_v22, %v9990_v24  ;;  %v6369_v35 = vpop.f32.mrb[209].mxu0  ;;  %v6658_v31 = vpop.f32.mrb[209].mxu1 }
 0x4c4   : > { %v6370_v21 = vpop.f32.mrb[210].mxu0  ;;  %v6659_v41 = vpop.f32.mrb[210].mxu1 }
 0x4c5   : > { %v6657_v19 = vadd.f32 %v6656_v7, %v6368_v51  ;;  %v6371_v33 = vadd.f32 %v6370_v21, %v9991_v23  ;;  %v6372_v9 = vpop.f32.mrb[211].mxu0  ;;  %v6661_v1 = vpop.f32.mrb[211].mxu1  ;;  %v9998_v21 = vld [vmem:[#allocation10_spill] sm:$0xff] }
 0x4c7   : > { %v6993_v13 = vadd.f32 %v9649_v29, %v6657_v19  ;;  %v6660_v61 = vadd.f32 %v6659_v41, %v6371_v33 }
 0x4c9   : > { %7057 = vst [vmem:[%s9655_s11 + $0x140] sm:$0xff] %v6993_v13  ;;  %v6994_v47 = vadd.f32 %v9649_v29, %v6660_v61  ;;  %v9999_v13 = vld [vmem:[#allocation11_spill] sm:$0xff] }
 0x4ca   : > { %v6375_v39 = vpop.f32.mrb[212].mxu0  ;;  %v6664_v17 = vpop.f32.mrb[212].mxu1 }
 0x4cb   : > { %7058 = vst [vmem:[%s9655_s11 + $0x148] sm:$0xff] %v6994_v47  ;;  %v6376_v54 = vadd.f32 %v6375_v39, %v9992_v3  ;;  %v6377_v57 = vpop.f32.mrb[213].mxu0  ;;  %v6666_v45 = vpop.f32.mrb[213].mxu1 }
 0x4cc   : > { %v6378_v28 = vpop.f32.mrb[214].mxu0  ;;  %v6667_v63 = vpop.f32.mrb[214].mxu1 }
 0x4cd   : > { %v6665_v15 = vadd.f32 %v6664_v17, %v6376_v54  ;;  %v6379_v4 = vadd.f32 %v6378_v28, %v9993_v30  ;;  %v6380_v62 = vpop.f32.mrb[215].mxu0  ;;  %v6669_v32 = vpop.f32.mrb[215].mxu1  ;;  %v10000_v28 = vld [vmem:[#allocation12_spill] sm:$0xff] }
 0x4cf   : > { %v6995_v48 = vadd.f32 %v9649_v29, %v6665_v15  ;;  %v6668_v53 = vadd.f32 %v6667_v63, %v6379_v4 }
 0x4d1   : > { %7059 = vst [vmem:[%s9655_s11 + $0x150] sm:$0xff] %v6995_v48  ;;  %v6996_v55 = vadd.f32 %v9649_v29, %v6668_v53  ;;  %v10001_v48 = vld [vmem:[#allocation13_spill] sm:$0xff] }
 0x4d2   : > { %v6383_v2 = vpop.f32.mrb[216].mxu0  ;;  %v6672_v27 = vpop.f32.mrb[216].mxu1 }
 0x4d3   : > { %7060 = vst [vmem:[%s9655_s11 + $0x158] sm:$0xff] %v6996_v55  ;;  %v6384_v18 = vadd.f32 %v6383_v2, %v9994_v52  ;;  %v6385_v12 = vpop.f32.mrb[217].mxu0  ;;  %v6674_v16 = vpop.f32.mrb[217].mxu1 }
 0x4d4   : > { %v6386_v46 = vpop.f32.mrb[218].mxu0  ;;  %v6675_v26 = vpop.f32.mrb[218].mxu1 }
 0x4d5   : > { %v6673_v38 = vadd.f32 %v6672_v27, %v6384_v18  ;;  %v6387_v37 = vadd.f32 %v6386_v46, %v9995_v25  ;;  %v6388_v10 = vpop.f32.mrb[219].mxu0  ;;  %v6677_v59 = vpop.f32.mrb[219].mxu1  ;;  %v10002_v46 = vld [vmem:[#allocation14_spill] sm:$0xff] }
 0x4d7   : > { %v6997_v49 = vadd.f32 %v9649_v29, %v6673_v38  ;;  %v6676_v6 = vadd.f32 %v6675_v26, %v6387_v37 }
 0x4d9   : > { %7061 = vst [vmem:[%s9655_s11 + $0x160] sm:$0xff] %v6997_v49  ;;  %v6998_v44 = vadd.f32 %v9649_v29, %v6676_v6  ;;  %v10003_v49 = vld [vmem:[#allocation15_spill] sm:$0xff] }
 0x4da   : > { %v6391_v42 = vpop.f32.mrb[220].mxu0  ;;  %v6680_v36 = vpop.f32.mrb[220].mxu1 }
 0x4db   : > { %7062 = vst [vmem:[%s9655_s11 + $0x168] sm:$0xff] %v6998_v44  ;;  %v6392_v43 = vadd.f32 %v6391_v42, %v9996_v60  ;;  %v6393_v50 = vpop.f32.mrb[221].mxu0  ;;  %v6682_v58 = vpop.f32.mrb[221].mxu1 }
 0x4dc   : > { %v6394_v20 = vpop.f32.mrb[222].mxu0  ;;  %v6683_v14 = vpop.f32.mrb[222].mxu1 }
 0x4dd   : > { %v6681_v5 = vadd.f32 %v6680_v36, %v6392_v43  ;;  %v6395_v34 = vadd.f32 %v6394_v20, %v9997_v11  ;;  %v6396_v22 = vpop.f32.mrb[223].mxu0  ;;  %v6685_v24 = vpop.f32.mrb[223].mxu1  ;;  %v10004_v20 = vld [vmem:[#allocation16_spill] sm:$0xff] }
 0x4df   : > { %v6999_v51 = vadd.f32 %v9649_v29, %v6681_v5  ;;  %v6684_v7 = vadd.f32 %v6683_v14, %v6395_v34 }
 0x4e1   : > { %7063 = vst [vmem:[%s9655_s11 + $0x170] sm:$0xff] %v6999_v51  ;;  %v7000_v35 = vadd.f32 %v9649_v29, %v6684_v7  ;;  %v10005_v51 = vld [vmem:[#allocation17_spill] sm:$0xff] }
 0x4e2   : > { %v6399_v31 = vpop.f32.mrb[224].mxu0  ;;  %v6688_v23 = vpop.f32.mrb[224].mxu1 }
 0x4e3   : > { %7064 = vst [vmem:[%s9655_s11 + $0x178] sm:$0xff] %v7000_v35  ;;  %v6400_v19 = vadd.f32 %v6399_v31, %v9998_v21  ;;  %v6401_v33 = vpop.f32.mrb[225].mxu0  ;;  %v6690_v41 = vpop.f32.mrb[225].mxu1 }
 0x4e4   : > { %v6402_v9 = vpop.f32.mrb[226].mxu0  ;;  %v6691_v47 = vpop.f32.mrb[226].mxu1 }
 0x4e5   : > { %v6689_v1 = vadd.f32 %v6688_v23, %v6400_v19  ;;  %v6403_v61 = vadd.f32 %v6402_v9, %v9999_v13  ;;  %v6404_v39 = vpop.f32.mrb[227].mxu0  ;;  %v6693_v3 = vpop.f32.mrb[227].mxu1  ;;  %v10006_v9 = vld [vmem:[#allocation18_spill] sm:$0xff] }
 0x4e7   : > { %v7001_v54 = vadd.f32 %v9649_v29, %v6689_v1  ;;  %v6692_v17 = vadd.f32 %v6691_v47, %v6403_v61 }
 0x4e9   : > { %7065 = vst [vmem:[%s9655_s11 + $0x180] sm:$0xff] %v7001_v54  ;;  %v7002_v57 = vadd.f32 %v9649_v29, %v6692_v17  ;;  %v10007_v54 = vld [vmem:[#allocation19_spill] sm:$0xff] }
 0x4ea   : > { %v6407_v45 = vpop.f32.mrb[228].mxu0  ;;  %v6696_v30 = vpop.f32.mrb[228].mxu1 }
 0x4eb   : > { %7066 = vst [vmem:[%s9655_s11 + $0x188] sm:$0xff] %v7002_v57  ;;  %v6408_v15 = vadd.f32 %v6407_v45, %v10000_v28  ;;  %v6409_v4 = vpop.f32.mrb[229].mxu0  ;;  %v6698_v63 = vpop.f32.mrb[229].mxu1 }
 0x4ec   : > { %v6410_v62 = vpop.f32.mrb[230].mxu0  ;;  %v6699_v55 = vpop.f32.mrb[230].mxu1 }
 0x4ed   : > { %v6697_v32 = vadd.f32 %v6696_v30, %v6408_v15  ;;  %v6411_v53 = vadd.f32 %v6410_v62, %v10001_v48  ;;  %v6412_v2 = vpop.f32.mrb[231].mxu0  ;;  %v6701_v52 = vpop.f32.mrb[231].mxu1  ;;  %v10008_v62 = vld [vmem:[#allocation20_spill] sm:$0xff] }
 0x4ef   : > { %v7003_v18 = vadd.f32 %v9649_v29, %v6697_v32  ;;  %v6700_v27 = vadd.f32 %v6699_v55, %v6411_v53 }
 0x4f1   : > { %7067 = vst [vmem:[%s9655_s11 + $0x190] sm:$0xff] %v7003_v18  ;;  %v7004_v12 = vadd.f32 %v9649_v29, %v6700_v27  ;;  %v10009_v18 = vld [vmem:[#allocation21_spill] sm:$0xff] }
 0x4f2   : > { %v6415_v16 = vpop.f32.mrb[232].mxu0  ;;  %v6704_v25 = vpop.f32.mrb[232].mxu1 }
 0x4f3   : > { %7068 = vst [vmem:[%s9655_s11 + $0x198] sm:$0xff] %v7004_v12  ;;  %v6416_v38 = vadd.f32 %v6415_v16, %v10002_v46  ;;  %v6417_v37 = vpop.f32.mrb[233].mxu0  ;;  %v6706_v26 = vpop.f32.mrb[233].mxu1 }
 0x4f4   : > { %v6418_v10 = vpop.f32.mrb[234].mxu0  ;;  %v6707_v44 = vpop.f32.mrb[234].mxu1 }
 0x4f5   : > { %v6705_v59 = vadd.f32 %v6704_v25, %v6416_v38  ;;  %v6419_v6 = vadd.f32 %v6418_v10, %v10003_v49  ;;  %v6420_v42 = vpop.f32.mrb[235].mxu0  ;;  %v6709_v60 = vpop.f32.mrb[235].mxu1 }
 0x4f7   : > { %v7005_v43 = vadd.f32 %v9649_v29, %v6705_v59  ;;  %v6708_v36 = vadd.f32 %v6707_v44, %v6419_v6 }
 0x4f9   : > { %7069 = vst [vmem:[%s9655_s11 + $0x1a0] sm:$0xff] %v7005_v43  ;;  %v7006_v50 = vadd.f32 %v9649_v29, %v6708_v36 }
 0x4fa   : > { %v6423_v58 = vpop.f32.mrb[236].mxu0  ;;  %v6712_v11 = vpop.f32.mrb[236].mxu1 }
 0x4fb   : > { %7070 = vst [vmem:[%s9655_s11 + $0x1a8] sm:$0xff] %v7006_v50  ;;  %v6424_v5 = vadd.f32 %v6423_v58, %v10004_v20  ;;  %v6425_v34 = vpop.f32.mrb[237].mxu0  ;;  %v6714_v14 = vpop.f32.mrb[237].mxu1 }
 0x4fc   : > { %v6426_v22 = vpop.f32.mrb[238].mxu0  ;;  %v6715_v35 = vpop.f32.mrb[238].mxu1 }
 0x4fd   : > { %v6713_v24 = vadd.f32 %v6712_v11, %v6424_v5  ;;  %v6427_v7 = vadd.f32 %v6426_v22, %v10005_v51  ;;  %v6428_v31 = vpop.f32.mrb[239].mxu0  ;;  %v6717_v21 = vpop.f32.mrb[239].mxu1 }
 0x4ff   : > { %v7007_v19 = vadd.f32 %v9649_v29, %v6713_v24  ;;  %v6716_v23 = vadd.f32 %v6715_v35, %v6427_v7 }
 0x501   : > { %7071 = vst [vmem:[%s9655_s11 + $0x1b0] sm:$0xff] %v7007_v19  ;;  %v7008_v33 = vadd.f32 %v9649_v29, %v6716_v23 }
 0x502   : > { %v6431_v41 = vpop.f32.mrb[240].mxu0  ;;  %v6720_v13 = vpop.f32.mrb[240].mxu1 }
 0x503   : > { %7072 = vst [vmem:[%s9655_s11 + $0x1b8] sm:$0xff] %v7008_v33  ;;  %v6432_v1 = vadd.f32 %v6431_v41, %v10006_v9  ;;  %v6433_v61 = vpop.f32.mrb[241].mxu0  ;;  %v6722_v47 = vpop.f32.mrb[241].mxu1 }
 0x504   : > { %v6434_v39 = vpop.f32.mrb[242].mxu0  ;;  %v6723_v57 = vpop.f32.mrb[242].mxu1 }
 0x505   : > { %v6721_v3 = vadd.f32 %v6720_v13, %v6432_v1  ;;  %v6435_v17 = vadd.f32 %v6434_v39, %v10007_v54  ;;  %v6436_v45 = vpop.f32.mrb[243].mxu0  ;;  %v6725_v28 = vpop.f32.mrb[243].mxu1 }
 0x507   : > { %v7009_v15 = vadd.f32 %v9649_v29, %v6721_v3  ;;  %v6724_v30 = vadd.f32 %v6723_v57, %v6435_v17 }
 0x509   : > { %7073 = vst [vmem:[%s9655_s11 + $0x1c0] sm:$0xff] %v7009_v15  ;;  %v7010_v4 = vadd.f32 %v9649_v29, %v6724_v30  ;;  %v7961_v29 = vld [vmem:[%s9867_s2] ss:$0 sm:$0xff] }
 0x50a   : > { %v6439_v63 = vpop.f32.mrb[244].mxu0  ;;  %v6728_v48 = vpop.f32.mrb[244].mxu1 }
 0x50b   : > { %7074 = vst [vmem:[%s9655_s11 + $0x1c8] sm:$0xff] %v7010_v4  ;;  %v6440_v32 = vadd.f32 %v6439_v63, %v10008_v62  ;;  %v6441_v53 = vpop.f32.mrb[245].mxu0  ;;  %v6730_v55 = vpop.f32.mrb[245].mxu1 }
 0x50c   : > { %v6442_v2 = vpop.f32.mrb[246].mxu0  ;;  %v6731_v12 = vpop.f32.mrb[246].mxu1 }
 0x50d   : > { %v6729_v52 = vadd.f32 %v6728_v48, %v6440_v32  ;;  %v6443_v27 = vadd.f32 %v6442_v2, %v10009_v18  ;;  %v6444_v16 = vpop.f32.mrb[247].mxu0  ;;  %v6733_v46 = vpop.f32.mrb[247].mxu1 }
 0x50f   : > { %v7011_v38 = vadd.f32 %v7961_v29, %v6729_v52  ;;  %v6732_v25 = vadd.f32 %v6731_v12, %v6443_v27 }
 0x511   : > { %7075 = vst [vmem:[%s9655_s11 + $0x1d0] sm:$0xff] %v7011_v38  ;;  %v7012_v37 = vadd.f32 %v7961_v29, %v6732_v25 }
 0x512   : > { %v6447_v26 = vpop.f32.mrb[248].mxu0  ;;  %v6736_v59 = vpop.f32.mrb[248].mxu1 }
 0x513   : > { %7076 = vst [vmem:[%s9655_s11 + $0x1d8] sm:$0xff] %v7012_v37  ;;  %v6448_v10 = vadd.f32 %v6447_v26, %v9625_v56  ;;  %v6449_v49 = vpop.f32.mrb[249].mxu0  ;;  %v6738_v6 = vpop.f32.mrb[249].mxu1 }
 0x514   : > { %v6450_v44 = vpop.f32.mrb[250].mxu0  ;;  %v6739_v43 = vpop.f32.mrb[250].mxu1 }
 0x515   : > { %v6737_v42 = vadd.f32 %v6736_v59, %v6448_v10  ;;  %v6451_v60 = vadd.f32 %v6450_v44, %v9628_v40  ;;  %v6452_v36 = vpop.f32.mrb[251].mxu0  ;;  %v6741_v50 = vpop.f32.mrb[251].mxu1 }
 0x517   : > { %v7013_v58 = vadd.f32 %v7961_v29, %v6737_v42  ;;  %v6740_v20 = vadd.f32 %v6739_v43, %v6451_v60 }
 0x519   : > { %7077 = vst [vmem:[%s9655_s11 + $0x1e0] sm:$0xff] %v7013_v58  ;;  %v7014_v5 = vadd.f32 %v7961_v29, %v6740_v20 }
 0x51a   : > { %v6455_v11 = vpop.f32.mrb[252].mxu0  ;;  %v6744_v34 = vpop.f32.mrb[252].mxu1 }
 0x51b   : > { %7078 = vst [vmem:[%s9655_s11 + $0x1e8] sm:$0xff] %v7014_v5  ;;  %v6456_v56 = vadd.f32 %v6455_v11, %v9635_v0  ;;  %v6457_v14 = vpop.f32.mrb[253].mxu0  ;;  %v6746_v22 = vpop.f32.mrb[253].mxu1 }
 0x51c   : > { %v6458_v24 = vpop.f32.mrb[254].mxu0  ;;  %v6747_v7 = vpop.f32.mrb[254].mxu1 }
 0x51d   : > { %v6745_v51 = vadd.f32 %v6744_v34, %v6456_v56  ;;  %v6459_v40 = vadd.f32 %v6458_v24, %v9638_v8  ;;  %v6460_v35 = vpop.f32.mrb[255].mxu0  ;;  %v6749_v31 = vpop.f32.mrb[255].mxu1 }
 0x51f   : > { %v7015_v21 = vadd.f32 %v7961_v29, %v6745_v51  ;;  %v6748_v19 = vadd.f32 %v6747_v7, %v6459_v40 }
 0x521   : > { %7079 = vst [vmem:[%s9655_s11 + $0x1f0] sm:$0xff] %v7015_v21  ;;  %v7016_v23 = vadd.f32 %v7961_v29, %v6748_v19 }
 0x523   : > { %7080 = vst [vmem:[%s9655_s11 + $0x1f8] sm:$0xff] %v7016_v23 }
 0x524 PF: > { %s13_s14 = sadd.s32 1, %s7984_s14   ;;  %s10010_s12 = smov %s7980_s13 }
 0x525   : > { %p10_p5 = scmp.ge.s32.totalorder %s13_s14, 6   ;;  %s10011_s13 = smov %s10013_s15 }
 0x527   :  { %12 = sbr.rel (!%p10_p5) target bundleno = 2 (0x2), region = 71 }

</bundles_post_ra>
